<compile_context>
chip_gen: v7x
topology: tpu7x:2x2x1
jax: 0.10.0
libtpu: 0.0.40
codegen_flags: <defaults>
</compile_context>

<pallas_src>
import jax
import jax.numpy as jnp
from jax.experimental import pallas as pl
from jax.experimental.pallas import tpu as pltpu

# ---------------------------------------------------------------------------
# shape constants implied by the model
# ---------------------------------------------------------------------------
T_IN, C_IN, KW = 128, 9, 9
C1, C2 = 32, 64
T1 = T_IN - KW + 1          # 120 conv1 output length
G = T1 // 4                 # 30  rows per (time mod 4) group
P1T = T1 // 2               # 60  after pool1
T2 = P1T - KW + 1           # 52  conv2 output length
P2T = T2 // 2               # 26  after pool2
FDIM = C2 * P2T             # 1664 = 64*26
H1, H2, NCLASS = 1000, 500, 6
H1P, H2P = 1024, 512        # lane-aligned (zero-padded) hidden sizes

NB = 16                     # images per grid step (batch tile)
M1 = G * NB                 # conv1 matmul rows per step  (480)
M2 = P2T * NB               # conv2 matmul rows per step  (416)
K2 = KW * C1                # conv2 im2col contraction    (288)


# ---------------------------------------------------------------------------
# Fused kernel: conv1+pool1+conv2+pool2+flatten+fc1+fc2+fc3+softmax,
# one batch tile (NB images) per grid step.
# Row layout inside a tile is time-major / image-minor: row = v*NB + b.
# ---------------------------------------------------------------------------
def _fused_kernel(g_ref, w1_ref, b1_ref, w2_ref, b2_ref,
                  fw1_ref, fb1_ref, fw2_ref, fb2_ref, fw3_ref, fb3_ref,
                  out_ref, ee_scr, oo_scr, x_scr):
    # ---- conv1: one im2col matmul per (time mod 4) group, M = 480, K = 81 ----
    b1 = b1_ref[...]                                             # (1, 32) f32

    def c1(r):
        return jnp.dot(g_ref[r], w1_ref[...],
                       preferred_element_type=jnp.float32)       # (M1, 32)

    # pool1 pairs (2v, 2v+1): even pooled rows from groups 0/1, odd from 2/3
    # (max commutes with +bias and ReLU).  Cast to bf16 for the next matmul.
    pe = jnp.maximum(jnp.maximum(c1(0), c1(1)) + b1, 0.0).astype(jnp.bfloat16)
    po = jnp.maximum(jnp.maximum(c1(2), c1(3)) + b1, 0.0).astype(jnp.bfloat16)

    # ---- conv2 as two K=288 im2col matmuls (even / odd output rows) --------
    # p1[2v] = pe[v], p1[2v+1] = po[v]; rows are v*NB + b, so the tap-k window
    # for output u is just a unit-stride slice starting at m*NB.
    def win(a, m):                      # (M2, 32) window, start row m*NB
        return a[m * NB: m * NB + M2, :]

    for k in range(KW):
        m = k // 2
        if k % 2 == 0:                  # even tap: h2[2u] <- pe, h2[2u+1] <- po
            ee_scr[:, k * C1:(k + 1) * C1] = win(pe, m)
            oo_scr[:, k * C1:(k + 1) * C1] = win(po, m)
        else:                           # odd tap:  h2[2u] <- po, h2[2u+1] <- pe
            ee_scr[:, k * C1:(k + 1) * C1] = win(po, m)
            oo_scr[:, k * C1:(k + 1) * C1] = win(pe, m + 1)

    he = jnp.dot(ee_scr[...], w2_ref[...],
                 preferred_element_type=jnp.float32)             # (M2, 64)
    ho = jnp.dot(oo_scr[...], w2_ref[...],
                 preferred_element_type=jnp.float32)
    # pool2 = max(even, odd); bias + ReLU afterwards (commutes with max).
    p2 = jnp.maximum(jnp.maximum(he, ho) + b2_ref[...],
                     0.0).astype(jnp.bfloat16)                   # (M2, 64)

    # ---- flatten to (NB, 1664): x[b, w*64 + c] = p2[w*NB + b, c] -----------
    # fc1's weight rows were permuted to this time-major order at prep time.
    for w in range(P2T):
        x_scr[:, w * C2:(w + 1) * C2] = p2[w * NB:(w + 1) * NB, :]

    # ---- MLP head (hidden dims zero-padded to 1024 / 512) ------------------
    h = jnp.dot(x_scr[...], fw1_ref[...],
                preferred_element_type=jnp.float32) + fb1_ref[...]
    h = jnp.maximum(h, 0.0).astype(jnp.bfloat16)                 # (NB, 1024)
    h = jnp.dot(h, fw2_ref[...],
                preferred_element_type=jnp.float32) + fb2_ref[...]
    h = jnp.maximum(h, 0.0).astype(jnp.bfloat16)                 # (NB, 512)
    y = jnp.dot(h, fw3_ref[...],
                preferred_element_type=jnp.float32) + fb3_ref[...]   # (NB, 6)

    # softmax over the 6 real logits (EUP reciprocal for the normalization).
    y = y - jnp.max(y, axis=-1, keepdims=True)
    e = jnp.exp(y)
    out_ref[...] = e * pl.reciprocal(jnp.sum(e, axis=-1, keepdims=True),
                                     approx=True)


def cnn_har_fused(groups, p, ntiles):
    def rep(shape):     # whole-array block, constant index -> fetched once
        return pl.BlockSpec(shape, lambda t, _s=shape: (0,) * len(_s))

    return pl.pallas_call(
        _fused_kernel,
        out_shape=jax.ShapeDtypeStruct((ntiles * NB, NCLASS), jnp.float32),
        grid=(ntiles,),
        in_specs=[pl.BlockSpec((4, M1, KW * C_IN), lambda t: (0, t, 0)),
                  rep((KW * C_IN, C1)), rep((1, C1)),
                  rep((K2, C2)), rep((1, C2)),
                  rep((FDIM, H1P)), rep((1, H1P)),
                  rep((H1P, H2P)), rep((1, H2P)),
                  rep((H2P, NCLASS)), rep((1, NCLASS))],
        out_specs=pl.BlockSpec((NB, NCLASS), lambda t: (t, 0)),
        scratch_shapes=[pltpu.VMEM((M2, K2), jnp.bfloat16),     # even im2col
                        pltpu.VMEM((M2, K2), jnp.bfloat16),     # odd  im2col
                        pltpu.VMEM((NB, FDIM), jnp.bfloat16)],  # fc1 input
        compiler_params=pltpu.CompilerParams(
            dimension_semantics=("parallel",),
            vmem_limit_bytes=32 * 1024 * 1024),
    )(groups, p["w1"], p["b1"], p["w2"], p["b2"],
      p["fw1"], p["fb1"], p["fw2"], p["fb2"], p["fw3"], p["fb3"])


# ---------------------------------------------------------------------------
# Full forward pass (wrapper does the cheap trace-time layout work).
# ---------------------------------------------------------------------------
def cnn_har_forward(x_nchw, p):
    N = x_nchw.shape[0]
    ntiles = max(1, -(-N // NB))
    Np = ntiles * NB
    # (N, 9, 1, 128) -> (N, 128, 9): time on sublanes, channels on lanes.
    x = jnp.transpose(x_nchw[:, :, 0, :], (0, 2, 1))
    if Np != N:                                     # batch remainder -> pad
        x = jnp.pad(x, ((0, Np - N), (0, 0), (0, 0)))
    # conv1 im2col (feature index = kw*9 + cin): (Np, 120, 81) bf16
    xc = jnp.concatenate([x[:, k:k + T1, :] for k in range(KW)], axis=-1)
    xc = xc.astype(jnp.bfloat16)
    # split by (pre-pool time mod 4), then re-order rows inside each batch
    # tile as time-major / image-minor (row = v*NB + b): one input, one DMA.
    g = jnp.stack([xc[:, r::4, :] for r in range(4)], axis=0)   # (4, Np, 30, 81)
    g = g.reshape(4, ntiles, NB, G, KW * C_IN)
    g = jnp.transpose(g, (0, 1, 3, 2, 4))                       # (4, nt, 30, NB, 81)
    g = g.reshape(4, ntiles * G * NB, KW * C_IN)
    out = cnn_har_fused(g, p, ntiles)                           # (Np, 6)
    return out[:N]


# ---------------------------------------------------------------------------
# Parameters: PyTorch-layout init + one-time conversion to kernel layout.
# ---------------------------------------------------------------------------
def init_torch_params(key):
    ks = jax.random.split(key, 10)

    def u(k, shape, fan_in):
        bound = 1.0 / float(fan_in) ** 0.5
        return jax.random.uniform(k, shape, jnp.float32, -bound, bound)

    return {
        "conv1_w": u(ks[0], (C1, C_IN, 1, KW), C_IN * KW),
        "conv1_b": u(ks[1], (C1,), C_IN * KW),
        "conv2_w": u(ks[2], (C2, C1, 1, KW), C1 * KW),
        "conv2_b": u(ks[3], (C2,), C1 * KW),
        "fc1_w": u(ks[4], (H1, FDIM), FDIM),
        "fc1_b": u(ks[5], (H1,), FDIM),
        "fc2_w": u(ks[6], (H2, H1), H1),
        "fc2_b": u(ks[7], (H2,), H1),
        "fc3_w": u(ks[8], (NCLASS, H2), H2),
        "fc3_b": u(ks[9], (NCLASS,), H2),
    }


def prepare_params(tp):
    # conv1 weight (Cout, Cin, 1, KW) -> (KW*Cin, Cout) matching im2col order.
    w1 = jnp.transpose(tp["conv1_w"][:, :, 0, :], (2, 1, 0)).reshape(KW * C_IN, C1)
    # conv2 weight -> (KW*C1, C2) matching the in-kernel K=288 im2col order.
    w2 = jnp.transpose(tp["conv2_w"][:, :, 0, :], (2, 1, 0)).reshape(K2, C2)
    # fc1: PyTorch flatten index is c*26 + w; ours is w*64 + c -> permute rows
    # once; then zero-pad hidden 1000 -> 1024 (exact: ReLU(0)=0 contributes 0).
    fw1 = (tp["fc1_w"].T.reshape(C2, P2T, H1)
           .transpose(1, 0, 2).reshape(FDIM, H1))
    fw1 = jnp.pad(fw1, ((0, 0), (0, H1P - H1)))
    fb1 = jnp.pad(tp["fc1_b"], (0, H1P - H1))
    fw2 = jnp.pad(tp["fc2_w"].T, ((0, H1P - H1), (0, H2P - H2)))
    fb2 = jnp.pad(tp["fc2_b"], (0, H2P - H2))
    fw3 = jnp.pad(tp["fc3_w"].T, ((0, H2P - H2), (0, 0)))
    return {
        "w1": w1.astype(jnp.bfloat16),
        "b1": tp["conv1_b"].reshape(1, -1).astype(jnp.float32),
        "w2": w2.astype(jnp.bfloat16),
        "b2": tp["conv2_b"].reshape(1, -1).astype(jnp.float32),
        "fw1": fw1.astype(jnp.bfloat16),
        "fb1": fb1.reshape(1, -1).astype(jnp.float32),
        "fw2": fw2.astype(jnp.bfloat16),
        "fb2": fb2.reshape(1, -1).astype(jnp.float32),
        "fw3": fw3.astype(jnp.bfloat16),
        "fb3": tp["fc3_b"].reshape(1, -1).astype(jnp.float32),
    }


# ---------------------------------------------------------------------------
# Pure-JAX reference (mirrors the kernel's bf16 operand rounding).
# ---------------------------------------------------------------------------
def reference_forward(x, tp):
    bf = lambda a: a.astype(jnp.bfloat16).astype(jnp.float32)
    dn = ("NCHW", "OIHW", "NCHW")
    pool = lambda h: jax.lax.reduce_window(h, -jnp.inf, jax.lax.max,
                                           (1, 1, 1, 2), (1, 1, 2, 2), "VALID")
    h = jax.lax.conv_general_dilated(bf(x), bf(tp["conv1_w"]), (1, 1), "VALID",
                                     dimension_numbers=dn)
    h = pool(jax.nn.relu(h + tp["conv1_b"].reshape(1, -1, 1, 1)))
    h = jax.lax.conv_general_dilated(bf(h), bf(tp["conv2_w"]), (1, 1), "VALID",
                                     dimension_numbers=dn)
    h = pool(jax.nn.relu(h + tp["conv2_b"].reshape(1, -1, 1, 1)))
    h = bf(h).reshape(x.shape[0], FDIM)              # PyTorch NCHW flatten
    h = bf(jax.nn.relu(h @ bf(tp["fc1_w"]).T + tp["fc1_b"]))
    h = bf(jax.nn.relu(h @ bf(tp["fc2_w"]).T + tp["fc2_b"]))
    y = h @ bf(tp["fc3_w"]).T + tp["fc3_b"]
    return jax.nn.softmax(y, axis=1)


if __name__ == "__main__":
    key = jax.random.PRNGKey(0)
    kp, kx = jax.random.split(key)
    tparams = init_torch_params(kp)
    kparams = prepare_params(tparams)

    # HAR-shaped input: batch=2, 9 sensor channels, 1 x 128 time steps
    # (fc1 expects 64*26 features => W_in = 128).
    x = jax.random.normal(kx, (2, C_IN, 1, T_IN), jnp.float32)

    fwd = jax.jit(cnn_har_forward)
    out = jax.block_until_ready(fwd(x, kparams))

    assert out.shape == (2, NCLASS)
    # softmax sanity: rows sum to ~1 (approx-reciprocal normalization)
    assert bool(jnp.all(jnp.abs(out.sum(axis=1) - 1.0) < 2e-3))
    # match the pure-JAX reference forward
    ref = reference_forward(x, tparams)
    assert bool(jnp.allclose(out, ref, atol=3e-3)), (out, ref)

    print("KERNEL_OK")
</pallas_src>

<mosaic_0001>
module attributes {stable_mosaic.version = 11 : i64} {
  func.func @_fused_kernel(%arg0: i32, %arg1: memref<4x480x81xbf16, #tpu.memory_space<vmem>>, %arg2: memref<81x32xbf16, #tpu.memory_space<vmem>>, %arg3: memref<1x32xf32, #tpu.memory_space<vmem>>, %arg4: memref<288x64xbf16, #tpu.memory_space<vmem>>, %arg5: memref<1x64xf32, #tpu.memory_space<vmem>>, %arg6: memref<1664x1024xbf16, #tpu.memory_space<vmem>>, %arg7: memref<1x1024xf32, #tpu.memory_space<vmem>>, %arg8: memref<1024x512xbf16, #tpu.memory_space<vmem>>, %arg9: memref<1x512xf32, #tpu.memory_space<vmem>>, %arg10: memref<512x6xbf16, #tpu.memory_space<vmem>>, %arg11: memref<1x6xf32, #tpu.memory_space<vmem>>, %arg12: memref<16x6xf32, #tpu.memory_space<vmem>>, %arg13: memref<416x288xbf16, #tpu.memory_space<vmem>>, %arg14: memref<416x288xbf16, #tpu.memory_space<vmem>>, %arg15: memref<16x1664xbf16, #tpu.memory_space<vmem>>) attributes {dimension_semantics = [#tpu.dimension_semantics<parallel>], iteration_bounds = array<i64: 1>, scalar_prefetch = 0 : i64, scratch_operands = 3 : i64, tpu.core_type = #tpu.core_type<tc>, window_params = [{transform_indices = @transform_0, window_bounds = array<i64: 4, 480, 81>}, {pipeline_mode = #tpu.pipeline_mode<synchronous>, transform_indices = @transform_1, window_bounds = array<i64: 81, 32>}, {pipeline_mode = #tpu.pipeline_mode<synchronous>, transform_indices = @transform_2, window_bounds = array<i64: 1, 32>}, {pipeline_mode = #tpu.pipeline_mode<synchronous>, transform_indices = @transform_3, window_bounds = array<i64: 288, 64>}, {pipeline_mode = #tpu.pipeline_mode<synchronous>, transform_indices = @transform_4, window_bounds = array<i64: 1, 64>}, {pipeline_mode = #tpu.pipeline_mode<synchronous>, transform_indices = @transform_5, window_bounds = array<i64: 1664, 1024>}, {pipeline_mode = #tpu.pipeline_mode<synchronous>, transform_indices = @transform_6, window_bounds = array<i64: 1, 1024>}, {pipeline_mode = #tpu.pipeline_mode<synchronous>, transform_indices = @transform_7, window_bounds = array<i64: 1024, 512>}, {pipeline_mode = #tpu.pipeline_mode<synchronous>, transform_indices = @transform_8, window_bounds = array<i64: 1, 512>}, {pipeline_mode = #tpu.pipeline_mode<synchronous>, transform_indices = @transform_9, window_bounds = array<i64: 512, 6>}, {pipeline_mode = #tpu.pipeline_mode<synchronous>, transform_indices = @transform_10, window_bounds = array<i64: 1, 6>}, {transform_indices = @transform_11, window_bounds = array<i64: 16, 6>}]} {
    %c0 = arith.constant 0 : index
    %c0_0 = arith.constant 0 : index
    %0 = vector.load %arg3[%c0, %c0_0] : memref<1x32xf32, #tpu.memory_space<vmem>>, vector<1x32xf32>
    %c0_1 = arith.constant 0 : index
    %c0_2 = arith.constant 0 : index
    %c0_3 = arith.constant 0 : index
    %1 = vector.load %arg1[%c0_1, %c0_2, %c0_3] : memref<4x480x81xbf16, #tpu.memory_space<vmem>>, vector<1x480x81xbf16>
    %2 = vector.shape_cast %1 : vector<1x480x81xbf16> to vector<480x81xbf16>
    %c0_4 = arith.constant 0 : index
    %c0_5 = arith.constant 0 : index
    %3 = vector.load %arg2[%c0_4, %c0_5] : memref<81x32xbf16, #tpu.memory_space<vmem>>, vector<81x32xbf16>
    %cst = arith.constant dense<0.000000e+00> : vector<480x32xf32>
    %4 = tpu.matmul %2, %3, %cst {dimension_numbers = #tpu.dot_dimension_numbers<[1], [0], [0], [1], [0, 0, 1, 1], [], []>} : vector<480x81xbf16>, vector<81x32xbf16>, vector<480x32xf32> -> vector<480x32xf32>
    %c1 = arith.constant 1 : index
    %c0_6 = arith.constant 0 : index
    %c0_7 = arith.constant 0 : index
    %5 = vector.load %arg1[%c1, %c0_6, %c0_7] : memref<4x480x81xbf16, #tpu.memory_space<vmem>>, vector<1x480x81xbf16>
    %6 = vector.shape_cast %5 : vector<1x480x81xbf16> to vector<480x81xbf16>
    %c0_8 = arith.constant 0 : index
    %c0_9 = arith.constant 0 : index
    %7 = vector.load %arg2[%c0_8, %c0_9] : memref<81x32xbf16, #tpu.memory_space<vmem>>, vector<81x32xbf16>
    %cst_10 = arith.constant dense<0.000000e+00> : vector<480x32xf32>
    %8 = tpu.matmul %6, %7, %cst_10 {dimension_numbers = #tpu.dot_dimension_numbers<[1], [0], [0], [1], [0, 0, 1, 1], [], []>} : vector<480x81xbf16>, vector<81x32xbf16>, vector<480x32xf32> -> vector<480x32xf32>
    %9 = arith.maximumf %4, %8 : vector<480x32xf32>
    %10 = vector.broadcast %0 : vector<1x32xf32> to vector<480x32xf32>
    %11 = arith.addf %9, %10 : vector<480x32xf32>
    %cst_11 = arith.constant 0.000000e+00 : f32
    %12 = vector.broadcast %cst_11 : f32 to vector<480x32xf32>
    %13 = arith.maximumf %11, %12 : vector<480x32xf32>
    %14 = arith.truncf %13 : vector<480x32xf32> to vector<480x32xbf16>
    %c2 = arith.constant 2 : index
    %c0_12 = arith.constant 0 : index
    %c0_13 = arith.constant 0 : index
    %15 = vector.load %arg1[%c2, %c0_12, %c0_13] : memref<4x480x81xbf16, #tpu.memory_space<vmem>>, vector<1x480x81xbf16>
    %16 = vector.shape_cast %15 : vector<1x480x81xbf16> to vector<480x81xbf16>
    %c0_14 = arith.constant 0 : index
    %c0_15 = arith.constant 0 : index
    %17 = vector.load %arg2[%c0_14, %c0_15] : memref<81x32xbf16, #tpu.memory_space<vmem>>, vector<81x32xbf16>
    %cst_16 = arith.constant dense<0.000000e+00> : vector<480x32xf32>
    %18 = tpu.matmul %16, %17, %cst_16 {dimension_numbers = #tpu.dot_dimension_numbers<[1], [0], [0], [1], [0, 0, 1, 1], [], []>} : vector<480x81xbf16>, vector<81x32xbf16>, vector<480x32xf32> -> vector<480x32xf32>
    %c3 = arith.constant 3 : index
    %c0_17 = arith.constant 0 : index
    %c0_18 = arith.constant 0 : index
    %19 = vector.load %arg1[%c3, %c0_17, %c0_18] : memref<4x480x81xbf16, #tpu.memory_space<vmem>>, vector<1x480x81xbf16>
    %20 = vector.shape_cast %19 : vector<1x480x81xbf16> to vector<480x81xbf16>
    %c0_19 = arith.constant 0 : index
    %c0_20 = arith.constant 0 : index
    %21 = vector.load %arg2[%c0_19, %c0_20] : memref<81x32xbf16, #tpu.memory_space<vmem>>, vector<81x32xbf16>
    %cst_21 = arith.constant dense<0.000000e+00> : vector<480x32xf32>
    %22 = tpu.matmul %20, %21, %cst_21 {dimension_numbers = #tpu.dot_dimension_numbers<[1], [0], [0], [1], [0, 0, 1, 1], [], []>} : vector<480x81xbf16>, vector<81x32xbf16>, vector<480x32xf32> -> vector<480x32xf32>
    %23 = arith.maximumf %18, %22 : vector<480x32xf32>
    %24 = vector.broadcast %0 : vector<1x32xf32> to vector<480x32xf32>
    %25 = arith.addf %23, %24 : vector<480x32xf32>
    %cst_22 = arith.constant 0.000000e+00 : f32
    %26 = vector.broadcast %cst_22 : f32 to vector<480x32xf32>
    %27 = arith.maximumf %25, %26 : vector<480x32xf32>
    %28 = arith.truncf %27 : vector<480x32xf32> to vector<480x32xbf16>
    %29 = vector.extract_strided_slice %14 {offsets = [0, 0], sizes = [416, 32], strides = [1, 1]} : vector<480x32xbf16> to vector<416x32xbf16>
    %c0_23 = arith.constant 0 : index
    %c0_24 = arith.constant 0 : index
    %30 = vector.load %arg13[%c0_23, %c0_24] : memref<416x288xbf16, #tpu.memory_space<vmem>>, vector<416x32xbf16>
    tpu.vector_store %arg13[%c0_23, %c0_24], %29 {strides = array<i32>} : memref<416x288xbf16, #tpu.memory_space<vmem>>, vector<416x32xbf16>,
    %31 = vector.extract_strided_slice %28 {offsets = [0, 0], sizes = [416, 32], strides = [1, 1]} : vector<480x32xbf16> to vector<416x32xbf16>
    %c0_25 = arith.constant 0 : index
    %c0_26 = arith.constant 0 : index
    %32 = vector.load %arg14[%c0_25, %c0_26] : memref<416x288xbf16, #tpu.memory_space<vmem>>, vector<416x32xbf16>
    tpu.vector_store %arg14[%c0_25, %c0_26], %31 {strides = array<i32>} : memref<416x288xbf16, #tpu.memory_space<vmem>>, vector<416x32xbf16>,
    %33 = vector.extract_strided_slice %28 {offsets = [0, 0], sizes = [416, 32], strides = [1, 1]} : vector<480x32xbf16> to vector<416x32xbf16>
    %c0_27 = arith.constant 0 : index
    %c32 = arith.constant 32 : index
    %34 = vector.load %arg13[%c0_27, %c32] : memref<416x288xbf16, #tpu.memory_space<vmem>>, vector<416x32xbf16>
    tpu.vector_store %arg13[%c0_27, %c32], %33 {strides = array<i32>} : memref<416x288xbf16, #tpu.memory_space<vmem>>, vector<416x32xbf16>,
    %35 = vector.extract_strided_slice %14 {offsets = [16, 0], sizes = [416, 32], strides = [1, 1]} : vector<480x32xbf16> to vector<416x32xbf16>
    %c0_28 = arith.constant 0 : index
    %c32_29 = arith.constant 32 : index
    %36 = vector.load %arg14[%c0_28, %c32_29] : memref<416x288xbf16, #tpu.memory_space<vmem>>, vector<416x32xbf16>
    tpu.vector_store %arg14[%c0_28, %c32_29], %35 {strides = array<i32>} : memref<416x288xbf16, #tpu.memory_space<vmem>>, vector<416x32xbf16>,
    %37 = vector.extract_strided_slice %14 {offsets = [16, 0], sizes = [416, 32], strides = [1, 1]} : vector<480x32xbf16> to vector<416x32xbf16>
    %c0_30 = arith.constant 0 : index
    %c64 = arith.constant 64 : index
    %38 = vector.load %arg13[%c0_30, %c64] : memref<416x288xbf16, #tpu.memory_space<vmem>>, vector<416x32xbf16>
    tpu.vector_store %arg13[%c0_30, %c64], %37 {strides = array<i32>} : memref<416x288xbf16, #tpu.memory_space<vmem>>, vector<416x32xbf16>,
    %39 = vector.extract_strided_slice %28 {offsets = [16, 0], sizes = [416, 32], strides = [1, 1]} : vector<480x32xbf16> to vector<416x32xbf16>
    %c0_31 = arith.constant 0 : index
    %c64_32 = arith.constant 64 : index
    %40 = vector.load %arg14[%c0_31, %c64_32] : memref<416x288xbf16, #tpu.memory_space<vmem>>, vector<416x32xbf16>
    tpu.vector_store %arg14[%c0_31, %c64_32], %39 {strides = array<i32>} : memref<416x288xbf16, #tpu.memory_space<vmem>>, vector<416x32xbf16>,
    %41 = vector.extract_strided_slice %28 {offsets = [16, 0], sizes = [416, 32], strides = [1, 1]} : vector<480x32xbf16> to vector<416x32xbf16>
    %c0_33 = arith.constant 0 : index
    %c96 = arith.constant 96 : index
    %42 = vector.load %arg13[%c0_33, %c96] : memref<416x288xbf16, #tpu.memory_space<vmem>>, vector<416x32xbf16>
    tpu.vector_store %arg13[%c0_33, %c96], %41 {strides = array<i32>} : memref<416x288xbf16, #tpu.memory_space<vmem>>, vector<416x32xbf16>,
    %43 = vector.extract_strided_slice %14 {offsets = [32, 0], sizes = [416, 32], strides = [1, 1]} : vector<480x32xbf16> to vector<416x32xbf16>
    %c0_34 = arith.constant 0 : index
    %c96_35 = arith.constant 96 : index
    %44 = vector.load %arg14[%c0_34, %c96_35] : memref<416x288xbf16, #tpu.memory_space<vmem>>, vector<416x32xbf16>
    tpu.vector_store %arg14[%c0_34, %c96_35], %43 {strides = array<i32>} : memref<416x288xbf16, #tpu.memory_space<vmem>>, vector<416x32xbf16>,
    %45 = vector.extract_strided_slice %14 {offsets = [32, 0], sizes = [416, 32], strides = [1, 1]} : vector<480x32xbf16> to vector<416x32xbf16>
    %c0_36 = arith.constant 0 : index
    %c128 = arith.constant 128 : index
    %46 = vector.load %arg13[%c0_36, %c128] : memref<416x288xbf16, #tpu.memory_space<vmem>>, vector<416x32xbf16>
    tpu.vector_store %arg13[%c0_36, %c128], %45 {strides = array<i32>} : memref<416x288xbf16, #tpu.memory_space<vmem>>, vector<416x32xbf16>,
    %47 = vector.extract_strided_slice %28 {offsets = [32, 0], sizes = [416, 32], strides = [1, 1]} : vector<480x32xbf16> to vector<416x32xbf16>
    %c0_37 = arith.constant 0 : index
    %c128_38 = arith.constant 128 : index
    %48 = vector.load %arg14[%c0_37, %c128_38] : memref<416x288xbf16, #tpu.memory_space<vmem>>, vector<416x32xbf16>
    tpu.vector_store %arg14[%c0_37, %c128_38], %47 {strides = array<i32>} : memref<416x288xbf16, #tpu.memory_space<vmem>>, vector<416x32xbf16>,
    %49 = vector.extract_strided_slice %28 {offsets = [32, 0], sizes = [416, 32], strides = [1, 1]} : vector<480x32xbf16> to vector<416x32xbf16>
    %c0_39 = arith.constant 0 : index
    %c160 = arith.constant 160 : index
    %50 = vector.load %arg13[%c0_39, %c160] : memref<416x288xbf16, #tpu.memory_space<vmem>>, vector<416x32xbf16>
    tpu.vector_store %arg13[%c0_39, %c160], %49 {strides = array<i32>} : memref<416x288xbf16, #tpu.memory_space<vmem>>, vector<416x32xbf16>,
    %51 = vector.extract_strided_slice %14 {offsets = [48, 0], sizes = [416, 32], strides = [1, 1]} : vector<480x32xbf16> to vector<416x32xbf16>
    %c0_40 = arith.constant 0 : index
    %c160_41 = arith.constant 160 : index
    %52 = vector.load %arg14[%c0_40, %c160_41] : memref<416x288xbf16, #tpu.memory_space<vmem>>, vector<416x32xbf16>
    tpu.vector_store %arg14[%c0_40, %c160_41], %51 {strides = array<i32>} : memref<416x288xbf16, #tpu.memory_space<vmem>>, vector<416x32xbf16>,
    %53 = vector.extract_strided_slice %14 {offsets = [48, 0], sizes = [416, 32], strides = [1, 1]} : vector<480x32xbf16> to vector<416x32xbf16>
    %c0_42 = arith.constant 0 : index
    %c192 = arith.constant 192 : index
    %54 = vector.load %arg13[%c0_42, %c192] : memref<416x288xbf16, #tpu.memory_space<vmem>>, vector<416x32xbf16>
    tpu.vector_store %arg13[%c0_42, %c192], %53 {strides = array<i32>} : memref<416x288xbf16, #tpu.memory_space<vmem>>, vector<416x32xbf16>,
    %55 = vector.extract_strided_slice %28 {offsets = [48, 0], sizes = [416, 32], strides = [1, 1]} : vector<480x32xbf16> to vector<416x32xbf16>
    %c0_43 = arith.constant 0 : index
    %c192_44 = arith.constant 192 : index
    %56 = vector.load %arg14[%c0_43, %c192_44] : memref<416x288xbf16, #tpu.memory_space<vmem>>, vector<416x32xbf16>
    tpu.vector_store %arg14[%c0_43, %c192_44], %55 {strides = array<i32>} : memref<416x288xbf16, #tpu.memory_space<vmem>>, vector<416x32xbf16>,
    %57 = vector.extract_strided_slice %28 {offsets = [48, 0], sizes = [416, 32], strides = [1, 1]} : vector<480x32xbf16> to vector<416x32xbf16>
    %c0_45 = arith.constant 0 : index
    %c224 = arith.constant 224 : index
    %58 = vector.load %arg13[%c0_45, %c224] : memref<416x288xbf16, #tpu.memory_space<vmem>>, vector<416x32xbf16>
    tpu.vector_store %arg13[%c0_45, %c224], %57 {strides = array<i32>} : memref<416x288xbf16, #tpu.memory_space<vmem>>, vector<416x32xbf16>,
    %59 = vector.extract_strided_slice %14 {offsets = [64, 0], sizes = [416, 32], strides = [1, 1]} : vector<480x32xbf16> to vector<416x32xbf16>
    %c0_46 = arith.constant 0 : index
    %c224_47 = arith.constant 224 : index
    %60 = vector.load %arg14[%c0_46, %c224_47] : memref<416x288xbf16, #tpu.memory_space<vmem>>, vector<416x32xbf16>
    tpu.vector_store %arg14[%c0_46, %c224_47], %59 {strides = array<i32>} : memref<416x288xbf16, #tpu.memory_space<vmem>>, vector<416x32xbf16>,
    %61 = vector.extract_strided_slice %14 {offsets = [64, 0], sizes = [416, 32], strides = [1, 1]} : vector<480x32xbf16> to vector<416x32xbf16>
    %c0_48 = arith.constant 0 : index
    %c256 = arith.constant 256 : index
    %62 = vector.load %arg13[%c0_48, %c256] : memref<416x288xbf16, #tpu.memory_space<vmem>>, vector<416x32xbf16>
    tpu.vector_store %arg13[%c0_48, %c256], %61 {strides = array<i32>} : memref<416x288xbf16, #tpu.memory_space<vmem>>, vector<416x32xbf16>,
    %63 = vector.extract_strided_slice %28 {offsets = [64, 0], sizes = [416, 32], strides = [1, 1]} : vector<480x32xbf16> to vector<416x32xbf16>
    %c0_49 = arith.constant 0 : index
    %c256_50 = arith.constant 256 : index
    %64 = vector.load %arg14[%c0_49, %c256_50] : memref<416x288xbf16, #tpu.memory_space<vmem>>, vector<416x32xbf16>
    tpu.vector_store %arg14[%c0_49, %c256_50], %63 {strides = array<i32>} : memref<416x288xbf16, #tpu.memory_space<vmem>>, vector<416x32xbf16>,
    %c0_51 = arith.constant 0 : index
    %c0_52 = arith.constant 0 : index
    %65 = vector.load %arg13[%c0_51, %c0_52] : memref<416x288xbf16, #tpu.memory_space<vmem>>, vector<416x288xbf16>
    %c0_53 = arith.constant 0 : index
    %c0_54 = arith.constant 0 : index
    %66 = vector.load %arg4[%c0_53, %c0_54] : memref<288x64xbf16, #tpu.memory_space<vmem>>, vector<288x64xbf16>
    %cst_55 = arith.constant dense<0.000000e+00> : vector<416x64xf32>
    %67 = tpu.matmul %65, %66, %cst_55 {dimension_numbers = #tpu.dot_dimension_numbers<[1], [0], [0], [1], [0, 0, 1, 1], [], []>} : vector<416x288xbf16>, vector<288x64xbf16>, vector<416x64xf32> -> vector<416x64xf32>
    %c0_56 = arith.constant 0 : index
    %c0_57 = arith.constant 0 : index
    %68 = vector.load %arg14[%c0_56, %c0_57] : memref<416x288xbf16, #tpu.memory_space<vmem>>, vector<416x288xbf16>
    %c0_58 = arith.constant 0 : index
    %c0_59 = arith.constant 0 : index
    %69 = vector.load %arg4[%c0_58, %c0_59] : memref<288x64xbf16, #tpu.memory_space<vmem>>, vector<288x64xbf16>
    %cst_60 = arith.constant dense<0.000000e+00> : vector<416x64xf32>
    %70 = tpu.matmul %68, %69, %cst_60 {dimension_numbers = #tpu.dot_dimension_numbers<[1], [0], [0], [1], [0, 0, 1, 1], [], []>} : vector<416x288xbf16>, vector<288x64xbf16>, vector<416x64xf32> -> vector<416x64xf32>
    %71 = arith.maximumf %67, %70 : vector<416x64xf32>
    %c0_61 = arith.constant 0 : index
    %c0_62 = arith.constant 0 : index
    %72 = vector.load %arg5[%c0_61, %c0_62] : memref<1x64xf32, #tpu.memory_space<vmem>>, vector<1x64xf32>
    %73 = vector.broadcast %72 : vector<1x64xf32> to vector<416x64xf32>
    %74 = arith.addf %71, %73 : vector<416x64xf32>
    %cst_63 = arith.constant 0.000000e+00 : f32
    %75 = vector.broadcast %cst_63 : f32 to vector<416x64xf32>
    %76 = arith.maximumf %74, %75 : vector<416x64xf32>
    %77 = arith.truncf %76 : vector<416x64xf32> to vector<416x64xbf16>
    %78 = vector.extract_strided_slice %77 {offsets = [0, 0], sizes = [16, 64], strides = [1, 1]} : vector<416x64xbf16> to vector<16x64xbf16>
    %c0_64 = arith.constant 0 : index
    %c0_65 = arith.constant 0 : index
    %79 = vector.load %arg15[%c0_64, %c0_65] : memref<16x1664xbf16, #tpu.memory_space<vmem>>, vector<16x64xbf16>
    tpu.vector_store %arg15[%c0_64, %c0_65], %78 {strides = array<i32>} : memref<16x1664xbf16, #tpu.memory_space<vmem>>, vector<16x64xbf16>,
    %80 = vector.extract_strided_slice %77 {offsets = [16, 0], sizes = [16, 64], strides = [1, 1]} : vector<416x64xbf16> to vector<16x64xbf16>
    %c0_66 = arith.constant 0 : index
    %c64_67 = arith.constant 64 : index
    %81 = vector.load %arg15[%c0_66, %c64_67] : memref<16x1664xbf16, #tpu.memory_space<vmem>>, vector<16x64xbf16>
    tpu.vector_store %arg15[%c0_66, %c64_67], %80 {strides = array<i32>} : memref<16x1664xbf16, #tpu.memory_space<vmem>>, vector<16x64xbf16>,
    %82 = vector.extract_strided_slice %77 {offsets = [32, 0], sizes = [16, 64], strides = [1, 1]} : vector<416x64xbf16> to vector<16x64xbf16>
    %c0_68 = arith.constant 0 : index
    %c128_69 = arith.constant 128 : index
    %83 = vector.load %arg15[%c0_68, %c128_69] : memref<16x1664xbf16, #tpu.memory_space<vmem>>, vector<16x64xbf16>
    tpu.vector_store %arg15[%c0_68, %c128_69], %82 {strides = array<i32>} : memref<16x1664xbf16, #tpu.memory_space<vmem>>, vector<16x64xbf16>,
    %84 = vector.extract_strided_slice %77 {offsets = [48, 0], sizes = [16, 64], strides = [1, 1]} : vector<416x64xbf16> to vector<16x64xbf16>
    %c0_70 = arith.constant 0 : index
    %c192_71 = arith.constant 192 : index
    %85 = vector.load %arg15[%c0_70, %c192_71] : memref<16x1664xbf16, #tpu.memory_space<vmem>>, vector<16x64xbf16>
    tpu.vector_store %arg15[%c0_70, %c192_71], %84 {strides = array<i32>} : memref<16x1664xbf16, #tpu.memory_space<vmem>>, vector<16x64xbf16>,
    %86 = vector.extract_strided_slice %77 {offsets = [64, 0], sizes = [16, 64], strides = [1, 1]} : vector<416x64xbf16> to vector<16x64xbf16>
    %c0_72 = arith.constant 0 : index
    %c256_73 = arith.constant 256 : index
    %87 = vector.load %arg15[%c0_72, %c256_73] : memref<16x1664xbf16, #tpu.memory_space<vmem>>, vector<16x64xbf16>
    tpu.vector_store %arg15[%c0_72, %c256_73], %86 {strides = array<i32>} : memref<16x1664xbf16, #tpu.memory_space<vmem>>, vector<16x64xbf16>,
    %88 = vector.extract_strided_slice %77 {offsets = [80, 0], sizes = [16, 64], strides = [1, 1]} : vector<416x64xbf16> to vector<16x64xbf16>
    %c0_74 = arith.constant 0 : index
    %c320 = arith.constant 320 : index
    %89 = vector.load %arg15[%c0_74, %c320] : memref<16x1664xbf16, #tpu.memory_space<vmem>>, vector<16x64xbf16>
    tpu.vector_store %arg15[%c0_74, %c320], %88 {strides = array<i32>} : memref<16x1664xbf16, #tpu.memory_space<vmem>>, vector<16x64xbf16>,
    %90 = vector.extract_strided_slice %77 {offsets = [96, 0], sizes = [16, 64], strides = [1, 1]} : vector<416x64xbf16> to vector<16x64xbf16>
    %c0_75 = arith.constant 0 : index
    %c384 = arith.constant 384 : index
    %91 = vector.load %arg15[%c0_75, %c384] : memref<16x1664xbf16, #tpu.memory_space<vmem>>, vector<16x64xbf16>
    tpu.vector_store %arg15[%c0_75, %c384], %90 {strides = array<i32>} : memref<16x1664xbf16, #tpu.memory_space<vmem>>, vector<16x64xbf16>,
    %92 = vector.extract_strided_slice %77 {offsets = [112, 0], sizes = [16, 64], strides = [1, 1]} : vector<416x64xbf16> to vector<16x64xbf16>
    %c0_76 = arith.constant 0 : index
    %c448 = arith.constant 448 : index
    %93 = vector.load %arg15[%c0_76, %c448] : memref<16x1664xbf16, #tpu.memory_space<vmem>>, vector<16x64xbf16>
    tpu.vector_store %arg15[%c0_76, %c448], %92 {strides = array<i32>} : memref<16x1664xbf16, #tpu.memory_space<vmem>>, vector<16x64xbf16>,
    %94 = vector.extract_strided_slice %77 {offsets = [128, 0], sizes = [16, 64], strides = [1, 1]} : vector<416x64xbf16> to vector<16x64xbf16>
    %c0_77 = arith.constant 0 : index
    %c512 = arith.constant 512 : index
    %95 = vector.load %arg15[%c0_77, %c512] : memref<16x1664xbf16, #tpu.memory_space<vmem>>, vector<16x64xbf16>
    tpu.vector_store %arg15[%c0_77, %c512], %94 {strides = array<i32>} : memref<16x1664xbf16, #tpu.memory_space<vmem>>, vector<16x64xbf16>,
    %96 = vector.extract_strided_slice %77 {offsets = [144, 0], sizes = [16, 64], strides = [1, 1]} : vector<416x64xbf16> to vector<16x64xbf16>
    %c0_78 = arith.constant 0 : index
    %c576 = arith.constant 576 : index
    %97 = vector.load %arg15[%c0_78, %c576] : memref<16x1664xbf16, #tpu.memory_space<vmem>>, vector<16x64xbf16>
    tpu.vector_store %arg15[%c0_78, %c576], %96 {strides = array<i32>} : memref<16x1664xbf16, #tpu.memory_space<vmem>>, vector<16x64xbf16>,
    %98 = vector.extract_strided_slice %77 {offsets = [160, 0], sizes = [16, 64], strides = [1, 1]} : vector<416x64xbf16> to vector<16x64xbf16>
    %c0_79 = arith.constant 0 : index
    %c640 = arith.constant 640 : index
    %99 = vector.load %arg15[%c0_79, %c640] : memref<16x1664xbf16, #tpu.memory_space<vmem>>, vector<16x64xbf16>
    tpu.vector_store %arg15[%c0_79, %c640], %98 {strides = array<i32>} : memref<16x1664xbf16, #tpu.memory_space<vmem>>, vector<16x64xbf16>,
    %100 = vector.extract_strided_slice %77 {offsets = [176, 0], sizes = [16, 64], strides = [1, 1]} : vector<416x64xbf16> to vector<16x64xbf16>
    %c0_80 = arith.constant 0 : index
    %c704 = arith.constant 704 : index
    %101 = vector.load %arg15[%c0_80, %c704] : memref<16x1664xbf16, #tpu.memory_space<vmem>>, vector<16x64xbf16>
    tpu.vector_store %arg15[%c0_80, %c704], %100 {strides = array<i32>} : memref<16x1664xbf16, #tpu.memory_space<vmem>>, vector<16x64xbf16>,
    %102 = vector.extract_strided_slice %77 {offsets = [192, 0], sizes = [16, 64], strides = [1, 1]} : vector<416x64xbf16> to vector<16x64xbf16>
    %c0_81 = arith.constant 0 : index
    %c768 = arith.constant 768 : index
    %103 = vector.load %arg15[%c0_81, %c768] : memref<16x1664xbf16, #tpu.memory_space<vmem>>, vector<16x64xbf16>
    tpu.vector_store %arg15[%c0_81, %c768], %102 {strides = array<i32>} : memref<16x1664xbf16, #tpu.memory_space<vmem>>, vector<16x64xbf16>,
    %104 = vector.extract_strided_slice %77 {offsets = [208, 0], sizes = [16, 64], strides = [1, 1]} : vector<416x64xbf16> to vector<16x64xbf16>
    %c0_82 = arith.constant 0 : index
    %c832 = arith.constant 832 : index
    %105 = vector.load %arg15[%c0_82, %c832] : memref<16x1664xbf16, #tpu.memory_space<vmem>>, vector<16x64xbf16>
    tpu.vector_store %arg15[%c0_82, %c832], %104 {strides = array<i32>} : memref<16x1664xbf16, #tpu.memory_space<vmem>>, vector<16x64xbf16>,
    %106 = vector.extract_strided_slice %77 {offsets = [224, 0], sizes = [16, 64], strides = [1, 1]} : vector<416x64xbf16> to vector<16x64xbf16>
    %c0_83 = arith.constant 0 : index
    %c896 = arith.constant 896 : index
    %107 = vector.load %arg15[%c0_83, %c896] : memref<16x1664xbf16, #tpu.memory_space<vmem>>, vector<16x64xbf16>
    tpu.vector_store %arg15[%c0_83, %c896], %106 {strides = array<i32>} : memref<16x1664xbf16, #tpu.memory_space<vmem>>, vector<16x64xbf16>,
    %108 = vector.extract_strided_slice %77 {offsets = [240, 0], sizes = [16, 64], strides = [1, 1]} : vector<416x64xbf16> to vector<16x64xbf16>
    %c0_84 = arith.constant 0 : index
    %c960 = arith.constant 960 : index
    %109 = vector.load %arg15[%c0_84, %c960] : memref<16x1664xbf16, #tpu.memory_space<vmem>>, vector<16x64xbf16>
    tpu.vector_store %arg15[%c0_84, %c960], %108 {strides = array<i32>} : memref<16x1664xbf16, #tpu.memory_space<vmem>>, vector<16x64xbf16>,
    %110 = vector.extract_strided_slice %77 {offsets = [256, 0], sizes = [16, 64], strides = [1, 1]} : vector<416x64xbf16> to vector<16x64xbf16>
    %c0_85 = arith.constant 0 : index
    %c1024 = arith.constant 1024 : index
    %111 = vector.load %arg15[%c0_85, %c1024] : memref<16x1664xbf16, #tpu.memory_space<vmem>>, vector<16x64xbf16>
    tpu.vector_store %arg15[%c0_85, %c1024], %110 {strides = array<i32>} : memref<16x1664xbf16, #tpu.memory_space<vmem>>, vector<16x64xbf16>,
    %112 = vector.extract_strided_slice %77 {offsets = [272, 0], sizes = [16, 64], strides = [1, 1]} : vector<416x64xbf16> to vector<16x64xbf16>
    %c0_86 = arith.constant 0 : index
    %c1088 = arith.constant 1088 : index
    %113 = vector.load %arg15[%c0_86, %c1088] : memref<16x1664xbf16, #tpu.memory_space<vmem>>, vector<16x64xbf16>
    tpu.vector_store %arg15[%c0_86, %c1088], %112 {strides = array<i32>} : memref<16x1664xbf16, #tpu.memory_space<vmem>>, vector<16x64xbf16>,
    %114 = vector.extract_strided_slice %77 {offsets = [288, 0], sizes = [16, 64], strides = [1, 1]} : vector<416x64xbf16> to vector<16x64xbf16>
    %c0_87 = arith.constant 0 : index
    %c1152 = arith.constant 1152 : index
    %115 = vector.load %arg15[%c0_87, %c1152] : memref<16x1664xbf16, #tpu.memory_space<vmem>>, vector<16x64xbf16>
    tpu.vector_store %arg15[%c0_87, %c1152], %114 {strides = array<i32>} : memref<16x1664xbf16, #tpu.memory_space<vmem>>, vector<16x64xbf16>,
    %116 = vector.extract_strided_slice %77 {offsets = [304, 0], sizes = [16, 64], strides = [1, 1]} : vector<416x64xbf16> to vector<16x64xbf16>
    %c0_88 = arith.constant 0 : index
    %c1216 = arith.constant 1216 : index
    %117 = vector.load %arg15[%c0_88, %c1216] : memref<16x1664xbf16, #tpu.memory_space<vmem>>, vector<16x64xbf16>
    tpu.vector_store %arg15[%c0_88, %c1216], %116 {strides = array<i32>} : memref<16x1664xbf16, #tpu.memory_space<vmem>>, vector<16x64xbf16>,
    %118 = vector.extract_strided_slice %77 {offsets = [320, 0], sizes = [16, 64], strides = [1, 1]} : vector<416x64xbf16> to vector<16x64xbf16>
    %c0_89 = arith.constant 0 : index
    %c1280 = arith.constant 1280 : index
    %119 = vector.load %arg15[%c0_89, %c1280] : memref<16x1664xbf16, #tpu.memory_space<vmem>>, vector<16x64xbf16>
    tpu.vector_store %arg15[%c0_89, %c1280], %118 {strides = array<i32>} : memref<16x1664xbf16, #tpu.memory_space<vmem>>, vector<16x64xbf16>,
    %120 = vector.extract_strided_slice %77 {offsets = [336, 0], sizes = [16, 64], strides = [1, 1]} : vector<416x64xbf16> to vector<16x64xbf16>
    %c0_90 = arith.constant 0 : index
    %c1344 = arith.constant 1344 : index
    %121 = vector.load %arg15[%c0_90, %c1344] : memref<16x1664xbf16, #tpu.memory_space<vmem>>, vector<16x64xbf16>
    tpu.vector_store %arg15[%c0_90, %c1344], %120 {strides = array<i32>} : memref<16x1664xbf16, #tpu.memory_space<vmem>>, vector<16x64xbf16>,
    %122 = vector.extract_strided_slice %77 {offsets = [352, 0], sizes = [16, 64], strides = [1, 1]} : vector<416x64xbf16> to vector<16x64xbf16>
    %c0_91 = arith.constant 0 : index
    %c1408 = arith.constant 1408 : index
    %123 = vector.load %arg15[%c0_91, %c1408] : memref<16x1664xbf16, #tpu.memory_space<vmem>>, vector<16x64xbf16>
    tpu.vector_store %arg15[%c0_91, %c1408], %122 {strides = array<i32>} : memref<16x1664xbf16, #tpu.memory_space<vmem>>, vector<16x64xbf16>,
    %124 = vector.extract_strided_slice %77 {offsets = [368, 0], sizes = [16, 64], strides = [1, 1]} : vector<416x64xbf16> to vector<16x64xbf16>
    %c0_92 = arith.constant 0 : index
    %c1472 = arith.constant 1472 : index
    %125 = vector.load %arg15[%c0_92, %c1472] : memref<16x1664xbf16, #tpu.memory_space<vmem>>, vector<16x64xbf16>
    tpu.vector_store %arg15[%c0_92, %c1472], %124 {strides = array<i32>} : memref<16x1664xbf16, #tpu.memory_space<vmem>>, vector<16x64xbf16>,
    %126 = vector.extract_strided_slice %77 {offsets = [384, 0], sizes = [16, 64], strides = [1, 1]} : vector<416x64xbf16> to vector<16x64xbf16>
    %c0_93 = arith.constant 0 : index
    %c1536 = arith.constant 1536 : index
    %127 = vector.load %arg15[%c0_93, %c1536] : memref<16x1664xbf16, #tpu.memory_space<vmem>>, vector<16x64xbf16>
    tpu.vector_store %arg15[%c0_93, %c1536], %126 {strides = array<i32>} : memref<16x1664xbf16, #tpu.memory_space<vmem>>, vector<16x64xbf16>,
    %128 = vector.extract_strided_slice %77 {offsets = [400, 0], sizes = [16, 64], strides = [1, 1]} : vector<416x64xbf16> to vector<16x64xbf16>
    %c0_94 = arith.constant 0 : index
    %c1600 = arith.constant 1600 : index
    %129 = vector.load %arg15[%c0_94, %c1600] : memref<16x1664xbf16, #tpu.memory_space<vmem>>, vector<16x64xbf16>
    tpu.vector_store %arg15[%c0_94, %c1600], %128 {strides = array<i32>} : memref<16x1664xbf16, #tpu.memory_space<vmem>>, vector<16x64xbf16>,
    %c0_95 = arith.constant 0 : index
    %c0_96 = arith.constant 0 : index
    %130 = vector.load %arg15[%c0_95, %c0_96] : memref<16x1664xbf16, #tpu.memory_space<vmem>>, vector<16x1664xbf16>
    %c0_97 = arith.constant 0 : index
    %c0_98 = arith.constant 0 : index
    %131 = vector.load %arg6[%c0_97, %c0_98] : memref<1664x1024xbf16, #tpu.memory_space<vmem>>, vector<1664x1024xbf16>
    %cst_99 = arith.constant dense<0.000000e+00> : vector<16x1024xf32>
    %132 = tpu.matmul %130, %131, %cst_99 {dimension_numbers = #tpu.dot_dimension_numbers<[1], [0], [0], [1], [0, 0, 1, 1], [], []>} : vector<16x1664xbf16>, vector<1664x1024xbf16>, vector<16x1024xf32> -> vector<16x1024xf32>
    %c0_100 = arith.constant 0 : index
    %c0_101 = arith.constant 0 : index
    %133 = vector.load %arg7[%c0_100, %c0_101] : memref<1x1024xf32, #tpu.memory_space<vmem>>, vector<1x1024xf32>
    %134 = vector.broadcast %133 : vector<1x1024xf32> to vector<16x1024xf32>
    %135 = arith.addf %132, %134 : vector<16x1024xf32>
    %cst_102 = arith.constant 0.000000e+00 : f32
    %136 = vector.broadcast %cst_102 : f32 to vector<16x1024xf32>
    %137 = arith.maximumf %135, %136 : vector<16x1024xf32>
    %138 = arith.truncf %137 : vector<16x1024xf32> to vector<16x1024xbf16>
    %c0_103 = arith.constant 0 : index
    %c0_104 = arith.constant 0 : index
    %139 = vector.load %arg8[%c0_103, %c0_104] : memref<1024x512xbf16, #tpu.memory_space<vmem>>, vector<1024x512xbf16>
    %cst_105 = arith.constant dense<0.000000e+00> : vector<16x512xf32>
    %140 = tpu.matmul %138, %139, %cst_105 {dimension_numbers = #tpu.dot_dimension_numbers<[1], [0], [0], [1], [0, 0, 1, 1], [], []>} : vector<16x1024xbf16>, vector<1024x512xbf16>, vector<16x512xf32> -> vector<16x512xf32>
    %c0_106 = arith.constant 0 : index
    %c0_107 = arith.constant 0 : index
    %141 = vector.load %arg9[%c0_106, %c0_107] : memref<1x512xf32, #tpu.memory_space<vmem>>, vector<1x512xf32>
    %142 = vector.broadcast %141 : vector<1x512xf32> to vector<16x512xf32>
    %143 = arith.addf %140, %142 : vector<16x512xf32>
    %cst_108 = arith.constant 0.000000e+00 : f32
    %144 = vector.broadcast %cst_108 : f32 to vector<16x512xf32>
    %145 = arith.maximumf %143, %144 : vector<16x512xf32>
    %146 = arith.truncf %145 : vector<16x512xf32> to vector<16x512xbf16>
    %c0_109 = arith.constant 0 : index
    %c0_110 = arith.constant 0 : index
    %147 = vector.load %arg10[%c0_109, %c0_110] : memref<512x6xbf16, #tpu.memory_space<vmem>>, vector<512x6xbf16>
    %cst_111 = arith.constant dense<0.000000e+00> : vector<16x6xf32>
    %148 = tpu.matmul %146, %147, %cst_111 {dimension_numbers = #tpu.dot_dimension_numbers<[1], [0], [0], [1], [0, 0, 1, 1], [], []>} : vector<16x512xbf16>, vector<512x6xbf16>, vector<16x6xf32> -> vector<16x6xf32>
    %c0_112 = arith.constant 0 : index
    %c0_113 = arith.constant 0 : index
    %149 = vector.load %arg11[%c0_112, %c0_113] : memref<1x6xf32, #tpu.memory_space<vmem>>, vector<1x6xf32>
    %150 = vector.broadcast %149 : vector<1x6xf32> to vector<16x6xf32>
    %151 = arith.addf %148, %150 : vector<16x6xf32>
    %cst_114 = arith.constant dense<0xFF800000> : vector<16xf32>
    %152 = vector.multi_reduction <maximumf>, %151, %cst_114 [1] : vector<16x6xf32> to vector<16xf32>
    %153 = vector.shape_cast %152 : vector<16xf32> to vector<16x1xf32>
    %154 = vector.broadcast %153 : vector<16x1xf32> to vector<16x6xf32>
    %155 = arith.subf %151, %154 : vector<16x6xf32>
    %156 = math.exp %155 : vector<16x6xf32>
    %cst_115 = arith.constant dense<0.000000e+00> : vector<16xf32>
    %157 = vector.multi_reduction <add>, %156, %cst_115 [1] : vector<16x6xf32> to vector<16xf32>
    %158 = vector.shape_cast %157 : vector<16xf32> to vector<16x1xf32>
    %159 = tpu.reciprocal %158 {approx = true} : vector<16x1xf32> -> vector<16x1xf32>
    %160 = vector.broadcast %159 : vector<16x1xf32> to vector<16x6xf32>
    %161 = arith.mulf %156, %160 : vector<16x6xf32>
    %c0_116 = arith.constant 0 : index
    %c0_117 = arith.constant 0 : index
    %162 = vector.load %arg12[%c0_116, %c0_117] : memref<16x6xf32, #tpu.memory_space<vmem>>, vector<16x6xf32>
    tpu.vector_store %arg12[%c0_116, %c0_117], %161 {strides = array<i32>} : memref<16x6xf32, #tpu.memory_space<vmem>>, vector<16x6xf32>,
    return
  }
  func.func @transform_0(%arg0: i32) -> (i32, i32, i32) {
    %c0_i32 = arith.constant 0 : i32
    %c0_i32_0 = arith.constant 0 : i32
    %c0_i32_1 = arith.constant 0 : i32
    return %c0_i32, %arg0, %c0_i32_0 : i32, i32, i32
  }
  func.func @transform_1(%arg0: i32) -> (i32, i32) {
    %c0_i32 = arith.constant 0 : i32
    %c0_i32_0 = arith.constant 0 : i32
    %c0_i32_1 = arith.constant 0 : i32
    return %c0_i32, %c0_i32_0 : i32, i32
  }
  func.func @transform_2(%arg0: i32) -> (i32, i32) {
    %c0_i32 = arith.constant 0 : i32
    %c0_i32_0 = arith.constant 0 : i32
    %c0_i32_1 = arith.constant 0 : i32
    return %c0_i32, %c0_i32_0 : i32, i32
  }
  func.func @transform_3(%arg0: i32) -> (i32, i32) {
    %c0_i32 = arith.constant 0 : i32
    %c0_i32_0 = arith.constant 0 : i32
    %c0_i32_1 = arith.constant 0 : i32
    return %c0_i32, %c0_i32_0 : i32, i32
  }
  func.func @transform_4(%arg0: i32) -> (i32, i32) {
    %c0_i32 = arith.constant 0 : i32
    %c0_i32_0 = arith.constant 0 : i32
    %c0_i32_1 = arith.constant 0 : i32
    return %c0_i32, %c0_i32_0 : i32, i32
  }
  func.func @transform_5(%arg0: i32) -> (i32, i32) {
    %c0_i32 = arith.constant 0 : i32
    %c0_i32_0 = arith.constant 0 : i32
    %c0_i32_1 = arith.constant 0 : i32
    return %c0_i32, %c0_i32_0 : i32, i32
  }
  func.func @transform_6(%arg0: i32) -> (i32, i32) {
    %c0_i32 = arith.constant 0 : i32
    %c0_i32_0 = arith.constant 0 : i32
    %c0_i32_1 = arith.constant 0 : i32
    return %c0_i32, %c0_i32_0 : i32, i32
  }
  func.func @transform_7(%arg0: i32) -> (i32, i32) {
    %c0_i32 = arith.constant 0 : i32
    %c0_i32_0 = arith.constant 0 : i32
    %c0_i32_1 = arith.constant 0 : i32
    return %c0_i32, %c0_i32_0 : i32, i32
  }
  func.func @transform_8(%arg0: i32) -> (i32, i32) {
    %c0_i32 = arith.constant 0 : i32
    %c0_i32_0 = arith.constant 0 : i32
    %c0_i32_1 = arith.constant 0 : i32
    return %c0_i32, %c0_i32_0 : i32, i32
  }
  func.func @transform_9(%arg0: i32) -> (i32, i32) {
    %c0_i32 = arith.constant 0 : i32
    %c0_i32_0 = arith.constant 0 : i32
    %c0_i32_1 = arith.constant 0 : i32
    return %c0_i32, %c0_i32_0 : i32, i32
  }
  func.func @transform_10(%arg0: i32) -> (i32, i32) {
    %c0_i32 = arith.constant 0 : i32
    %c0_i32_0 = arith.constant 0 : i32
    %c0_i32_1 = arith.constant 0 : i32
    return %c0_i32, %c0_i32_0 : i32, i32
  }
  func.func @transform_11(%arg0: i32) -> (i32, i32) {
    %c0_i32 = arith.constant 0 : i32
    %c0_i32_0 = arith.constant 0 : i32
    return %arg0, %c0_i32 : i32, i32
  }
}

</mosaic_0001>

<bundles_post_ra>
// kernel: cnn_har_forward.1
= control target key start
LH: loop header
LB: loop body
LE: loop exit
PB: predicated region body
PF: predicated region fallthrough
CT: control target
= control target key end

     0   :  { %vm294_vm0 = vcmask 662528   ;;  %vm385_vm1 = vcmask 1040384   ;;  %v23038_v8 = vmov 0   ;;  %vm2812_vm2 = vcmask 261120   ;;  %s17096_s12 = smov 64   ;;  %s17097_s26 = smov 96   ;;  %s23026_s1 = inlined_call_operand.vmem [shape: bf16[81,32], index: 1, kind: input, shape index: {}]   ;;  %s23027_s0 = inlined_call_operand.vmem [shape: bf16[4,480,81], index: 0, kind: input, shape index: {}]   ;;  %s23028_s3 = inlined_call_operand.vmem [shape: bf16[288,64], index: 3, kind: input, shape index: {}]   ;;  %s23029_s2 = inlined_call_operand.vmem [shape: f32[1,32], index: 2, kind: input, shape index: {}]   ;;  %s23030_s5 = inlined_call_operand.vmem [shape: bf16[1664,1024], index: 5, kind: input, shape index: {}]   ;;  %s23031_s4 = inlined_call_operand.vmem [shape: f32[1,64], index: 4, kind: input, shape index: {}]   ;;  %s23032_s6 = inlined_call_operand.vmem [shape: f32[1,1024], index: 6, kind: input, shape index: {}]   ;;  %s23033_s7 = inlined_call_operand.vmem [shape: bf16[1024,512], index: 7, kind: input, shape index: {}]   ;;  %s23034_s9 = inlined_call_operand.vmem [shape: bf16[512,6], index: 9, kind: input, shape index: {}]   ;;  %s23035_s8 = inlined_call_operand.vmem [shape: f32[1,512], index: 8, kind: input, shape index: {}]   ;;  %s23036_s10 = inlined_call_operand.vmem [shape: f32[1,6], index: 10, kind: input, shape index: {}]   ;;  %s23037_s11 = inlined_call_operand.vmem [shape: f32[16,6], index: 11, kind: output, shape index: {}]  }
   0x1   :  { %v16509_v0 = vld [vmem:[%s23026_s1] sm:$0xff]   ;;  %v16510_v1 = vld [vmem:[%s23026_s1 + $0x8] sm:$0xff]   ;;  %v16511_v2 = vld [vmem:[%s23026_s1 + $0x10] sm:$0xff]   ;;  %v387_v9 = vsel %vm385_vm1, 65535, %v23038_v8  ;;  %s17098_s27 = smov 32   ;;  %vm2969_vm3 = vcmask 523520  }
   0x2   :  { %15961 = vmatprep.subr.bf16.mxu0 %v16509_v0  ;;  %16033 = vmatprep.subr.bf16.mxu1 %v16509_v0  ;;  %v16515_v3 = vld [vmem:[%s23027_s0] sm:$0xff]   ;;  %v16516_v4 = vld [vmem:[%s23027_s0 + $0xf0] sm:$0xff]   ;;  %v16512_v5 = vld [vmem:[%s23026_s1 + $0x18] sm:$0xff]   ;;  %vm3204_vm4 = vcmask 785920   ;;  %vm3414_vm5 = vcmask 1048320   ;;  %vm5455_vm6 = vcmask 523264  }
   0x3   :  { %15962 = vmatpush3.bf16.msra.mxu0 %v16509_v0  ;;  %16034 = vmatpush3.bf16.msra.mxu1 %v16509_v0  ;;  %v16514_v6 = vld [vmem:[%s23026_s1 + $0x28] ss:$0 sps:$4 sm:$0x11]   ;;  %v16513_v7 = vld [vmem:[%s23026_s1 + $0x20] sm:$0xff]   ;;  %v16518_v12 = vld [vmem:[%s23027_s0 + $0xf8] sm:$0xff]   ;;  %vm5461_vm7 = vcmask 1048064  }
   0x4   :  { %15963 = vmatprep.subr.bf16.mxu0 %v16510_v1  ;;  %16035 = vmatprep.subr.bf16.mxu1 %v16510_v1  ;;  %v389_v10 = vand.u32 %v16514_v6, %v387_v9  ;;  %v16517_v11 = vld [vmem:[%s23027_s0 + $0x8] sm:$0xff]   ;;  %v16519_v13 = vld [vmem:[%s23027_s0 + $0x10] sm:$0xff]   ;;  %v16520_v14 = vld [vmem:[%s23027_s0 + $0x100] sm:$0xff]   ;;  %vm14069_vm8 = vcmask 48128  }
   0x5   :  { %15973 = vmatprep.mubr.msk.bf16.mxu0 %vm294_vm0, %v16515_v3  ;;  %16045 = vmatprep.mubr.msk.bf16.mxu1 %vm294_vm0, %v16516_v4  ;;  %v16521_v15 = vld [vmem:[%s23027_s0 + $0x18] sm:$0xff]   ;;  %v16522_v16 = vld [vmem:[%s23027_s0 + $0x108] sm:$0xff]   ;;  %v16523_v17 = vld [vmem:[%s23027_s0 + $0x20] sm:$0xff]  }
   0x6   :  { %v16524_v18 = vld [vmem:[%s23027_s0 + $0x110] sm:$0xff]   ;;  %v16525_v19 = vld [vmem:[%s23027_s0 + $0x28] sm:$0xff]   ;;  %v16526_v20 = vld [vmem:[%s23027_s0 + $0x118] sm:$0xff]  }
   0x7   :  { %15964 = vmatpush3.bf16.msra.mxu0 %v16510_v1  ;;  %16036 = vmatpush3.bf16.msra.mxu1 %v16510_v1  ;;  %v16527_v21 = vld [vmem:[%s23027_s0 + $0x30] sm:$0xff]   ;;  %v16528_v22 = vld [vmem:[%s23027_s0 + $0x120] sm:$0xff]   ;;  %v16529_v23 = vld [vmem:[%s23027_s0 + $0x38] sm:$0xff]  }
   0x8   :  { %15965 = vmatprep.subr.bf16.mxu0 %v16511_v2  ;;  %16037 = vmatprep.subr.bf16.mxu1 %v16511_v2  ;;  %v16530_v24 = vld [vmem:[%s23027_s0 + $0x128] sm:$0xff]   ;;  %v16531_v25 = vld [vmem:[%s23027_s0 + $0x40] sm:$0xff]   ;;  %v16532_v26 = vld [vmem:[%s23027_s0 + $0x130] sm:$0xff]  }
   0x9   :  { %v16533_v27 = vld [vmem:[%s23027_s0 + $0x48] sm:$0xff]   ;;  %v16534_v28 = vld [vmem:[%s23027_s0 + $0x138] sm:$0xff]   ;;  %v16535_v29 = vld [vmem:[%s23027_s0 + $0x50] sm:$0xff]  }
   0xa   :  { %v16536_v30 = vld [vmem:[%s23027_s0 + $0x140] sm:$0xff]   ;;  %v16537_v31 = vld [vmem:[%s23027_s0 + $0x58] sm:$0xff]   ;;  %v16538_v32 = vld [vmem:[%s23027_s0 + $0x148] sm:$0xff]  }
   0xb   :  { %15966 = vmatpush3.bf16.msra.mxu0 %v16511_v2  ;;  %16038 = vmatpush3.bf16.msra.mxu1 %v16511_v2  ;;  %v16539_v33 = vld [vmem:[%s23027_s0 + $0x60] sm:$0xff]   ;;  %v16540_v34 = vld [vmem:[%s23027_s0 + $0x150] sm:$0xff]   ;;  %v16541_v35 = vld [vmem:[%s23027_s0 + $0x68] sm:$0xff]  }
   0xc   :  { %15967 = vmatprep.subr.bf16.mxu0 %v16512_v5  ;;  %16039 = vmatprep.subr.bf16.mxu1 %v16512_v5  ;;  %v16542_v36 = vld [vmem:[%s23027_s0 + $0x158] sm:$0xff]   ;;  %v16543_v37 = vld [vmem:[%s23027_s0 + $0x70] sm:$0xff]   ;;  %v16544_v38 = vld [vmem:[%s23027_s0 + $0x160] sm:$0xff]  }
   0xd   :  { %v16545_v39 = vld [vmem:[%s23027_s0 + $0x78] sm:$0xff]   ;;  %v16546_v40 = vld [vmem:[%s23027_s0 + $0x168] sm:$0xff]   ;;  %v16547_v41 = vld [vmem:[%s23027_s0 + $0x80] sm:$0xff]  }
   0xe   :  { %v16548_v42 = vld [vmem:[%s23027_s0 + $0x170] sm:$0xff]   ;;  %v16549_v43 = vld [vmem:[%s23027_s0 + $0x88] sm:$0xff]   ;;  %v16550_v44 = vld [vmem:[%s23027_s0 + $0x178] sm:$0xff]  }
   0xf   :  { %15968 = vmatpush3.bf16.msra.mxu0 %v16512_v5  ;;  %16040 = vmatpush3.bf16.msra.mxu1 %v16512_v5  ;;  %v16551_v45 = vld [vmem:[%s23027_s0 + $0x90] sm:$0xff]   ;;  %v16552_v46 = vld [vmem:[%s23027_s0 + $0x180] sm:$0xff]   ;;  %v16553_v47 = vld [vmem:[%s23027_s0 + $0x98] sm:$0xff]  }
  0x10   :  { %15969 = vmatprep.subr.bf16.mxu0 %v16513_v7  ;;  %16041 = vmatprep.subr.bf16.mxu1 %v16513_v7  ;;  %v16554_v48 = vld [vmem:[%s23027_s0 + $0x188] sm:$0xff]   ;;  %v16555_v49 = vld [vmem:[%s23027_s0 + $0xa0] sm:$0xff]   ;;  %v16556_v50 = vld [vmem:[%s23027_s0 + $0x190] sm:$0xff]  }
  0x11   :  { %v16557_v51 = vld [vmem:[%s23027_s0 + $0xa8] sm:$0xff]   ;;  %v16558_v52 = vld [vmem:[%s23027_s0 + $0x198] sm:$0xff]   ;;  %v16559_v53 = vld [vmem:[%s23027_s0 + $0xb0] sm:$0xff]  }
  0x12   :  { %v16560_v54 = vld [vmem:[%s23027_s0 + $0x1a0] sm:$0xff]   ;;  %v16561_v55 = vld [vmem:[%s23027_s0 + $0xb8] sm:$0xff]   ;;  %v16562_v56 = vld [vmem:[%s23027_s0 + $0x1a8] sm:$0xff]  }
  0x13   :  { %15970 = vmatpush3.bf16.msra.mxu0 %v16513_v7  ;;  %16042 = vmatpush3.bf16.msra.mxu1 %v16513_v7  ;;  %v16563_v57 = vld [vmem:[%s23027_s0 + $0xc0] sm:$0xff]   ;;  %v16564_v58 = vld [vmem:[%s23027_s0 + $0x1b0] sm:$0xff]   ;;  %v16565_v59 = vld [vmem:[%s23027_s0 + $0xc8] sm:$0xff]  }
  0x14   :  { %15971 = vmatprep.subr.bf16.mxu0 %v389_v10  ;;  %16043 = vmatprep.subr.bf16.mxu1 %v389_v10  ;;  %v16566_v60 = vld [vmem:[%s23027_s0 + $0x1b8] sm:$0xff]   ;;  %v16567_v61 = vld [vmem:[%s23027_s0 + $0xd0] sm:$0xff]   ;;  %v16568_v62 = vld [vmem:[%s23027_s0 + $0x1c0] sm:$0xff]  }
  0x15   :  { %v16569_v63 = vld [vmem:[%s23027_s0 + $0xd8] sm:$0xff]   ;;  %v16573_v3 = vld [vmem:[%s23027_s0 + $0xe8] sm:$0xff]   ;;  %v16576_v6 = vld [vmem:[%s23027_s0 + $0x2d0] sm:$0xff]  }
  0x16   :  { %v16574_v4 = vld [vmem:[%s23027_s0 + $0x1d8] sm:$0xff]   ;;  %v16577_v9 = vld [vmem:[%s23027_s0 + $0x1e8] sm:$0xff]  }
  0x17   :  { %15972 = vmatpush3.bf16.msra.mxu0 %v389_v10  ;;  %16044 = vmatpush3.bf16.msra.mxu1 %v389_v10 }
  0x18   :  { %16105 = vmatprep.subr.bf16.mxu0 %v16509_v0  ;;  %16177 = vmatprep.subr.bf16.mxu1 %v16509_v0 }
  0x1a   :  { %15974 = vmatmul.mubr.msk.bf16.vlgmr.msra.gmra.mrb[0].mxu0 %vm294_vm0, %v16517_v11  ;;  %16046 = vmatmul.mubr.msk.bf16.vlgmr.msra.gmra.mrb[0].mxu1 %vm294_vm0, %v16518_v12  ;;  %v16579_v11 = vld [vmem:[%s23027_s0 + $0x1f0] sm:$0xff]   ;;  %v16580_v12 = vld [vmem:[%s23027_s0 + $0x2e0] sm:$0xff]  }
  0x1b   :  { %16106 = vmatpush3.bf16.msra.mxu0 %v16509_v0  ;;  %16178 = vmatpush3.bf16.msra.mxu1 %v16509_v0  ;;  %v16570_v0 = vld [vmem:[%s23027_s0 + $0x1c8] sm:$0xff]  }
  0x1c   :  { %15977 = vmatprep.mubr.msk.bf16.mxu0 %vm294_vm0, %v16519_v13  ;;  %16049 = vmatprep.mubr.msk.bf16.mxu1 %vm294_vm0, %v16520_v14  ;;  %v16629_v13 = vld [vmem:[%s23028_s3 + $0x88] sm:$0xff]   ;;  %v16581_v14 = vld [vmem:[%s23027_s0 + $0x1f8] sm:$0xff]  }
  0x1d   :  { %16107 = vmatprep.subr.bf16.mxu0 %v16510_v1  ;;  %16179 = vmatprep.subr.bf16.mxu1 %v16510_v1 }
  0x1f   :  { %16108 = vmatpush3.bf16.msra.mxu0 %v16510_v1  ;;  %16180 = vmatpush3.bf16.msra.mxu1 %v16510_v1  ;;  %v16571_v1 = vld [vmem:[%s23027_s0 + $0xe0] sm:$0xff]  }
  0x20   :  { %16109 = vmatprep.subr.bf16.mxu0 %v16511_v2  ;;  %16181 = vmatprep.subr.bf16.mxu1 %v16511_v2 }
  0x22   :  { %15978 = vmatmul.mubr.msk.bf16.gmra.mrb[4].mxu0 %vm294_vm0, %v16521_v15  ;;  %16050 = vmatmul.mubr.msk.bf16.gmra.mrb[4].mxu1 %vm294_vm0, %v16522_v16  ;;  %v16582_v15 = vld [vmem:[%s23027_s0 + $0x2e8] sm:$0xff]   ;;  %v16583_v16 = vld [vmem:[%s23027_s0 + $0x200] sm:$0xff]  }
  0x23   :  { %15981 = vmatprep.mubr.msk.bf16.mxu0 %vm294_vm0, %v16523_v17  ;;  %16053 = vmatprep.mubr.msk.bf16.mxu1 %vm294_vm0, %v16524_v18  ;;  %v16584_v17 = vld [vmem:[%s23027_s0 + $0x2f0] sm:$0xff]   ;;  %v16585_v18 = vld [vmem:[%s23027_s0 + $0x208] sm:$0xff]  }
  0x24   :  { %16110 = vmatpush3.bf16.msra.mxu0 %v16511_v2  ;;  %16182 = vmatpush3.bf16.msra.mxu1 %v16511_v2  ;;  %v16572_v2 = vld [vmem:[%s23027_s0 + $0x1d0] sm:$0xff]  }
  0x25   :  { %16111 = vmatprep.subr.bf16.mxu0 %v16512_v5  ;;  %16183 = vmatprep.subr.bf16.mxu1 %v16512_v5 }
  0x28   :  { %16112 = vmatpush3.bf16.msra.mxu0 %v16512_v5  ;;  %16184 = vmatpush3.bf16.msra.mxu1 %v16512_v5  ;;  %v16575_v5 = vld [vmem:[%s23027_s0 + $0x1e0] sm:$0xff]  }
  0x29   :  { %16113 = vmatprep.subr.bf16.mxu0 %v16513_v7  ;;  %16185 = vmatprep.subr.bf16.mxu1 %v16513_v7 }
  0x2a   :  { %15982 = vmatmul.mubr.msk.bf16.gmra.mrb[8].mxu0 %vm294_vm0, %v16525_v19  ;;  %16054 = vmatmul.mubr.msk.bf16.gmra.mrb[8].mxu1 %vm294_vm0, %v16526_v20  ;;  %v16586_v19 = vld [vmem:[%s23027_s0 + $0x2f8] sm:$0xff]   ;;  %v16587_v20 = vld [vmem:[%s23027_s0 + $0x210] sm:$0xff]  }
  0x2b   :  { %15985 = vmatprep.mubr.msk.bf16.mxu0 %vm294_vm0, %v16527_v21  ;;  %16057 = vmatprep.mubr.msk.bf16.mxu1 %vm294_vm0, %v16528_v22  ;;  %v16588_v21 = vld [vmem:[%s23027_s0 + $0x300] sm:$0xff]   ;;  %v16589_v22 = vld [vmem:[%s23027_s0 + $0x218] sm:$0xff]  }
  0x2c   :  { %16114 = vmatpush3.bf16.msra.mxu0 %v16513_v7  ;;  %16186 = vmatpush3.bf16.msra.mxu1 %v16513_v7  ;;  %v16627_v7 = vld [vmem:[%s23028_s3 + $0x80] sm:$0xff]  }
  0x2d   :  { %16115 = vmatprep.subr.bf16.mxu0 %v389_v10  ;;  %16187 = vmatprep.subr.bf16.mxu1 %v389_v10 }
  0x30   :  { %16116 = vmatpush3.bf16.msra.mxu0 %v389_v10  ;;  %16188 = vmatpush3.bf16.msra.mxu1 %v389_v10  ;;  %v16578_v10 = vld [vmem:[%s23027_s0 + $0x2d8] sm:$0xff]  }
  0x31   :  { %4146 = vmatprep.subr.bf16.mxu0 %v23038_v8  ;;  %16249 = vmatprep.subr.bf16.mxu1 %v16627_v7 }
  0x32   :  { %15986 = vmatmul.mubr.msk.bf16.gmra.mrb[12].mxu0 %vm294_vm0, %v16529_v23  ;;  %16058 = vmatmul.mubr.msk.bf16.gmra.mrb[12].mxu1 %vm294_vm0, %v16530_v24  ;;  %v16590_v23 = vld [vmem:[%s23027_s0 + $0x308] sm:$0xff]   ;;  %v16591_v24 = vld [vmem:[%s23027_s0 + $0x220] sm:$0xff]  }
  0x33   :  { %15989 = vmatprep.mubr.msk.bf16.mxu0 %vm294_vm0, %v16531_v25  ;;  %16061 = vmatprep.mubr.msk.bf16.mxu1 %vm294_vm0, %v16532_v26  ;;  %v16592_v25 = vld [vmem:[%s23027_s0 + $0x310] sm:$0xff]   ;;  %v16593_v26 = vld [vmem:[%s23027_s0 + $0x228] sm:$0xff]  }
  0x3a   :  { %15990 = vmatmul.mubr.msk.bf16.gmra.mrb[16].mxu0 %vm294_vm0, %v16533_v27  ;;  %16062 = vmatmul.mubr.msk.bf16.gmra.mrb[16].mxu1 %vm294_vm0, %v16534_v28  ;;  %v16594_v27 = vld [vmem:[%s23027_s0 + $0x318] sm:$0xff]   ;;  %v16595_v28 = vld [vmem:[%s23027_s0 + $0x230] sm:$0xff]  }
  0x3b   :  { %15993 = vmatprep.mubr.msk.bf16.mxu0 %vm294_vm0, %v16535_v29  ;;  %16065 = vmatprep.mubr.msk.bf16.mxu1 %vm294_vm0, %v16536_v30  ;;  %v16596_v29 = vld [vmem:[%s23027_s0 + $0x320] sm:$0xff]   ;;  %v16597_v30 = vld [vmem:[%s23027_s0 + $0x238] sm:$0xff]  }
  0x42   :  { %15994 = vmatmul.mubr.msk.bf16.gmra.mrb[20].mxu0 %vm294_vm0, %v16537_v31  ;;  %16066 = vmatmul.mubr.msk.bf16.gmra.mrb[20].mxu1 %vm294_vm0, %v16538_v32  ;;  %v16598_v31 = vld [vmem:[%s23027_s0 + $0x328] sm:$0xff]   ;;  %v16599_v32 = vld [vmem:[%s23027_s0 + $0x330] sm:$0xff]  }
  0x43   :  { %15997 = vmatprep.mubr.msk.bf16.mxu0 %vm294_vm0, %v16539_v33  ;;  %16069 = vmatprep.mubr.msk.bf16.mxu1 %vm294_vm0, %v16540_v34  ;;  %v16601_v33 = vld [vmem:[%s23027_s0 + $0x240] sm:$0xff]   ;;  %v16600_v34 = vld [vmem:[%s23027_s0 + $0x338] sm:$0xff]  }
  0x4a   :  { %15998 = vmatmul.mubr.msk.bf16.gmra.mrb[24].mxu0 %vm294_vm0, %v16541_v35  ;;  %16070 = vmatmul.mubr.msk.bf16.gmra.mrb[24].mxu1 %vm294_vm0, %v16542_v36  ;;  %v16602_v35 = vld [vmem:[%s23027_s0 + $0x248] sm:$0xff]   ;;  %v16603_v36 = vld [vmem:[%s23027_s0 + $0x340] sm:$0xff]  }
  0x4b   :  { %16001 = vmatprep.mubr.msk.bf16.mxu0 %vm294_vm0, %v16543_v37  ;;  %16073 = vmatprep.mubr.msk.bf16.mxu1 %vm294_vm0, %v16544_v38  ;;  %v16605_v37 = vld [vmem:[%s23027_s0 + $0x250] sm:$0xff]   ;;  %v16604_v38 = vld [vmem:[%s23027_s0 + $0x348] sm:$0xff]  }
  0x52   :  { %16002 = vmatmul.mubr.msk.bf16.gmra.mrb[28].mxu0 %vm294_vm0, %v16545_v39  ;;  %16074 = vmatmul.mubr.msk.bf16.gmra.mrb[28].mxu1 %vm294_vm0, %v16546_v40  ;;  %v16607_v39 = vld [vmem:[%s23027_s0 + $0x258] sm:$0xff]   ;;  %v16606_v40 = vld [vmem:[%s23027_s0 + $0x350] sm:$0xff]  }
  0x53   :  { %16005 = vmatprep.mubr.msk.bf16.mxu0 %vm294_vm0, %v16547_v41  ;;  %16077 = vmatprep.mubr.msk.bf16.mxu1 %vm294_vm0, %v16548_v42  ;;  %v16611_v41 = vld [vmem:[%s23027_s0 + $0x260] sm:$0xff]   ;;  %v16608_v42 = vld [vmem:[%s23027_s0 + $0x358] sm:$0xff]  }
  0x5a   :  { %16006 = vmatmul.mubr.msk.bf16.gmra.mrb[32].mxu0 %vm294_vm0, %v16549_v43  ;;  %16078 = vmatmul.mubr.msk.bf16.gmra.mrb[32].mxu1 %vm294_vm0, %v16550_v44  ;;  %v16612_v43 = vld [vmem:[%s23027_s0 + $0x268] sm:$0xff]   ;;  %v16609_v44 = vld [vmem:[%s23027_s0 + $0x360] sm:$0xff]  }
  0x5b   :  { %16009 = vmatprep.mubr.msk.bf16.mxu0 %vm294_vm0, %v16551_v45  ;;  %16081 = vmatprep.mubr.msk.bf16.mxu1 %vm294_vm0, %v16552_v46  ;;  %v16615_v45 = vld [vmem:[%s23027_s0 + $0x270] sm:$0xff]   ;;  %v16610_v46 = vld [vmem:[%s23027_s0 + $0x368] sm:$0xff]  }
  0x62   :  { %16010 = vmatmul.mubr.msk.bf16.gmra.mrb[36].mxu0 %vm294_vm0, %v16553_v47  ;;  %16082 = vmatmul.mubr.msk.bf16.gmra.mrb[36].mxu1 %vm294_vm0, %v16554_v48  ;;  %v16617_v47 = vld [vmem:[%s23027_s0 + $0x278] sm:$0xff]   ;;  %v16613_v48 = vld [vmem:[%s23027_s0 + $0x370] sm:$0xff]  }
  0x63   :  { %16013 = vmatprep.mubr.msk.bf16.mxu0 %vm294_vm0, %v16555_v49  ;;  %16085 = vmatprep.mubr.msk.bf16.mxu1 %vm294_vm0, %v16556_v50  ;;  %v16621_v49 = vld [vmem:[%s23027_s0 + $0x280] sm:$0xff]   ;;  %v16614_v50 = vld [vmem:[%s23027_s0 + $0x378] sm:$0xff]  }
  0x6a   :  { %16014 = vmatmul.mubr.msk.bf16.gmra.mrb[40].mxu0 %vm294_vm0, %v16557_v51  ;;  %16086 = vmatmul.mubr.msk.bf16.gmra.mrb[40].mxu1 %vm294_vm0, %v16558_v52  ;;  %v16623_v51 = vld [vmem:[%s23027_s0 + $0x288] sm:$0xff]   ;;  %v16616_v52 = vld [vmem:[%s23027_s0 + $0x380] sm:$0xff]  }
  0x6b   :  { %16017 = vmatprep.mubr.msk.bf16.mxu0 %vm294_vm0, %v16559_v53  ;;  %16089 = vmatprep.mubr.msk.bf16.mxu1 %vm294_vm0, %v16560_v54  ;;  %v16628_v53 = vld [vmem:[%s23027_s0 + $0x290] sm:$0xff]   ;;  %v16618_v54 = vld [vmem:[%s23027_s0 + $0x388] sm:$0xff]  }
  0x72   :  { %16018 = vmatmul.mubr.msk.bf16.gmra.mrb[44].mxu0 %vm294_vm0, %v16561_v55  ;;  %16090 = vmatmul.mubr.msk.bf16.gmra.mrb[44].mxu1 %vm294_vm0, %v16562_v56  ;;  %v16630_v55 = vld [vmem:[%s23027_s0 + $0x298] sm:$0xff]   ;;  %v16619_v56 = vld [vmem:[%s23027_s0 + $0x390] sm:$0xff]  }
  0x73   :  { %16021 = vmatprep.mubr.msk.bf16.mxu0 %vm294_vm0, %v16563_v57  ;;  %16093 = vmatprep.mubr.msk.bf16.mxu1 %vm294_vm0, %v16564_v58  ;;  %v16631_v57 = vld [vmem:[%s23027_s0 + $0x2a0] sm:$0xff]  }
  0x7a   :  { %16022 = vmatmul.mubr.msk.bf16.gmra.mrb[48].mxu0 %vm294_vm0, %v16565_v59  ;;  %16094 = vmatmul.mubr.msk.bf16.gmra.mrb[48].mxu1 %vm294_vm0, %v16566_v60  ;;  %v17629_v59 = vld [vmem:[%s23029_s2] ss:$0 sm:$0xff] }
  0x7b   :  { %16025 = vmatprep.mubr.msk.bf16.mxu0 %vm294_vm0, %v16567_v61  ;;  %16097 = vmatprep.mubr.msk.bf16.mxu1 %vm294_vm0, %v16568_v62 }
  0x82   :  { %16026 = vmatmul.mubr.msk.bf16.gmra.mrb[52].mxu0 %vm294_vm0, %v16569_v63  ;;  %16098 = vmatmul.mubr.msk.bf16.gmra.mrb[52].mxu1 %vm294_vm0, %v16570_v0  ;;  %v16620_v0 = vld [vmem:[%s23027_s0 + $0x398] sm:$0xff]  }
  0x83   :  { %16029 = vmatprep.mubr.msk.bf16.mxu0 %vm294_vm0, %v16571_v1  ;;  %16101 = vmatprep.mubr.msk.bf16.mxu1 %vm294_vm0, %v16572_v2  ;;  %v16632_v1 = vld [vmem:[%s23027_s0 + $0x2a8] sm:$0xff]  }
  0x8a   :  { %16030 = vmatmul.mubr.msk.bf16.gmra.mrb[56].mxu0 %vm294_vm0, %v16573_v3  ;;  %16102 = vmatmul.mubr.msk.bf16.gmra.mrb[56].mxu1 %vm294_vm0, %v16574_v4 }
  0x8b   :  { %16117 = vmatprep.mubr.msk.bf16.mxu0 %vm294_vm0, %v16575_v5  ;;  %16189 = vmatprep.mubr.msk.bf16.mxu1 %vm294_vm0, %v16576_v6  ;;  %v16622_v5 = vld [vmem:[%s23027_s0 + $0x3a0] sm:$0xff]   ;;  %v16633_v6 = vld [vmem:[%s23027_s0 + $0x2b0] sm:$0xff]  }
  0x92   :  { %16118 = vmatmul.mubr.msk.bf16.vlgmr.msra.gmra.mrb[60].mxu0 %vm294_vm0, %v16577_v9  ;;  %16190 = vmatmul.mubr.msk.bf16.vlgmr.msra.gmra.mrb[60].mxu1 %vm294_vm0, %v16578_v10 }
  0x93   :  { %16121 = vmatprep.mubr.msk.bf16.mxu0 %vm294_vm0, %v16579_v11  ;;  %16193 = vmatprep.mubr.msk.bf16.mxu1 %vm294_vm0, %v16580_v12 }
  0x94   :  { %16250 = vmatpush3.bf16.msra.mxu1 %v16627_v7 }
  0x95   :  { %16251 = vmatprep.subr.bf16.mxu1 %v16629_v13 }
  0x98   :  { %16252 = vmatpush3.bf16.msra.mxu1 %v16629_v13 }
  0x99   :  { %4784 = vmatprep.subr.bf16.mxu1 %v23038_v8 }
  0x9a   :  { %16122 = vmatmul.mubr.msk.bf16.gmra.mrb[64].mxu0 %vm294_vm0, %v16581_v14  ;;  %16194 = vmatmul.mubr.msk.bf16.gmra.mrb[64].mxu1 %vm294_vm0, %v16582_v15 }
  0x9b   :  { %16125 = vmatprep.mubr.msk.bf16.mxu0 %vm294_vm0, %v16583_v16  ;;  %16197 = vmatprep.mubr.msk.bf16.mxu1 %vm294_vm0, %v16584_v17 }
  0xa2   :  { %16126 = vmatmul.mubr.msk.bf16.gmra.mrb[68].mxu0 %vm294_vm0, %v16585_v18  ;;  %16198 = vmatmul.mubr.msk.bf16.gmra.mrb[68].mxu1 %vm294_vm0, %v16586_v19 }
  0xa3   :  { %16129 = vmatprep.mubr.msk.bf16.mxu0 %vm294_vm0, %v16587_v20  ;;  %16201 = vmatprep.mubr.msk.bf16.mxu1 %vm294_vm0, %v16588_v21 }
  0xaa   :  { %16130 = vmatmul.mubr.msk.bf16.gmra.mrb[72].mxu0 %vm294_vm0, %v16589_v22  ;;  %16202 = vmatmul.mubr.msk.bf16.gmra.mrb[72].mxu1 %vm294_vm0, %v16590_v23 }
  0xab   :  { %16133 = vmatprep.mubr.msk.bf16.mxu0 %vm294_vm0, %v16591_v24  ;;  %16205 = vmatprep.mubr.msk.bf16.mxu1 %vm294_vm0, %v16592_v25 }
  0xb2   :  { %16134 = vmatmul.mubr.msk.bf16.gmra.mrb[76].mxu0 %vm294_vm0, %v16593_v26  ;;  %16206 = vmatmul.mubr.msk.bf16.gmra.mrb[76].mxu1 %vm294_vm0, %v16594_v27  ;;  %v16624_v26 = vld [vmem:[%s23027_s0 + $0x3a8] sm:$0xff]   ;;  %v16634_v27 = vld [vmem:[%s23027_s0 + $0x2b8] sm:$0xff]  }
  0xb3   :  { %16137 = vmatprep.mubr.msk.bf16.mxu0 %vm294_vm0, %v16595_v28  ;;  %16209 = vmatprep.mubr.msk.bf16.mxu1 %vm294_vm0, %v16596_v29 }
  0xba   :  { %16138 = vmatmul.mubr.msk.bf16.gmra.mrb[80].mxu0 %vm294_vm0, %v16597_v30  ;;  %16210 = vmatmul.mubr.msk.bf16.gmra.mrb[80].mxu1 %vm294_vm0, %v16598_v31  ;;  %v16625_v31 = vld [vmem:[%s23027_s0 + $0x3b0] sm:$0xff]  }
  0xbb   :  { %16213 = vmatprep.mubr.msk.bf16.mxu1 %vm294_vm0, %v16599_v32  ;;  %16141 = vmatprep.mubr.msk.bf16.mxu0 %vm294_vm0, %v16601_v33  ;;  %v16635_v32 = vld [vmem:[%s23027_s0 + $0x2c0] sm:$0xff]  }
  0xc2   :  { %16214 = vmatmul.mubr.msk.bf16.gmra.mrb[84].mxu1 %vm294_vm0, %v16600_v34  ;;  %16142 = vmatmul.mubr.msk.bf16.gmra.mrb[84].mxu0 %vm294_vm0, %v16602_v35 }
  0xc3   :  { %16217 = vmatprep.mubr.msk.bf16.mxu1 %vm294_vm0, %v16603_v36  ;;  %16145 = vmatprep.mubr.msk.bf16.mxu0 %vm294_vm0, %v16605_v37 }
  0xca   :  { %16218 = vmatmul.mubr.msk.bf16.gmra.mrb[88].mxu1 %vm294_vm0, %v16604_v38  ;;  %16146 = vmatmul.mubr.msk.bf16.gmra.mrb[88].mxu0 %vm294_vm0, %v16607_v39 }
  0xcb   :  { %16221 = vmatprep.mubr.msk.bf16.mxu1 %vm294_vm0, %v16606_v40  ;;  %16149 = vmatprep.mubr.msk.bf16.mxu0 %vm294_vm0, %v16611_v41 }
  0xd2   :  { %16222 = vmatmul.mubr.msk.bf16.gmra.mrb[92].mxu1 %vm294_vm0, %v16608_v42  ;;  %16150 = vmatmul.mubr.msk.bf16.gmra.mrb[92].mxu0 %vm294_vm0, %v16612_v43 }
  0xd3   :  { %16225 = vmatprep.mubr.msk.bf16.mxu1 %vm294_vm0, %v16609_v44  ;;  %16153 = vmatprep.mubr.msk.bf16.mxu0 %vm294_vm0, %v16615_v45 }
  0xda   :  { %16226 = vmatmul.mubr.msk.bf16.gmra.mrb[96].mxu1 %vm294_vm0, %v16610_v46  ;;  %16154 = vmatmul.mubr.msk.bf16.gmra.mrb[96].mxu0 %vm294_vm0, %v16617_v47 }
  0xdb   :  { %16229 = vmatprep.mubr.msk.bf16.mxu1 %vm294_vm0, %v16613_v48  ;;  %16157 = vmatprep.mubr.msk.bf16.mxu0 %vm294_vm0, %v16621_v49 }
  0xe2   :  { %16230 = vmatmul.mubr.msk.bf16.gmra.mrb[100].mxu1 %vm294_vm0, %v16614_v50  ;;  %16158 = vmatmul.mubr.msk.bf16.gmra.mrb[100].mxu0 %vm294_vm0, %v16623_v51 }
  0xe3   :  { %16233 = vmatprep.mubr.msk.bf16.mxu1 %vm294_vm0, %v16616_v52  ;;  %16161 = vmatprep.mubr.msk.bf16.mxu0 %vm294_vm0, %v16628_v53  ;;  %v16626_v52 = vld [vmem:[%s23027_s0 + $0x3b8] sm:$0xff]   ;;  %v16636_v53 = vld [vmem:[%s23027_s0 + $0x2c8] sm:$0xff]  }
  0xea   :  { %16234 = vmatmul.mubr.msk.bf16.gmra.mrb[104].mxu1 %vm294_vm0, %v16618_v54  ;;  %16162 = vmatmul.mubr.msk.bf16.gmra.mrb[104].mxu0 %vm294_vm0, %v16630_v55 }
  0xeb   :  { %16237 = vmatprep.mubr.msk.bf16.mxu1 %vm294_vm0, %v16619_v56  ;;  %16165 = vmatprep.mubr.msk.bf16.mxu0 %vm294_vm0, %v16631_v57 }
  0xed   :  { %v15975_v58 = vpop.f32.mrb[0].mxu0  ;;  %v16047_v60 = vpop.f32.mrb[0].mxu1 }
  0xee   :  { %v1240_v61 = vmax.f32 %v15975_v58, %v16047_v60  ;;  %v425_v62 = vpop.f32.mrb[1].mxu0  ;;  %v999_v63 = vpop.f32.mrb[1].mxu1 }
  0xef   :  { %v1238_v2 = vmax.f32 %v425_v62, %v999_v63  ;;  %v15976_v3 = vpop.f32.mrb[2].mxu0  ;;  %v16048_v4 = vpop.f32.mrb[2].mxu1 }
  0xf0   :  { %v1306_v7 = vadd.f32 %v17629_v59, %v1240_v61  ;;  %v1241_v9 = vmax.f32 %v15976_v3, %v16048_v4  ;;  %v428_v10 = vpop.f32.mrb[3].mxu0  ;;  %v1002_v11 = vpop.f32.mrb[3].mxu1 }
  0xf1   :  { %v1304_v12 = vadd.f32 %v17629_v59, %v1238_v2  ;;  %v1239_v13 = vmax.f32 %v428_v10, %v1002_v11 }
  0xf2   :  { %v1307_v14 = vadd.f32 %v17629_v59, %v1241_v9  ;;  %16238 = vmatmul.mubr.msk.bf16.gmra.mrb[108].mxu1 %vm294_vm0, %v16620_v0  ;;  %16166 = vmatmul.mubr.msk.bf16.gmra.mrb[108].mxu0 %vm294_vm0, %v16632_v1  ;;  %v1366_v16 = vmax.f32 %v1306_v7, 0.0 }
  0xf3   :  { %v1305_v15 = vadd.f32 %v17629_v59, %v1239_v13  ;;  %16241 = vmatprep.mubr.msk.bf16.mxu1 %vm294_vm0, %v16622_v5  ;;  %16169 = vmatprep.mubr.msk.bf16.mxu0 %vm294_vm0, %v16633_v6  ;;  %v1364_v18 = vmax.f32 %v1304_v12, 0.0 }
  0xf4   :  { %v1367_v17 = vmax.f32 %v1307_v14, 0.0 }
  0xf5   :  { %v1365_v19 = vmax.f32 %v1305_v15, 0.0  ;;  %v15979_v20 = vpop.f32.mrb[4].mxu0  ;;  %v16051_v21 = vpop.f32.mrb[4].mxu1 }
  0xf6   :  { %v1244_v22 = vmax.f32 %v15979_v20, %v16051_v21  ;;  %v441_v23 = vpop.f32.mrb[5].mxu0  ;;  %v1015_v24 = vpop.f32.mrb[5].mxu1  ;;  %v17651_v25 = vpack.c.bf16 %v1367_v17, %v1366_v16 }
  0xf7   :  { %v1242_v28 = vmax.f32 %v441_v23, %v1015_v24  ;;  %v15980_v29 = vpop.f32.mrb[6].mxu0  ;;  %v16052_v30 = vpop.f32.mrb[6].mxu1  ;;  %v1424_v33 = vpack.c.bf16 %v1365_v19, %v1364_v18  ;;  %v16637_v24 = vld [vmem:[%s23028_s3] sm:$0xff]  }
  0xf8   :  { %v1310_v34 = vadd.f32 %v17629_v59, %v1244_v22  ;;  %v1245_v35 = vmax.f32 %v15980_v29, %v16052_v30  ;;  %v1018_v36 = vpop.f32.mrb[7].mxu1  ;;  %3126 = vrot.lane.b32.xlu1 %v17651_v25, %s17096_s12  ;;  %v444_v37 = vpop.f32.mrb[7].mxu0  ;;  %2814 = vst.msk [vmem:[#allocation2 + $0x18] sm:$0xff] %vm2812_vm2, %v17651_v25  ;;  %4147 = vmatpush1.bf16.msra.mxu0 %v16637_v24 }
  0xf9   :  { %v1308_v38 = vadd.f32 %v17629_v59, %v1242_v28  ;;  %v1243_v39 = vmax.f32 %v444_v37, %v1018_v36  ;;  %2813 = vst.msk [vmem:[#allocation2] sm:$0xff] %vm2812_vm2, %v1424_v33  ;;  %4148 = vmatprep.subr.bf16.mxu0 %v23038_v8 }
  0xfa   :  { %v1311_v40 = vadd.f32 %v17629_v59, %v1245_v35  ;;  %16242 = vmatmul.mubr.msk.bf16.gmra.mrb[112].mxu1 %vm294_vm0, %v16624_v26  ;;  %16170 = vmatmul.mubr.msk.bf16.gmra.mrb[112].mxu0 %vm294_vm0, %v16634_v27  ;;  %v1370_v42 = vmax.f32 %v1310_v34, 0.0 }
  0xfb   :  { %v1309_v41 = vadd.f32 %v17629_v59, %v1243_v39  ;;  %16245 = vmatprep.mubr.msk.bf16.mxu1 %vm294_vm0, %v16625_v31  ;;  %16173 = vmatprep.mubr.msk.bf16.mxu0 %vm294_vm0, %v16635_v32  ;;  %v1368_v44 = vmax.f32 %v1308_v38, 0.0 }
  0xfc   :  { %v1371_v43 = vmax.f32 %v1311_v40, 0.0 }
  0xfd   :  { %v1369_v45 = vmax.f32 %v1309_v41, 0.0  ;;  %v15983_v46 = vpop.f32.mrb[8].mxu0  ;;  %v16055_v47 = vpop.f32.mrb[8].mxu1 }
  0xfe   :  { %v17678_v48 = vpack.c.bf16 %v1371_v43, %v1370_v42  ;;  %v1248_v49 = vmax.f32 %v15983_v46, %v16055_v47  ;;  %v457_v50 = vpop.f32.mrb[9].mxu0  ;;  %v1031_v51 = vpop.f32.mrb[9].mxu1 }
  0xff   :  { %v17686_v54 = vpack.c.bf16 %v1369_v45, %v1368_v44  ;;  %v1246_v55 = vmax.f32 %v457_v50, %v1031_v51  ;;  %v15984_v56 = vpop.f32.mrb[10].mxu0  ;;  %v16056_v57 = vpop.f32.mrb[10].mxu1  ;;  %v16638_v51 = vld [vmem:[%s23028_s3 + $0x8] sm:$0xff]  }
 0x100   :  { %v1314_v58 = vadd.f32 %v17629_v59, %v1248_v49  ;;  %v1249_v60 = vmax.f32 %v15984_v56, %v16056_v57  ;;  %2816 = vst.msk [vmem:[#allocation2 + $0x48] sm:$0xff] %vm2812_vm2, %v17678_v48  ;;  %3547 = vst.msk [vmem:[#allocation2 + $0x20] sm:$0xff] %vm2812_vm2, %v17678_v48  ;;  %v1034_v61 = vpop.f32.mrb[11].mxu1  ;;  %3130 = vrot.lane.b32.xlu1 %v17678_v48, %s17096_s12  ;;  %v460_v62 = vpop.f32.mrb[11].mxu0  ;;  %4149 = vmatpush1.bf16.msra.mxu0 %v16638_v51 }
 0x101   :  { %v1312_v63 = vadd.f32 %v17629_v59, %v1246_v55  ;;  %2815 = vst.msk [vmem:[#allocation2 + $0x30] sm:$0xff] %vm2812_vm2, %v17686_v54  ;;  %3546 = vst.msk [vmem:[#allocation2 + $0x8] sm:$0xff] %vm2812_vm2, %v17686_v54  ;;  %v1247_v0 = vmax.f32 %v460_v62, %v1034_v61  ;;  %v16639_v55 = vld [vmem:[%s23028_s3 + $0x10] sm:$0xff]   ;;  %4150 = vmatprep.subr.bf16.mxu0 %v23038_v8 }
 0x102   :  { %v1315_v1 = vadd.f32 %v17629_v59, %v1249_v60  ;;  %16246 = vmatmul.mubr.msk.bf16.gmra.mrb[116].mxu1 %vm294_vm0, %v16626_v52  ;;  %16174 = vmatmul.mubr.msk.bf16.gmra.mrb[116].mxu0 %vm294_vm0, %v16636_v53  ;;  %v1374_v3 = vmax.f32 %v1314_v58, 0.0 }
 0x103   :  { %v1313_v2 = vadd.f32 %v17629_v59, %v1247_v0  ;;  %v1372_v5 = vmax.f32 %v1312_v63, 0.0 }
 0x104   :  { %v1375_v4 = vmax.f32 %v1315_v1, 0.0  ;;  %4151 = vmatpush1.bf16.msra.mxu0 %v16639_v55 }
 0x105   :  { %v1373_v6 = vmax.f32 %v1313_v2, 0.0  ;;  %v15987_v7 = vpop.f32.mrb[12].mxu0  ;;  %v16059_v9 = vpop.f32.mrb[12].mxu1  ;;  %4152 = vmatprep.subr.bf16.mxu0 %v23038_v8 }
 0x106   :  { %v17704_v10 = vpack.c.bf16 %v1375_v4, %v1374_v3  ;;  %v1252_v11 = vmax.f32 %v15987_v7, %v16059_v9  ;;  %v473_v12 = vpop.f32.mrb[13].mxu0  ;;  %v1047_v13 = vpop.f32.mrb[13].mxu1 }
 0x107   :  { %v17706_v14 = vpack.c.bf16 %v1373_v6, %v1372_v5  ;;  %v1250_v15 = vmax.f32 %v473_v12, %v1047_v13  ;;  %v15988_v16 = vpop.f32.mrb[14].mxu0  ;;  %v16060_v17 = vpop.f32.mrb[14].mxu1 }
 0x108   :  { %3795 = vst.msk [vmem:[#allocation2 + $0x28] sm:$0xff] %vm2812_vm2, %v17704_v10  ;;  %2818 = vst.msk [vmem:[#allocation2 + $0x78] sm:$0xff] %vm2812_vm2, %v17704_v10  ;;  %v1318_v18 = vadd.f32 %v17629_v59, %v1252_v11  ;;  %v1253_v19 = vmax.f32 %v15988_v16, %v16060_v17  ;;  %v476_v20 = vpop.f32.mrb[15].mxu0  ;;  %v1050_v21 = vpop.f32.mrb[15].mxu1 }
 0x109   :  { %3549 = vst.msk [vmem:[#allocation2 + $0x50] sm:$0xff] %vm2812_vm2, %v17704_v10  ;;  %3794 = vst.msk [vmem:[#allocation2 + $0x10] sm:$0xff] %vm2812_vm2, %v17706_v14  ;;  %v1316_v22 = vadd.f32 %v17629_v59, %v1250_v15  ;;  %v1251_v23 = vmax.f32 %v476_v20, %v1050_v21 }
 0x10a   :  { %2817 = vst.msk [vmem:[#allocation2 + $0x60] sm:$0xff] %vm2812_vm2, %v17706_v14  ;;  %3548 = vst.msk [vmem:[#allocation2 + $0x38] sm:$0xff] %vm2812_vm2, %v17706_v14  ;;  %v1319_v26 = vadd.f32 %v17629_v59, %v1253_v19  ;;  %v1378_v28 = vmax.f32 %v1318_v18, 0.0  ;;  %v16640_v18 = vld [vmem:[%s23028_s3 + $0x18] sm:$0xff]  }
 0x10b   :  { %v1317_v27 = vadd.f32 %v17629_v59, %v1251_v23  ;;  %v1376_v30 = vmax.f32 %v1316_v22, 0.0  ;;  %4153 = vmatpush1.bf16.msra.mxu0 %v16640_v18 }
 0x10c   :  { %v1379_v29 = vmax.f32 %v1319_v26, 0.0  ;;  %4154 = vmatprep.subr.bf16.mxu0 %v23038_v8 }
 0x10d   :  { %v1377_v31 = vmax.f32 %v1317_v27, 0.0  ;;  %v15991_v32 = vpop.f32.mrb[16].mxu0  ;;  %v16063_v33 = vpop.f32.mrb[16].mxu1 }
 0x10e   :  { %v17728_v34 = vpack.c.bf16 %v1379_v29, %v1378_v28  ;;  %v1256_v35 = vmax.f32 %v15991_v32, %v16063_v33  ;;  %v489_v36 = vpop.f32.mrb[17].mxu0  ;;  %v1063_v37 = vpop.f32.mrb[17].mxu1 }
 0x10f   :  { %v17730_v38 = vpack.c.bf16 %v1377_v31, %v1376_v30  ;;  %v1254_v39 = vmax.f32 %v489_v36, %v1063_v37  ;;  %v15992_v40 = vpop.f32.mrb[18].mxu0  ;;  %v16064_v41 = vpop.f32.mrb[18].mxu1  ;;  %v3851_v50 = vld [vmem:[#allocation2 + $0x28] sm:$0xff] }
 0x110   :  { %3797 = vst.msk [vmem:[#allocation2 + $0x58] sm:$0xff] %vm2812_vm2, %v17728_v34  ;;  %2820 = vst.msk [vmem:[#allocation2 + $0xa8] sm:$0xff] %vm2812_vm2, %v17728_v34  ;;  %v1322_v42 = vadd.f32 %v17629_v59, %v1256_v35  ;;  %v1257_v43 = vmax.f32 %v15992_v40, %v16064_v41  ;;  %v492_v44 = vpop.f32.mrb[19].mxu0  ;;  %v1066_v45 = vpop.f32.mrb[19].mxu1  ;;  %v3848_v46 = vld [vmem:[#allocation2 + $0x10] sm:$0xff] }
 0x111   :  { %3551 = vst.msk [vmem:[#allocation2 + $0x80] sm:$0xff] %vm2812_vm2, %v17728_v34  ;;  %3796 = vst.msk [vmem:[#allocation2 + $0x40] sm:$0xff] %vm2812_vm2, %v17730_v38  ;;  %v1320_v47 = vadd.f32 %v17629_v59, %v1254_v39  ;;  %v1255_v49 = vmax.f32 %v492_v44, %v1066_v45  ;;  %16253 = vmatprep.mubr.msk.bf16.mxu1 %vm2812_vm2, %v3848_v46  ;;  %v16641_v46 = vld [vmem:[%s23028_s3 + $0x20] sm:$0xff]  }
 0x112   :  { %2819 = vst.msk [vmem:[#allocation2 + $0x90] sm:$0xff] %vm2812_vm2, %v17730_v38  ;;  %3550 = vst.msk [vmem:[#allocation2 + $0x68] sm:$0xff] %vm2812_vm2, %v17730_v38  ;;  %v1323_v52 = vadd.f32 %v17629_v59, %v1257_v43  ;;  %16254 = vmatmul.mubr.msk.bf16.vlgmr.msra.gmra.mrb[120].mxu1 %vm2812_vm2, %v3851_v50  ;;  %v1382_v56 = vmax.f32 %v1322_v42, 0.0  ;;  %4155 = vmatpush1.bf16.msra.mxu0 %v16641_v46 }
 0x113   :  { %v1321_v53 = vadd.f32 %v17629_v59, %v1255_v49  ;;  %4785 = vmatpush1.bf16.msra.mxu1 %v16637_v24  ;;  %v1380_v58 = vmax.f32 %v1320_v47, 0.0  ;;  %4156 = vmatprep.subr.bf16.mxu0 %v23038_v8 }
 0x114   :  { %v1383_v57 = vmax.f32 %v1323_v52, 0.0  ;;  %4786 = vmatprep.subr.bf16.mxu1 %v23038_v8 }
 0x115   :  { %v1381_v60 = vmax.f32 %v1321_v53, 0.0  ;;  %v15995_v61 = vpop.f32.mrb[20].mxu0  ;;  %v16067_v62 = vpop.f32.mrb[20].mxu1 }
 0x116   :  { %v17758_v63 = vpack.c.bf16 %v1383_v57, %v1382_v56  ;;  %v1260_v0 = vmax.f32 %v15995_v61, %v16067_v62  ;;  %v505_v1 = vpop.f32.mrb[21].mxu0  ;;  %v1079_v2 = vpop.f32.mrb[21].mxu1 }
 0x117   :  { %v17760_v3 = vpack.c.bf16 %v1381_v60, %v1380_v58  ;;  %v1258_v4 = vmax.f32 %v505_v1, %v1079_v2  ;;  %v15996_v5 = vpop.f32.mrb[22].mxu0  ;;  %v16068_v6 = vpop.f32.mrb[22].mxu1  ;;  %4787 = vmatpush1.bf16.msra.mxu1 %v16638_v51  ;;  %v3857_v17 = vld [vmem:[#allocation2 + $0x58] sm:$0xff] }
 0x118   :  { %3799 = vst.msk [vmem:[#allocation2 + $0x88] sm:$0xff] %vm2812_vm2, %v17758_v63  ;;  %2822 = vst.msk [vmem:[#allocation2 + $0xd8] sm:$0xff] %vm2812_vm2, %v17758_v63  ;;  %v1326_v7 = vadd.f32 %v17629_v59, %v1260_v0  ;;  %v1261_v9 = vmax.f32 %v15996_v5, %v16068_v6  ;;  %v508_v11 = vpop.f32.mrb[23].mxu0  ;;  %v1082_v12 = vpop.f32.mrb[23].mxu1  ;;  %v3854_v13 = vld [vmem:[#allocation2 + $0x40] sm:$0xff]  ;;  %4788 = vmatprep.subr.bf16.mxu1 %v23038_v8 }
 0x119   :  { %3553 = vst.msk [vmem:[#allocation2 + $0xb0] sm:$0xff] %vm2812_vm2, %v17758_v63  ;;  %3798 = vst.msk [vmem:[#allocation2 + $0x70] sm:$0xff] %vm2812_vm2, %v17760_v3  ;;  %v1324_v15 = vadd.f32 %v17629_v59, %v1258_v4  ;;  %v1259_v16 = vmax.f32 %v508_v11, %v1082_v12  ;;  %16257 = vmatprep.mubr.msk.bf16.mxu1 %vm2812_vm2, %v3854_v13 }
 0x11a   :  { %2821 = vst.msk [vmem:[#allocation2 + $0xc0] sm:$0xff] %vm2812_vm2, %v17760_v3  ;;  %3552 = vst.msk [vmem:[#allocation2 + $0x98] sm:$0xff] %vm2812_vm2, %v17760_v3  ;;  %v1327_v19 = vadd.f32 %v17629_v59, %v1261_v9  ;;  %16258 = vmatmul.mubr.msk.bf16.gmra.mrb[124].mxu1 %vm2812_vm2, %v3857_v17  ;;  %v1386_v21 = vmax.f32 %v1326_v7, 0.0 }
 0x11b   :  { %v1325_v20 = vadd.f32 %v17629_v59, %v1259_v16  ;;  %4789 = vmatpush1.bf16.msra.mxu1 %v16639_v55  ;;  %v1384_v23 = vmax.f32 %v1324_v15, 0.0  ;;  %v16642_v15 = vld [vmem:[%s23028_s3 + $0x28] sm:$0xff]  }
 0x11c   :  { %v1387_v22 = vmax.f32 %v1327_v19, 0.0  ;;  %4790 = vmatprep.subr.bf16.mxu1 %v23038_v8  ;;  %4157 = vmatpush1.bf16.msra.mxu0 %v16642_v15 }
 0x11d   :  { %v1385_v24 = vmax.f32 %v1325_v20, 0.0  ;;  %v15999_v26 = vpop.f32.mrb[24].mxu0  ;;  %v16071_v27 = vpop.f32.mrb[24].mxu1  ;;  %4158 = vmatprep.subr.bf16.mxu0 %v23038_v8 }
 0x11e   :  { %v17787_v28 = vpack.c.bf16 %v1387_v22, %v1386_v21  ;;  %v1264_v29 = vmax.f32 %v15999_v26, %v16071_v27  ;;  %v521_v30 = vpop.f32.mrb[25].mxu0  ;;  %v1095_v31 = vpop.f32.mrb[25].mxu1 }
 0x11f   :  { %v17789_v32 = vpack.c.bf16 %v1385_v24, %v1384_v23  ;;  %v1262_v33 = vmax.f32 %v521_v30, %v1095_v31  ;;  %v16000_v35 = vpop.f32.mrb[26].mxu0  ;;  %v16072_v36 = vpop.f32.mrb[26].mxu1  ;;  %4791 = vmatpush1.bf16.msra.mxu1 %v16640_v18  ;;  %v3863_v45 = vld [vmem:[#allocation2 + $0x88] sm:$0xff] }
 0x120   :  { %2824 = vst.msk [vmem:[#allocation2 + $0x108] sm:$0xff] %vm2812_vm2, %v17787_v28  ;;  %3555 = vst.msk [vmem:[#allocation2 + $0xe0] sm:$0xff] %vm2812_vm2, %v17787_v28  ;;  %v1330_v37 = vadd.f32 %v17629_v59, %v1264_v29  ;;  %v1265_v39 = vmax.f32 %v16000_v35, %v16072_v36  ;;  %v524_v40 = vpop.f32.mrb[27].mxu0  ;;  %v1098_v41 = vpop.f32.mrb[27].mxu1  ;;  %v3860_v42 = vld [vmem:[#allocation2 + $0x70] sm:$0xff]  ;;  %4792 = vmatprep.subr.bf16.mxu1 %v23038_v8 }
 0x121   :  { %3801 = vst.msk [vmem:[#allocation2 + $0xb8] sm:$0xff] %vm2812_vm2, %v17787_v28  ;;  %2823 = vst.msk [vmem:[#allocation2 + $0xf0] sm:$0xff] %vm2812_vm2, %v17789_v32  ;;  %v1328_v43 = vadd.f32 %v17629_v59, %v1262_v33  ;;  %v1263_v44 = vmax.f32 %v524_v40, %v1098_v41  ;;  %16261 = vmatprep.mubr.msk.bf16.mxu1 %vm2812_vm2, %v3860_v42 }
 0x122   :  { %3554 = vst.msk [vmem:[#allocation2 + $0xc8] sm:$0xff] %vm2812_vm2, %v17789_v32  ;;  %3800 = vst.msk [vmem:[#allocation2 + $0xa0] sm:$0xff] %vm2812_vm2, %v17789_v32  ;;  %v1331_v47 = vadd.f32 %v17629_v59, %v1265_v39  ;;  %16262 = vmatmul.mubr.msk.bf16.gmra.mrb[128].mxu1 %vm2812_vm2, %v3863_v45  ;;  %v1390_v50 = vmax.f32 %v1330_v37, 0.0  ;;  %v16643_v45 = vld [vmem:[%s23028_s3 + $0x30] sm:$0xff]  }
 0x123   :  { %v1329_v49 = vadd.f32 %v17629_v59, %v1263_v44  ;;  %4793 = vmatpush1.bf16.msra.mxu1 %v16641_v46  ;;  %v1388_v52 = vmax.f32 %v1328_v43, 0.0  ;;  %4159 = vmatpush1.bf16.msra.mxu0 %v16643_v45 }
 0x124   :  { %v1391_v51 = vmax.f32 %v1331_v47, 0.0  ;;  %4794 = vmatprep.subr.bf16.mxu1 %v23038_v8  ;;  %4160 = vmatprep.subr.bf16.mxu0 %v23038_v8 }
 0x125   :  { %v1389_v53 = vmax.f32 %v1329_v49, 0.0  ;;  %v16003_v55 = vpop.f32.mrb[28].mxu0  ;;  %v16075_v56 = vpop.f32.mrb[28].mxu1 }
 0x126   :  { %v17815_v57 = vpack.c.bf16 %v1391_v51, %v1390_v50  ;;  %v1268_v58 = vmax.f32 %v16003_v55, %v16075_v56  ;;  %v537_v60 = vpop.f32.mrb[29].mxu0  ;;  %v1111_v61 = vpop.f32.mrb[29].mxu1 }
 0x127   :  { %v17817_v62 = vpack.c.bf16 %v1389_v53, %v1388_v52  ;;  %v1266_v0 = vmax.f32 %v537_v60, %v1111_v61  ;;  %v16004_v1 = vpop.f32.mrb[30].mxu0  ;;  %v16076_v2 = vpop.f32.mrb[30].mxu1  ;;  %4795 = vmatpush1.bf16.msra.mxu1 %v16642_v15 }
 0x128   :  { %23063 = vst [vmem:[#allocation5_spill] sm:$0xff] %v17815_v57  ;;  %2826 = vst.msk [vmem:[#allocation2 + $0x138] sm:$0xff] %vm2812_vm2, %v17815_v57  ;;  %v1334_v4 = vadd.f32 %v17629_v59, %v1268_v58  ;;  %v1269_v5 = vmax.f32 %v16004_v1, %v16076_v2  ;;  %v540_v6 = vpop.f32.mrb[31].mxu0  ;;  %v1114_v7 = vpop.f32.mrb[31].mxu1  ;;  %v3869_v13 = vld [vmem:[#allocation2 + $0xb8] sm:$0xff]  ;;  %4796 = vmatprep.subr.bf16.mxu1 %v23038_v8 }
 0x129   :  { %3557 = vst.msk [vmem:[#allocation2 + $0x110] sm:$0xff] %vm2812_vm2, %v17815_v57  ;;  %3803 = vst.msk [vmem:[#allocation2 + $0xe8] sm:$0xff] %vm2812_vm2, %v17815_v57  ;;  %v3866_v9 = vld [vmem:[#allocation2 + $0xa0] sm:$0xff]  ;;  %v1332_v11 = vadd.f32 %v17629_v59, %v1266_v0  ;;  %v1267_v12 = vmax.f32 %v540_v6, %v1114_v7 }
 0x12a   :  { %2825 = vst.msk [vmem:[#allocation2 + $0x120] sm:$0xff] %vm2812_vm2, %v17817_v62  ;;  %3556 = vst.msk [vmem:[#allocation2 + $0xf8] sm:$0xff] %vm2812_vm2, %v17817_v62  ;;  %16265 = vmatprep.mubr.msk.bf16.mxu1 %vm2812_vm2, %v3866_v9  ;;  %v1335_v16 = vadd.f32 %v17629_v59, %v1269_v5  ;;  %v1394_v18 = vmax.f32 %v1334_v4, 0.0 }
 0x12b   :  { %3802 = vst.msk [vmem:[#allocation2 + $0xd0] sm:$0xff] %vm2812_vm2, %v17817_v62  ;;  %16266 = vmatmul.mubr.msk.bf16.gmra.mrb[132].mxu1 %vm2812_vm2, %v3869_v13  ;;  %v1333_v17 = vadd.f32 %v17629_v59, %v1267_v12  ;;  %v1392_v20 = vmax.f32 %v1332_v11, 0.0 }
 0x12c   :  { %v1395_v19 = vmax.f32 %v1335_v16, 0.0  ;;  %4797 = vmatpush1.bf16.msra.mxu1 %v16643_v45  ;;  %v16644_v16 = vld [vmem:[%s23028_s3 + $0x38] sm:$0xff]   ;;  %v16645_v45 = vld [vmem:[%s23028_s3 + $0x40] sm:$0xff]  }
 0x12d   :  { %v1393_v21 = vmax.f32 %v1333_v17, 0.0  ;;  %v16007_v22 = vpop.f32.mrb[32].mxu0  ;;  %v16079_v23 = vpop.f32.mrb[32].mxu1  ;;  %4798 = vmatprep.subr.bf16.mxu1 %v23038_v8  ;;  %4161 = vmatpush1.bf16.msra.mxu0 %v16644_v16 }
 0x12e   :  { %v17842_v24 = vpack.c.bf16 %v1395_v19, %v1394_v18  ;;  %v1272_v26 = vmax.f32 %v16007_v22, %v16079_v23  ;;  %v553_v27 = vpop.f32.mrb[33].mxu0  ;;  %v1127_v29 = vpop.f32.mrb[33].mxu1  ;;  %4162 = vmatprep.subr.bf16.mxu0 %v23038_v8 }
 0x12f   :  { %v17844_v30 = vpack.c.bf16 %v1393_v21, %v1392_v20  ;;  %v1270_v31 = vmax.f32 %v553_v27, %v1127_v29  ;;  %v16008_v33 = vpop.f32.mrb[34].mxu0  ;;  %v16080_v35 = vpop.f32.mrb[34].mxu1 }
 0x130   :  { %23064 = vst [vmem:[#allocation6_spill] sm:$0xff] %v17842_v24  ;;  %3805 = vst.msk [vmem:[#allocation2 + $0x118] sm:$0xff] %vm2812_vm2, %v17842_v24  ;;  %v1338_v36 = vadd.f32 %v17629_v59, %v1272_v26  ;;  %v1273_v37 = vmax.f32 %v16008_v33, %v16080_v35  ;;  %v556_v39 = vpop.f32.mrb[35].mxu0  ;;  %v1130_v40 = vpop.f32.mrb[35].mxu1  ;;  %v3875_v44 = vld [vmem:[#allocation2 + $0xe8] sm:$0xff]  ;;  %4799 = vmatpush1.bf16.msra.mxu1 %v16644_v16 }
 0x131   :  { %2828 = vst.msk [vmem:[#allocation2 + $0x168] sm:$0xff] %vm2812_vm2, %v17842_v24  ;;  %3559 = vst.msk [vmem:[#allocation2 + $0x140] sm:$0xff] %vm2812_vm2, %v17842_v24  ;;  %v1336_v42 = vadd.f32 %v17629_v59, %v1270_v31  ;;  %v1271_v43 = vmax.f32 %v556_v39, %v1130_v40  ;;  %4800 = vmatprep.subr.bf16.mxu1 %v23038_v8  ;;  %4163 = vmatpush1.bf16.msra.mxu0 %v16645_v45 }
 0x132   :  { %v3872_v41 = vld [vmem:[#allocation2 + $0xd0] sm:$0xff]  ;;  %3804 = vst.msk [vmem:[#allocation2 + $0x100] sm:$0xff] %vm2812_vm2, %v17844_v30  ;;  %2827 = vst.msk [vmem:[#allocation2 + $0x150] sm:$0xff] %vm2812_vm2, %v17844_v30  ;;  %v1339_v46 = vadd.f32 %v17629_v59, %v1273_v37  ;;  %v1398_v49 = vmax.f32 %v1338_v36, 0.0  ;;  %4164 = vmatprep.subr.bf16.mxu0 %v23038_v8 }
 0x133   :  { %3558 = vst.msk [vmem:[#allocation2 + $0x128] sm:$0xff] %vm2812_vm2, %v17844_v30  ;;  %16269 = vmatprep.mubr.msk.bf16.mxu1 %vm2812_vm2, %v3872_v41  ;;  %v1337_v47 = vadd.f32 %v17629_v59, %v1271_v43  ;;  %v1396_v51 = vmax.f32 %v1336_v42, 0.0 }
 0x134   :  { %16270 = vmatmul.mubr.msk.bf16.gmra.mrb[136].mxu1 %vm2812_vm2, %v3875_v44  ;;  %v1399_v50 = vmax.f32 %v1339_v46, 0.0 }
 0x135   :  { %v1397_v52 = vmax.f32 %v1337_v47, 0.0  ;;  %v16011_v53 = vpop.f32.mrb[36].mxu0  ;;  %v16083_v55 = vpop.f32.mrb[36].mxu1  ;;  %4801 = vmatpush1.bf16.msra.mxu1 %v16645_v45 }
 0x136   :  { %v17869_v56 = vpack.c.bf16 %v1399_v50, %v1398_v49  ;;  %v1276_v58 = vmax.f32 %v16011_v53, %v16083_v55  ;;  %v569_v60 = vpop.f32.mrb[37].mxu0  ;;  %v1143_v61 = vpop.f32.mrb[37].mxu1  ;;  %4802 = vmatprep.subr.bf16.mxu1 %v23038_v8 }
 0x137   :  { %v17871_v0 = vpack.c.bf16 %v1397_v52, %v1396_v51  ;;  %v1274_v1 = vmax.f32 %v569_v60, %v1143_v61  ;;  %v16012_v2 = vpop.f32.mrb[38].mxu0  ;;  %v16084_v4 = vpop.f32.mrb[38].mxu1  ;;  %v3881_v15 = vld [vmem:[#allocation2 + $0x118] sm:$0xff] }
 0x138   :  { %23065 = vst [vmem:[#allocation7_spill] sm:$0xff] %v17869_v56  ;;  %3807 = vst.msk [vmem:[#allocation2 + $0x148] sm:$0xff] %vm2812_vm2, %v17869_v56  ;;  %v1342_v5 = vadd.f32 %v17629_v59, %v1276_v58  ;;  %v1277_v6 = vmax.f32 %v16012_v2, %v16084_v4  ;;  %v572_v7 = vpop.f32.mrb[39].mxu0  ;;  %v1146_v9 = vpop.f32.mrb[39].mxu1 }
 0x139   :  { %23066 = vst [vmem:[#allocation8_spill] sm:$0xff] %v17871_v0  ;;  %2830 = vst.msk [vmem:[#allocation2 + $0x198] sm:$0xff] %vm2812_vm2, %v17869_v56  ;;  %v3878_v11 = vld [vmem:[#allocation2 + $0x100] sm:$0xff]  ;;  %v1340_v12 = vadd.f32 %v17629_v59, %v1274_v1  ;;  %v1275_v13 = vmax.f32 %v572_v7, %v1146_v9 }
 0x13a   :  { %3561 = vst.msk [vmem:[#allocation2 + $0x170] sm:$0xff] %vm2812_vm2, %v17869_v56  ;;  %3806 = vst.msk [vmem:[#allocation2 + $0x130] sm:$0xff] %vm2812_vm2, %v17871_v0  ;;  %16273 = vmatprep.mubr.msk.bf16.mxu1 %vm2812_vm2, %v3878_v11  ;;  %v1343_v17 = vadd.f32 %v17629_v59, %v1277_v6  ;;  %v1402_v19 = vmax.f32 %v1342_v5, 0.0 }
 0x13b   :  { %2829 = vst.msk [vmem:[#allocation2 + $0x180] sm:$0xff] %vm2812_vm2, %v17871_v0  ;;  %3560 = vst.msk [vmem:[#allocation2 + $0x158] sm:$0xff] %vm2812_vm2, %v17871_v0  ;;  %v1341_v18 = vadd.f32 %v17629_v59, %v1275_v13  ;;  %v1400_v21 = vmax.f32 %v1340_v12, 0.0 }
 0x13c   :  { %16274 = vmatmul.mubr.msk.bf16.gmra.mrb[140].mxu1 %vm2812_vm2, %v3881_v15  ;;  %v1403_v20 = vmax.f32 %v1343_v17, 0.0 }
 0x13d   :  { %v1401_v22 = vmax.f32 %v1341_v18, 0.0  ;;  %v16015_v23 = vpop.f32.mrb[40].mxu0  ;;  %v16087_v26 = vpop.f32.mrb[40].mxu1  ;;  %v16646_v18 = vld [vmem:[%s23028_s3 + $0x48] sm:$0xff]  }
 0x13e   :  { %v17896_v27 = vpack.c.bf16 %v1403_v20, %v1402_v19  ;;  %v1280_v29 = vmax.f32 %v16015_v23, %v16087_v26  ;;  %v585_v31 = vpop.f32.mrb[41].mxu0  ;;  %v1159_v33 = vpop.f32.mrb[41].mxu1  ;;  %4165 = vmatpush1.bf16.msra.mxu0 %v16646_v18  ;;  %4803 = vmatpush1.bf16.msra.mxu1 %v16646_v18 }
 0x13f   :  { %v17898_v35 = vpack.c.bf16 %v1401_v22, %v1400_v21  ;;  %v1278_v36 = vmax.f32 %v585_v31, %v1159_v33  ;;  %v16016_v37 = vpop.f32.mrb[42].mxu0  ;;  %v16088_v39 = vpop.f32.mrb[42].mxu1  ;;  %v3887_v49 = vld [vmem:[#allocation2 + $0x148] sm:$0xff]  ;;  %4166 = vmatprep.subr.bf16.mxu0 %v23038_v8  ;;  %4804 = vmatprep.subr.bf16.mxu1 %v23038_v8 }
 0x140   :  { %23067 = vst [vmem:[#allocation9_spill] sm:$0xff] %v17896_v27  ;;  %3809 = vst.msk [vmem:[#allocation2 + $0x178] sm:$0xff] %vm2812_vm2, %v17896_v27  ;;  %v1346_v40 = vadd.f32 %v17629_v59, %v1280_v29  ;;  %v1281_v41 = vmax.f32 %v16016_v37, %v16088_v39  ;;  %v588_v42 = vpop.f32.mrb[43].mxu0  ;;  %v1162_v43 = vpop.f32.mrb[43].mxu1  ;;  %v16647_v39 = vld [vmem:[%s23028_s3 + $0x50] sm:$0xff]  }
 0x141   :  { %2832 = vst.msk [vmem:[#allocation2 + $0x1c8] sm:$0xff] %vm2812_vm2, %v17896_v27  ;;  %3563 = vst.msk [vmem:[#allocation2 + $0x1a0] sm:$0xff] %vm2812_vm2, %v17896_v27  ;;  %v3884_v44 = vld [vmem:[#allocation2 + $0x130] sm:$0xff]  ;;  %v1344_v46 = vadd.f32 %v17629_v59, %v1278_v36  ;;  %v1279_v47 = vmax.f32 %v588_v42, %v1162_v43 }
 0x142   :  { %3808 = vst.msk [vmem:[#allocation2 + $0x160] sm:$0xff] %vm2812_vm2, %v17898_v35  ;;  %2831 = vst.msk [vmem:[#allocation2 + $0x1b0] sm:$0xff] %vm2812_vm2, %v17898_v35  ;;  %16277 = vmatprep.mubr.msk.bf16.mxu1 %vm2812_vm2, %v3884_v44  ;;  %v1347_v50 = vadd.f32 %v17629_v59, %v1281_v41  ;;  %v1406_v52 = vmax.f32 %v1346_v40, 0.0  ;;  %4167 = vmatpush1.bf16.msra.mxu0 %v16647_v39 }
 0x143   :  { %3562 = vst.msk [vmem:[#allocation2 + $0x188] sm:$0xff] %vm2812_vm2, %v17898_v35  ;;  %v1345_v51 = vadd.f32 %v17629_v59, %v1279_v47  ;;  %v1404_v55 = vmax.f32 %v1344_v46, 0.0  ;;  %4805 = vmatpush1.bf16.msra.mxu1 %v16647_v39  ;;  %4168 = vmatprep.subr.bf16.mxu0 %v23038_v8 }
 0x144   :  { %16278 = vmatmul.mubr.msk.bf16.gmra.mrb[144].mxu1 %vm2812_vm2, %v3887_v49  ;;  %v1407_v53 = vmax.f32 %v1347_v50, 0.0  ;;  %4806 = vmatprep.subr.bf16.mxu1 %v23038_v8 }
 0x145   :  { %v1405_v58 = vmax.f32 %v1345_v51, 0.0  ;;  %v16019_v60 = vpop.f32.mrb[44].mxu0  ;;  %v16091_v61 = vpop.f32.mrb[44].mxu1 }
 0x146   :  { %v17923_v1 = vpack.c.bf16 %v1407_v53, %v1406_v52  ;;  %v1284_v2 = vmax.f32 %v16019_v60, %v16091_v61  ;;  %v601_v4 = vpop.f32.mrb[45].mxu0  ;;  %v1175_v5 = vpop.f32.mrb[45].mxu1 }
 0x147   :  { %v17925_v6 = vpack.c.bf16 %v1405_v58, %v1404_v55  ;;  %v1282_v7 = vmax.f32 %v601_v4, %v1175_v5  ;;  %v16020_v9 = vpop.f32.mrb[46].mxu0  ;;  %v16092_v11 = vpop.f32.mrb[46].mxu1  ;;  %v3893_v21 = vld [vmem:[#allocation2 + $0x178] sm:$0xff] }
 0x148   :  { %3811 = vst.msk [vmem:[#allocation2 + $0x1a8] sm:$0xff] %vm2812_vm2, %v17923_v1  ;;  %2834 = vst.msk [vmem:[#allocation2 + $0x1f8] sm:$0xff] %vm2812_vm2, %v17923_v1  ;;  %v1350_v12 = vadd.f32 %v17629_v59, %v1284_v2  ;;  %v1285_v13 = vmax.f32 %v16020_v9, %v16092_v11  ;;  %v604_v15 = vpop.f32.mrb[47].mxu0  ;;  %v1178_v16 = vpop.f32.mrb[47].mxu1 }
 0x149   :  { %3565 = vst.msk [vmem:[#allocation2 + $0x1d0] sm:$0xff] %vm2812_vm2, %v17923_v1  ;;  %v3890_v17 = vld [vmem:[#allocation2 + $0x160] sm:$0xff]  ;;  %3810 = vst.msk [vmem:[#allocation2 + $0x190] sm:$0xff] %vm2812_vm2, %v17925_v6  ;;  %v1348_v19 = vadd.f32 %v17629_v59, %v1282_v7  ;;  %v1283_v20 = vmax.f32 %v604_v15, %v1178_v16 }
 0x14a   :  { %2833 = vst.msk [vmem:[#allocation2 + $0x1e0] sm:$0xff] %vm2812_vm2, %v17925_v6  ;;  %3564 = vst.msk [vmem:[#allocation2 + $0x1b8] sm:$0xff] %vm2812_vm2, %v17925_v6  ;;  %16281 = vmatprep.mubr.msk.bf16.mxu1 %vm2812_vm2, %v3890_v17  ;;  %v1351_v22 = vadd.f32 %v17629_v59, %v1285_v13  ;;  %v1410_v26 = vmax.f32 %v1350_v12, 0.0  ;;  %v16648_v13 = vld [vmem:[%s23028_s3 + $0x58] sm:$0xff]  }
 0x14b   :  { %v1349_v23 = vadd.f32 %v17629_v59, %v1283_v20  ;;  %v1408_v31 = vmax.f32 %v1348_v19, 0.0  ;;  %4169 = vmatpush1.bf16.msra.mxu0 %v16648_v13  ;;  %4807 = vmatpush1.bf16.msra.mxu1 %v16648_v13 }
 0x14c   :  { %16282 = vmatmul.mubr.msk.bf16.gmra.mrb[148].mxu1 %vm2812_vm2, %v3893_v21  ;;  %v1411_v29 = vmax.f32 %v1351_v22, 0.0  ;;  %4170 = vmatprep.subr.bf16.mxu0 %v23038_v8 }
 0x14d   :  { %v1409_v33 = vmax.f32 %v1349_v23, 0.0  ;;  %v16023_v36 = vpop.f32.mrb[48].mxu0  ;;  %v16095_v37 = vpop.f32.mrb[48].mxu1  ;;  %4808 = vmatprep.subr.bf16.mxu1 %v23038_v8 }
 0x14e   :  { %v17953_v40 = vpack.c.bf16 %v1411_v29, %v1410_v26  ;;  %v1288_v41 = vmax.f32 %v16023_v36, %v16095_v37  ;;  %v617_v42 = vpop.f32.mrb[49].mxu0  ;;  %v1191_v43 = vpop.f32.mrb[49].mxu1 }
 0x14f   :  { %v17955_v44 = vpack.c.bf16 %v1409_v33, %v1408_v31  ;;  %v1286_v45 = vmax.f32 %v617_v42, %v1191_v43  ;;  %v16024_v46 = vpop.f32.mrb[50].mxu0  ;;  %v16096_v47 = vpop.f32.mrb[50].mxu1  ;;  %v3899_v60 = vld [vmem:[#allocation2 + $0x1a8] sm:$0xff] }
 0x150   :  { %3813 = vst.msk [vmem:[#allocation2 + $0x1d8] sm:$0xff] %vm2812_vm2, %v17953_v40  ;;  %2836 = vst.msk [vmem:[#allocation2 + $0x228] sm:$0xff] %vm2812_vm2, %v17953_v40  ;;  %v1354_v49 = vadd.f32 %v17629_v59, %v1288_v41  ;;  %v1289_v50 = vmax.f32 %v16024_v46, %v16096_v47  ;;  %v620_v51 = vpop.f32.mrb[51].mxu0  ;;  %v1194_v52 = vpop.f32.mrb[51].mxu1  ;;  %v3896_v53 = vld [vmem:[#allocation2 + $0x190] sm:$0xff] }
 0x151   :  { %3567 = vst.msk [vmem:[#allocation2 + $0x200] sm:$0xff] %vm2812_vm2, %v17953_v40  ;;  %3812 = vst.msk [vmem:[#allocation2 + $0x1c0] sm:$0xff] %vm2812_vm2, %v17955_v44  ;;  %v1352_v55 = vadd.f32 %v17629_v59, %v1286_v45  ;;  %v1287_v58 = vmax.f32 %v620_v51, %v1194_v52  ;;  %16285 = vmatprep.mubr.msk.bf16.mxu1 %vm2812_vm2, %v3896_v53  ;;  %v16649_v51 = vld [vmem:[%s23028_s3 + $0x60] sm:$0xff]  }
 0x152   :  { %2835 = vst.msk [vmem:[#allocation2 + $0x210] sm:$0xff] %vm2812_vm2, %v17955_v44  ;;  %3566 = vst.msk [vmem:[#allocation2 + $0x1e8] sm:$0xff] %vm2812_vm2, %v17955_v44  ;;  %v1355_v61 = vadd.f32 %v17629_v59, %v1289_v50  ;;  %v1414_v4 = vmax.f32 %v1354_v49, 0.0  ;;  %4171 = vmatpush1.bf16.msra.mxu0 %v16649_v51  ;;  %4809 = vmatpush1.bf16.msra.mxu1 %v16649_v51 }
 0x153   :  { %v1353_v2 = vadd.f32 %v17629_v59, %v1287_v58  ;;  %v1412_v7 = vmax.f32 %v1352_v55, 0.0  ;;  %4172 = vmatprep.subr.bf16.mxu0 %v23038_v8  ;;  %4810 = vmatprep.subr.bf16.mxu1 %v23038_v8 }
 0x154   :  { %16286 = vmatmul.mubr.msk.bf16.gmra.mrb[152].mxu1 %vm2812_vm2, %v3899_v60  ;;  %v1415_v5 = vmax.f32 %v1355_v61, 0.0 }
 0x155   :  { %v1413_v9 = vmax.f32 %v1353_v2, 0.0  ;;  %v16027_v11 = vpop.f32.mrb[52].mxu0  ;;  %v16099_v12 = vpop.f32.mrb[52].mxu1 }
 0x156   :  { %v17980_v15 = vpack.c.bf16 %v1415_v5, %v1414_v4  ;;  %v1292_v16 = vmax.f32 %v16027_v11, %v16099_v12  ;;  %v633_v17 = vpop.f32.mrb[53].mxu0  ;;  %v1207_v18 = vpop.f32.mrb[53].mxu1  ;;  %v18018_v4 = vld [vmem:[%s23029_s2] ss:$0 sm:$0xff] }
 0x157   :  { %v17982_v19 = vpack.c.bf16 %v1413_v9, %v1412_v7  ;;  %v1290_v20 = vmax.f32 %v633_v17, %v1207_v18  ;;  %v16028_v21 = vpop.f32.mrb[54].mxu0  ;;  %v16100_v22 = vpop.f32.mrb[54].mxu1  ;;  %v3905_v39 = vld [vmem:[#allocation2 + $0x1d8] sm:$0xff] }
 0x158   :  { %3815 = vst.msk [vmem:[#allocation2 + $0x208] sm:$0xff] %vm2812_vm2, %v17980_v15  ;;  %2838 = vst.msk [vmem:[#allocation2 + $0x258] sm:$0xff] %vm2812_vm2, %v17980_v15  ;;  %v1358_v23 = vadd.f32 %v17629_v59, %v1292_v16  ;;  %v1293_v26 = vmax.f32 %v16028_v21, %v16100_v22  ;;  %v636_v29 = vpop.f32.mrb[55].mxu0  ;;  %v1210_v31 = vpop.f32.mrb[55].mxu1  ;;  %v3902_v33 = vld [vmem:[#allocation2 + $0x1c0] sm:$0xff] }
 0x159   :  { %3569 = vst.msk [vmem:[#allocation2 + $0x230] sm:$0xff] %vm2812_vm2, %v17980_v15  ;;  %3814 = vst.msk [vmem:[#allocation2 + $0x1f0] sm:$0xff] %vm2812_vm2, %v17982_v19  ;;  %v1356_v36 = vadd.f32 %v17629_v59, %v1290_v20  ;;  %v1291_v37 = vmax.f32 %v636_v29, %v1210_v31  ;;  %16289 = vmatprep.mubr.msk.bf16.mxu1 %vm2812_vm2, %v3902_v33 }
 0x15a   :  { %2837 = vst.msk [vmem:[#allocation2 + $0x240] sm:$0xff] %vm2812_vm2, %v17982_v19  ;;  %3568 = vst.msk [vmem:[#allocation2 + $0x218] sm:$0xff] %vm2812_vm2, %v17982_v19  ;;  %v1359_v41 = vadd.f32 %v17629_v59, %v1293_v26  ;;  %v1418_v43 = vmax.f32 %v1358_v23, 0.0 }
 0x15b   :  { %v1357_v42 = vadd.f32 %v17629_v59, %v1291_v37  ;;  %v1416_v46 = vmax.f32 %v1356_v36, 0.0 }
 0x15c   :  { %16290 = vmatmul.mubr.msk.bf16.gmra.mrb[156].mxu1 %vm2812_vm2, %v3905_v39  ;;  %v1419_v45 = vmax.f32 %v1359_v41, 0.0 }
 0x15d   :  { %v1417_v47 = vmax.f32 %v1357_v42, 0.0  ;;  %v16031_v49 = vpop.f32.mrb[56].mxu0  ;;  %v16103_v50 = vpop.f32.mrb[56].mxu1 }
 0x15e   :  { %v18007_v52 = vpack.c.bf16 %v1419_v45, %v1418_v43  ;;  %v1296_v53 = vmax.f32 %v16031_v49, %v16103_v50  ;;  %v649_v55 = vpop.f32.mrb[57].mxu0  ;;  %v1223_v58 = vpop.f32.mrb[57].mxu1 }
 0x15f   :  { %v18009_v60 = vpack.c.bf16 %v1417_v47, %v1416_v46  ;;  %v1294_v61 = vmax.f32 %v649_v55, %v1223_v58  ;;  %v16032_v2 = vpop.f32.mrb[58].mxu0  ;;  %v16104_v59 = vpop.f32.mrb[58].mxu1  ;;  %v3911_v17 = vld [vmem:[#allocation2 + $0x208] sm:$0xff] }
 0x160   :  { %23068 = vst [vmem:[#allocation10_spill] sm:$0xff] %v18007_v52  ;;  %3817 = vst.msk [vmem:[#allocation2 + $0x238] sm:$0xff] %vm2812_vm2, %v18007_v52  ;;  %v1362_v5 = vadd.f32 %v18018_v4, %v1296_v53  ;;  %v1297_v7 = vmax.f32 %v16032_v2, %v16104_v59  ;;  %v652_v9 = vpop.f32.mrb[59].mxu0  ;;  %v1226_v11 = vpop.f32.mrb[59].mxu1  ;;  %v3908_v12 = vld [vmem:[#allocation2 + $0x1f0] sm:$0xff]  ;;  %v16650_v46 = vld [vmem:[%s23028_s3 + $0x68] sm:$0xff]  }
 0x161   :  { %3571 = vst.msk [vmem:[#allocation2 + $0x260] sm:$0xff] %vm2812_vm2, %v18007_v52  ;;  %3816 = vst.msk [vmem:[#allocation2 + $0x220] sm:$0xff] %vm2812_vm2, %v18009_v60  ;;  %v1360_v13 = vadd.f32 %v18018_v4, %v1294_v61  ;;  %v1295_v16 = vmax.f32 %v652_v9, %v1226_v11  ;;  %16293 = vmatprep.mubr.msk.bf16.mxu1 %vm2812_vm2, %v3908_v12  ;;  %4173 = vmatpush1.bf16.msra.mxu0 %v16650_v46 }
 0x162   :  { %3570 = vst.msk [vmem:[#allocation2 + $0x248] sm:$0xff] %vm2812_vm2, %v18009_v60  ;;  %v1363_v18 = vadd.f32 %v18018_v4, %v1297_v7  ;;  %v1422_v21 = vmax.f32 %v1362_v5, 0.0  ;;  %4174 = vmatprep.subr.bf16.mxu0 %v23038_v8  ;;  %4811 = vmatpush1.bf16.msra.mxu1 %v16650_v46 }
 0x163   :  { %v1361_v20 = vadd.f32 %v18018_v4, %v1295_v16  ;;  %v1420_v23 = vmax.f32 %v1360_v13, 0.0  ;;  %4812 = vmatprep.subr.bf16.mxu1 %v23038_v8  ;;  %v16651_v16 = vld [vmem:[%s23028_s3 + $0x70] sm:$0xff]  }
 0x164   :  { %16294 = vmatmul.mubr.msk.bf16.gmra.mrb[160].mxu1 %vm2812_vm2, %v3911_v17  ;;  %v1423_v22 = vmax.f32 %v1363_v18, 0.0 }
 0x165   :  { %v1421_v26 = vmax.f32 %v1361_v20, 0.0  ;;  %v16119_v29 = vpop.f32.mrb[60].mxu0  ;;  %v16191_v31 = vpop.f32.mrb[60].mxu1  ;;  %4175 = vmatpush1.bf16.msra.mxu0 %v16651_v16 }
 0x166   :  { %v18032_v33 = vpack.c.bf16 %v1423_v22, %v1422_v21  ;;  %v2604_v36 = vmax.f32 %v16119_v29, %v16191_v31  ;;  %v1789_v37 = vpop.f32.mrb[61].mxu0  ;;  %v2363_v39 = vpop.f32.mrb[61].mxu1  ;;  %4813 = vmatpush1.bf16.msra.mxu1 %v16651_v16  ;;  %4176 = vmatprep.subr.bf16.mxu0 %v23038_v8 }
 0x167   :  { %v18034_v41 = vpack.c.bf16 %v1421_v26, %v1420_v23  ;;  %v2602_v42 = vmax.f32 %v1789_v37, %v2363_v39  ;;  %v16120_v43 = vpop.f32.mrb[62].mxu0  ;;  %v16192_v45 = vpop.f32.mrb[62].mxu1  ;;  %v3917_v61 = vld [vmem:[#allocation2 + $0x238] sm:$0xff]  ;;  %4814 = vmatprep.subr.bf16.mxu1 %v23038_v8 }
 0x168   :  { %23069 = vst [vmem:[#allocation11_spill] sm:$0xff] %v18032_v33  ;;  %3819 = vst.msk [vmem:[#allocation2 + $0x268] sm:$0xff] %vm2812_vm2, %v18032_v33  ;;  %v2664_v47 = vadd.f32 %v18018_v4, %v2604_v36  ;;  %v2605_v49 = vmax.f32 %v16120_v43, %v16192_v45  ;;  %v1792_v50 = vpop.f32.mrb[63].mxu0  ;;  %v2366_v51 = vpop.f32.mrb[63].mxu1  ;;  %v3914_v53 = vld [vmem:[#allocation2 + $0x220] sm:$0xff] }
 0x169   :  { %23070 = vst [vmem:[#allocation12_spill] sm:$0xff] %v18034_v41  ;;  %3818 = vst.msk [vmem:[#allocation2 + $0x250] sm:$0xff] %vm2812_vm2, %v18034_v41  ;;  %v2662_v55 = vadd.f32 %v18018_v4, %v2602_v42  ;;  %v2603_v58 = vmax.f32 %v1792_v50, %v2366_v51  ;;  %16297 = vmatprep.mubr.msk.bf16.mxu1 %vm2812_vm2, %v3914_v53 }
 0x16a   :  { %v2665_v2 = vadd.f32 %v18018_v4, %v2605_v49  ;;  %v2724_v5 = vmax.f32 %v2664_v47, 0.0 }
 0x16b   :  { %v2663_v59 = vadd.f32 %v18018_v4, %v2603_v58  ;;  %v2722_v9 = vmax.f32 %v2662_v55, 0.0 }
 0x16c   :  { %16298 = vmatmul.mubr.msk.bf16.gmra.mrb[164].mxu1 %vm2812_vm2, %v3917_v61  ;;  %v2725_v7 = vmax.f32 %v2665_v2, 0.0  ;;  %v16652_v2 = vld [vmem:[%s23028_s3 + $0x78] sm:$0xff]  }
 0x16d   :  { %v2723_v11 = vmax.f32 %v2663_v59, 0.0  ;;  %v16123_v12 = vpop.f32.mrb[64].mxu0  ;;  %v16195_v13 = vpop.f32.mrb[64].mxu1  ;;  %4177 = vmatpush1.bf16.msra.mxu0 %v16652_v2  ;;  %4815 = vmatpush1.bf16.msra.mxu1 %v16652_v2 }
 0x16e   :  { %v18054_v17 = vpack.c.bf16 %v2725_v7, %v2724_v5  ;;  %v2608_v18 = vmax.f32 %v16123_v12, %v16195_v13  ;;  %v1805_v20 = vpop.f32.mrb[65].mxu0  ;;  %v2379_v21 = vpop.f32.mrb[65].mxu1 }
 0x16f   :  { %v2606_v22 = vmax.f32 %v1805_v20, %v2379_v21  ;;  %v16124_v23 = vpop.f32.mrb[66].mxu0  ;;  %v16196_v26 = vpop.f32.mrb[66].mxu1  ;;  %v2782_v29 = vpack.c.bf16 %v2723_v11, %v2722_v9  ;;  %v3923_v46 = vld [vmem:[#allocation2 + $0x268] sm:$0xff] }
 0x170   :  { %2840 = vst.msk [vmem:[#allocation3 + $0x18] sm:$0xff] %vm2812_vm2, %v18054_v17  ;;  %v2668_v31 = vadd.f32 %v18018_v4, %v2608_v18  ;;  %v2609_v36 = vmax.f32 %v16124_v23, %v16196_v26  ;;  %v2382_v37 = vpop.f32.mrb[67].mxu1  ;;  %3336 = vrot.lane.b32.xlu1 %v18054_v17, %s17097_s26  ;;  %v1808_v39 = vpop.f32.mrb[67].mxu0  ;;  %v3920_v42 = vld [vmem:[#allocation2 + $0x250] sm:$0xff] }
 0x171   :  { %v2666_v43 = vadd.f32 %v18018_v4, %v2606_v22  ;;  %v2607_v45 = vmax.f32 %v1808_v39, %v2382_v37  ;;  %2891 = vrot.lane.b32.xlu0 %v2782_v29, %s17098_s27  ;;  %2839 = vst.msk [vmem:[#allocation3] sm:$0xff] %vm2812_vm2, %v2782_v29  ;;  %16301 = vmatprep.mubr.msk.bf16.mxu1 %vm2812_vm2, %v3920_v42  ;;  %v18096_v29 = vld [vmem:[%s23028_s3 + $0x80] sm:$0xff]  }
 0x172   :  { %v2669_v47 = vadd.f32 %v18018_v4, %v2609_v36  ;;  %v2728_v50 = vmax.f32 %v2668_v31, 0.0  ;;  %16305 = vmatprep.subr.bf16.mxu0 %v18096_v29 }
 0x173   :  { %v2667_v49 = vadd.f32 %v18018_v4, %v2607_v45  ;;  %v2726_v53 = vmax.f32 %v2666_v43, 0.0 }
 0x174   :  { %16302 = vmatmul.mubr.msk.bf16.gmra.mrb[168].mxu1 %vm2812_vm2, %v3923_v46  ;;  %v2729_v51 = vmax.f32 %v2669_v47, 0.0  ;;  %2893 = vrot.lane.b32.xlu1 %v18054_v17, %s17098_s27 }
 0x175   :  { %v2727_v55 = vmax.f32 %v2667_v49, 0.0  ;;  %v16127_v58 = vpop.f32.mrb[68].mxu0  ;;  %v16199_v61 = vpop.f32.mrb[68].mxu1 }
 0x176   :  { %v18075_v59 = vpack.c.bf16 %v2729_v51, %v2728_v50  ;;  %v2612_v5 = vmax.f32 %v16127_v58, %v16199_v61  ;;  %v1821_v7 = vpop.f32.mrb[69].mxu0  ;;  %v2395_v9 = vpop.f32.mrb[69].mxu1 }
 0x177   :  { %v18077_v11 = vpack.c.bf16 %v2727_v55, %v2726_v53  ;;  %v2610_v12 = vmax.f32 %v1821_v7, %v2395_v9  ;;  %v16128_v13 = vpop.f32.mrb[70].mxu0  ;;  %v16200_v16 = vpop.f32.mrb[70].mxu1 }
 0x178   :  { %2842 = vst.msk [vmem:[#allocation3 + $0x48] sm:$0xff] %vm2812_vm2, %v18075_v59  ;;  %3573 = vst.msk [vmem:[#allocation3 + $0x20] sm:$0xff] %vm2812_vm2, %v18075_v59  ;;  %3128 = vrot.lane.b32.xlu1 %v17686_v54, %s17096_s12  ;;  %3340 = vrot.lane.b32.xlu0 %v18075_v59, %s17097_s26  ;;  %v2672_v18 = vadd.f32 %v18018_v4, %v2612_v5  ;;  %v2613_v20 = vmax.f32 %v16128_v13, %v16200_v16  ;;  %v2398_v21 = vpop.f32.mrb[71].mxu1  ;;  %v1824_v22 = vpop.f32.mrb[71].mxu0 }
 0x179   :  { %2841 = vst.msk [vmem:[#allocation3 + $0x30] sm:$0xff] %vm2812_vm2, %v18077_v11  ;;  %3572 = vst.msk [vmem:[#allocation3 + $0x8] sm:$0xff] %vm2812_vm2, %v18077_v11  ;;  %v2670_v23 = vadd.f32 %v18018_v4, %v2610_v12  ;;  %v2611_v26 = vmax.f32 %v1824_v22, %v2398_v21 }
 0x17a   :  { %v2732_v31 = vmax.f32 %v2672_v18, 0.0  ;;  %v2673_v36 = vadd.f32 %v18018_v4, %v2613_v20 }
 0x17b   :  { %v2730_v37 = vmax.f32 %v2670_v23, 0.0  ;;  %v2671_v39 = vadd.f32 %v18018_v4, %v2611_v26 }
 0x17c   :  { %v2733_v42 = vmax.f32 %v2673_v36, 0.0  ;;  %3338 = vrot.lane.b32.xlu1 %v18077_v11, %s17097_s26  ;;  %2895 = vrot.lane.b32.xlu0 %v18077_v11, %s17098_s27 }
 0x17d   :  { %v2731_v43 = vmax.f32 %v2671_v39, 0.0  ;;  %v16131_v45 = vpop.f32.mrb[72].mxu0  ;;  %v16203_v46 = vpop.f32.mrb[72].mxu1 }
 0x17e   :  { %v18105_v47 = vpack.c.bf16 %v2733_v42, %v2732_v31  ;;  %v2616_v49 = vmax.f32 %v16131_v45, %v16203_v46  ;;  %v1837_v50 = vpop.f32.mrb[73].mxu0  ;;  %v2411_v51 = vpop.f32.mrb[73].mxu1 }
 0x17f   :  { %v18107_v53 = vpack.c.bf16 %v2731_v43, %v2730_v37  ;;  %v2614_v55 = vmax.f32 %v1837_v50, %v2411_v51  ;;  %v16132_v58 = vpop.f32.mrb[74].mxu0  ;;  %v16204_v61 = vpop.f32.mrb[74].mxu1 }
 0x180   :  { %3821 = vst.msk [vmem:[#allocation3 + $0x28] sm:$0xff] %vm2812_vm2, %v18105_v47  ;;  %2844 = vst.msk [vmem:[#allocation3 + $0x78] sm:$0xff] %vm2812_vm2, %v18105_v47  ;;  %v2676_v2 = vadd.f32 %v18018_v4, %v2616_v49  ;;  %v2617_v5 = vmax.f32 %v16132_v58, %v16204_v61  ;;  %v2414_v7 = vpop.f32.mrb[75].mxu1  ;;  %3134 = vrot.lane.b32.xlu1 %v17704_v10, %s17096_s12  ;;  %2897 = vrot.lane.b32.xlu0 %v18075_v59, %s17098_s27  ;;  %v1840_v9 = vpop.f32.mrb[75].mxu0 }
 0x181   :  { %3575 = vst.msk [vmem:[#allocation3 + $0x50] sm:$0xff] %vm2812_vm2, %v18105_v47  ;;  %3820 = vst.msk [vmem:[#allocation3 + $0x10] sm:$0xff] %vm2812_vm2, %v18107_v53  ;;  %v2674_v12 = vadd.f32 %v18018_v4, %v2614_v55  ;;  %v2615_v13 = vmax.f32 %v1840_v9, %v2414_v7 }
 0x182   :  { %2843 = vst.msk [vmem:[#allocation3 + $0x60] sm:$0xff] %vm2812_vm2, %v18107_v53  ;;  %3574 = vst.msk [vmem:[#allocation3 + $0x38] sm:$0xff] %vm2812_vm2, %v18107_v53  ;;  %v2736_v16 = vmax.f32 %v2676_v2, 0.0  ;;  %v2677_v18 = vadd.f32 %v18018_v4, %v2617_v5 }
 0x183   :  { %v2734_v20 = vmax.f32 %v2674_v12, 0.0  ;;  %v2675_v21 = vadd.f32 %v18018_v4, %v2615_v13 }
 0x184   :  { %v2737_v22 = vmax.f32 %v2677_v18, 0.0  ;;  %3132 = vrot.lane.b32.xlu0 %v17706_v14, %s17096_s12  ;;  %2901 = vrot.lane.b32.xlu1 %v18105_v47, %s17098_s27 }
 0x185   :  { %v2735_v23 = vmax.f32 %v2675_v21, 0.0  ;;  %v16207_v26 = vpop.f32.mrb[76].mxu1  ;;  %v16135_v31 = vpop.f32.mrb[76].mxu0 }
 0x186   :  { %v18133_v36 = vpack.c.bf16 %v2737_v22, %v2736_v16  ;;  %v2620_v37 = vmax.f32 %v16135_v31, %v16207_v26  ;;  %v1853_v39 = vpop.f32.mrb[77].mxu0  ;;  %v2427_v42 = vpop.f32.mrb[77].mxu1 }
 0x187   :  { %v18135_v43 = vpack.c.bf16 %v2735_v23, %v2734_v20  ;;  %v2618_v45 = vmax.f32 %v1853_v39, %v2427_v42  ;;  %v16136_v46 = vpop.f32.mrb[78].mxu0  ;;  %v16208_v49 = vpop.f32.mrb[78].mxu1 }
 0x188   :  { %3823 = vst.msk [vmem:[#allocation3 + $0x58] sm:$0xff] %vm2812_vm2, %v18133_v36  ;;  %2846 = vst.msk [vmem:[#allocation3 + $0xa8] sm:$0xff] %vm2812_vm2, %v18133_v36  ;;  %3342 = vrot.lane.b32.xlu0 %v18107_v53, %s17097_s26  ;;  %v2680_v50 = vadd.f32 %v18018_v4, %v2620_v37  ;;  %v2621_v51 = vmax.f32 %v16136_v46, %v16208_v49  ;;  %v2430_v55 = vpop.f32.mrb[79].mxu1  ;;  %v1856_v58 = vpop.f32.mrb[79].mxu0 }
 0x189   :  { %3577 = vst.msk [vmem:[#allocation3 + $0x80] sm:$0xff] %vm2812_vm2, %v18133_v36  ;;  %3822 = vst.msk [vmem:[#allocation3 + $0x40] sm:$0xff] %vm2812_vm2, %v18135_v43  ;;  %3346 = vrot.lane.b32.xlu1 %v18135_v43, %s17097_s26  ;;  %v2678_v61 = vadd.f32 %v18018_v4, %v2618_v45  ;;  %v2619_v2 = vmax.f32 %v1856_v58, %v2430_v55 }
 0x18a   :  { %2845 = vst.msk [vmem:[#allocation3 + $0x90] sm:$0xff] %vm2812_vm2, %v18135_v43  ;;  %3576 = vst.msk [vmem:[#allocation3 + $0x68] sm:$0xff] %vm2812_vm2, %v18135_v43  ;;  %v2740_v5 = vmax.f32 %v2680_v50, 0.0  ;;  %v2681_v7 = vadd.f32 %v18018_v4, %v2621_v51 }
 0x18b   :  { %v2738_v9 = vmax.f32 %v2678_v61, 0.0  ;;  %v2679_v12 = vadd.f32 %v18018_v4, %v2619_v2 }
 0x18c   :  { %v2741_v13 = vmax.f32 %v2681_v7, 0.0  ;;  %2899 = vrot.lane.b32.xlu0 %v18107_v53, %s17098_s27 }
 0x18d   :  { %v2739_v16 = vmax.f32 %v2679_v12, 0.0  ;;  %3138 = vrot.lane.b32.xlu1 %v17728_v34, %s17096_s12  ;;  %v16211_v18 = vpop.f32.mrb[80].mxu1  ;;  %v16139_v20 = vpop.f32.mrb[80].mxu0 }
 0x18e   :  { %v18161_v21 = vpack.c.bf16 %v2741_v13, %v2740_v5  ;;  %v2624_v22 = vmax.f32 %v16139_v20, %v16211_v18  ;;  %v1869_v23 = vpop.f32.mrb[81].mxu0  ;;  %v2443_v26 = vpop.f32.mrb[81].mxu1 }
 0x18f   :  { %v18163_v31 = vpack.c.bf16 %v2739_v16, %v2738_v9  ;;  %v2622_v37 = vmax.f32 %v1869_v23, %v2443_v26  ;;  %v16140_v39 = vpop.f32.mrb[82].mxu0  ;;  %v16212_v42 = vpop.f32.mrb[82].mxu1 }
 0x190   :  { %3825 = vst.msk [vmem:[#allocation3 + $0x88] sm:$0xff] %vm2812_vm2, %v18161_v21  ;;  %2848 = vst.msk [vmem:[#allocation3 + $0xd8] sm:$0xff] %vm2812_vm2, %v18161_v21  ;;  %3344 = vrot.lane.b32.xlu0 %v18105_v47, %s17097_s26  ;;  %v2684_v45 = vadd.f32 %v18018_v4, %v2624_v22  ;;  %v2625_v46 = vmax.f32 %v16140_v39, %v16212_v42  ;;  %v2446_v49 = vpop.f32.mrb[83].mxu1  ;;  %v1872_v50 = vpop.f32.mrb[83].mxu0 }
 0x191   :  { %3579 = vst.msk [vmem:[#allocation3 + $0xb0] sm:$0xff] %vm2812_vm2, %v18161_v21  ;;  %3824 = vst.msk [vmem:[#allocation3 + $0x70] sm:$0xff] %vm2812_vm2, %v18163_v31  ;;  %2905 = vrot.lane.b32.xlu1 %v18133_v36, %s17098_s27  ;;  %v2682_v51 = vadd.f32 %v18018_v4, %v2622_v37  ;;  %v2623_v55 = vmax.f32 %v1872_v50, %v2446_v49 }
 0x192   :  { %2847 = vst.msk [vmem:[#allocation3 + $0xc0] sm:$0xff] %vm2812_vm2, %v18163_v31  ;;  %3578 = vst.msk [vmem:[#allocation3 + $0x98] sm:$0xff] %vm2812_vm2, %v18163_v31  ;;  %v2744_v58 = vmax.f32 %v2684_v45, 0.0  ;;  %v2685_v61 = vadd.f32 %v18018_v4, %v2625_v46 }
 0x193   :  { %v2742_v2 = vmax.f32 %v2682_v51, 0.0  ;;  %v2683_v5 = vadd.f32 %v18018_v4, %v2623_v55 }
 0x194   :  { %3136 = vrot.lane.b32.xlu0 %v17730_v38, %s17096_s12  ;;  %v2745_v7 = vmax.f32 %v2685_v61, 0.0 }
 0x195   :  { %3350 = vrot.lane.b32.xlu1 %v18163_v31, %s17097_s26  ;;  %v2743_v9 = vmax.f32 %v2683_v5, 0.0  ;;  %v16215_v12 = vpop.f32.mrb[84].mxu1  ;;  %v16143_v13 = vpop.f32.mrb[84].mxu0 }
 0x196   :  { %v18189_v16 = vpack.c.bf16 %v2745_v7, %v2744_v58  ;;  %v2628_v18 = vmax.f32 %v16143_v13, %v16215_v12  ;;  %v1885_v20 = vpop.f32.mrb[85].mxu0  ;;  %v2459_v22 = vpop.f32.mrb[85].mxu1 }
 0x197   :  { %v18191_v23 = vpack.c.bf16 %v2743_v9, %v2742_v2  ;;  %v2626_v26 = vmax.f32 %v1885_v20, %v2459_v22  ;;  %v16144_v37 = vpop.f32.mrb[86].mxu0  ;;  %v16216_v39 = vpop.f32.mrb[86].mxu1 }
 0x198   :  { %3827 = vst.msk [vmem:[#allocation3 + $0xb8] sm:$0xff] %vm2812_vm2, %v18189_v16  ;;  %2850 = vst.msk [vmem:[#allocation3 + $0x108] sm:$0xff] %vm2812_vm2, %v18189_v16  ;;  %2903 = vrot.lane.b32.xlu0 %v18135_v43, %s17098_s27  ;;  %v2688_v42 = vadd.f32 %v18018_v4, %v2628_v18  ;;  %v2629_v45 = vmax.f32 %v16144_v37, %v16216_v39  ;;  %v2462_v46 = vpop.f32.mrb[87].mxu1  ;;  %v1888_v49 = vpop.f32.mrb[87].mxu0 }
 0x199   :  { %23071 = vst [vmem:[#allocation13_spill] sm:$0xff] %v18191_v23  ;;  %3581 = vst.msk [vmem:[#allocation3 + $0xe0] sm:$0xff] %vm2812_vm2, %v18189_v16  ;;  %3142 = vrot.lane.b32.xlu1 %v17758_v63, %s17096_s12  ;;  %v2686_v50 = vadd.f32 %v18018_v4, %v2626_v26  ;;  %v2627_v51 = vmax.f32 %v1888_v49, %v2462_v46 }
 0x19a   :  { %3826 = vst.msk [vmem:[#allocation3 + $0xa0] sm:$0xff] %vm2812_vm2, %v18191_v23  ;;  %2849 = vst.msk [vmem:[#allocation3 + $0xf0] sm:$0xff] %vm2812_vm2, %v18191_v23  ;;  %v2748_v55 = vmax.f32 %v2688_v42, 0.0  ;;  %v2689_v58 = vadd.f32 %v18018_v4, %v2629_v45 }
 0x19b   :  { %3580 = vst.msk [vmem:[#allocation3 + $0xc8] sm:$0xff] %vm2812_vm2, %v18191_v23  ;;  %v2746_v61 = vmax.f32 %v2686_v50, 0.0  ;;  %v2687_v2 = vadd.f32 %v18018_v4, %v2627_v51 }
 0x19c   :  { %3348 = vrot.lane.b32.xlu0 %v18133_v36, %s17097_s26  ;;  %v2749_v5 = vmax.f32 %v2689_v58, 0.0 }
 0x19d   :  { %2909 = vrot.lane.b32.xlu1 %v18161_v21, %s17098_s27  ;;  %v2747_v7 = vmax.f32 %v2687_v2, 0.0  ;;  %v16219_v9 = vpop.f32.mrb[88].mxu1  ;;  %v16147_v12 = vpop.f32.mrb[88].mxu0 }
 0x19e   :  { %v18217_v13 = vpack.c.bf16 %v2749_v5, %v2748_v55  ;;  %v2632_v18 = vmax.f32 %v16147_v12, %v16219_v9  ;;  %v1901_v20 = vpop.f32.mrb[89].mxu0  ;;  %v2475_v22 = vpop.f32.mrb[89].mxu1 }
 0x19f   :  { %v18219_v26 = vpack.c.bf16 %v2747_v7, %v2746_v61  ;;  %v2630_v37 = vmax.f32 %v1901_v20, %v2475_v22  ;;  %v16148_v39 = vpop.f32.mrb[90].mxu0  ;;  %v16220_v42 = vpop.f32.mrb[90].mxu1 }
 0x1a0   :  { %3140 = vrot.lane.b32.xlu0 %v17760_v3, %s17096_s12  ;;  %3829 = vst.msk [vmem:[#allocation3 + $0xe8] sm:$0xff] %vm2812_vm2, %v18217_v13  ;;  %2852 = vst.msk [vmem:[#allocation3 + $0x138] sm:$0xff] %vm2812_vm2, %v18217_v13  ;;  %v2692_v45 = vadd.f32 %v18018_v4, %v2632_v18  ;;  %v2633_v46 = vmax.f32 %v16148_v39, %v16220_v42  ;;  %v2478_v49 = vpop.f32.mrb[91].mxu1  ;;  %v1904_v50 = vpop.f32.mrb[91].mxu0 }
 0x1a1   :  { %23072 = vst [vmem:[#allocation14_spill] sm:$0xff] %v18219_v26  ;;  %3583 = vst.msk [vmem:[#allocation3 + $0x110] sm:$0xff] %vm2812_vm2, %v18217_v13  ;;  %3354 = vrot.lane.b32.xlu1 %v18191_v23, %s17097_s26  ;;  %v2690_v51 = vadd.f32 %v18018_v4, %v2630_v37  ;;  %v2631_v55 = vmax.f32 %v1904_v50, %v2478_v49 }
 0x1a2   :  { %3828 = vst.msk [vmem:[#allocation3 + $0xd0] sm:$0xff] %vm2812_vm2, %v18219_v26  ;;  %2851 = vst.msk [vmem:[#allocation3 + $0x120] sm:$0xff] %vm2812_vm2, %v18219_v26  ;;  %v2752_v58 = vmax.f32 %v2692_v45, 0.0  ;;  %v2693_v61 = vadd.f32 %v18018_v4, %v2633_v46 }
 0x1a3   :  { %3582 = vst.msk [vmem:[#allocation3 + $0xf8] sm:$0xff] %vm2812_vm2, %v18219_v26  ;;  %v2750_v2 = vmax.f32 %v2690_v51, 0.0  ;;  %v2691_v5 = vadd.f32 %v18018_v4, %v2631_v55 }
 0x1a4   :  { %2907 = vrot.lane.b32.xlu0 %v18163_v31, %s17098_s27  ;;  %v2753_v7 = vmax.f32 %v2693_v61, 0.0 }
 0x1a5   :  { %3146 = vrot.lane.b32.xlu1 %v17787_v28, %s17096_s12  ;;  %v2751_v9 = vmax.f32 %v2691_v5, 0.0  ;;  %v16223_v12 = vpop.f32.mrb[92].mxu1  ;;  %v16151_v18 = vpop.f32.mrb[92].mxu0 }
 0x1a6   :  { %v18245_v20 = vpack.c.bf16 %v2753_v7, %v2752_v58  ;;  %v2636_v22 = vmax.f32 %v16151_v18, %v16223_v12  ;;  %v1917_v37 = vpop.f32.mrb[93].mxu0  ;;  %v2491_v39 = vpop.f32.mrb[93].mxu1 }
 0x1a7   :  { %v18247_v42 = vpack.c.bf16 %v2751_v9, %v2750_v2  ;;  %v2634_v45 = vmax.f32 %v1917_v37, %v2491_v39  ;;  %v16152_v46 = vpop.f32.mrb[94].mxu0  ;;  %v16224_v49 = vpop.f32.mrb[94].mxu1 }
 0x1a8   :  { %23073 = vst [vmem:[#allocation15_spill] sm:$0xff] %v18245_v20  ;;  %3352 = vrot.lane.b32.xlu0 %v18161_v21, %s17097_s26  ;;  %3831 = vst.msk [vmem:[#allocation3 + $0x118] sm:$0xff] %vm2812_vm2, %v18245_v20  ;;  %v2696_v50 = vadd.f32 %v18018_v4, %v2636_v22  ;;  %v2637_v51 = vmax.f32 %v16152_v46, %v16224_v49  ;;  %v2494_v55 = vpop.f32.mrb[95].mxu1  ;;  %v1920_v58 = vpop.f32.mrb[95].mxu0 }
 0x1a9   :  { %23074 = vst [vmem:[#allocation16_spill] sm:$0xff] %v18247_v42  ;;  %2854 = vst.msk [vmem:[#allocation3 + $0x168] sm:$0xff] %vm2812_vm2, %v18245_v20  ;;  %2913 = vrot.lane.b32.xlu1 %v18189_v16, %s17098_s27  ;;  %v2694_v61 = vadd.f32 %v18018_v4, %v2634_v45  ;;  %v2635_v2 = vmax.f32 %v1920_v58, %v2494_v55 }
 0x1aa   :  { %3585 = vst.msk [vmem:[#allocation3 + $0x140] sm:$0xff] %vm2812_vm2, %v18245_v20  ;;  %3830 = vst.msk [vmem:[#allocation3 + $0x100] sm:$0xff] %vm2812_vm2, %v18247_v42  ;;  %v2756_v5 = vmax.f32 %v2696_v50, 0.0  ;;  %v2697_v7 = vadd.f32 %v18018_v4, %v2637_v51 }
 0x1ab   :  { %2853 = vst.msk [vmem:[#allocation3 + $0x150] sm:$0xff] %vm2812_vm2, %v18247_v42  ;;  %3584 = vst.msk [vmem:[#allocation3 + $0x128] sm:$0xff] %vm2812_vm2, %v18247_v42  ;;  %v2754_v9 = vmax.f32 %v2694_v61, 0.0  ;;  %v2695_v12 = vadd.f32 %v18018_v4, %v2635_v2 }
 0x1ac   :  { %3144 = vrot.lane.b32.xlu0 %v17789_v32, %s17096_s12  ;;  %v2757_v18 = vmax.f32 %v2697_v7, 0.0 }
 0x1ad   :  { %3358 = vrot.lane.b32.xlu1 %v18219_v26, %s17097_s26  ;;  %v2755_v22 = vmax.f32 %v2695_v12, 0.0  ;;  %v16227_v37 = vpop.f32.mrb[96].mxu1  ;;  %v16155_v39 = vpop.f32.mrb[96].mxu0 }
 0x1ae   :  { %v18273_v46 = vpack.c.bf16 %v2757_v18, %v2756_v5  ;;  %v2640_v45 = vmax.f32 %v16155_v39, %v16227_v37  ;;  %v1933_v49 = vpop.f32.mrb[97].mxu0  ;;  %v2507_v50 = vpop.f32.mrb[97].mxu1 }
 0x1af   :  { %v18275_v55 = vpack.c.bf16 %v2755_v22, %v2754_v9  ;;  %v2638_v51 = vmax.f32 %v1933_v49, %v2507_v50  ;;  %v16156_v58 = vpop.f32.mrb[98].mxu0  ;;  %v16228_v61 = vpop.f32.mrb[98].mxu1 }
 0x1b0   :  { %2911 = vrot.lane.b32.xlu0 %v18191_v23, %s17098_s27  ;;  %3833 = vst.msk [vmem:[#allocation3 + $0x148] sm:$0xff] %vm2812_vm2, %v18273_v46  ;;  %2856 = vst.msk [vmem:[#allocation3 + $0x198] sm:$0xff] %vm2812_vm2, %v18273_v46  ;;  %v2700_v2 = vadd.f32 %v18018_v4, %v2640_v45  ;;  %v2641_v5 = vmax.f32 %v16156_v58, %v16228_v61  ;;  %v2510_v7 = vpop.f32.mrb[99].mxu1  ;;  %v1936_v9 = vpop.f32.mrb[99].mxu0 }
 0x1b1   :  { %23075 = vst [vmem:[#allocation17_spill] sm:$0xff] %v18275_v55  ;;  %3587 = vst.msk [vmem:[#allocation3 + $0x170] sm:$0xff] %vm2812_vm2, %v18273_v46  ;;  %3150 = vrot.lane.b32.xlu1 %v17815_v57, %s17096_s12  ;;  %v2698_v12 = vadd.f32 %v18018_v4, %v2638_v51  ;;  %v2639_v18 = vmax.f32 %v1936_v9, %v2510_v7 }
 0x1b2   :  { %3832 = vst.msk [vmem:[#allocation3 + $0x130] sm:$0xff] %vm2812_vm2, %v18275_v55  ;;  %2855 = vst.msk [vmem:[#allocation3 + $0x180] sm:$0xff] %vm2812_vm2, %v18275_v55  ;;  %v2760_v22 = vmax.f32 %v2700_v2, 0.0  ;;  %v2701_v37 = vadd.f32 %v18018_v4, %v2641_v5 }
 0x1b3   :  { %3586 = vst.msk [vmem:[#allocation3 + $0x158] sm:$0xff] %vm2812_vm2, %v18275_v55  ;;  %v2758_v39 = vmax.f32 %v2698_v12, 0.0  ;;  %v2699_v45 = vadd.f32 %v18018_v4, %v2639_v18 }
 0x1b4   :  { %3356 = vrot.lane.b32.xlu0 %v18189_v16, %s17097_s26  ;;  %v2761_v49 = vmax.f32 %v2701_v37, 0.0 }
 0x1b5   :  { %2917 = vrot.lane.b32.xlu1 %v18217_v13, %s17098_s27  ;;  %v2759_v50 = vmax.f32 %v2699_v45, 0.0  ;;  %v16231_v58 = vpop.f32.mrb[100].mxu1  ;;  %v16159_v61 = vpop.f32.mrb[100].mxu0 }
 0x1b6   :  { %v18301_v8 = vpack.c.bf16 %v2761_v49, %v2760_v22  ;;  %v2523_v51 = vpop.f32.mrb[101].mxu1  ;;  %v2644_v7 = vmax.f32 %v16159_v61, %v16231_v58  ;;  %v1949_v2 = vpop.f32.mrb[101].mxu0 }
 0x1b7   :  { %v18303_v9 = vpack.c.bf16 %v2759_v50, %v2758_v39  ;;  %v16232_v5 = vpop.f32.mrb[102].mxu1  ;;  %v2642_v12 = vmax.f32 %v1949_v2, %v2523_v51  ;;  %v16160_v18 = vpop.f32.mrb[102].mxu0 }
 0x1b8   :  { %3148 = vrot.lane.b32.xlu0 %v17817_v62, %s17096_s12  ;;  %3835 = vst.msk [vmem:[#allocation3 + $0x178] sm:$0xff] %vm2812_vm2, %v18301_v8  ;;  %2858 = vst.msk [vmem:[#allocation3 + $0x1c8] sm:$0xff] %vm2812_vm2, %v18301_v8  ;;  %v2526_v22 = vpop.f32.mrb[103].mxu1  ;;  %v2704_v37 = vadd.f32 %v18018_v4, %v2644_v7  ;;  %v2645_v39 = vmax.f32 %v16160_v18, %v16232_v5  ;;  %v1952_v45 = vpop.f32.mrb[103].mxu0 }
 0x1b9   :  { %3589 = vst.msk [vmem:[#allocation3 + $0x1a0] sm:$0xff] %vm2812_vm2, %v18301_v8  ;;  %3362 = vrot.lane.b32.xlu1 %v18247_v42, %s17097_s26  ;;  %3834 = vst.msk [vmem:[#allocation3 + $0x160] sm:$0xff] %vm2812_vm2, %v18303_v9  ;;  %v2702_v49 = vadd.f32 %v18018_v4, %v2642_v12  ;;  %v2643_v50 = vmax.f32 %v1952_v45, %v2526_v22 }
 0x1ba   :  { %2857 = vst.msk [vmem:[#allocation3 + $0x1b0] sm:$0xff] %vm2812_vm2, %v18303_v9  ;;  %3588 = vst.msk [vmem:[#allocation3 + $0x188] sm:$0xff] %vm2812_vm2, %v18303_v9  ;;  %v2764_v58 = vmax.f32 %v2704_v37, 0.0  ;;  %v2705_v61 = vadd.f32 %v18018_v4, %v2645_v39 }
 0x1bb   :  { %v2762_v51 = vmax.f32 %v2702_v49, 0.0  ;;  %v2703_v7 = vadd.f32 %v18018_v4, %v2643_v50 }
 0x1bc   :  { %2915 = vrot.lane.b32.xlu0 %v18219_v26, %s17098_s27  ;;  %v2765_v2 = vmax.f32 %v2705_v61, 0.0 }
 0x1bd   :  { %3154 = vrot.lane.b32.xlu1 %v17842_v24, %s17096_s12  ;;  %v16235_v5 = vpop.f32.mrb[104].mxu1  ;;  %v2763_v18 = vmax.f32 %v2703_v7, 0.0  ;;  %v16163_v33 = vpop.f32.mrb[104].mxu0 }
 0x1be   :  { %v2539_v57 = vpop.f32.mrb[105].mxu1  ;;  %v18329_v23 = vpack.c.bf16 %v2765_v2, %v2764_v58  ;;  %v2648_v12 = vmax.f32 %v16163_v33, %v16235_v5  ;;  %v1965_v22 = vpop.f32.mrb[105].mxu0 }
 0x1bf   :  { %v16236_v37 = vpop.f32.mrb[106].mxu1  ;;  %v18331_v39 = vpack.c.bf16 %v2763_v18, %v2762_v51  ;;  %v2646_v45 = vmax.f32 %v1965_v22, %v2539_v57  ;;  %v16164_v49 = vpop.f32.mrb[106].mxu0 }
 0x1c0   :  { %3360 = vrot.lane.b32.xlu0 %v18217_v13, %s17097_s26  ;;  %3837 = vst.msk [vmem:[#allocation3 + $0x1a8] sm:$0xff] %vm2812_vm2, %v18329_v23  ;;  %2860 = vst.msk [vmem:[#allocation3 + $0x1f8] sm:$0xff] %vm2812_vm2, %v18329_v23  ;;  %v2542_v50 = vpop.f32.mrb[107].mxu1  ;;  %v2708_v33 = vadd.f32 %v18018_v4, %v2648_v12  ;;  %v2649_v58 = vmax.f32 %v16164_v49, %v16236_v37  ;;  %v1968_v61 = vpop.f32.mrb[107].mxu0 }
 0x1c1   :  { %3591 = vst.msk [vmem:[#allocation3 + $0x1d0] sm:$0xff] %vm2812_vm2, %v18329_v23  ;;  %2921 = vrot.lane.b32.xlu1 %v18245_v20, %s17098_s27  ;;  %3836 = vst.msk [vmem:[#allocation3 + $0x190] sm:$0xff] %vm2812_vm2, %v18331_v39  ;;  %v2706_v57 = vadd.f32 %v18018_v4, %v2646_v45  ;;  %v2647_v51 = vmax.f32 %v1968_v61, %v2542_v50 }
 0x1c2   :  { %2859 = vst.msk [vmem:[#allocation3 + $0x1e0] sm:$0xff] %vm2812_vm2, %v18331_v39  ;;  %3590 = vst.msk [vmem:[#allocation3 + $0x1b8] sm:$0xff] %vm2812_vm2, %v18331_v39  ;;  %v2768_v7 = vmax.f32 %v2708_v33, 0.0  ;;  %v2709_v2 = vadd.f32 %v18018_v4, %v2649_v58 }
 0x1c3   :  { %v2766_v5 = vmax.f32 %v2706_v57, 0.0  ;;  %v2707_v18 = vadd.f32 %v18018_v4, %v2647_v51 }
 0x1c4   :  { %3152 = vrot.lane.b32.xlu0 %v17844_v30, %s17096_s12  ;;  %v2769_v12 = vmax.f32 %v2709_v2, 0.0 }
 0x1c5   :  { %3366 = vrot.lane.b32.xlu1 %v18275_v55, %s17097_s26  ;;  %v16239_v22 = vpop.f32.mrb[108].mxu1  ;;  %v2767_v37 = vmax.f32 %v2707_v18, 0.0  ;;  %v16167_v49 = vpop.f32.mrb[108].mxu0 }
 0x1c6   :  { %v2555_v24 = vpop.f32.mrb[109].mxu1  ;;  %v18357_v26 = vpack.c.bf16 %v2769_v12, %v2768_v7  ;;  %v2652_v45 = vmax.f32 %v16167_v49, %v16239_v22  ;;  %v1981_v50 = vpop.f32.mrb[109].mxu0 }
 0x1c7   :  { %v16240_v33 = vpop.f32.mrb[110].mxu1  ;;  %v18359_v58 = vpack.c.bf16 %v2767_v37, %v2766_v5  ;;  %v2650_v61 = vmax.f32 %v1981_v50, %v2555_v24  ;;  %v16168_v57 = vpop.f32.mrb[110].mxu0 }
 0x1c8   :  { %2919 = vrot.lane.b32.xlu0 %v18247_v42, %s17098_s27  ;;  %v2558_v51 = vpop.f32.mrb[111].mxu1  ;;  %3839 = vst.msk [vmem:[#allocation3 + $0x1d8] sm:$0xff] %vm2812_vm2, %v18357_v26  ;;  %2862 = vst.msk [vmem:[#allocation3 + $0x228] sm:$0xff] %vm2812_vm2, %v18357_v26  ;;  %v2712_v7 = vadd.f32 %v18018_v4, %v2652_v45  ;;  %v2653_v2 = vmax.f32 %v16168_v57, %v16240_v33  ;;  %v1984_v5 = vpop.f32.mrb[111].mxu0 }
 0x1c9   :  { %3593 = vst.msk [vmem:[#allocation3 + $0x200] sm:$0xff] %vm2812_vm2, %v18357_v26  ;;  %3158 = vrot.lane.b32.xlu1 %v17869_v56, %s17096_s12  ;;  %3838 = vst.msk [vmem:[#allocation3 + $0x1c0] sm:$0xff] %vm2812_vm2, %v18359_v58  ;;  %v2710_v24 = vadd.f32 %v18018_v4, %v2650_v61  ;;  %v2651_v18 = vmax.f32 %v1984_v5, %v2558_v51 }
 0x1ca   :  { %2861 = vst.msk [vmem:[#allocation3 + $0x210] sm:$0xff] %vm2812_vm2, %v18359_v58  ;;  %3592 = vst.msk [vmem:[#allocation3 + $0x1e8] sm:$0xff] %vm2812_vm2, %v18359_v58  ;;  %v2772_v12 = vmax.f32 %v2712_v7, 0.0  ;;  %v2713_v22 = vadd.f32 %v18018_v4, %v2653_v2 }
 0x1cb   :  { %v2770_v37 = vmax.f32 %v2710_v24, 0.0  ;;  %v2711_v49 = vadd.f32 %v18018_v4, %v2651_v18 }
 0x1cc   :  { %3364 = vrot.lane.b32.xlu0 %v18245_v20, %s17097_s26  ;;  %v2773_v45 = vmax.f32 %v2713_v22, 0.0 }
 0x1cd   :  { %2925 = vrot.lane.b32.xlu1 %v18273_v46, %s17098_s27  ;;  %v16243_v50 = vpop.f32.mrb[112].mxu1  ;;  %v2771_v33 = vmax.f32 %v2711_v49, 0.0  ;;  %v16171_v57 = vpop.f32.mrb[112].mxu0 }
 0x1ce   :  { %v2571_v56 = vpop.f32.mrb[113].mxu1  ;;  %v18385_v42 = vpack.c.bf16 %v2773_v45, %v2772_v12  ;;  %v2656_v61 = vmax.f32 %v16171_v57, %v16243_v50  ;;  %v1997_v51 = vpop.f32.mrb[113].mxu0 }
 0x1cf   :  { %v16244_v7 = vpop.f32.mrb[114].mxu1  ;;  %v18387_v2 = vpack.c.bf16 %v2771_v33, %v2770_v37  ;;  %v2654_v5 = vmax.f32 %v1997_v51, %v2571_v56  ;;  %v16172_v24 = vpop.f32.mrb[114].mxu0 }
 0x1d0   :  { %3156 = vrot.lane.b32.xlu0 %v17871_v0, %s17096_s12  ;;  %v2574_v18 = vpop.f32.mrb[115].mxu1  ;;  %3841 = vst.msk [vmem:[#allocation3 + $0x208] sm:$0xff] %vm2812_vm2, %v18385_v42  ;;  %2864 = vst.msk [vmem:[#allocation3 + $0x258] sm:$0xff] %vm2812_vm2, %v18385_v42  ;;  %v2716_v12 = vadd.f32 %v18018_v4, %v2656_v61  ;;  %v2657_v22 = vmax.f32 %v16172_v24, %v16244_v7  ;;  %v2000_v37 = vpop.f32.mrb[115].mxu0 }
 0x1d1   :  { %3595 = vst.msk [vmem:[#allocation3 + $0x230] sm:$0xff] %vm2812_vm2, %v18385_v42  ;;  %3370 = vrot.lane.b32.xlu1 %v18303_v9, %s17097_s26  ;;  %3840 = vst.msk [vmem:[#allocation3 + $0x1f0] sm:$0xff] %vm2812_vm2, %v18387_v2  ;;  %v2714_v56 = vadd.f32 %v18018_v4, %v2654_v5  ;;  %v2655_v49 = vmax.f32 %v2000_v37, %v2574_v18 }
 0x1d2   :  { %2863 = vst.msk [vmem:[#allocation3 + $0x240] sm:$0xff] %vm2812_vm2, %v18387_v2  ;;  %3594 = vst.msk [vmem:[#allocation3 + $0x218] sm:$0xff] %vm2812_vm2, %v18387_v2  ;;  %v2776_v45 = vmax.f32 %v2716_v12, 0.0  ;;  %v2717_v50 = vadd.f32 %v18018_v4, %v2657_v22 }
 0x1d3   :  { %v2774_v33 = vmax.f32 %v2714_v56, 0.0  ;;  %v2715_v57 = vadd.f32 %v18018_v4, %v2655_v49 }
 0x1d4   :  { %2923 = vrot.lane.b32.xlu0 %v18275_v55, %s17098_s27  ;;  %v2777_v61 = vmax.f32 %v2717_v50, 0.0 }
 0x1d5   :  { %3162 = vrot.lane.b32.xlu1 %v17896_v27, %s17096_s12  ;;  %v16247_v51 = vpop.f32.mrb[116].mxu1  ;;  %v2775_v7 = vmax.f32 %v2715_v57, 0.0  ;;  %v16175_v24 = vpop.f32.mrb[116].mxu0 }
 0x1d6   :  { %v2587_v0 = vpop.f32.mrb[117].mxu1  ;;  %v18413_v20 = vpack.c.bf16 %v2777_v61, %v2776_v45  ;;  %v2660_v5 = vmax.f32 %v16175_v24, %v16247_v51  ;;  %v2013_v18 = vpop.f32.mrb[117].mxu0 }
 0x1d7   :  { %v16248_v12 = vpop.f32.mrb[118].mxu1  ;;  %v18415_v22 = vpack.c.bf16 %v2775_v7, %v2774_v33  ;;  %v2658_v37 = vmax.f32 %v2013_v18, %v2587_v0  ;;  %v16176_v56 = vpop.f32.mrb[118].mxu0 }
 0x1d8   :  { %23076 = vst [vmem:[#allocation18_spill] sm:$0xff] %v18413_v20  ;;  %3368 = vrot.lane.b32.xlu0 %v18273_v46, %s17097_s26  ;;  %v2590_v49 = vpop.f32.mrb[119].mxu1  ;;  %3843 = vst.msk [vmem:[#allocation3 + $0x238] sm:$0xff] %vm2812_vm2, %v18413_v20  ;;  %v2720_v45 = vadd.f32 %v18018_v4, %v2660_v5  ;;  %v2661_v50 = vmax.f32 %v16176_v56, %v16248_v12  ;;  %v2016_v57 = vpop.f32.mrb[119].mxu0 }
 0x1d9   :  { %23077 = vst [vmem:[#allocation19_spill] sm:$0xff] %v18415_v22  ;;  %3597 = vst.msk [vmem:[#allocation3 + $0x260] sm:$0xff] %vm2812_vm2, %v18413_v20  ;;  %2929 = vrot.lane.b32.xlu1 %v18301_v8, %s17098_s27  ;;  %v2718_v0 = vadd.f32 %v18018_v4, %v2658_v37  ;;  %v2659_v33 = vmax.f32 %v2016_v57, %v2590_v49  ;;  %v3127_v61 = vpop.permute.xlu1 %3126 }
 0x1da   :  { %3842 = vst.msk [vmem:[#allocation3 + $0x220] sm:$0xff] %vm2812_vm2, %v18415_v22  ;;  %3596 = vst.msk [vmem:[#allocation3 + $0x248] sm:$0xff] %vm2812_vm2, %v18415_v22  ;;  %v2780_v51 = vmax.f32 %v2720_v45, 0.0  ;;  %v2721_v7 = vadd.f32 %v18018_v4, %v2661_v50 }
 0x1db   :  { %v2778_v24 = vmax.f32 %v2718_v0, 0.0  ;;  %v2719_v5 = vadd.f32 %v18018_v4, %v2659_v33 }
 0x1dc   :  { %3160 = vrot.lane.b32.xlu0 %v17898_v35, %s17096_s12  ;;  %v2781_v18 = vmax.f32 %v2721_v7, 0.0 }
 0x1dd   :  { %3166 = vrot.lane.b32.xlu1 %v17923_v1, %s17096_s12  ;;  %v2779_v12 = vmax.f32 %v2719_v5, 0.0  ;;  %v3131_v56 = vpop.permute.xlu1 %3130 }
 0x1de   :  { %v2811_v27 = vpack.c.bf16 %v2781_v18, %v2780_v51 }
 0x1df   :  { %v18437_v55 = vpack.c.bf16 %v2779_v12, %v2778_v24 }
 0x1e0   :  { %3372 = vrot.lane.b32.xlu0 %v18301_v8, %s17097_s26  ;;  %3845 = vst.msk [vmem:[#allocation3 + $0x268] sm:$0xff] %vm2812_vm2, %v2811_v27 }
 0x1e1   :  { %23078 = vst [vmem:[#allocation20_spill] sm:$0xff] %v18437_v55  ;;  %3374 = vrot.lane.b32.xlu1 %v18331_v39, %s17097_s26  ;;  %3844 = vst.msk [vmem:[#allocation3 + $0x250] sm:$0xff] %vm2812_vm2, %v18437_v55 }
 0x1e2   :  { %v3337_v4 = vpop.permute.xlu1 %3336 }
 0x1e3   :  { %v2892_v37 = vpop.permute.xlu0 %2891 }
 0x1e4   :  { %2970 = vst.msk [vmem:[#allocation2] sm:$0xff] %vm2969_vm3, %v2892_v37  ;;  %2927 = vrot.lane.b32.xlu0 %v18303_v9, %s17098_s27 }
 0x1e5   :  { %3205 = vst.msk [vmem:[#allocation2] sm:$0xff] %vm3204_vm4, %v3127_v61  ;;  %v18450_v49 = vpop.f32.mrb[120].mxu1  ;;  %2933 = vrot.lane.b32.xlu1 %v18329_v23, %s17098_s27 }
 0x1e6   :  { %3415 = vst.msk [vmem:[#allocation2] sm:$0xff] %vm3414_vm5, %v3337_v4  ;;  %v18455_v27 = vpop.f32.mrb[121].mxu1  ;;  %v2894_v45 = vpop.permute.xlu1 %2893 }
 0x1e7   :  { %2971 = vst.msk [vmem:[#allocation2 + $0x18] sm:$0xff] %vm2969_vm3, %v2894_v45  ;;  %v18458_v50 = vpop.f32.mrb[122].mxu1 }
 0x1e8   :  { %v18460_v57 = vpop.f32.mrb[123].mxu1  ;;  %3164 = vrot.lane.b32.xlu0 %v17925_v6, %s17096_s12 }
 0x1e9   :  { %3170 = vrot.lane.b32.xlu1 %v17953_v40, %s17096_s12 }
 0x1ea   :  { %v3129_v0 = vpop.permute.xlu1 %3128  ;;  %v3341_v33 = vpop.permute.xlu0 %3340 }
 0x1eb   :  { %3206 = vst.msk [vmem:[#allocation2 + $0x18] sm:$0xff] %vm3204_vm4, %v3129_v0 }
 0x1ec   :  { %3376 = vrot.lane.b32.xlu0 %v18329_v23, %s17097_s26 }
 0x1ed   :  { %v18469_v61 = vpop.f32.mrb[124].mxu1  ;;  %2937 = vrot.lane.b32.xlu1 %v18357_v26, %s17098_s27 }
 0x1ee   :  { %v18473_v51 = vpop.f32.mrb[125].mxu1  ;;  %v3339_v7 = vpop.permute.xlu1 %3338 }
 0x1ef   :  { %3416 = vst.msk [vmem:[#allocation2 + $0x18] sm:$0xff] %vm3414_vm5, %v3339_v7  ;;  %v2896_v24 = vpop.permute.xlu0 %2895  ;;  %v18476_v5 = vpop.f32.mrb[126].mxu1 }
 0x1f0   :  { %2972 = vst.msk [vmem:[#allocation2 + $0x30] sm:$0xff] %vm2969_vm3, %v2896_v24  ;;  %3605 = vst.msk [vmem:[#allocation2 + $0x8] sm:$0xff] %vm2969_vm3, %v2896_v24  ;;  %v18480_v18 = vpop.f32.mrb[127].mxu1  ;;  %3168 = vrot.lane.b32.xlu0 %v17955_v44, %s17096_s12 }
 0x1f1   :  { %3207 = vst.msk [vmem:[#allocation2 + $0x30] sm:$0xff] %vm3204_vm4, %v3131_v56  ;;  %3670 = vst.msk [vmem:[#allocation2 + $0x8] sm:$0xff] %vm3204_vm4, %v3131_v56  ;;  %3378 = vrot.lane.b32.xlu1 %v18359_v58, %s17097_s26 }
 0x1f2   :  { %3417 = vst.msk [vmem:[#allocation2 + $0x30] sm:$0xff] %vm3414_vm5, %v3341_v33  ;;  %3735 = vst.msk [vmem:[#allocation2 + $0x8] sm:$0xff] %vm3414_vm5, %v3341_v33  ;;  %v3135_v12 = vpop.permute.xlu1 %3134 }
 0x1f3   :  { %v2898_v4 = vpop.permute.xlu0 %2897 }
 0x1f4   :  { %2973 = vst.msk [vmem:[#allocation2 + $0x48] sm:$0xff] %vm2969_vm3, %v2898_v4  ;;  %3606 = vst.msk [vmem:[#allocation2 + $0x20] sm:$0xff] %vm2969_vm3, %v2898_v4  ;;  %2931 = vrot.lane.b32.xlu0 %v18331_v39, %s17098_s27  ;;  %v3846_v4 = vld [vmem:[#allocation2] sm:$0xff] }
 0x1f5   :  { %v18494_v37 = vpop.f32.mrb[128].mxu1  ;;  %3174 = vrot.lane.b32.xlu1 %v17980_v15, %s17096_s12 }
 0x1f6   :  { %23079 = vst [vmem:[#allocation21_spill] sm:$0xff] %v18494_v37  ;;  %v18498_v56 = vpop.f32.mrb[129].mxu1  ;;  %v2902_v45 = vpop.permute.xlu1 %2901 }
 0x1f7   :  { %v3133_v0 = vpop.permute.xlu0 %3132  ;;  %v18500_v7 = vpop.f32.mrb[130].mxu1  ;;  %2975 = vst.msk [vmem:[#allocation2 + $0x78] sm:$0xff] %vm2969_vm3, %v2902_v45  ;;  %3608 = vst.msk [vmem:[#allocation2 + $0x50] sm:$0xff] %vm2969_vm3, %v2902_v45 }
 0x1f8   :  { %23080 = vst [vmem:[#allocation22_spill] sm:$0xff] %v18500_v7  ;;  %3208 = vst.msk [vmem:[#allocation2 + $0x48] sm:$0xff] %vm3204_vm4, %v3133_v0  ;;  %v18506_v33 = vpop.f32.mrb[131].mxu1  ;;  %3172 = vrot.lane.b32.xlu0 %v17982_v19, %s17096_s12 }
 0x1f9   :  { %3671 = vst.msk [vmem:[#allocation2 + $0x20] sm:$0xff] %vm3204_vm4, %v3133_v0  ;;  %23081 = vst [vmem:[#allocation23_spill] sm:$0xff] %v18506_v33  ;;  %v3847_v24 = vld [vmem:[#allocation2 + $0x8] sm:$0xff]  ;;  %3236 = vrot.lane.b32.xlu1 %v18075_v59, %s17096_s12 }
 0x1fa   :  { %4178 = vmatprep.mubr.bf16.mxu0 %v3847_v24  ;;  %v17079_v59 = vld [vmem:[%s23028_s3 + $0x88] sm:$0xff]  }
 0x1fb   :  { %4179 = vmatmul.mubr.bf16.vlgmr.msra.gmra.mrb[120].mxu0 %v3846_v4  ;;  %v3343_v7 = vpop.permute.xlu0 %3342  ;;  %v3347_v37 = vpop.permute.xlu1 %3346 }
 0x1fc   :  { %3418 = vst.msk [vmem:[#allocation2 + $0x48] sm:$0xff] %vm3414_vm5, %v3343_v7  ;;  %3736 = vst.msk [vmem:[#allocation2 + $0x20] sm:$0xff] %vm3414_vm5, %v3343_v7  ;;  %3380 = vrot.lane.b32.xlu0 %v18357_v26, %s17097_s26  ;;  %16306 = vmatpush3.bf16.msra.mxu0 %v18096_v29 }
 0x1fd   :  { %2941 = vrot.lane.b32.xlu1 %v18385_v42, %s17098_s27  ;;  %16307 = vmatprep.subr.bf16.mxu0 %v17079_v59 }
 0x1fe   :  { %v18517_v45 = vpop.f32.mrb[132].mxu1 }
 0x1ff   :  { %23082 = vst [vmem:[#allocation24_spill] sm:$0xff] %v18517_v45  ;;  %v18524_v0 = vpop.f32.mrb[133].mxu1  ;;  %v2900_v24 = vpop.permute.xlu0 %2899 }
 0x200   :  { %23083 = vst [vmem:[#allocation25_spill] sm:$0xff] %v18524_v0  ;;  %v18526_v4 = vpop.f32.mrb[134].mxu1  ;;  %2974 = vst.msk [vmem:[#allocation2 + $0x60] sm:$0xff] %vm2969_vm3, %v2900_v24  ;;  %v3139_v29 = vpop.permute.xlu1 %3138  ;;  %3176 = vrot.lane.b32.xlu0 %v18009_v60, %s17096_s12  ;;  %16308 = vmatpush3.bf16.msra.mxu0 %v17079_v59 }
 0x201   :  { %23084 = vst [vmem:[#allocation26_spill] sm:$0xff] %v18526_v4  ;;  %3607 = vst.msk [vmem:[#allocation2 + $0x38] sm:$0xff] %vm2969_vm3, %v2900_v24  ;;  %v18530_v7 = vpop.f32.mrb[135].mxu1  ;;  %3382 = vrot.lane.b32.xlu1 %v18387_v2, %s17097_s26 }
 0x202   :  { %23085 = vst [vmem:[#allocation27_spill] sm:$0xff] %v18530_v7  ;;  %3209 = vst.msk [vmem:[#allocation2 + $0x60] sm:$0xff] %vm3204_vm4, %v3135_v12  ;;  %v3849_v7 = vld [vmem:[#allocation2 + $0x18] sm:$0xff] }
 0x203   :  { %3672 = vst.msk [vmem:[#allocation2 + $0x38] sm:$0xff] %vm3204_vm4, %v3135_v12  ;;  %v3345_v45 = vpop.permute.xlu0 %3344  ;;  %v3850_v4 = vld [vmem:[#allocation2 + $0x20] sm:$0xff] }
 0x204   :  { %3419 = vst.msk [vmem:[#allocation2 + $0x60] sm:$0xff] %vm3414_vm5, %v3345_v45  ;;  %3737 = vst.msk [vmem:[#allocation2 + $0x38] sm:$0xff] %vm3414_vm5, %v3345_v45  ;;  %4186 = vmatprep.mubr.bf16.mxu0 %v3850_v4  ;;  %v2906_v24 = vpop.permute.xlu1 %2905  ;;  %2935 = vrot.lane.b32.xlu0 %v18359_v58, %s17098_s27 }
 0x205   :  { %2977 = vst.msk [vmem:[#allocation2 + $0xa8] sm:$0xff] %vm2969_vm3, %v2906_v24  ;;  %3610 = vst.msk [vmem:[#allocation2 + $0x80] sm:$0xff] %vm2969_vm3, %v2906_v24  ;;  %4187 = vmatmul.mubr.bf16.gmra.mrb[124].mxu0 %v3849_v7  ;;  %3232 = vrot.lane.b32.xlu1 %v18054_v17, %s17096_s12  ;;  %v3852_v24 = vld [vmem:[#allocation2 + $0x30] sm:$0xff] }
 0x207   :  { %v18544_v12 = vpop.f32.mrb[136].mxu1  ;;  %v3137_v0 = vpop.permute.xlu0 %3136 }
 0x208   :  { %23086 = vst [vmem:[#allocation28_spill] sm:$0xff] %v18544_v12  ;;  %v18548_v59 = vpop.f32.mrb[137].mxu1  ;;  %3210 = vst.msk [vmem:[#allocation2 + $0x78] sm:$0xff] %vm3204_vm4, %v3137_v0  ;;  %v3351_v4 = vpop.permute.xlu1 %3350  ;;  %3026 = vrot.lane.b32.xlu0 %v17678_v48, %s17098_s27 }
 0x209   :  { %v18550_v45 = vpop.f32.mrb[138].mxu1  ;;  %3673 = vst.msk [vmem:[#allocation2 + $0x50] sm:$0xff] %vm3204_vm4, %v3137_v0  ;;  %3028 = vrot.lane.b32.xlu1 %v17706_v14, %s17098_s27 }
 0x20a   :  { %23087 = vst [vmem:[#allocation29_spill] sm:$0xff] %v18550_v45  ;;  %v18554_v33 = vpop.f32.mrb[139].mxu1  ;;  %3420 = vst.msk [vmem:[#allocation2 + $0x78] sm:$0xff] %vm3414_vm5, %v3347_v37 }
 0x20b   :  { %23088 = vst [vmem:[#allocation30_spill] sm:$0xff] %v18554_v33  ;;  %3738 = vst.msk [vmem:[#allocation2 + $0x50] sm:$0xff] %vm3414_vm5, %v3347_v37  ;;  %v2904_v17 = vpop.permute.xlu0 %2903  ;;  %v3853_v7 = vld [vmem:[#allocation2 + $0x38] sm:$0xff] }
 0x20c   :  { %2976 = vst.msk [vmem:[#allocation2 + $0x90] sm:$0xff] %vm2969_vm3, %v2904_v17  ;;  %3609 = vst.msk [vmem:[#allocation2 + $0x68] sm:$0xff] %vm2969_vm3, %v2904_v17  ;;  %4194 = vmatprep.mubr.bf16.mxu0 %v3853_v7  ;;  %v3143_v0 = vpop.permute.xlu1 %3142  ;;  %3022 = vrot.lane.b32.xlu0 %v17651_v25, %s17098_s27 }
 0x20d   :  { %3211 = vst.msk [vmem:[#allocation2 + $0x90] sm:$0xff] %vm3204_vm4, %v3139_v29  ;;  %3674 = vst.msk [vmem:[#allocation2 + $0x68] sm:$0xff] %vm3204_vm4, %v3139_v29  ;;  %4195 = vmatmul.mubr.bf16.gmra.mrb[128].mxu0 %v3852_v24  ;;  %3729 = vrot.lane.b32.xlu1 %v18413_v20, %s17097_s26 }
 0x20f   :  { %v18568_v37 = vpop.f32.mrb[140].mxu1  ;;  %v3349_v12 = vpop.permute.xlu0 %3348 }
 0x210   :  { %23089 = vst [vmem:[#allocation31_spill] sm:$0xff] %v18568_v37  ;;  %v18572_v45 = vpop.f32.mrb[141].mxu1  ;;  %3421 = vst.msk [vmem:[#allocation2 + $0x90] sm:$0xff] %vm3414_vm5, %v3349_v12  ;;  %v2910_v25 = vpop.permute.xlu1 %2909  ;;  %3384 = vrot.lane.b32.xlu0 %v18385_v42, %s17097_s26 }
 0x211   :  { %23090 = vst [vmem:[#allocation32_spill] sm:$0xff] %v18572_v45  ;;  %v18574_v17 = vpop.f32.mrb[142].mxu1  ;;  %3739 = vst.msk [vmem:[#allocation2 + $0x68] sm:$0xff] %vm3414_vm5, %v3349_v12  ;;  %3386 = vrot.lane.b32.xlu1 %v18415_v22, %s17097_s26 }
 0x212   :  { %23091 = vst [vmem:[#allocation33_spill] sm:$0xff] %v18574_v17  ;;  %v18578_v7 = vpop.f32.mrb[143].mxu1  ;;  %v3856_v29 = vld [vmem:[#allocation2 + $0x50] sm:$0xff]  ;;  %2979 = vst.msk [vmem:[#allocation2 + $0xd8] sm:$0xff] %vm2969_vm3, %v2910_v25  ;;  %v3855_v17 = vld [vmem:[#allocation2 + $0x48] sm:$0xff] }
 0x213   :  { %23092 = vst [vmem:[#allocation34_spill] sm:$0xff] %v18578_v7  ;;  %3612 = vst.msk [vmem:[#allocation2 + $0xb0] sm:$0xff] %vm2969_vm3, %v2910_v25  ;;  %4202 = vmatprep.mubr.bf16.mxu0 %v3856_v29  ;;  %v3141_v24 = vpop.permute.xlu0 %3140 }
 0x214   :  { %3212 = vst.msk [vmem:[#allocation2 + $0xa8] sm:$0xff] %vm3204_vm4, %v3141_v24  ;;  %3675 = vst.msk [vmem:[#allocation2 + $0x80] sm:$0xff] %vm3204_vm4, %v3141_v24  ;;  %v3355_v12 = vpop.permute.xlu1 %3354  ;;  %2939 = vrot.lane.b32.xlu0 %v18387_v2, %s17098_s27 }
 0x215   :  { %3422 = vst.msk [vmem:[#allocation2 + $0xa8] sm:$0xff] %vm3414_vm5, %v3351_v4  ;;  %3740 = vst.msk [vmem:[#allocation2 + $0x80] sm:$0xff] %vm3414_vm5, %v3351_v4  ;;  %4203 = vmatmul.mubr.bf16.gmra.mrb[132].mxu0 %v3855_v17  ;;  %3024 = vrot.lane.b32.xlu1 %v17686_v54, %s17098_s27  ;;  %v3858_v17 = vld [vmem:[#allocation2 + $0x60] sm:$0xff] }
 0x217   :  { %v18592_v25 = vpop.f32.mrb[144].mxu1  ;;  %v2908_v37 = vpop.permute.xlu0 %2907 }
 0x218   :  { %v18596_v29 = vpop.f32.mrb[145].mxu1  ;;  %v3859_v7 = vld [vmem:[#allocation2 + $0x68] sm:$0xff]  ;;  %2978 = vst.msk [vmem:[#allocation2 + $0xc0] sm:$0xff] %vm2969_vm3, %v2908_v37  ;;  %3611 = vst.msk [vmem:[#allocation2 + $0x98] sm:$0xff] %vm2969_vm3, %v2908_v37  ;;  %v3147_v45 = vpop.permute.xlu1 %3146  ;;  %3664 = vrot.lane.b32.xlu0 %v18007_v52, %s17096_s12 }
 0x219   :  { %v18598_v24 = vpop.f32.mrb[146].mxu1  ;;  %4210 = vmatprep.mubr.bf16.mxu0 %v3859_v7  ;;  %3213 = vst.msk [vmem:[#allocation2 + $0xc0] sm:$0xff] %vm3204_vm4, %v3143_v0  ;;  %3676 = vst.msk [vmem:[#allocation2 + $0x98] sm:$0xff] %vm3204_vm4, %v3143_v0  ;;  %3599 = vrot.lane.b32.xlu1 %v18415_v22, %s17098_s27 }
 0x21a   :  { %23093 = vst [vmem:[#allocation35_spill] sm:$0xff] %v18598_v24  ;;  %v18602_v33 = vpop.f32.mrb[147].mxu1 }
 0x21b   :  { %v3353_v4 = vpop.permute.xlu0 %3352 }
 0x21c   :  { %3423 = vst.msk [vmem:[#allocation2 + $0xc0] sm:$0xff] %vm3414_vm5, %v3353_v4  ;;  %3741 = vst.msk [vmem:[#allocation2 + $0x98] sm:$0xff] %vm3414_vm5, %v3353_v4  ;;  %v2914_v37 = vpop.permute.xlu1 %2913  ;;  %3446 = vrot.lane.b32.xlu0 %v17706_v14, %s17097_s26  ;;  %v3862_v7 = vld [vmem:[#allocation2 + $0x80] sm:$0xff] }
 0x21d   :  { %2981 = vst.msk [vmem:[#allocation2 + $0x108] sm:$0xff] %vm2969_vm3, %v2914_v37  ;;  %3614 = vst.msk [vmem:[#allocation2 + $0xe0] sm:$0xff] %vm2969_vm3, %v2914_v37  ;;  %4211 = vmatmul.mubr.bf16.gmra.mrb[136].mxu0 %v3858_v17  ;;  %3666 = vrot.lane.b32.xlu1 %v18034_v41, %s17096_s12 }
 0x21e   :  { %4218 = vmatprep.mubr.bf16.mxu0 %v3862_v7  ;;  %v3861_v7 = vld [vmem:[#allocation2 + $0x78] sm:$0xff] }
 0x21f   :  { %v18616_v0 = vpop.f32.mrb[148].mxu1  ;;  %v3145_v4 = vpop.permute.xlu0 %3144 }
 0x220   :  { %v18620_v52 = vpop.f32.mrb[149].mxu1  ;;  %3214 = vst.msk [vmem:[#allocation2 + $0xd8] sm:$0xff] %vm3204_vm4, %v3145_v4  ;;  %3677 = vst.msk [vmem:[#allocation2 + $0xb0] sm:$0xff] %vm3204_vm4, %v3145_v4  ;;  %v3359_v14 = vpop.permute.xlu1 %3358  ;;  %3442 = vrot.lane.b32.xlu0 %v17686_v54, %s17097_s26 }
 0x221   :  { %v18622_v22 = vpop.f32.mrb[150].mxu1  ;;  %3424 = vst.msk [vmem:[#allocation2 + $0xd8] sm:$0xff] %vm3414_vm5, %v3355_v12  ;;  %3742 = vst.msk [vmem:[#allocation2 + $0xb0] sm:$0xff] %vm3414_vm5, %v3355_v12  ;;  %3448 = vrot.lane.b32.xlu1 %v17704_v10, %s17097_s26 }
 0x222   :  { %23094 = vst [vmem:[#allocation36_spill] sm:$0xff] %v18622_v22  ;;  %v18626_v24 = vpop.f32.mrb[151].mxu1 }
 0x223   :  { %v2912_v37 = vpop.permute.xlu0 %2911  ;;  %v3865_v54 = vld [vmem:[#allocation2 + $0x98] sm:$0xff] }
 0x224   :  { %2980 = vst.msk [vmem:[#allocation2 + $0xf0] sm:$0xff] %vm2969_vm3, %v2912_v37  ;;  %3613 = vst.msk [vmem:[#allocation2 + $0xc8] sm:$0xff] %vm2969_vm3, %v2912_v37  ;;  %v3151_v17 = vpop.permute.xlu1 %3150  ;;  %3601 = vrot.lane.b32.xlu0 %v18413_v20, %s17098_s27 }
 0x225   :  { %3215 = vst.msk [vmem:[#allocation2 + $0xf0] sm:$0xff] %vm3204_vm4, %v3147_v45  ;;  %3678 = vst.msk [vmem:[#allocation2 + $0xc8] sm:$0xff] %vm3204_vm4, %v3147_v45  ;;  %4219 = vmatmul.mubr.bf16.gmra.mrb[140].mxu0 %v3861_v7  ;;  %3444 = vrot.lane.b32.xlu1 %v17678_v48, %s17097_s26 }
 0x226   :  { %4226 = vmatprep.mubr.bf16.mxu0 %v3865_v54  ;;  %v3864_v54 = vld [vmem:[#allocation2 + $0x90] sm:$0xff] }
 0x227   :  { %v18640_v12 = vpop.f32.mrb[152].mxu1  ;;  %v3357_v37 = vpop.permute.xlu0 %3356 }
 0x228   :  { %v18644_v4 = vpop.f32.mrb[153].mxu1  ;;  %3425 = vst.msk [vmem:[#allocation2 + $0xf0] sm:$0xff] %vm3414_vm5, %v3357_v37  ;;  %3743 = vst.msk [vmem:[#allocation2 + $0xc8] sm:$0xff] %vm3414_vm5, %v3357_v37  ;;  %v2918_v20 = vpop.permute.xlu1 %2917  ;;  %3238 = vrot.lane.b32.xlu0 %v18107_v53, %s17096_s12  ;;  %v3868_v45 = vld [vmem:[#allocation2 + $0xb0] sm:$0xff] }
 0x229   :  { %v18646_v41 = vpop.f32.mrb[154].mxu1  ;;  %2983 = vst.msk [vmem:[#allocation2 + $0x138] sm:$0xff] %vm2969_vm3, %v2918_v20  ;;  %3616 = vst.msk [vmem:[#allocation2 + $0x110] sm:$0xff] %vm2969_vm3, %v2918_v20  ;;  %3240 = vrot.lane.b32.xlu1 %v18105_v47, %s17096_s12 }
 0x22a   :  { %v18650_v22 = vpop.f32.mrb[155].mxu1 }
 0x22b   :  { %v3149_v48 = vpop.permute.xlu0 %3148 }
 0x22c   :  { %3216 = vst.msk [vmem:[#allocation2 + $0x108] sm:$0xff] %vm3204_vm4, %v3149_v48  ;;  %3679 = vst.msk [vmem:[#allocation2 + $0xe0] sm:$0xff] %vm3204_vm4, %v3149_v48  ;;  %v3363_v7 = vpop.permute.xlu1 %3362  ;;  %3234 = vrot.lane.b32.xlu0 %v18077_v11, %s17096_s12 }
 0x22d   :  { %3426 = vst.msk [vmem:[#allocation2 + $0x108] sm:$0xff] %vm3414_vm5, %v3359_v14  ;;  %3744 = vst.msk [vmem:[#allocation2 + $0xe0] sm:$0xff] %vm3414_vm5, %v3359_v14  ;;  %4227 = vmatmul.mubr.bf16.gmra.mrb[144].mxu0 %v3864_v54  ;;  %3032 = vrot.lane.b32.xlu1 %v17730_v38, %s17098_s27  ;;  %v3867_v54 = vld [vmem:[#allocation2 + $0xa8] sm:$0xff] }
 0x22e   :  { %4234 = vmatprep.mubr.bf16.mxu0 %v3868_v45 }
 0x22f   :  { %v18664_v53 = vpop.f32.mrb[156].mxu1  ;;  %v2916_v20 = vpop.permute.xlu0 %2915 }
 0x230   :  { %23095 = vst [vmem:[#allocation37_spill] sm:$0xff] %v18664_v53  ;;  %v18668_v47 = vpop.f32.mrb[157].mxu1  ;;  %2982 = vst.msk [vmem:[#allocation2 + $0x120] sm:$0xff] %vm2969_vm3, %v2916_v20  ;;  %v3155_v11 = vpop.permute.xlu1 %3154  ;;  %3731 = vrot.lane.b32.xlu0 %v18437_v55, %s17097_s26 }
 0x231   :  { %v18670_v37 = vpop.f32.mrb[158].mxu1  ;;  %3615 = vst.msk [vmem:[#allocation2 + $0xf8] sm:$0xff] %vm2969_vm3, %v2916_v20  ;;  %3452 = vrot.lane.b32.xlu1 %v17728_v34, %s17097_s26  ;;  %v3871_v20 = vld [vmem:[#allocation2 + $0xc8] sm:$0xff] }
 0x232   :  { %23096 = vst [vmem:[#allocation38_spill] sm:$0xff] %v18670_v37  ;;  %v18674_v48 = vpop.f32.mrb[159].mxu1  ;;  %3217 = vst.msk [vmem:[#allocation2 + $0x120] sm:$0xff] %vm3204_vm4, %v3151_v17 }
 0x233   :  { %3680 = vst.msk [vmem:[#allocation2 + $0xf8] sm:$0xff] %vm3204_vm4, %v3151_v17  ;;  %v3361_v14 = vpop.permute.xlu0 %3360 }
 0x234   :  { %3427 = vst.msk [vmem:[#allocation2 + $0x120] sm:$0xff] %vm3414_vm5, %v3361_v14  ;;  %3745 = vst.msk [vmem:[#allocation2 + $0xf8] sm:$0xff] %vm3414_vm5, %v3361_v14  ;;  %v2922_v45 = vpop.permute.xlu1 %2921  ;;  %3030 = vrot.lane.b32.xlu0 %v17704_v10, %s17098_s27 }
 0x235   :  { %2985 = vst.msk [vmem:[#allocation2 + $0x168] sm:$0xff] %vm2969_vm3, %v2922_v45  ;;  %3618 = vst.msk [vmem:[#allocation2 + $0x140] sm:$0xff] %vm2969_vm3, %v2922_v45  ;;  %4235 = vmatmul.mubr.bf16.gmra.mrb[148].mxu0 %v3867_v54  ;;  %3244 = vrot.lane.b32.xlu1 %v18133_v36, %s17096_s12  ;;  %v3874_v45 = vld [vmem:[#allocation2 + $0xe0] sm:$0xff] }
 0x236   :  { %4242 = vmatprep.mubr.bf16.mxu0 %v3871_v20  ;;  %v3870_v20 = vld [vmem:[#allocation2 + $0xc0] sm:$0xff] }
 0x237   :  { %v18688_v17 = vpop.f32.mrb[160].mxu1  ;;  %v3153_v14 = vpop.permute.xlu0 %3152 }
 0x238   :  { %v18692_v55 = vpop.f32.mrb[161].mxu1  ;;  %3218 = vst.msk [vmem:[#allocation2 + $0x138] sm:$0xff] %vm3204_vm4, %v3153_v14  ;;  %3681 = vst.msk [vmem:[#allocation2 + $0x110] sm:$0xff] %vm3204_vm4, %v3153_v14  ;;  %v3367_v10 = vpop.permute.xlu1 %3366  ;;  %3450 = vrot.lane.b32.xlu0 %v17730_v38, %s17097_s26 }
 0x239   :  { %v18694_v37 = vpop.f32.mrb[162].mxu1  ;;  %3428 = vst.msk [vmem:[#allocation2 + $0x138] sm:$0xff] %vm3414_vm5, %v3363_v7  ;;  %3746 = vst.msk [vmem:[#allocation2 + $0x110] sm:$0xff] %vm3414_vm5, %v3363_v7  ;;  %3036 = vrot.lane.b32.xlu1 %v17760_v3, %s17098_s27 }
 0x23a   :  { %23097 = vst [vmem:[#allocation39_spill] sm:$0xff] %v18694_v37  ;;  %v18698_v53 = vpop.f32.mrb[163].mxu1 }
 0x23b   :  { %v2920_v36 = vpop.permute.xlu0 %2919 }
 0x23c   :  { %2984 = vst.msk [vmem:[#allocation2 + $0x150] sm:$0xff] %vm2969_vm3, %v2920_v36  ;;  %3617 = vst.msk [vmem:[#allocation2 + $0x128] sm:$0xff] %vm2969_vm3, %v2920_v36  ;;  %v3159_v54 = vpop.permute.xlu1 %3158  ;;  %3242 = vrot.lane.b32.xlu0 %v18135_v43, %s17096_s12 }
 0x23d   :  { %3219 = vst.msk [vmem:[#allocation2 + $0x150] sm:$0xff] %vm3204_vm4, %v3155_v11  ;;  %3682 = vst.msk [vmem:[#allocation2 + $0x128] sm:$0xff] %vm3204_vm4, %v3155_v11  ;;  %4243 = vmatmul.mubr.bf16.gmra.mrb[152].mxu0 %v3870_v20  ;;  %3456 = vrot.lane.b32.xlu1 %v17758_v63, %s17097_s26  ;;  %v3873_v20 = vld [vmem:[#allocation2 + $0xd8] sm:$0xff] }
 0x23e   :  { %4250 = vmatprep.mubr.bf16.mxu0 %v3874_v45 }
 0x23f   :  { %v18712_v38 = vpop.f32.mrb[164].mxu1  ;;  %v3365_v14 = vpop.permute.xlu0 %3364 }
 0x240   :  { %v18716_v7 = vpop.f32.mrb[165].mxu1  ;;  %3429 = vst.msk [vmem:[#allocation2 + $0x150] sm:$0xff] %vm3414_vm5, %v3365_v14  ;;  %3747 = vst.msk [vmem:[#allocation2 + $0x128] sm:$0xff] %vm3414_vm5, %v3365_v14  ;;  %v2926_v43 = vpop.permute.xlu1 %2925  ;;  %3034 = vrot.lane.b32.xlu0 %v17728_v34, %s17098_s27  ;;  %v3877_v34 = vld [vmem:[#allocation2 + $0xf8] sm:$0xff] }
 0x241   :  { %v18718_v36 = vpop.f32.mrb[166].mxu1  ;;  %2987 = vst.msk [vmem:[#allocation2 + $0x198] sm:$0xff] %vm2969_vm3, %v2926_v43  ;;  %3620 = vst.msk [vmem:[#allocation2 + $0x170] sm:$0xff] %vm2969_vm3, %v2926_v43  ;;  %3248 = vrot.lane.b32.xlu1 %v18161_v21, %s17096_s12 }
 0x242   :  { %v18722_v37 = vpop.f32.mrb[167].mxu1 }
 0x243   :  { %v3157_v11 = vpop.permute.xlu0 %3156 }
 0x244   :  { %3220 = vst.msk [vmem:[#allocation2 + $0x168] sm:$0xff] %vm3204_vm4, %v3157_v11  ;;  %3683 = vst.msk [vmem:[#allocation2 + $0x140] sm:$0xff] %vm3204_vm4, %v3157_v11  ;;  %v3371_v45 = vpop.permute.xlu1 %3370  ;;  %3454 = vrot.lane.b32.xlu0 %v17760_v3, %s17097_s26 }
 0x245   :  { %3430 = vst.msk [vmem:[#allocation2 + $0x168] sm:$0xff] %vm3414_vm5, %v3367_v10  ;;  %3748 = vst.msk [vmem:[#allocation2 + $0x140] sm:$0xff] %vm3414_vm5, %v3367_v10  ;;  %4251 = vmatmul.mubr.bf16.gmra.mrb[156].mxu0 %v3873_v20  ;;  %3040 = vrot.lane.b32.xlu1 %v17789_v32, %s17098_s27 }
 0x246   :  { %4258 = vmatprep.mubr.bf16.mxu0 %v3877_v34  ;;  %v3880_v34 = vld [vmem:[#allocation2 + $0x110] sm:$0xff] }
 0x247   :  { %v18738_v21 = vpop.f32.mrb[168].mxu1  ;;  %v2924_v43 = vpop.permute.xlu0 %2923 }
 0x248   :  { %v18740_v14 = vpop.f32.mrb[169].mxu1  ;;  %2986 = vst.msk [vmem:[#allocation2 + $0x180] sm:$0xff] %vm2969_vm3, %v2924_v43  ;;  %3619 = vst.msk [vmem:[#allocation2 + $0x158] sm:$0xff] %vm2969_vm3, %v2924_v43  ;;  %v3163_v3 = vpop.permute.xlu1 %3162  ;;  %3246 = vrot.lane.b32.xlu0 %v18163_v31, %s17096_s12 }
 0x249   :  { %v18742_v11 = vpop.f32.mrb[170].mxu1  ;;  %3221 = vst.msk [vmem:[#allocation2 + $0x180] sm:$0xff] %vm3204_vm4, %v3159_v54  ;;  %3684 = vst.msk [vmem:[#allocation2 + $0x158] sm:$0xff] %vm3204_vm4, %v3159_v54  ;;  %3460 = vrot.lane.b32.xlu1 %v17787_v28, %s17097_s26 }
 0x24a   :  { %23098 = vst [vmem:[#allocation40_spill] sm:$0xff] %v18742_v11  ;;  %v18748_v10 = vpop.f32.mrb[171].mxu1  ;;  %v3876_v11 = vld [vmem:[#allocation2 + $0xf0] sm:$0xff] }
 0x24b   :  { %v3369_v20 = vpop.permute.xlu0 %3368 }
 0x24c   :  { %3431 = vst.msk [vmem:[#allocation2 + $0x180] sm:$0xff] %vm3414_vm5, %v3369_v20  ;;  %3749 = vst.msk [vmem:[#allocation2 + $0x158] sm:$0xff] %vm3414_vm5, %v3369_v20  ;;  %v2930_v43 = vpop.permute.xlu1 %2929  ;;  %3038 = vrot.lane.b32.xlu0 %v17758_v63, %s17098_s27  ;;  %v23099_v20 = vld [vmem:[#allocation13_spill] sm:$0xff] }
 0x24d   :  { %2989 = vst.msk [vmem:[#allocation2 + $0x1c8] sm:$0xff] %vm2969_vm3, %v2930_v43  ;;  %3622 = vst.msk [vmem:[#allocation2 + $0x1a0] sm:$0xff] %vm2969_vm3, %v2930_v43  ;;  %4259 = vmatmul.mubr.bf16.gmra.mrb[160].mxu0 %v3876_v11  ;;  %3252 = vrot.lane.b32.xlu1 %v18189_v16, %s17096_s12  ;;  %v3879_v16 = vld [vmem:[#allocation2 + $0x108] sm:$0xff] }
 0x24e   :  { %4266 = vmatprep.mubr.bf16.mxu0 %v3880_v34  ;;  %v3883_v34 = vld [vmem:[#allocation2 + $0x128] sm:$0xff] }
 0x24f   :  { %v3161_v31 = vpop.permute.xlu0 %3160  ;;  %v23100_v43 = vld [vmem:[#allocation5_spill] sm:$0xff] }
 0x250   :  { %3222 = vst.msk [vmem:[#allocation2 + $0x198] sm:$0xff] %vm3204_vm4, %v3161_v31  ;;  %3685 = vst.msk [vmem:[#allocation2 + $0x170] sm:$0xff] %vm3204_vm4, %v3161_v31  ;;  %v3167_v54 = vpop.permute.xlu1 %3166  ;;  %3458 = vrot.lane.b32.xlu0 %v17789_v32, %s17097_s26 }
 0x251   :  { %3432 = vst.msk [vmem:[#allocation2 + $0x198] sm:$0xff] %vm3414_vm5, %v3371_v45  ;;  %3750 = vst.msk [vmem:[#allocation2 + $0x170] sm:$0xff] %vm3414_vm5, %v3371_v45  ;;  %3044 = vrot.lane.b32.xlu1 %v17817_v62, %s17098_s27 }
 0x253   :  { %v3373_v63 = vpop.permute.xlu0 %3372 }
 0x254   :  { %v3375_v11 = vpop.permute.xlu1 %3374  ;;  %3250 = vrot.lane.b32.xlu0 %v23099_v20, %s17096_s12  ;;  %v23101_v20 = vld [vmem:[#allocation14_spill] sm:$0xff] }
 0x255   :  { %4267 = vmatmul.mubr.bf16.gmra.mrb[164].mxu0 %v3879_v16  ;;  %3464 = vrot.lane.b32.xlu1 %v23100_v43, %s17097_s26  ;;  %v3886_v16 = vld [vmem:[#allocation2 + $0x140] sm:$0xff] }
 0x256   :  { %4274 = vmatprep.mubr.bf16.mxu0 %v3883_v34 }
 0x257   :  { %v2928_v32 = vpop.permute.xlu0 %2927 }
 0x258   :  { %2988 = vst.msk [vmem:[#allocation2 + $0x1b0] sm:$0xff] %vm2969_vm3, %v2928_v32  ;;  %3621 = vst.msk [vmem:[#allocation2 + $0x188] sm:$0xff] %vm2969_vm3, %v2928_v32  ;;  %v2934_v45 = vpop.permute.xlu1 %2933  ;;  %3042 = vrot.lane.b32.xlu0 %v17787_v28, %s17098_s27  ;;  %v3885_v32 = vld [vmem:[#allocation2 + $0x138] sm:$0xff] }
 0x259   :  { %3223 = vst.msk [vmem:[#allocation2 + $0x1b0] sm:$0xff] %vm3204_vm4, %v3163_v3  ;;  %3686 = vst.msk [vmem:[#allocation2 + $0x188] sm:$0xff] %vm3204_vm4, %v3163_v3  ;;  %3256 = vrot.lane.b32.xlu1 %v18217_v13, %s17096_s12  ;;  %v3882_v3 = vld [vmem:[#allocation2 + $0x120] sm:$0xff] }
 0x25a   :  { %2991 = vst.msk [vmem:[#allocation2 + $0x1f8] sm:$0xff] %vm2969_vm3, %v2934_v45  ;;  %3624 = vst.msk [vmem:[#allocation2 + $0x1d0] sm:$0xff] %vm2969_vm3, %v2934_v45  ;;  %v3889_v45 = vld [vmem:[#allocation2 + $0x158] sm:$0xff] }
 0x25b   :  { %3433 = vst.msk [vmem:[#allocation2 + $0x1b0] sm:$0xff] %vm3414_vm5, %v3373_v63  ;;  %3751 = vst.msk [vmem:[#allocation2 + $0x188] sm:$0xff] %vm3414_vm5, %v3373_v63  ;;  %v3165_v31 = vpop.permute.xlu0 %3164 }
 0x25c   :  { %3224 = vst.msk [vmem:[#allocation2 + $0x1c8] sm:$0xff] %vm3204_vm4, %v3165_v31  ;;  %3687 = vst.msk [vmem:[#allocation2 + $0x1a0] sm:$0xff] %vm3204_vm4, %v3165_v31  ;;  %v18788_v28 = vpop.permute.xlu1 %3170  ;;  %3462 = vrot.lane.b32.xlu0 %v17817_v62, %s17097_s26  ;;  %v23102_v62 = vld [vmem:[#allocation6_spill] sm:$0xff]  ;;  %v23103_v31 = vld [vmem:[#allocation15_spill] sm:$0xff] }
 0x25d   :  { %3434 = vst.msk [vmem:[#allocation2 + $0x1c8] sm:$0xff] %vm3414_vm5, %v3375_v11  ;;  %3752 = vst.msk [vmem:[#allocation2 + $0x1a0] sm:$0xff] %vm3414_vm5, %v3375_v11  ;;  %4275 = vmatmul.mubr.bf16.gmra.mrb[168].mxu0 %v3882_v3  ;;  %3048 = vrot.lane.b32.xlu1 %v17844_v30, %s17098_s27 }
 0x25e   :  { %4282 = vmatprep.mubr.bf16.mxu0 %v3886_v16 }
 0x25f   :  { %v3377_v13 = vpop.permute.xlu0 %3376 }
 0x260   :  { %v2938_v63 = vpop.permute.xlu1 %2937  ;;  %3254 = vrot.lane.b32.xlu0 %v23101_v20, %s17096_s12  ;;  %v3892_v20 = vld [vmem:[#allocation2 + $0x170] sm:$0xff] }
 0x261   :  { %2993 = vst.msk [vmem:[#allocation2 + $0x228] sm:$0xff] %vm2969_vm3, %v2938_v63  ;;  %3626 = vst.msk [vmem:[#allocation2 + $0x200] sm:$0xff] %vm2969_vm3, %v2938_v63  ;;  %3468 = vrot.lane.b32.xlu1 %v23102_v62, %s17097_s26 }
 0x263   :  { %v3169_v34 = vpop.permute.xlu0 %3168 }
 0x264   :  { %3226 = vst.msk [vmem:[#allocation2 + $0x1f8] sm:$0xff] %vm3204_vm4, %v3169_v34  ;;  %3689 = vst.msk [vmem:[#allocation2 + $0x1d0] sm:$0xff] %vm3204_vm4, %v3169_v34  ;;  %v3379_v11 = vpop.permute.xlu1 %3378  ;;  %3046 = vrot.lane.b32.xlu0 %v23100_v43, %s17098_s27  ;;  %v23104_v43 = vld [vmem:[#allocation8_spill] sm:$0xff] }
 0x265   :  { %3436 = vst.msk [vmem:[#allocation2 + $0x1f8] sm:$0xff] %vm3414_vm5, %v3379_v11  ;;  %3754 = vst.msk [vmem:[#allocation2 + $0x1d0] sm:$0xff] %vm3414_vm5, %v3379_v11  ;;  %4283 = vmatmul.mubr.bf16.gmra.mrb[172].mxu0 %v3885_v32  ;;  %3260 = vrot.lane.b32.xlu1 %v23103_v31, %s17096_s12  ;;  %v3888_v11 = vld [vmem:[#allocation2 + $0x150] sm:$0xff] }
 0x266   :  { %4290 = vmatprep.mubr.bf16.mxu0 %v3889_v45 }
 0x267   :  { %v2932_v16 = vpop.permute.xlu0 %2931 }
 0x268   :  { %2990 = vst.msk [vmem:[#allocation2 + $0x1e0] sm:$0xff] %vm2969_vm3, %v2932_v16  ;;  %3623 = vst.msk [vmem:[#allocation2 + $0x1b8] sm:$0xff] %vm2969_vm3, %v2932_v16  ;;  %v18812_v3 = vpop.permute.xlu1 %3174  ;;  %3466 = vrot.lane.b32.xlu0 %v17844_v30, %s17097_s26  ;;  %v23105_v30 = vld [vmem:[#allocation16_spill] sm:$0xff]  ;;  %v3891_v16 = vld [vmem:[#allocation2 + $0x168] sm:$0xff] }
 0x269   :  { %3225 = vst.msk [vmem:[#allocation2 + $0x1e0] sm:$0xff] %vm3204_vm4, %v3167_v54  ;;  %3688 = vst.msk [vmem:[#allocation2 + $0x1b8] sm:$0xff] %vm3204_vm4, %v3167_v54  ;;  %3052 = vrot.lane.b32.xlu1 %v23104_v43, %s17098_s27  ;;  %v23106_v54 = vld [vmem:[#allocation7_spill] sm:$0xff] }
 0x26a   :  { %3435 = vst.msk [vmem:[#allocation2 + $0x1e0] sm:$0xff] %vm3414_vm5, %v3377_v13  ;;  %3753 = vst.msk [vmem:[#allocation2 + $0x1b8] sm:$0xff] %vm3414_vm5, %v3377_v13 }
 0x26b   :  { %v3173_v63 = vpop.permute.xlu0 %3172 }
 0x26c   :  { %3228 = vst.msk [vmem:[#allocation2 + $0x228] sm:$0xff] %vm3204_vm4, %v3173_v63  ;;  %3691 = vst.msk [vmem:[#allocation2 + $0x200] sm:$0xff] %vm3204_vm4, %v3173_v63  ;;  %v3237_v34 = vpop.permute.xlu1 %3236  ;;  %3258 = vrot.lane.b32.xlu0 %v23105_v30, %s17096_s12  ;;  %v3898_v30 = vld [vmem:[#allocation2 + $0x1a0] sm:$0xff] }
 0x26d   :  { %4291 = vmatmul.mubr.bf16.gmra.mrb[176].mxu0 %v3888_v11  ;;  %3472 = vrot.lane.b32.xlu1 %v23106_v54, %s17097_s26 }
 0x26e   :  { %4298 = vmatprep.mubr.bf16.mxu0 %v3892_v20  ;;  %v23107_v20 = vld [vmem:[#allocation17_spill] sm:$0xff] }
 0x26f   :  { %v3381_v32 = vpop.permute.xlu0 %3380 }
 0x270   :  { %v2942_v45 = vpop.permute.xlu1 %2941  ;;  %3050 = vrot.lane.b32.xlu0 %v23102_v62, %s17098_s27  ;;  %v3895_v62 = vld [vmem:[#allocation2 + $0x188] sm:$0xff] }
 0x271   :  { %2995 = vst.msk [vmem:[#allocation2 + $0x258] sm:$0xff] %vm2969_vm3, %v2942_v45  ;;  %3628 = vst.msk [vmem:[#allocation2 + $0x230] sm:$0xff] %vm2969_vm3, %v2942_v45  ;;  %3264 = vrot.lane.b32.xlu1 %v18273_v46, %s17096_s12 }
 0x273   :  { %v3177_v13 = vpop.permute.xlu0 %3176 }
 0x274   :  { %3230 = vst.msk [vmem:[#allocation2 + $0x258] sm:$0xff] %vm3204_vm4, %v3177_v13  ;;  %3693 = vst.msk [vmem:[#allocation2 + $0x230] sm:$0xff] %vm3204_vm4, %v3177_v13  ;;  %v3383_v31 = vpop.permute.xlu1 %3382  ;;  %3470 = vrot.lane.b32.xlu0 %v23104_v43, %s17097_s26  ;;  %v23108_v43 = vld [vmem:[#allocation9_spill] sm:$0xff]  ;;  %v3894_v13 = vld [vmem:[#allocation2 + $0x180] sm:$0xff] }
 0x275   :  { %3438 = vst.msk [vmem:[#allocation2 + $0x228] sm:$0xff] %vm3414_vm5, %v3383_v31  ;;  %3756 = vst.msk [vmem:[#allocation2 + $0x200] sm:$0xff] %vm3414_vm5, %v3383_v31  ;;  %4299 = vmatmul.mubr.bf16.gmra.mrb[180].mxu0 %v3891_v16  ;;  %3056 = vrot.lane.b32.xlu1 %v17898_v35, %s17098_s27  ;;  %v3897_v31 = vld [vmem:[#allocation2 + $0x198] sm:$0xff] }
 0x276   :  { %4306 = vmatprep.mubr.bf16.mxu0 %v3895_v62 }
 0x277   :  { %v2936_v46 = vpop.permute.xlu0 %2935 }
 0x278   :  { %2992 = vst.msk [vmem:[#allocation2 + $0x210] sm:$0xff] %vm2969_vm3, %v2936_v46  ;;  %3625 = vst.msk [vmem:[#allocation2 + $0x1e8] sm:$0xff] %vm2969_vm3, %v2936_v46  ;;  %v3233_v63 = vpop.permute.xlu1 %3232  ;;  %3262 = vrot.lane.b32.xlu0 %v23107_v20, %s17096_s12  ;;  %v3900_v46 = vld [vmem:[#allocation2 + $0x1b0] sm:$0xff] }
 0x279   :  { %3227 = vst.msk [vmem:[#allocation2 + $0x210] sm:$0xff] %vm3204_vm4, %v18788_v28  ;;  %3690 = vst.msk [vmem:[#allocation2 + $0x1e8] sm:$0xff] %vm3204_vm4, %v18788_v28  ;;  %3476 = vrot.lane.b32.xlu1 %v23108_v43, %s17097_s26 }
 0x27a   :  { %3437 = vst.msk [vmem:[#allocation2 + $0x210] sm:$0xff] %vm3414_vm5, %v3381_v32  ;;  %3755 = vst.msk [vmem:[#allocation2 + $0x1e8] sm:$0xff] %vm3414_vm5, %v3381_v32 }
 0x27b   :  { %v3027_v11 = vpop.permute.xlu0 %3026 }
 0x27c   :  { %3102 = vst.msk [vmem:[#allocation3 + $0x30] sm:$0xff] %vm2969_vm3, %v3027_v11  ;;  %3638 = vst.msk [vmem:[#allocation3 + $0x8] sm:$0xff] %vm2969_vm3, %v3027_v11  ;;  %v3029_v45 = vpop.permute.xlu1 %3028  ;;  %3054 = vrot.lane.b32.xlu0 %v23106_v54, %s17098_s27 }
 0x27d   :  { %3312 = vst.msk [vmem:[#allocation3 + $0x30] sm:$0xff] %vm3204_vm4, %v3237_v34  ;;  %3703 = vst.msk [vmem:[#allocation3 + $0x8] sm:$0xff] %vm3204_vm4, %v3237_v34  ;;  %4307 = vmatmul.mubr.bf16.gmra.mrb[184].mxu0 %v3894_v13  ;;  %3268 = vrot.lane.b32.xlu1 %v18301_v8, %s17096_s12  ;;  %v3901_v8 = vld [vmem:[#allocation2 + $0x1b8] sm:$0xff] }
 0x27e   :  { %3103 = vst.msk [vmem:[#allocation3 + $0x48] sm:$0xff] %vm2969_vm3, %v3029_v45  ;;  %3639 = vst.msk [vmem:[#allocation3 + $0x20] sm:$0xff] %vm2969_vm3, %v3029_v45  ;;  %4314 = vmatprep.mubr.bf16.mxu0 %v3898_v30 }
 0x27f   :  { %v3023_v28 = vpop.permute.xlu0 %3022 }
 0x280   :  { %3100 = vst.msk [vmem:[#allocation3] sm:$0xff] %vm2969_vm3, %v3023_v28  ;;  %v3730_v32 = vpop.permute.xlu1 %3729  ;;  %3474 = vrot.lane.b32.xlu0 %v17898_v35, %s17097_s26  ;;  %v3906_v28 = vld [vmem:[#allocation2 + $0x1e0] sm:$0xff] }
 0x281   :  { %3310 = vst.msk [vmem:[#allocation3] sm:$0xff] %vm3204_vm4, %v3233_v63  ;;  %3060 = vrot.lane.b32.xlu1 %v17925_v6, %s17098_s27  ;;  %v3904_v63 = vld [vmem:[#allocation2 + $0x1d0] sm:$0xff]  ;;  %v3907_v11 = vld [vmem:[#allocation2 + $0x1e8] sm:$0xff] }
 0x283   :  { %v3385_v34 = vpop.permute.xlu0 %3384 }
 0x284   :  { %v3387_v54 = vpop.permute.xlu1 %3386  ;;  %3266 = vrot.lane.b32.xlu0 %v18303_v9, %s17096_s12 }
 0x285   :  { %3440 = vst.msk [vmem:[#allocation2 + $0x258] sm:$0xff] %vm3414_vm5, %v3387_v54  ;;  %3758 = vst.msk [vmem:[#allocation2 + $0x230] sm:$0xff] %vm3414_vm5, %v3387_v54  ;;  %4315 = vmatmul.mubr.bf16.gmra.mrb[188].mxu0 %v3897_v31  ;;  %3480 = vrot.lane.b32.xlu1 %v17923_v1, %s17097_s26  ;;  %v3909_v31 = vld [vmem:[#allocation2 + $0x1f8] sm:$0xff] }
 0x286   :  { %4322 = vmatprep.mubr.bf16.mxu0 %v3901_v8 }
 0x287   :  { %v2940_v35 = vpop.permute.xlu0 %2939 }
 0x288   :  { %2994 = vst.msk [vmem:[#allocation2 + $0x240] sm:$0xff] %vm2969_vm3, %v2940_v35  ;;  %3627 = vst.msk [vmem:[#allocation2 + $0x218] sm:$0xff] %vm2969_vm3, %v2940_v35  ;;  %v3025_v16 = vpop.permute.xlu1 %3024  ;;  %3058 = vrot.lane.b32.xlu0 %v23108_v43, %s17098_s27  ;;  %v3903_v43 = vld [vmem:[#allocation2 + $0x1c8] sm:$0xff] }
 0x289   :  { %3229 = vst.msk [vmem:[#allocation2 + $0x240] sm:$0xff] %vm3204_vm4, %v18812_v3  ;;  %3692 = vst.msk [vmem:[#allocation2 + $0x218] sm:$0xff] %vm3204_vm4, %v18812_v3  ;;  %3272 = vrot.lane.b32.xlu1 %v18329_v23, %s17096_s12 }
 0x28a   :  { %3101 = vst.msk [vmem:[#allocation3 + $0x18] sm:$0xff] %vm2969_vm3, %v3025_v16 }
 0x28b   :  { %3439 = vst.msk [vmem:[#allocation2 + $0x240] sm:$0xff] %vm3414_vm5, %v3385_v34  ;;  %3757 = vst.msk [vmem:[#allocation2 + $0x218] sm:$0xff] %vm3414_vm5, %v3385_v34  ;;  %v3665_v9 = vpop.permute.xlu0 %3664 }
 0x28c   :  { %v3600_v62 = vpop.permute.xlu1 %3599  ;;  %3478 = vrot.lane.b32.xlu0 %v17925_v6, %s17097_s26 }
 0x28d   :  { %3629 = vst.msk [vmem:[#allocation2 + $0x248] sm:$0xff] %vm2969_vm3, %v3600_v62  ;;  %4323 = vmatmul.mubr.bf16.gmra.mrb[192].mxu0 %v3900_v46  ;;  %3064 = vrot.lane.b32.xlu1 %v17955_v44, %s17098_s27  ;;  %v3912_v62 = vld [vmem:[#allocation2 + $0x210] sm:$0xff] }
 0x28e   :  { %3694 = vst.msk [vmem:[#allocation2 + $0x248] sm:$0xff] %vm3204_vm4, %v3665_v9  ;;  %4330 = vmatprep.mubr.bf16.mxu0 %v3904_v63 }
 0x28f   :  { %3759 = vst.msk [vmem:[#allocation2 + $0x248] sm:$0xff] %vm3414_vm5, %v3730_v32  ;;  %v3447_v23 = vpop.permute.xlu0 %3446 }
 0x290   :  { %3522 = vst.msk [vmem:[#allocation3 + $0x30] sm:$0xff] %vm3414_vm5, %v3447_v23  ;;  %3768 = vst.msk [vmem:[#allocation3 + $0x8] sm:$0xff] %vm3414_vm5, %v3447_v23  ;;  %v3667_v3 = vpop.permute.xlu1 %3666  ;;  %3270 = vrot.lane.b32.xlu0 %v18331_v39, %s17096_s12 }
 0x291   :  { %3484 = vrot.lane.b32.xlu1 %v17953_v40, %s17097_s26 }
 0x293   :  { %v3443_v6 = vpop.permute.xlu0 %3442 }
 0x294   :  { %3520 = vst.msk [vmem:[#allocation3] sm:$0xff] %vm3414_vm5, %v3443_v6  ;;  %v3449_v20 = vpop.permute.xlu1 %3448  ;;  %3062 = vrot.lane.b32.xlu0 %v17923_v1, %s17098_s27  ;;  %v3915_v6 = vld [vmem:[#allocation2 + $0x228] sm:$0xff] }
 0x295   :  { %4331 = vmatmul.mubr.bf16.gmra.mrb[196].mxu0 %v3903_v43  ;;  %3276 = vrot.lane.b32.xlu1 %v18357_v26, %s17096_s12 }
 0x296   :  { %4338 = vmatprep.mubr.bf16.mxu0 %v3907_v11  ;;  %v3919_v43 = vld [vmem:[#allocation2 + $0x248] sm:$0xff] }
 0x297   :  { %v3602_v30 = vpop.permute.xlu0 %3601  ;;  %v4629_v45 = vld [vmem:[#allocation3 + $0x8] sm:$0xff] }
 0x298   :  { %3630 = vst.msk [vmem:[#allocation2 + $0x260] sm:$0xff] %vm2969_vm3, %v3602_v30  ;;  %v3445_v39 = vpop.permute.xlu1 %3444  ;;  %4816 = vmatprep.mubr.bf16.mxu1 %v4629_v45  ;;  %3482 = vrot.lane.b32.xlu0 %v17955_v44, %s17097_s26  ;;  %v3910_v44 = vld [vmem:[#allocation2 + $0x200] sm:$0xff] }
 0x299   :  { %3695 = vst.msk [vmem:[#allocation2 + $0x260] sm:$0xff] %vm3204_vm4, %v3667_v3  ;;  %3068 = vrot.lane.b32.xlu1 %v17982_v19, %s17098_s27 }
 0x29b   :  { %v3239_v1 = vpop.permute.xlu0 %3238  ;;  %v4628_v13 = vld [vmem:[#allocation3] sm:$0xff] }
 0x29c   :  { %3313 = vst.msk [vmem:[#allocation3 + $0x48] sm:$0xff] %vm3204_vm4, %v3239_v1  ;;  %3704 = vst.msk [vmem:[#allocation3 + $0x20] sm:$0xff] %vm3204_vm4, %v3239_v1  ;;  %v3241_v26 = vpop.permute.xlu1 %3240  ;;  %4817 = vmatmul.mubr.bf16.vlgmr.msra.gmra.mrb[172].mxu1 %v4628_v13  ;;  %3274 = vrot.lane.b32.xlu0 %v18359_v58, %s17096_s12 }
 0x29d   :  { %3523 = vst.msk [vmem:[#allocation3 + $0x48] sm:$0xff] %vm3414_vm5, %v3449_v20  ;;  %3769 = vst.msk [vmem:[#allocation3 + $0x20] sm:$0xff] %vm3414_vm5, %v3449_v20  ;;  %4339 = vmatmul.mubr.bf16.gmra.mrb[200].mxu0 %v3906_v28  ;;  %3488 = vrot.lane.b32.xlu1 %v17980_v15, %s17097_s26  ;;  %v4634_v20 = vld [vmem:[#allocation3 + $0x30] sm:$0xff] }
 0x29e   :  { %4346 = vmatprep.mubr.bf16.mxu0 %v3910_v44 }
 0x29f   :  { %v3235_v32 = vpop.permute.xlu0 %3234 }
 0x2a0   :  { %3311 = vst.msk [vmem:[#allocation3 + $0x18] sm:$0xff] %vm3204_vm4, %v3235_v32  ;;  %v3033_v34 = vpop.permute.xlu1 %3032  ;;  %3066 = vrot.lane.b32.xlu0 %v17953_v40, %s17098_s27  ;;  %v3913_v40 = vld [vmem:[#allocation2 + $0x218] sm:$0xff] }
 0x2a1   :  { %3521 = vst.msk [vmem:[#allocation3 + $0x18] sm:$0xff] %vm3414_vm5, %v3445_v39  ;;  %3280 = vrot.lane.b32.xlu1 %v18385_v42, %s17096_s12 }
 0x2a2   :  { %3105 = vst.msk [vmem:[#allocation3 + $0x78] sm:$0xff] %vm2969_vm3, %v3033_v34  ;;  %3641 = vst.msk [vmem:[#allocation3 + $0x50] sm:$0xff] %vm2969_vm3, %v3033_v34 }
 0x2a3   :  { %v3732_v58 = vpop.permute.xlu0 %3731 }
 0x2a4   :  { %3760 = vst.msk [vmem:[#allocation2 + $0x260] sm:$0xff] %vm3414_vm5, %v3732_v58  ;;  %v3453_v54 = vpop.permute.xlu1 %3452  ;;  %3486 = vrot.lane.b32.xlu0 %v17982_v19, %s17097_s26  ;;  %v4632_v8 = vld [vmem:[#allocation3 + $0x20] sm:$0xff]  ;;  %v4637_v28 = vld [vmem:[#allocation3 + $0x48] sm:$0xff] }
 0x2a5   :  { %4347 = vmatmul.mubr.bf16.gmra.mrb[204].mxu0 %v3909_v31  ;;  %4824 = vmatprep.mubr.bf16.mxu1 %v4632_v8  ;;  %v3921_v31 = vld [vmem:[#allocation2 + $0x258] sm:$0xff] }
 0x2a6   :  { %4354 = vmatprep.mubr.bf16.mxu0 %v3913_v40 }
 0x2a7   :  { %v3031_v35 = vpop.permute.xlu0 %3030 }
 0x2a8   :  { %3104 = vst.msk [vmem:[#allocation3 + $0x60] sm:$0xff] %vm2969_vm3, %v3031_v35  ;;  %3640 = vst.msk [vmem:[#allocation3 + $0x38] sm:$0xff] %vm2969_vm3, %v3031_v35  ;;  %v3245_v16 = vpop.permute.xlu1 %3244  ;;  %3278 = vrot.lane.b32.xlu0 %v18387_v2, %s17096_s12  ;;  %v4631_v42 = vld [vmem:[#allocation3 + $0x18] sm:$0xff]  ;;  %v3916_v2 = vld [vmem:[#allocation2 + $0x230] sm:$0xff] }
 0x2a9   :  { %3314 = vst.msk [vmem:[#allocation3 + $0x60] sm:$0xff] %vm3204_vm4, %v3241_v26  ;;  %3705 = vst.msk [vmem:[#allocation3 + $0x38] sm:$0xff] %vm3204_vm4, %v3241_v26  ;;  %4825 = vmatmul.mubr.bf16.gmra.mrb[176].mxu1 %v4631_v42  ;;  %v3918_v26 = vld [vmem:[#allocation2 + $0x240] sm:$0xff] }
 0x2aa   :  { %v4630_v35 = vld [vmem:[#allocation3 + $0x10] sm:$0xff] }
 0x2ab   :  { %v3451_v19 = vpop.permute.xlu0 %3450  ;;  %v3922_v1 = vld [vmem:[#allocation2 + $0x260] sm:$0xff] }
 0x2ac   :  { %3524 = vst.msk [vmem:[#allocation3 + $0x60] sm:$0xff] %vm3414_vm5, %v3451_v19  ;;  %3770 = vst.msk [vmem:[#allocation3 + $0x38] sm:$0xff] %vm3414_vm5, %v3451_v19  ;;  %v3037_v9 = vpop.permute.xlu1 %3036  ;;  %3070 = vrot.lane.b32.xlu0 %v17980_v15, %s17098_s27 }
 0x2ad   :  { %3107 = vst.msk [vmem:[#allocation3 + $0xa8] sm:$0xff] %vm2969_vm3, %v3037_v9  ;;  %3643 = vst.msk [vmem:[#allocation3 + $0x80] sm:$0xff] %vm2969_vm3, %v3037_v9  ;;  %4355 = vmatmul.mubr.bf16.gmra.mrb[208].mxu0 %v3912_v62 }
 0x2ae   :  { %4362 = vmatprep.mubr.bf16.mxu0 %v3916_v2  ;;  %v4633_v2 = vld [vmem:[#allocation3 + $0x28] sm:$0xff] }
 0x2af   :  { %v3243_v46 = vpop.permute.xlu0 %3242 }
 0x2b0   :  { %3315 = vst.msk [vmem:[#allocation3 + $0x78] sm:$0xff] %vm3204_vm4, %v3243_v46  ;;  %3706 = vst.msk [vmem:[#allocation3 + $0x50] sm:$0xff] %vm3204_vm4, %v3243_v46  ;;  %v3457_v63 = vpop.permute.xlu1 %3456  ;;  %3490 = vrot.lane.b32.xlu0 %v18009_v60, %s17097_s26 }
 0x2b1   :  { %3525 = vst.msk [vmem:[#allocation3 + $0x78] sm:$0xff] %vm3414_vm5, %v3453_v54  ;;  %3771 = vst.msk [vmem:[#allocation3 + $0x50] sm:$0xff] %vm3414_vm5, %v3453_v54 }
 0x2b3   :  { %v3035_v15 = vpop.permute.xlu0 %3034  ;;  %v4635_v23 = vld [vmem:[#allocation3 + $0x38] sm:$0xff]  ;;  %v4640_v8 = vld [vmem:[#allocation3 + $0x60] sm:$0xff] }
 0x2b4   :  { %3106 = vst.msk [vmem:[#allocation3 + $0x90] sm:$0xff] %vm2969_vm3, %v3035_v15  ;;  %3642 = vst.msk [vmem:[#allocation3 + $0x68] sm:$0xff] %vm2969_vm3, %v3035_v15  ;;  %v3249_v3 = vpop.permute.xlu1 %3248  ;;  %4832 = vmatprep.mubr.bf16.mxu1 %v4635_v23 }
 0x2b5   :  { %3316 = vst.msk [vmem:[#allocation3 + $0x90] sm:$0xff] %vm3204_vm4, %v3245_v16  ;;  %3707 = vst.msk [vmem:[#allocation3 + $0x68] sm:$0xff] %vm3204_vm4, %v3245_v16  ;;  %4363 = vmatmul.mubr.bf16.gmra.mrb[212].mxu0 %v3915_v6  ;;  %4833 = vmatmul.mubr.bf16.gmra.mrb[180].mxu1 %v4634_v20 }
 0x2b6   :  { %4370 = vmatprep.mubr.bf16.mxu0 %v3919_v43 }
 0x2b7   :  { %v3455_v11 = vpop.permute.xlu0 %3454 }
 0x2b8   :  { %3526 = vst.msk [vmem:[#allocation3 + $0x90] sm:$0xff] %vm3414_vm5, %v3455_v11  ;;  %3772 = vst.msk [vmem:[#allocation3 + $0x68] sm:$0xff] %vm3414_vm5, %v3455_v11  ;;  %v3041_v30 = vpop.permute.xlu1 %3040  ;;  %v4638_v45 = vld [vmem:[#allocation3 + $0x50] sm:$0xff]  ;;  %v4643_v62 = vld [vmem:[#allocation3 + $0x78] sm:$0xff] }
 0x2b9   :  { %3109 = vst.msk [vmem:[#allocation3 + $0xd8] sm:$0xff] %vm2969_vm3, %v3041_v30  ;;  %3645 = vst.msk [vmem:[#allocation3 + $0xb0] sm:$0xff] %vm2969_vm3, %v3041_v30  ;;  %4840 = vmatprep.mubr.bf16.mxu1 %v4638_v45 }
 0x2bb   :  { %v3247_v39 = vpop.permute.xlu0 %3246 }
 0x2bc   :  { %3317 = vst.msk [vmem:[#allocation3 + $0xa8] sm:$0xff] %vm3204_vm4, %v3247_v39  ;;  %3708 = vst.msk [vmem:[#allocation3 + $0x80] sm:$0xff] %vm3204_vm4, %v3247_v39  ;;  %v3461_v13 = vpop.permute.xlu1 %3460 }
 0x2bd   :  { %3527 = vst.msk [vmem:[#allocation3 + $0xa8] sm:$0xff] %vm3414_vm5, %v3457_v63  ;;  %3773 = vst.msk [vmem:[#allocation3 + $0x80] sm:$0xff] %vm3414_vm5, %v3457_v63  ;;  %4371 = vmatmul.mubr.bf16.gmra.mrb[216].mxu0 %v3918_v26  ;;  %4841 = vmatmul.mubr.bf16.gmra.mrb[184].mxu1 %v4637_v28  ;;  %v4636_v63 = vld [vmem:[#allocation3 + $0x40] sm:$0xff] }
 0x2be   :  { %4378 = vmatprep.mubr.bf16.mxu0 %v3922_v1  ;;  %v4639_v1 = vld [vmem:[#allocation3 + $0x58] sm:$0xff] }
 0x2bf   :  { %v3039_v44 = vpop.permute.xlu0 %3038  ;;  %v4641_v32 = vld [vmem:[#allocation3 + $0x68] sm:$0xff]  ;;  %v4646_v39 = vld [vmem:[#allocation3 + $0x90] sm:$0xff] }
 0x2c0   :  { %3108 = vst.msk [vmem:[#allocation3 + $0xc0] sm:$0xff] %vm2969_vm3, %v3039_v44  ;;  %3644 = vst.msk [vmem:[#allocation3 + $0x98] sm:$0xff] %vm2969_vm3, %v3039_v44  ;;  %v3253_v34 = vpop.permute.xlu1 %3252  ;;  %4848 = vmatprep.mubr.bf16.mxu1 %v4641_v32 }
 0x2c1   :  { %3318 = vst.msk [vmem:[#allocation3 + $0xc0] sm:$0xff] %vm3204_vm4, %v3249_v3  ;;  %3709 = vst.msk [vmem:[#allocation3 + $0x98] sm:$0xff] %vm3204_vm4, %v3249_v3 }
 0x2c3   :  { %v3459_v58 = vpop.permute.xlu0 %3458 }
 0x2c4   :  { %3528 = vst.msk [vmem:[#allocation3 + $0xc0] sm:$0xff] %vm3414_vm5, %v3459_v58  ;;  %3774 = vst.msk [vmem:[#allocation3 + $0x98] sm:$0xff] %vm3414_vm5, %v3459_v58  ;;  %v3045_v54 = vpop.permute.xlu1 %3044  ;;  %v4644_v40 = vld [vmem:[#allocation3 + $0x80] sm:$0xff] }
 0x2c5   :  { %3111 = vst.msk [vmem:[#allocation3 + $0x108] sm:$0xff] %vm2969_vm3, %v3045_v54  ;;  %3647 = vst.msk [vmem:[#allocation3 + $0xe0] sm:$0xff] %vm2969_vm3, %v3045_v54  ;;  %4379 = vmatmul.mubr.bf16.gmra.mrb[220].mxu0 %v3921_v31  ;;  %4849 = vmatmul.mubr.bf16.gmra.mrb[188].mxu1 %v4640_v8 }
 0x2c6   :  { %4856 = vmatprep.mubr.bf16.mxu1 %v4644_v40  ;;  %16309 = vmatprep.mubr.msk.bf16.mxu0 %vm2812_vm2, %v4630_v35  ;;  %v4649_v35 = vld [vmem:[#allocation3 + $0xa8] sm:$0xff] }
 0x2c7   :  { %v3251_v16 = vpop.permute.xlu0 %3250 }
 0x2c8   :  { %3319 = vst.msk [vmem:[#allocation3 + $0xd8] sm:$0xff] %vm3204_vm4, %v3251_v16  ;;  %3710 = vst.msk [vmem:[#allocation3 + $0xb0] sm:$0xff] %vm3204_vm4, %v3251_v16  ;;  %v3465_v42 = vpop.permute.xlu1 %3464  ;;  %v4645_v16 = vld [vmem:[#allocation3 + $0x88] sm:$0xff] }
 0x2c9   :  { %3529 = vst.msk [vmem:[#allocation3 + $0xd8] sm:$0xff] %vm3414_vm5, %v3461_v13  ;;  %3775 = vst.msk [vmem:[#allocation3 + $0xb0] sm:$0xff] %vm3414_vm5, %v3461_v13  ;;  %v4642_v13 = vld [vmem:[#allocation3 + $0x70] sm:$0xff] }
 0x2cb   :  { %v3043_v19 = vpop.permute.xlu0 %3042  ;;  %v4647_v46 = vld [vmem:[#allocation3 + $0x98] sm:$0xff] }
 0x2cc   :  { %3110 = vst.msk [vmem:[#allocation3 + $0xf0] sm:$0xff] %vm2969_vm3, %v3043_v19  ;;  %3646 = vst.msk [vmem:[#allocation3 + $0xc8] sm:$0xff] %vm2969_vm3, %v3043_v19  ;;  %v3257_v9 = vpop.permute.xlu1 %3256 }
 0x2cd   :  { %3320 = vst.msk [vmem:[#allocation3 + $0xf0] sm:$0xff] %vm3204_vm4, %v3253_v34  ;;  %3711 = vst.msk [vmem:[#allocation3 + $0xc8] sm:$0xff] %vm3204_vm4, %v3253_v34  ;;  %4857 = vmatmul.mubr.bf16.gmra.mrb[192].mxu1 %v4643_v62  ;;  %16310 = vmatmul.mubr.msk.bf16.vlgmr.msra.gmra.mrb[224].mxu0 %vm2812_vm2, %v4633_v2 }
 0x2ce   :  { %v4180_v15 = vpop.f32.mrb[120].mxu0  ;;  %4864 = vmatprep.mubr.bf16.mxu1 %v4647_v46  ;;  %16313 = vmatprep.mubr.msk.bf16.mxu0 %vm2812_vm2, %v4636_v63 }
 0x2cf   :  { %v18982_v23 = vadd.f32 %v18455_v27, %v4180_v15  ;;  %v4182_v3 = vpop.f32.mrb[121].mxu0  ;;  %v3463_v6 = vpop.permute.xlu0 %3462 }
 0x2d0   :  { %3530 = vst.msk [vmem:[#allocation3 + $0xf0] sm:$0xff] %vm3414_vm5, %v3463_v6  ;;  %3776 = vst.msk [vmem:[#allocation3 + $0xc8] sm:$0xff] %vm3414_vm5, %v3463_v6  ;;  %v4183_v20 = vpop.f32.mrb[122].mxu0  ;;  %v3049_v43 = vpop.permute.xlu1 %3048 }
 0x2d1   :  { %v18987_v11 = vadd.f32 %v18460_v57, %v4183_v20  ;;  %3113 = vst.msk [vmem:[#allocation3 + $0x138] sm:$0xff] %vm2969_vm3, %v3049_v43  ;;  %3649 = vst.msk [vmem:[#allocation3 + $0x110] sm:$0xff] %vm2969_vm3, %v3049_v43  ;;  %v4185_v30 = vpop.f32.mrb[123].mxu0  ;;  %v4650_v57 = vld [vmem:[#allocation3 + $0xb0] sm:$0xff]  ;;  %v4652_v20 = vld [vmem:[#allocation3 + $0xc0] sm:$0xff] }
 0x2d2   :  { %v4651_v43 = vld [vmem:[#allocation3 + $0xb8] sm:$0xff]  ;;  %v4654_v30 = vld [vmem:[#allocation3 + $0xd0] sm:$0xff] }
 0x2d3   :  { %v3255_v45 = vpop.permute.xlu0 %3254 }
 0x2d4   :  { %3321 = vst.msk [vmem:[#allocation3 + $0x108] sm:$0xff] %vm3204_vm4, %v3255_v45  ;;  %3712 = vst.msk [vmem:[#allocation3 + $0xe0] sm:$0xff] %vm3204_vm4, %v3255_v45  ;;  %v3469_v27 = vpop.permute.xlu1 %3468 }
 0x2d5   :  { %3531 = vst.msk [vmem:[#allocation3 + $0x108] sm:$0xff] %vm3414_vm5, %v3465_v42  ;;  %3777 = vst.msk [vmem:[#allocation3 + $0xe0] sm:$0xff] %vm3414_vm5, %v3465_v42  ;;  %4865 = vmatmul.mubr.bf16.gmra.mrb[196].mxu1 %v4646_v39  ;;  %16314 = vmatmul.mubr.msk.bf16.gmra.mrb[228].mxu0 %vm2812_vm2, %v4639_v1  ;;  %v4648_v42 = vld [vmem:[#allocation3 + $0xa0] sm:$0xff] }
 0x2d6   :  { %4872 = vmatprep.mubr.bf16.mxu1 %v4650_v57  ;;  %16317 = vmatprep.mubr.msk.bf16.mxu0 %vm2812_vm2, %v4642_v13 }
 0x2d7   :  { %v3047_v26 = vpop.permute.xlu0 %3046 }
 0x2d8   :  { %3112 = vst.msk [vmem:[#allocation3 + $0x120] sm:$0xff] %vm2969_vm3, %v3047_v26  ;;  %3648 = vst.msk [vmem:[#allocation3 + $0xf8] sm:$0xff] %vm2969_vm3, %v3047_v26  ;;  %v4188_v28 = vpop.f32.mrb[124].mxu0  ;;  %v3261_v44 = vpop.permute.xlu1 %3260 }
 0x2d9   :  { %3322 = vst.msk [vmem:[#allocation3 + $0x120] sm:$0xff] %vm3204_vm4, %v3257_v9  ;;  %3713 = vst.msk [vmem:[#allocation3 + $0xf8] sm:$0xff] %vm3204_vm4, %v3257_v9  ;;  %v19002_v32 = vadd.f32 %v18450_v49, %v4188_v28  ;;  %v4190_v34 = vpop.f32.mrb[125].mxu0  ;;  %v4653_v49 = vld [vmem:[#allocation3 + $0xc8] sm:$0xff] }
 0x2da   :  { %v4191_v58 = vpop.f32.mrb[126].mxu0  ;;  %v4655_v34 = vld [vmem:[#allocation3 + $0xd8] sm:$0xff] }
 0x2db   :  { %v19005_v54 = vadd.f32 %v18458_v50, %v4191_v58  ;;  %v4193_v31 = vpop.f32.mrb[127].mxu0  ;;  %v3467_v8 = vpop.permute.xlu0 %3466  ;;  %v4657_v58 = vld [vmem:[#allocation3 + $0xe8] sm:$0xff] }
 0x2dc   :  { %3532 = vst.msk [vmem:[#allocation3 + $0x120] sm:$0xff] %vm3414_vm5, %v3467_v8  ;;  %3778 = vst.msk [vmem:[#allocation3 + $0xf8] sm:$0xff] %vm3414_vm5, %v3467_v8  ;;  %v3053_v40 = vpop.permute.xlu1 %3052  ;;  %v4660_v31 = vld [vmem:[#allocation3 + $0x100] sm:$0xff] }
 0x2dd   :  { %3115 = vst.msk [vmem:[#allocation3 + $0x168] sm:$0xff] %vm2969_vm3, %v3053_v40  ;;  %3651 = vst.msk [vmem:[#allocation3 + $0x140] sm:$0xff] %vm2969_vm3, %v3053_v40  ;;  %4873 = vmatmul.mubr.bf16.gmra.mrb[200].mxu1 %v4649_v35  ;;  %16318 = vmatmul.mubr.msk.bf16.gmra.mrb[232].mxu0 %vm2812_vm2, %v4645_v16 }
 0x2de   :  { %4880 = vmatprep.mubr.bf16.mxu1 %v4653_v49  ;;  %16321 = vmatprep.mubr.msk.bf16.mxu0 %vm2812_vm2, %v4648_v42  ;;  %v23109_v42 = vld [vmem:[#allocation23_spill] sm:$0xff] }
 0x2df   :  { %v3259_v50 = vpop.permute.xlu0 %3258 }
 0x2e0   :  { %3323 = vst.msk [vmem:[#allocation3 + $0x138] sm:$0xff] %vm3204_vm4, %v3259_v50  ;;  %3714 = vst.msk [vmem:[#allocation3 + $0x110] sm:$0xff] %vm3204_vm4, %v3259_v50  ;;  %v4196_v19 = vpop.f32.mrb[128].mxu0  ;;  %v3473_v9 = vpop.permute.xlu1 %3472 }
 0x2e1   :  { %3533 = vst.msk [vmem:[#allocation3 + $0x138] sm:$0xff] %vm3414_vm5, %v3469_v27  ;;  %3779 = vst.msk [vmem:[#allocation3 + $0x110] sm:$0xff] %vm3414_vm5, %v3469_v27  ;;  %v19018_v62 = vadd.f32 %v18473_v51, %v4196_v19  ;;  %v4198_v2 = vpop.f32.mrb[129].mxu0  ;;  %v4656_v51 = vld [vmem:[#allocation3 + $0xe0] sm:$0xff] }
 0x2e2   :  { %v4199_v46 = vpop.f32.mrb[130].mxu0 }
 0x2e3   :  { %v19021_v63 = vadd.f32 %v18480_v18, %v4199_v46  ;;  %v4201_v15 = vpop.f32.mrb[131].mxu0  ;;  %v3051_v3 = vpop.permute.xlu0 %3050  ;;  %v4658_v46 = vld [vmem:[#allocation3 + $0xf0] sm:$0xff] }
 0x2e4   :  { %3114 = vst.msk [vmem:[#allocation3 + $0x150] sm:$0xff] %vm2969_vm3, %v3051_v3  ;;  %3650 = vst.msk [vmem:[#allocation3 + $0x128] sm:$0xff] %vm2969_vm3, %v3051_v3  ;;  %v3265_v6 = vpop.permute.xlu1 %3264  ;;  %v4663_v15 = vld [vmem:[#allocation3 + $0x118] sm:$0xff]  ;;  %v4666_v3 = vld [vmem:[#allocation3 + $0x130] sm:$0xff] }
 0x2e5   :  { %3324 = vst.msk [vmem:[#allocation3 + $0x150] sm:$0xff] %vm3204_vm4, %v3261_v44  ;;  %3715 = vst.msk [vmem:[#allocation3 + $0x128] sm:$0xff] %vm3204_vm4, %v3261_v44  ;;  %4881 = vmatmul.mubr.bf16.gmra.mrb[204].mxu1 %v4652_v20  ;;  %16322 = vmatmul.mubr.msk.bf16.gmra.mrb[236].mxu0 %vm2812_vm2, %v4651_v43 }
 0x2e6   :  { %4888 = vmatprep.mubr.bf16.mxu1 %v4656_v51  ;;  %16325 = vmatprep.mubr.msk.bf16.mxu0 %vm2812_vm2, %v4654_v30  ;;  %v23110_v51 = vld [vmem:[#allocation21_spill] sm:$0xff] }
 0x2e7   :  { %v3471_v18 = vpop.permute.xlu0 %3470 }
 0x2e8   :  { %3534 = vst.msk [vmem:[#allocation3 + $0x150] sm:$0xff] %vm3414_vm5, %v3471_v18  ;;  %3780 = vst.msk [vmem:[#allocation3 + $0x128] sm:$0xff] %vm3414_vm5, %v3471_v18  ;;  %v4204_v45 = vpop.f32.mrb[132].mxu0  ;;  %v3057_v27 = vpop.permute.xlu1 %3056 }
 0x2e9   :  { %v19032_v39 = vadd.f32 %v18469_v61, %v4204_v45  ;;  %3117 = vst.msk [vmem:[#allocation3 + $0x198] sm:$0xff] %vm2969_vm3, %v3057_v27  ;;  %3653 = vst.msk [vmem:[#allocation3 + $0x170] sm:$0xff] %vm2969_vm3, %v3057_v27  ;;  %v4206_v1 = vpop.f32.mrb[133].mxu0  ;;  %v4659_v61 = vld [vmem:[#allocation3 + $0xf8] sm:$0xff]  ;;  %v23111_v27 = vld [vmem:[#allocation22_spill] sm:$0xff] }
 0x2ea   :  { %v4207_v57 = vpop.f32.mrb[134].mxu0 }
 0x2eb   :  { %v19037_v13 = vadd.f32 %v18476_v5, %v4207_v57  ;;  %v4209_v26 = vpop.f32.mrb[135].mxu0  ;;  %v3263_v28 = vpop.permute.xlu0 %3262 }
 0x2ec   :  { %3325 = vst.msk [vmem:[#allocation3 + $0x168] sm:$0xff] %vm3204_vm4, %v3263_v28  ;;  %3716 = vst.msk [vmem:[#allocation3 + $0x140] sm:$0xff] %vm3204_vm4, %v3263_v28  ;;  %v3477_v44 = vpop.permute.xlu1 %3476 }
 0x2ed   :  { %3535 = vst.msk [vmem:[#allocation3 + $0x168] sm:$0xff] %vm3414_vm5, %v3473_v9  ;;  %3781 = vst.msk [vmem:[#allocation3 + $0x140] sm:$0xff] %vm3414_vm5, %v3473_v9  ;;  %4889 = vmatmul.mubr.bf16.gmra.mrb[208].mxu1 %v4655_v34  ;;  %16326 = vmatmul.mubr.msk.bf16.gmra.mrb[240].mxu0 %vm2812_vm2, %v4657_v58  ;;  %v4661_v34 = vld [vmem:[#allocation3 + $0x108] sm:$0xff] }
 0x2ee   :  { %4896 = vmatprep.mubr.bf16.mxu1 %v4659_v61  ;;  %16329 = vmatprep.mubr.msk.bf16.mxu0 %vm2812_vm2, %v4660_v31  ;;  %v4669_v58 = vld [vmem:[#allocation3 + $0x148] sm:$0xff]  ;;  %v4672_v61 = vld [vmem:[#allocation3 + $0x160] sm:$0xff] }
 0x2ef   :  { %v3055_v5 = vpop.permute.xlu0 %3054 }
 0x2f0   :  { %3116 = vst.msk [vmem:[#allocation3 + $0x180] sm:$0xff] %vm2969_vm3, %v3055_v5  ;;  %3652 = vst.msk [vmem:[#allocation3 + $0x158] sm:$0xff] %vm2969_vm3, %v3055_v5  ;;  %v4212_v8 = vpop.f32.mrb[136].mxu0  ;;  %v3269_v40 = vpop.permute.xlu1 %3268 }
 0x2f1   :  { %3326 = vst.msk [vmem:[#allocation3 + $0x180] sm:$0xff] %vm3204_vm4, %v3265_v6  ;;  %3717 = vst.msk [vmem:[#allocation3 + $0x158] sm:$0xff] %vm3204_vm4, %v3265_v6  ;;  %v19050_v35 = vadd.f32 %v18498_v56, %v4212_v8  ;;  %v4214_v16 = vpop.f32.mrb[137].mxu0  ;;  %v4662_v56 = vld [vmem:[#allocation3 + $0x110] sm:$0xff] }
 0x2f2   :  { %v4215_v49 = vpop.f32.mrb[138].mxu0  ;;  %v23112_v16 = vld [vmem:[#allocation25_spill] sm:$0xff] }
 0x2f3   :  { %v19053_v50 = vadd.f32 %v23109_v42, %v4215_v49  ;;  %v4217_v19 = vpop.f32.mrb[139].mxu0  ;;  %v3475_v9 = vpop.permute.xlu0 %3474 }
 0x2f4   :  { %3536 = vst.msk [vmem:[#allocation3 + $0x180] sm:$0xff] %vm3414_vm5, %v3475_v9  ;;  %3782 = vst.msk [vmem:[#allocation3 + $0x158] sm:$0xff] %vm3414_vm5, %v3475_v9  ;;  %v3061_v2 = vpop.permute.xlu1 %3060  ;;  %v23113_v19 = vld [vmem:[#allocation27_spill] sm:$0xff] }
 0x2f5   :  { %3119 = vst.msk [vmem:[#allocation3 + $0x1c8] sm:$0xff] %vm2969_vm3, %v3061_v2  ;;  %3655 = vst.msk [vmem:[#allocation3 + $0x1a0] sm:$0xff] %vm2969_vm3, %v3061_v2  ;;  %4897 = vmatmul.mubr.bf16.gmra.mrb[212].mxu1 %v4658_v46  ;;  %16330 = vmatmul.mubr.msk.bf16.gmra.mrb[244].mxu0 %vm2812_vm2, %v4663_v15 }
 0x2f6   :  { %4904 = vmatprep.mubr.bf16.mxu1 %v4662_v56  ;;  %16333 = vmatprep.mubr.msk.bf16.mxu0 %vm2812_vm2, %v4666_v3  ;;  %v4664_v56 = vld [vmem:[#allocation3 + $0x120] sm:$0xff]  ;;  %v4675_v3 = vld [vmem:[#allocation3 + $0x178] sm:$0xff] }
 0x2f7   :  { %v3267_v6 = vpop.permute.xlu0 %3266 }
 0x2f8   :  { %3327 = vst.msk [vmem:[#allocation3 + $0x198] sm:$0xff] %vm3204_vm4, %v3267_v6  ;;  %3718 = vst.msk [vmem:[#allocation3 + $0x170] sm:$0xff] %vm3204_vm4, %v3267_v6  ;;  %v4220_v20 = vpop.f32.mrb[140].mxu0  ;;  %v3481_v43 = vpop.permute.xlu1 %3480  ;;  %v4668_v6 = vld [vmem:[#allocation3 + $0x140] sm:$0xff] }
 0x2f9   :  { %3537 = vst.msk [vmem:[#allocation3 + $0x198] sm:$0xff] %vm3414_vm5, %v3477_v44  ;;  %3783 = vst.msk [vmem:[#allocation3 + $0x170] sm:$0xff] %vm3414_vm5, %v3477_v44  ;;  %v19066_v30 = vadd.f32 %v23110_v51, %v4220_v20  ;;  %v4222_v18 = vpop.f32.mrb[141].mxu0  ;;  %v4665_v44 = vld [vmem:[#allocation3 + $0x128] sm:$0xff]  ;;  %v4678_v20 = vld [vmem:[#allocation3 + $0x190] sm:$0xff] }
 0x2fa   :  { %v4223_v45 = vpop.f32.mrb[142].mxu0 }
 0x2fb   :  { %v19069_v1 = vadd.f32 %v23111_v27, %v4223_v45  ;;  %v4225_v57 = vpop.f32.mrb[143].mxu0  ;;  %v3059_v26 = vpop.permute.xlu0 %3058 }
 0x2fc   :  { %3118 = vst.msk [vmem:[#allocation3 + $0x1b0] sm:$0xff] %vm2969_vm3, %v3059_v26  ;;  %3654 = vst.msk [vmem:[#allocation3 + $0x188] sm:$0xff] %vm2969_vm3, %v3059_v26  ;;  %v3273_v28 = vpop.permute.xlu1 %3272 }
 0x2fd   :  { %3328 = vst.msk [vmem:[#allocation3 + $0x1b0] sm:$0xff] %vm3204_vm4, %v3269_v40  ;;  %3719 = vst.msk [vmem:[#allocation3 + $0x188] sm:$0xff] %vm3204_vm4, %v3269_v40  ;;  %4905 = vmatmul.mubr.bf16.gmra.mrb[216].mxu1 %v4661_v34  ;;  %16334 = vmatmul.mubr.msk.bf16.gmra.mrb[248].mxu0 %vm2812_vm2, %v4669_v58  ;;  %v23115_v34 = vld [vmem:[#allocation26_spill] sm:$0xff] }
 0x2fe   :  { %4912 = vmatprep.mubr.bf16.mxu1 %v4665_v44  ;;  %16337 = vmatprep.mubr.msk.bf16.mxu0 %vm2812_vm2, %v4672_v61 }
 0x2ff   :  { %v3479_v31 = vpop.permute.xlu0 %3478 }
 0x300   :  { %3538 = vst.msk [vmem:[#allocation3 + $0x1b0] sm:$0xff] %vm3414_vm5, %v3479_v31  ;;  %3784 = vst.msk [vmem:[#allocation3 + $0x188] sm:$0xff] %vm3414_vm5, %v3479_v31  ;;  %v4228_v5 = vpop.f32.mrb[144].mxu0  ;;  %v3065_v8 = vpop.permute.xlu1 %3064 }
 0x301   :  { %v19080_v49 = vadd.f32 %v23112_v16, %v4228_v5  ;;  %3121 = vst.msk [vmem:[#allocation3 + $0x1f8] sm:$0xff] %vm2969_vm3, %v3065_v8  ;;  %3657 = vst.msk [vmem:[#allocation3 + $0x1d0] sm:$0xff] %vm2969_vm3, %v3065_v8  ;;  %v4230_v40 = vpop.f32.mrb[145].mxu0  ;;  %v4667_v5 = vld [vmem:[#allocation3 + $0x138] sm:$0xff]  ;;  %v4681_v8 = vld [vmem:[#allocation3 + $0x1a8] sm:$0xff] }
 0x302   :  { %v4231_v42 = vpop.f32.mrb[146].mxu0  ;;  %v4684_v16 = vld [vmem:[#allocation3 + $0x1c0] sm:$0xff] }
 0x303   :  { %v19085_v9 = vadd.f32 %v23113_v19, %v4231_v42  ;;  %v4233_v2 = vpop.f32.mrb[147].mxu0  ;;  %v3271_v46 = vpop.permute.xlu0 %3270 }
 0x304   :  { %3329 = vst.msk [vmem:[#allocation3 + $0x1c8] sm:$0xff] %vm3204_vm4, %v3271_v46  ;;  %3720 = vst.msk [vmem:[#allocation3 + $0x1a0] sm:$0xff] %vm3204_vm4, %v3271_v46  ;;  %v3485_v15 = vpop.permute.xlu1 %3484 }
 0x305   :  { %3539 = vst.msk [vmem:[#allocation3 + $0x1c8] sm:$0xff] %vm3414_vm5, %v3481_v43  ;;  %3785 = vst.msk [vmem:[#allocation3 + $0x1a0] sm:$0xff] %vm3414_vm5, %v3481_v43  ;;  %4913 = vmatmul.mubr.bf16.gmra.mrb[220].mxu1 %v4664_v56  ;;  %16338 = vmatmul.mubr.msk.bf16.gmra.mrb[252].mxu0 %vm2812_vm2, %v4675_v3  ;;  %v23114_v43 = vld [vmem:[#allocation24_spill] sm:$0xff]  ;;  %v23116_v56 = vld [vmem:[#allocation30_spill] sm:$0xff] }
 0x306   :  { %4920 = vmatprep.mubr.bf16.mxu1 %v4668_v6  ;;  %16341 = vmatprep.mubr.msk.bf16.mxu0 %vm2812_vm2, %v4678_v20 }
 0x307   :  { %v3063_v51 = vpop.permute.xlu0 %3062 }
 0x308   :  { %3120 = vst.msk [vmem:[#allocation3 + $0x1e0] sm:$0xff] %vm2969_vm3, %v3063_v51  ;;  %3656 = vst.msk [vmem:[#allocation3 + $0x1b8] sm:$0xff] %vm2969_vm3, %v3063_v51  ;;  %v4236_v18 = vpop.f32.mrb[148].mxu0  ;;  %v3277_v45 = vpop.permute.xlu1 %3276  ;;  %v4670_v51 = vld [vmem:[#allocation3 + $0x150] sm:$0xff] }
 0x309   :  { %3330 = vst.msk [vmem:[#allocation3 + $0x1e0] sm:$0xff] %vm3204_vm4, %v3273_v28  ;;  %3721 = vst.msk [vmem:[#allocation3 + $0x1b8] sm:$0xff] %vm3204_vm4, %v3273_v28  ;;  %v19098_v27 = vadd.f32 %v23114_v43, %v4236_v18  ;;  %v4238_v57 = vpop.f32.mrb[149].mxu0  ;;  %v4671_v28 = vld [vmem:[#allocation3 + $0x158] sm:$0xff] }
 0x30a   :  { %v4239_v26 = vpop.f32.mrb[150].mxu0  ;;  %v4687_v18 = vld [vmem:[#allocation3 + $0x1d8] sm:$0xff] }
 0x30b   :  { %v19101_v58 = vadd.f32 %v23115_v34, %v4239_v26  ;;  %v4241_v44 = vpop.f32.mrb[151].mxu0  ;;  %v3483_v61 = vpop.permute.xlu0 %3482  ;;  %v23117_v26 = vld [vmem:[#allocation28_spill] sm:$0xff] }
 0x30c   :  { %3540 = vst.msk [vmem:[#allocation3 + $0x1e0] sm:$0xff] %vm3414_vm5, %v3483_v61  ;;  %3786 = vst.msk [vmem:[#allocation3 + $0x1b8] sm:$0xff] %vm3414_vm5, %v3483_v61  ;;  %v3069_v31 = vpop.permute.xlu1 %3068 }
 0x30d   :  { %3123 = vst.msk [vmem:[#allocation3 + $0x228] sm:$0xff] %vm2969_vm3, %v3069_v31  ;;  %3659 = vst.msk [vmem:[#allocation3 + $0x200] sm:$0xff] %vm2969_vm3, %v3069_v31  ;;  %4921 = vmatmul.mubr.bf16.gmra.mrb[224].mxu1 %v4667_v5  ;;  %16342 = vmatmul.mubr.msk.bf16.gmra.mrb[0].mxu0 %vm2812_vm2, %v4681_v8  ;;  %v23118_v31 = vld [vmem:[#allocation29_spill] sm:$0xff] }
 0x30e   :  { %4928 = vmatprep.mubr.bf16.mxu1 %v4671_v28  ;;  %16345 = vmatprep.mubr.msk.bf16.mxu0 %vm2812_vm2, %v4684_v16  ;;  %v4673_v16 = vld [vmem:[#allocation3 + $0x168] sm:$0xff] }
 0x30f   :  { %v3275_v40 = vpop.permute.xlu0 %3274 }
 0x310   :  { %3331 = vst.msk [vmem:[#allocation3 + $0x1f8] sm:$0xff] %vm3204_vm4, %v3275_v40  ;;  %3722 = vst.msk [vmem:[#allocation3 + $0x1d0] sm:$0xff] %vm3204_vm4, %v3275_v40  ;;  %v4244_v42 = vpop.f32.mrb[152].mxu0  ;;  %v3489_v61 = vpop.permute.xlu1 %3488  ;;  %v4693_v40 = vld [vmem:[#allocation3 + $0x208] sm:$0xff] }
 0x311   :  { %3541 = vst.msk [vmem:[#allocation3 + $0x1f8] sm:$0xff] %vm3414_vm5, %v3485_v15  ;;  %3787 = vst.msk [vmem:[#allocation3 + $0x1d0] sm:$0xff] %vm3414_vm5, %v3485_v15  ;;  %v19114_v19 = vadd.f32 %v18548_v59, %v4244_v42  ;;  %v4246_v2 = vpop.f32.mrb[153].mxu0  ;;  %v4674_v59 = vld [vmem:[#allocation3 + $0x170] sm:$0xff]  ;;  %v4677_v42 = vld [vmem:[#allocation3 + $0x188] sm:$0xff] }
 0x312   :  { %v4247_v46 = vpop.f32.mrb[154].mxu0  ;;  %v4690_v15 = vld [vmem:[#allocation3 + $0x1f0] sm:$0xff]  ;;  %v4696_v2 = vld [vmem:[#allocation3 + $0x220] sm:$0xff] }
 0x313   :  { %v19117_v3 = vadd.f32 %v23116_v56, %v4247_v46  ;;  %v4249_v6 = vpop.f32.mrb[155].mxu0  ;;  %v3067_v20 = vpop.permute.xlu0 %3066 }
 0x314   :  { %3122 = vst.msk [vmem:[#allocation3 + $0x210] sm:$0xff] %vm2969_vm3, %v3067_v20  ;;  %3658 = vst.msk [vmem:[#allocation3 + $0x1e8] sm:$0xff] %vm2969_vm3, %v3067_v20  ;;  %v3281_v56 = vpop.permute.xlu1 %3280  ;;  %v23119_v20 = vld [vmem:[#allocation32_spill] sm:$0xff] }
 0x315   :  { %3332 = vst.msk [vmem:[#allocation3 + $0x210] sm:$0xff] %vm3204_vm4, %v3277_v45  ;;  %3723 = vst.msk [vmem:[#allocation3 + $0x1e8] sm:$0xff] %vm3204_vm4, %v3277_v45  ;;  %4929 = vmatmul.mubr.bf16.gmra.mrb[228].mxu1 %v4670_v51  ;;  %16346 = vmatmul.mubr.msk.bf16.gmra.mrb[4].mxu0 %vm2812_vm2, %v4687_v18 }
 0x316   :  { %4936 = vmatprep.mubr.bf16.mxu1 %v4674_v59  ;;  %16349 = vmatprep.mubr.msk.bf16.mxu0 %vm2812_vm2, %v4690_v15  ;;  %v23120_v15 = vld [vmem:[#allocation34_spill] sm:$0xff] }
 0x317   :  { %v3487_v43 = vpop.permute.xlu0 %3486 }
 0x318   :  { %3542 = vst.msk [vmem:[#allocation3 + $0x210] sm:$0xff] %vm3414_vm5, %v3487_v43  ;;  %3788 = vst.msk [vmem:[#allocation3 + $0x1e8] sm:$0xff] %vm3414_vm5, %v3487_v43  ;;  %v4252_v57 = vpop.f32.mrb[156].mxu0 }
 0x319   :  { %v19128_v34 = vadd.f32 %v23117_v26, %v4252_v57  ;;  %v4254_v44 = vpop.f32.mrb[157].mxu0 }
 0x31a   :  { %v4255_v45 = vpop.f32.mrb[158].mxu0  ;;  %v4676_v44 = vld [vmem:[#allocation3 + $0x180] sm:$0xff] }
 0x31b   :  { %v19131_v5 = vadd.f32 %v23118_v31, %v4255_v45  ;;  %v4257_v8 = vpop.f32.mrb[159].mxu0  ;;  %v3279_v28 = vpop.permute.xlu0 %3278  ;;  %v4680_v45 = vld [vmem:[#allocation3 + $0x1a0] sm:$0xff]  ;;  %v4702_v31 = vld [vmem:[#allocation3 + $0x250] sm:$0xff] }
 0x31c   :  { %3333 = vst.msk [vmem:[#allocation3 + $0x228] sm:$0xff] %vm3204_vm4, %v3279_v28  ;;  %3724 = vst.msk [vmem:[#allocation3 + $0x200] sm:$0xff] %vm3204_vm4, %v3279_v28  ;;  %v23121_v28 = vld [vmem:[#allocation31_spill] sm:$0xff] }
 0x31d   :  { %3543 = vst.msk [vmem:[#allocation3 + $0x228] sm:$0xff] %vm3414_vm5, %v3489_v61  ;;  %3789 = vst.msk [vmem:[#allocation3 + $0x200] sm:$0xff] %vm3414_vm5, %v3489_v61  ;;  %4937 = vmatmul.mubr.bf16.gmra.mrb[232].mxu1 %v4673_v16  ;;  %16350 = vmatmul.mubr.msk.bf16.gmra.mrb[8].mxu0 %vm2812_vm2, %v4693_v40  ;;  %v4699_v61 = vld [vmem:[#allocation3 + $0x238] sm:$0xff] }
 0x31e   :  { %4944 = vmatprep.mubr.bf16.mxu1 %v4677_v42  ;;  %16353 = vmatprep.mubr.msk.bf16.mxu0 %vm2812_vm2, %v4696_v2  ;;  %v23122_v2 = vld [vmem:[#allocation33_spill] sm:$0xff] }
 0x31f   :  { %v3071_v46 = vpop.permute.xlu0 %3070 }
 0x320   :  { %3124 = vst.msk [vmem:[#allocation3 + $0x240] sm:$0xff] %vm2969_vm3, %v3071_v46  ;;  %3660 = vst.msk [vmem:[#allocation3 + $0x218] sm:$0xff] %vm2969_vm3, %v3071_v46  ;;  %v4260_v6 = vpop.f32.mrb[160].mxu0 }
 0x321   :  { %3334 = vst.msk [vmem:[#allocation3 + $0x240] sm:$0xff] %vm3204_vm4, %v3281_v56  ;;  %3725 = vst.msk [vmem:[#allocation3 + $0x218] sm:$0xff] %vm3204_vm4, %v3281_v56  ;;  %v19144_v51 = vadd.f32 %v23119_v20, %v4260_v6  ;;  %v4262_v18 = vpop.f32.mrb[161].mxu0  ;;  %v4705_v6 = vld [vmem:[#allocation3 + $0x268] sm:$0xff]  ;;  %v4679_v20 = vld [vmem:[#allocation3 + $0x198] sm:$0xff] }
 0x322   :  { %v4263_v59 = vpop.f32.mrb[162].mxu0  ;;  %v5549_v18 = vld [vmem:[%s23030_s5 + $0x8] sm:$0xff] }
 0x323   :  { %v19147_v43 = vadd.f32 %v23120_v15, %v4263_v59  ;;  %v4265_v57 = vpop.f32.mrb[163].mxu0  ;;  %v3491_v26 = vpop.permute.xlu0 %3490  ;;  %v5553_v59 = vld [vmem:[%s23030_s5 + $0x28] sm:$0xff] }
 0x324   :  { %3544 = vst.msk [vmem:[#allocation3 + $0x240] sm:$0xff] %vm3414_vm5, %v3491_v26  ;;  %3790 = vst.msk [vmem:[#allocation3 + $0x218] sm:$0xff] %vm3414_vm5, %v3491_v26  ;;  %v4683_v15 = vld [vmem:[#allocation3 + $0x1b8] sm:$0xff]  ;;  %v14598_v57 = vcombine.low %v5549_v18, %v5553_v59  ;;  %v14599_v26 = vcombine.high %v5549_v18, %v5553_v59 }
 0x325   :  { %4945 = vmatmul.mubr.bf16.gmra.mrb[236].mxu1 %v4676_v44  ;;  %16354 = vmatmul.mubr.msk.bf16.gmra.mrb[12].mxu0 %vm2812_vm2, %v4699_v61 }
 0x326   :  { %4952 = vmatprep.mubr.bf16.mxu1 %v4680_v45  ;;  %16357 = vmatprep.mubr.msk.bf16.mxu0 %vm2812_vm2, %v4702_v31 }
 0x327   :  { %10883 = vmatprep.subr.bf16.mxu1 %v14599_v26 }
 0x328   :  { %v4268_v8 = vpop.f32.mrb[164].mxu0  ;;  %10884 = vmatpush1.bf16.msra.mxu1 %v14598_v57 }
 0x329   :  { %v19154_v16 = vadd.f32 %v23121_v28, %v4268_v8  ;;  %v4270_v40 = vpop.f32.mrb[165].mxu0 }
 0x32a   :  { %v4271_v42 = vpop.f32.mrb[166].mxu0  ;;  %v4682_v40 = vld [vmem:[#allocation3 + $0x1b0] sm:$0xff] }
 0x32b   :  { %v19157_v46 = vadd.f32 %v23122_v2, %v4271_v42  ;;  %v4273_v56 = vpop.f32.mrb[167].mxu0  ;;  %v4686_v42 = vld [vmem:[#allocation3 + $0x1d0] sm:$0xff] }
 0x32c   :  { %v5557_v56 = vld [vmem:[%s23030_s5 + $0x48] sm:$0xff] }
 0x32d   :  { %4953 = vmatmul.mubr.bf16.gmra.mrb[240].mxu1 %v4679_v20  ;;  %16358 = vmatmul.mubr.msk.bf16.gmra.mrb[16].mxu0 %vm2812_vm2, %v4705_v6 }
 0x32e   :  { %4960 = vmatprep.mubr.bf16.mxu1 %v4683_v15  ;;  %v23123_v15 = vld [vmem:[#allocation35_spill] sm:$0xff] }
 0x330   :  { %v4276_v44 = vpop.f32.mrb[168].mxu0 }
 0x331   :  { %v19167_v61 = vadd.f32 %v18596_v29, %v4276_v44  ;;  %v4278_v45 = vpop.f32.mrb[169].mxu0  ;;  %v5561_v29 = vld [vmem:[%s23030_s5 + $0x68] sm:$0xff]  ;;  %v4685_v44 = vld [vmem:[#allocation3 + $0x1c8] sm:$0xff] }
 0x332   :  { %v4279_v31 = vpop.f32.mrb[170].mxu0  ;;  %v14607_v18 = vcombine.high %v5557_v56, %v5561_v29  ;;  %v4689_v45 = vld [vmem:[#allocation3 + $0x1e8] sm:$0xff] }
 0x333   :  { %v19170_v8 = vadd.f32 %v18602_v33, %v4279_v31  ;;  %v4281_v28 = vpop.f32.mrb[171].mxu0  ;;  %v14606_v33 = vcombine.low %v5557_v56, %v5561_v29  ;;  %v5565_v56 = vld [vmem:[%s23030_s5 + $0x88] sm:$0xff] }
 0x334   :  { %10885 = vmatprep.subr.bf16.mxu1 %v14607_v18  ;;  %v5569_v29 = vld [vmem:[%s23030_s5 + $0xa8] sm:$0xff] }
 0x335   :  { %4961 = vmatmul.mubr.bf16.gmra.mrb[244].mxu1 %v4682_v40  ;;  %v14615_v18 = vcombine.high %v5565_v56, %v5569_v29 }
 0x336   :  { %4968 = vmatprep.mubr.bf16.mxu1 %v4686_v42  ;;  %10886 = vmatpush1.bf16.msra.mxu1 %v14606_v33  ;;  %v14614_v33 = vcombine.low %v5565_v56, %v5569_v29 }
 0x337   :  { %10887 = vmatprep.subr.bf16.mxu1 %v14615_v18 }
 0x338   :  { %v4284_v2 = vpop.f32.mrb[172].mxu0 }
 0x339   :  { %v19179_v6 = vadd.f32 %v18592_v25, %v4284_v2  ;;  %v4286_v20 = vpop.f32.mrb[173].mxu0 }
 0x33a   :  { %v4287_v59 = vpop.f32.mrb[174].mxu0  ;;  %v4688_v20 = vld [vmem:[#allocation3 + $0x1e0] sm:$0xff]  ;;  %10888 = vmatpush1.bf16.msra.mxu1 %v14614_v33  ;;  %v5577_v33 = vld [vmem:[%s23030_s5 + $0xe8] sm:$0xff] }
 0x33b   :  { %v19182_v57 = vadd.f32 %v23123_v15, %v4287_v59  ;;  %v4289_v26 = vpop.f32.mrb[175].mxu0 }
 0x33d   :  { %4969 = vmatmul.mubr.bf16.gmra.mrb[248].mxu1 %v4685_v44  ;;  %v23124_v44 = vld [vmem:[#allocation36_spill] sm:$0xff] }
 0x33e   :  { %4976 = vmatprep.mubr.bf16.mxu1 %v4689_v45 }
 0x340   :  { %v4292_v31 = vpop.f32.mrb[176].mxu0 }
 0x341   :  { %v19185_v28 = vadd.f32 %v18620_v52, %v4292_v31  ;;  %v4294_v25 = vpop.f32.mrb[177].mxu0  ;;  %v4692_v52 = vld [vmem:[#allocation3 + $0x200] sm:$0xff] }
 0x342   :  { %v4295_v40 = vpop.f32.mrb[178].mxu0  ;;  %v4691_v25 = vld [vmem:[#allocation3 + $0x1f8] sm:$0xff] }
 0x343   :  { %v19188_v42 = vadd.f32 %v18626_v24, %v4295_v40  ;;  %v4297_v2 = vpop.f32.mrb[179].mxu0  ;;  %v4695_v40 = vld [vmem:[#allocation3 + $0x218] sm:$0xff] }
 0x345   :  { %4977 = vmatmul.mubr.bf16.gmra.mrb[252].mxu1 %v4688_v20 }
 0x346   :  { %4984 = vmatprep.mubr.bf16.mxu1 %v4692_v52 }
 0x348   :  { %v4300_v59 = vpop.f32.mrb[180].mxu0 }
 0x349   :  { %v19197_v24 = vadd.f32 %v18616_v0, %v4300_v59  ;;  %v4302_v15 = vpop.f32.mrb[181].mxu0  ;;  %v5573_v0 = vld [vmem:[%s23030_s5 + $0xc8] sm:$0xff] }
 0x34a   :  { %v4303_v26 = vpop.f32.mrb[182].mxu0  ;;  %v14622_v59 = vcombine.low %v5573_v0, %v5577_v33  ;;  %v14623_v15 = vcombine.high %v5573_v0, %v5577_v33 }
 0x34b   :  { %v19200_v45 = vadd.f32 %v23124_v44, %v4303_v26  ;;  %v4305_v31 = vpop.f32.mrb[183].mxu0  ;;  %v4694_v26 = vld [vmem:[#allocation3 + $0x210] sm:$0xff] }
 0x34c   :  { %10889 = vmatprep.subr.bf16.mxu1 %v14623_v15 }
 0x34d   :  { %4985 = vmatmul.mubr.bf16.gmra.mrb[0].mxu1 %v4691_v25 }
 0x34e   :  { %4992 = vmatprep.mubr.bf16.mxu1 %v4695_v40  ;;  %10890 = vmatpush1.bf16.msra.mxu1 %v14622_v59 }
 0x350   :  { %v4308_v2 = vpop.f32.mrb[184].mxu0 }
 0x351   :  { %v19203_v56 = vadd.f32 %v18644_v4, %v4308_v2  ;;  %v4310_v29 = vpop.f32.mrb[185].mxu0 }
 0x352   :  { %v4311_v20 = vpop.f32.mrb[186].mxu0  ;;  %v5585_v29 = vld [vmem:[%s23030_s5 + $0x128] sm:$0xff] }
 0x353   :  { %v19212_v18 = vadd.f32 %v18650_v22, %v4311_v20  ;;  %v4313_v52 = vpop.f32.mrb[187].mxu0  ;;  %v5581_v22 = vld [vmem:[%s23030_s5 + $0x108] sm:$0xff] }
 0x354   :  { %v14630_v0 = vcombine.low %v5581_v22, %v5585_v29  ;;  %v14631_v33 = vcombine.high %v5581_v22, %v5585_v29 }
 0x355   :  { %4993 = vmatmul.mubr.bf16.gmra.mrb[4].mxu1 %v4694_v26 }
 0x356   :  { %10891 = vmatprep.subr.bf16.mxu1 %v14631_v33 }
 0x357   :  { %10892 = vmatpush1.bf16.msra.mxu1 %v14630_v0  ;;  %v5548_v0 = vld [vmem:[%s23030_s5] sm:$0xff] }
 0x358   :  { %v4316_v4 = vpop.f32.mrb[188].mxu0 }
 0x359   :  { %v19215_v44 = vadd.f32 %v18640_v12, %v4316_v4  ;;  %v4318_v31 = vpop.f32.mrb[189].mxu0  ;;  %v23129_v4 = vld [vmem:[#allocation37_spill] sm:$0xff] }
 0x35a   :  { %v4319_v25 = vpop.f32.mrb[190].mxu0 }
 0x35b   :  { %23125 = vst [vmem:[#allocation13_spill] sm:$0xff] %v19215_v44  ;;  %v19218_v40 = vadd.f32 %v18646_v41, %v4319_v25  ;;  %v4321_v2 = vpop.f32.mrb[191].mxu0 }
 0x35d   :  { %23126 = vst [vmem:[#allocation5_spill] sm:$0xff] %v19218_v40  ;;  %v23131_v40 = vld [vmem:[#allocation38_spill] sm:$0xff] }
 0x360   :  { %v4324_v20 = vpop.f32.mrb[192].mxu0 }
 0x361   :  { %v19227_v12 = vadd.f32 %v18668_v47, %v4324_v20  ;;  %v4326_v52 = vpop.f32.mrb[193].mxu0  ;;  %v5589_v47 = vld [vmem:[%s23030_s5 + $0x148] sm:$0xff] }
 0x362   :  { %v4327_v59 = vpop.f32.mrb[194].mxu0 }
 0x363   :  { %23127 = vst [vmem:[#allocation14_spill] sm:$0xff] %v19227_v12  ;;  %v19230_v41 = vadd.f32 %v18674_v48, %v4327_v59  ;;  %v4329_v15 = vpop.f32.mrb[195].mxu0  ;;  %v5593_v48 = vld [vmem:[%s23030_s5 + $0x168] sm:$0xff] }
 0x364   :  { %v14638_v29 = vcombine.low %v5589_v47, %v5593_v48  ;;  %v14639_v20 = vcombine.high %v5589_v47, %v5593_v48  ;;  %v5560_v47 = vld [vmem:[%s23030_s5 + $0x60] sm:$0xff] }
 0x365   :  { %23128 = vst [vmem:[#allocation6_spill] sm:$0xff] %v19230_v41 }
 0x366   :  { %10893 = vmatprep.subr.bf16.mxu1 %v14639_v20 }
 0x367   :  { %10894 = vmatpush1.bf16.msra.mxu1 %v14638_v29 }
 0x368   :  { %v4332_v26 = vpop.f32.mrb[196].mxu0 }
 0x369   :  { %v19233_v31 = vadd.f32 %v23129_v4, %v4332_v26  ;;  %v4334_v25 = vpop.f32.mrb[197].mxu0 }
 0x36a   :  { %v4335_v2 = vpop.f32.mrb[198].mxu0 }
 0x36b   :  { %23130 = vst [vmem:[#allocation15_spill] sm:$0xff] %v19233_v31  ;;  %v19236_v44 = vadd.f32 %v23131_v40, %v4335_v2  ;;  %v4337_v22 = vpop.f32.mrb[199].mxu0  ;;  %v5552_v40 = vld [vmem:[%s23030_s5 + $0x20] sm:$0xff] }
 0x36c   :  { %v14597_v33 = vcombine.high %v5548_v0, %v5552_v40  ;;  %v14596_v59 = vcombine.low %v5548_v0, %v5552_v40  ;;  %v5556_v22 = vld [vmem:[%s23030_s5 + $0x40] sm:$0xff] }
 0x36d   :  { %23132 = vst [vmem:[#allocation8_spill] sm:$0xff] %v19236_v44  ;;  %v14605_v20 = vcombine.high %v5556_v22, %v5560_v47  ;;  %v14604_v40 = vcombine.low %v5556_v22, %v5560_v47  ;;  %v5572_v22 = vld [vmem:[%s23030_s5 + $0xc0] sm:$0xff] }
 0x36e   :  { %10582 = vmatprep.subr.bf16.mxu0 %v14597_v33  ;;  %v5564_v33 = vld [vmem:[%s23030_s5 + $0x80] sm:$0xff] }
 0x36f   :  { %v19250_v52 = vpop.f32.mrb[172].mxu1  ;;  %10583 = vmatpush1.bf16.msra.mxu0 %v14596_v59  ;;  %v5568_v59 = vld [vmem:[%s23030_s5 + $0xa0] sm:$0xff] }
 0x370   :  { %v4340_v15 = vpop.f32.mrb[200].mxu0  ;;  %v4820_v26 = vpop.f32.mrb[173].mxu1  ;;  %10584 = vmatprep.subr.bf16.mxu0 %v14605_v20  ;;  %v5576_v47 = vld [vmem:[%s23030_s5 + $0xe0] sm:$0xff] }
 0x371   :  { %v19253_v4 = vadd.f32 %v18692_v55, %v4340_v15  ;;  %v4342_v25 = vpop.f32.mrb[201].mxu0  ;;  %v19255_v2 = vpop.f32.mrb[174].mxu1  ;;  %v14613_v15 = vcombine.high %v5564_v33, %v5568_v59  ;;  %v14612_v26 = vcombine.low %v5564_v33, %v5568_v59  ;;  %v14621_v20 = vcombine.high %v5572_v22, %v5576_v47  ;;  %v5601_v59 = vld [vmem:[%s23030_s5 + $0x1a8] sm:$0xff] }
 0x372   :  { %v4343_v48 = vpop.f32.mrb[202].mxu0  ;;  %v4823_v29 = vpop.f32.mrb[175].mxu1 }
 0x373   :  { %23133 = vst [vmem:[#allocation16_spill] sm:$0xff] %v19253_v4  ;;  %v19264_v0 = vadd.f32 %v18698_v53, %v4343_v48  ;;  %v4345_v55 = vpop.f32.mrb[203].mxu0  ;;  %10585 = vmatpush1.bf16.msra.mxu0 %v14604_v40  ;;  %v5656_v4 = vld [vmem:[%s23030_s5 + $0x360] sm:$0xff] }
 0x374   :  { %10586 = vmatprep.subr.bf16.mxu0 %v14613_v15  ;;  %v23136_v55 = vld [vmem:[#allocation39_spill] sm:$0xff]  ;;  %v14620_v15 = vcombine.low %v5572_v22, %v5576_v47 }
 0x375   :  { %23134 = vst [vmem:[#allocation7_spill] sm:$0xff] %v19264_v0 }
 0x377   :  { %10587 = vmatpush1.bf16.msra.mxu0 %v14612_v26 }
 0x378   :  { %v4348_v25 = vpop.f32.mrb[204].mxu0  ;;  %10588 = vmatprep.subr.bf16.mxu0 %v14621_v20 }
 0x379   :  { %v19273_v29 = vadd.f32 %v18688_v17, %v4348_v25  ;;  %v4350_v53 = vpop.f32.mrb[205].mxu0  ;;  %v5597_v17 = vld [vmem:[%s23030_s5 + $0x188] sm:$0xff] }
 0x37a   :  { %v4351_v48 = vpop.f32.mrb[206].mxu0  ;;  %v14646_v25 = vcombine.low %v5597_v17, %v5601_v59  ;;  %v14647_v53 = vcombine.high %v5597_v17, %v5601_v59  ;;  %v5605_v17 = vld [vmem:[%s23030_s5 + $0x1c8] sm:$0xff] }
 0x37b   :  { %23135 = vst [vmem:[#allocation17_spill] sm:$0xff] %v19273_v29  ;;  %v19282_v40 = vadd.f32 %v23136_v55, %v4351_v48  ;;  %v4353_v33 = vpop.f32.mrb[207].mxu0  ;;  %10589 = vmatpush1.bf16.msra.mxu0 %v14620_v15  ;;  %v5580_v48 = vld [vmem:[%s23030_s5 + $0x100] sm:$0xff]  ;;  %v5609_v59 = vld [vmem:[%s23030_s5 + $0x1e8] sm:$0xff] }
 0x37c   :  { %v19290_v26 = vpop.f32.mrb[176].mxu1  ;;  %v5584_v55 = vld [vmem:[%s23030_s5 + $0x120] sm:$0xff]  ;;  %10895 = vmatprep.subr.bf16.mxu1 %v14647_v53  ;;  %v14654_v53 = vcombine.low %v5605_v17, %v5609_v59 }
 0x37d   :  { %23137 = vst [vmem:[#allocation9_spill] sm:$0xff] %v19282_v40  ;;  %v4828_v29 = vpop.f32.mrb[177].mxu1  ;;  %v14629_v40 = vcombine.high %v5580_v48, %v5584_v55  ;;  %10896 = vmatpush1.bf16.msra.mxu1 %v14646_v25  ;;  %v14628_v47 = vcombine.low %v5580_v48, %v5584_v55  ;;  %v5588_v15 = vld [vmem:[%s23030_s5 + $0x140] sm:$0xff] }
 0x37e   :  { %v19298_v33 = vpop.f32.mrb[178].mxu1 }
 0x37f   :  { %v4831_v22 = vpop.f32.mrb[179].mxu1  ;;  %10590 = vmatprep.subr.bf16.mxu0 %v14629_v40  ;;  %v14655_v40 = vcombine.high %v5605_v17, %v5609_v59 }
 0x380   :  { %v4356_v0 = vpop.f32.mrb[208].mxu0  ;;  %10591 = vmatpush1.bf16.msra.mxu0 %v14628_v47  ;;  %v5596_v47 = vld [vmem:[%s23030_s5 + $0x180] sm:$0xff] }
 0x381   :  { %v19301_v29 = vadd.f32 %v18716_v7, %v4356_v0  ;;  %v4358_v20 = vpop.f32.mrb[209].mxu0  ;;  %v5592_v7 = vld [vmem:[%s23030_s5 + $0x160] sm:$0xff]  ;;  %10897 = vmatprep.subr.bf16.mxu1 %v14655_v40 }
 0x382   :  { %v4359_v25 = vpop.f32.mrb[210].mxu0  ;;  %v14636_v55 = vcombine.low %v5588_v15, %v5592_v7  ;;  %v14637_v22 = vcombine.high %v5588_v15, %v5592_v7  ;;  %10898 = vmatpush1.bf16.msra.mxu1 %v14654_v53  ;;  %v5600_v20 = vld [vmem:[%s23030_s5 + $0x1a0] sm:$0xff] }
 0x383   :  { %23138 = vst [vmem:[#allocation23_spill] sm:$0xff] %v19301_v29  ;;  %v19316_v0 = vadd.f32 %v18722_v37, %v4359_v25  ;;  %v4361_v48 = vpop.f32.mrb[211].mxu0  ;;  %v14645_v17 = vcombine.high %v5596_v47, %v5600_v20  ;;  %v14644_v59 = vcombine.low %v5596_v47, %v5600_v20  ;;  %v5604_v40 = vld [vmem:[%s23030_s5 + $0x1c0] sm:$0xff] }
 0x384   :  { %10592 = vmatprep.subr.bf16.mxu0 %v14637_v22  ;;  %v5608_v7 = vld [vmem:[%s23030_s5 + $0x1e0] sm:$0xff] }
 0x385   :  { %23139 = vst [vmem:[#allocation21_spill] sm:$0xff] %v19316_v0  ;;  %10593 = vmatpush1.bf16.msra.mxu0 %v14636_v55  ;;  %v14653_v22 = vcombine.high %v5604_v40, %v5608_v7  ;;  %v14652_v20 = vcombine.low %v5604_v40, %v5608_v7 }
 0x386   :  { %10594 = vmatprep.subr.bf16.mxu0 %v14645_v17  ;;  %v5612_v17 = vld [vmem:[%s23030_s5 + $0x200] sm:$0xff] }
 0x388   :  { %v4364_v29 = vpop.f32.mrb[212].mxu0  ;;  %v19324_v37 = vpop.f32.mrb[180].mxu1 }
 0x389   :  { %v19327_v15 = vadd.f32 %v18712_v38, %v4364_v29  ;;  %v4366_v25 = vpop.f32.mrb[213].mxu0  ;;  %v4836_v53 = vpop.f32.mrb[181].mxu1  ;;  %10595 = vmatpush1.bf16.msra.mxu0 %v14644_v59 }
 0x38a   :  { %v4367_v48 = vpop.f32.mrb[214].mxu0  ;;  %v19335_v55 = vpop.f32.mrb[182].mxu1  ;;  %10596 = vmatprep.subr.bf16.mxu0 %v14653_v22  ;;  %v5616_v25 = vld [vmem:[%s23030_s5 + $0x220] sm:$0xff]  ;;  %v5617_v22 = vld [vmem:[%s23030_s5 + $0x228] sm:$0xff] }
 0x38b   :  { %23140 = vst [vmem:[#allocation22_spill] sm:$0xff] %v19327_v15  ;;  %v19338_v47 = vadd.f32 %v18718_v36, %v4367_v48  ;;  %v4369_v38 = vpop.f32.mrb[215].mxu0  ;;  %v4839_v29 = vpop.f32.mrb[183].mxu1  ;;  %v14661_v53 = vcombine.high %v5612_v17, %v5616_v25  ;;  %v14660_v15 = vcombine.low %v5612_v17, %v5616_v25  ;;  %v5613_v48 = vld [vmem:[%s23030_s5 + $0x208] sm:$0xff]  ;;  %v5624_v25 = vld [vmem:[%s23030_s5 + $0x260] sm:$0xff] }
 0x38c   :  { %v5620_v38 = vld [vmem:[%s23030_s5 + $0x240] sm:$0xff]  ;;  %v14662_v17 = vcombine.low %v5613_v48, %v5617_v22 }
 0x38d   :  { %23141 = vst [vmem:[#allocation25_spill] sm:$0xff] %v19338_v47  ;;  %10597 = vmatpush1.bf16.msra.mxu0 %v14652_v20  ;;  %v5628_v47 = vld [vmem:[%s23030_s5 + $0x280] sm:$0xff] }
 0x38e   :  { %10598 = vmatprep.subr.bf16.mxu0 %v14661_v53 }
 0x390   :  { %v4372_v59 = vpop.f32.mrb[216].mxu0  ;;  %v19346_v0 = vpop.f32.mrb[184].mxu1 }
 0x391   :  { %v19349_v36 = vadd.f32 %v18740_v14, %v4372_v59  ;;  %v4374_v40 = vpop.f32.mrb[217].mxu0  ;;  %v4844_v7 = vpop.f32.mrb[185].mxu1  ;;  %v14663_v14 = vcombine.high %v5613_v48, %v5617_v22  ;;  %10599 = vmatpush1.bf16.msra.mxu0 %v14660_v15  ;;  %v5632_v15 = vld [vmem:[%s23030_s5 + $0x2a0] sm:$0xff] }
 0x392   :  { %v4375_v29 = vpop.f32.mrb[218].mxu0  ;;  %v19360_v20 = vpop.f32.mrb[186].mxu1  ;;  %v14668_v7 = vcombine.low %v5620_v38, %v5624_v25  ;;  %v14677_v48 = vcombine.high %v5628_v47, %v5632_v15  ;;  %v14676_v22 = vcombine.low %v5628_v47, %v5632_v15 }
 0x393   :  { %23142 = vst [vmem:[#allocation27_spill] sm:$0xff] %v19349_v36  ;;  %v19366_v53 = vadd.f32 %v18748_v10, %v4375_v29  ;;  %v4377_v59 = vpop.f32.mrb[219].mxu0  ;;  %v4847_v40 = vpop.f32.mrb[187].mxu1  ;;  %v14669_v36 = vcombine.high %v5620_v38, %v5624_v25  ;;  %10899 = vmatprep.subr.bf16.mxu1 %v14663_v14  ;;  %v5636_v14 = vld [vmem:[%s23030_s5 + $0x2c0] sm:$0xff] }
 0x394   :  { %10900 = vmatpush1.bf16.msra.mxu1 %v14662_v17  ;;  %v5640_v25 = vld [vmem:[%s23030_s5 + $0x2e0] sm:$0xff] }
 0x395   :  { %23143 = vst [vmem:[#allocation24_spill] sm:$0xff] %v19366_v53  ;;  %10600 = vmatprep.subr.bf16.mxu0 %v14669_v36  ;;  %v14685_v47 = vcombine.high %v5636_v14, %v5640_v25  ;;  %v5652_v53 = vld [vmem:[%s23030_s5 + $0x340] sm:$0xff] }
 0x396   :  { %10601 = vmatpush1.bf16.msra.mxu0 %v14668_v7  ;;  %v23145_v7 = vld [vmem:[#allocation40_spill] sm:$0xff]  ;;  %v14700_v31 = vcombine.low %v5652_v53, %v5656_v4 }
 0x397   :  { %10602 = vmatprep.subr.bf16.mxu0 %v14677_v48 }
 0x398   :  { %v4380_v10 = vpop.f32.mrb[220].mxu0  ;;  %v19374_v29 = vpop.f32.mrb[188].mxu1 }
 0x399   :  { %v19377_v38 = vadd.f32 %v18738_v21, %v4380_v10  ;;  %v4382_v17 = vpop.f32.mrb[221].mxu0  ;;  %v4852_v36 = vpop.f32.mrb[189].mxu1  ;;  %v14684_v10 = vcombine.low %v5636_v14, %v5640_v25 }
 0x39a   :  { %v4383_v59 = vpop.f32.mrb[222].mxu0  ;;  %v19385_v40 = vpop.f32.mrb[190].mxu1  ;;  %10603 = vmatpush1.bf16.msra.mxu0 %v14676_v22  ;;  %v5644_v17 = vld [vmem:[%s23030_s5 + $0x300] sm:$0xff]  ;;  %v5621_v22 = vld [vmem:[%s23030_s5 + $0x248] sm:$0xff] }
 0x39b   :  { %23144 = vst [vmem:[#allocation26_spill] sm:$0xff] %v19377_v38  ;;  %v19388_v15 = vadd.f32 %v23145_v7, %v4383_v59  ;;  %v4385_v21 = vpop.f32.mrb[223].mxu0  ;;  %v4855_v48 = vpop.f32.mrb[191].mxu1  ;;  %10604 = vmatprep.subr.bf16.mxu0 %v14685_v47  ;;  %v5648_v36 = vld [vmem:[%s23030_s5 + $0x320] sm:$0xff]  ;;  %v5625_v59 = vld [vmem:[%s23030_s5 + $0x268] sm:$0xff] }
 0x39c   :  { %v14693_v38 = vcombine.high %v5644_v17, %v5648_v36  ;;  %v14692_v14 = vcombine.low %v5644_v17, %v5648_v36  ;;  %v14670_v7 = vcombine.low %v5621_v22, %v5625_v59  ;;  %v14671_v21 = vcombine.high %v5621_v22, %v5625_v59  ;;  %v19414_v17 = vld [vmem:[%s23031_s4] ss:$0 sm:$0xff] }
 0x39d   :  { %23146 = vst [vmem:[#allocation30_spill] sm:$0xff] %v19388_v15 }
 0x39e   :  { %10605 = vmatpush1.bf16.msra.mxu0 %v14684_v10  ;;  %10901 = vmatprep.subr.bf16.mxu1 %v14671_v21 }
 0x39f   :  { %10606 = vmatprep.subr.bf16.mxu0 %v14693_v38  ;;  %10902 = vmatpush1.bf16.msra.mxu1 %v14670_v7 }
 0x3a0   :  { %v19402_v25 = vpop.f32.mrb[192].mxu1  ;;  %v16311_v47 = vpop.f32.mrb[224].mxu0 }
 0x3a1   :  { %v5068_v48 = vadd.f32 %v16311_v47, %v19290_v26  ;;  %v4860_v15 = vpop.f32.mrb[193].mxu1  ;;  %v5059_v10 = vpop.f32.mrb[225].mxu0 }
 0x3a2   :  { %v5060_v36 = vadd.f32 %v5059_v10, %v19250_v52  ;;  %v19417_v38 = vpop.f32.mrb[194].mxu1  ;;  %v16312_v26 = vpop.f32.mrb[226].mxu0  ;;  %10607 = vmatpush1.bf16.msra.mxu0 %v14692_v14  ;;  %v14701_v15 = vcombine.high %v5652_v53, %v5656_v4  ;;  %v5660_v14 = vld [vmem:[%s23030_s5 + $0x380] sm:$0xff] }
 0x3a3   :  { %v5268_v22 = vmax.f32 %v19002_v32, %v5068_v48  ;;  %v5071_v59 = vadd.f32 %v16312_v26, %v19298_v33  ;;  %v4863_v47 = vpop.f32.mrb[195].mxu1  ;;  %v5062_v44 = vpop.f32.mrb[227].mxu0  ;;  %v5664_v32 = vld [vmem:[%s23030_s5 + $0x3a0] sm:$0xff] }
 0x3a4   :  { %v5266_v41 = vmax.f32 %v18982_v23, %v5060_v36  ;;  %v5063_v12 = vadd.f32 %v5062_v44, %v19255_v2  ;;  %10608 = vmatprep.subr.bf16.mxu0 %v14701_v15  ;;  %v14709_v23 = vcombine.high %v5660_v14, %v5664_v32  ;;  %v14708_v2 = vcombine.low %v5660_v14, %v5664_v32  ;;  %v5672_v47 = vld [vmem:[%s23030_s5 + $0x3e0] sm:$0xff] }
 0x3a5   :  { %v5327_v52 = vadd.f32 %v19414_v17, %v5268_v22  ;;  %v5269_v10 = vmax.f32 %v19005_v54, %v5071_v59  ;;  %v5668_v59 = vld [vmem:[%s23030_s5 + $0x3c0] sm:$0xff] }
 0x3a6   :  { %v5325_v33 = vadd.f32 %v19414_v17, %v5266_v41  ;;  %v5267_v4 = vmax.f32 %v18987_v11, %v5063_v12  ;;  %10609 = vmatpush1.bf16.msra.mxu0 %v14700_v31 }
 0x3a7   :  { %v5328_v44 = vadd.f32 %v19414_v17, %v5269_v10  ;;  %10610 = vmatprep.subr.bf16.mxu0 %v14709_v23  ;;  %v5379_v21 = vmax.f32 %v5327_v52, 0.0 }
 0x3a8   :  { %v5326_v53 = vadd.f32 %v19414_v17, %v5267_v4  ;;  %v19435_v54 = vpop.f32.mrb[196].mxu1  ;;  %v16315_v7 = vpop.f32.mrb[228].mxu0  ;;  %v5377_v41 = vmax.f32 %v5325_v33, 0.0  ;;  %v5633_v33 = vld [vmem:[%s23030_s5 + $0x2a8] sm:$0xff]  ;;  %v14717_v4 = vcombine.high %v5668_v59, %v5672_v47 }
 0x3a9   :  { %v5380_v48 = vmax.f32 %v5328_v44, 0.0  ;;  %v5084_v36 = vadd.f32 %v16315_v7, %v19346_v0  ;;  %v4868_v26 = vpop.f32.mrb[197].mxu1  ;;  %v5075_v15 = vpop.f32.mrb[229].mxu0 }
 0x3aa   :  { %v5378_v11 = vmax.f32 %v5326_v53, 0.0  ;;  %v5076_v12 = vadd.f32 %v5075_v15, %v19324_v37  ;;  %v19439_v31 = vpop.f32.mrb[198].mxu1  ;;  %v16316_v22 = vpop.f32.mrb[230].mxu0  ;;  %10611 = vmatpush1.bf16.msra.mxu0 %v14708_v2  ;;  %v5629_v37 = vld [vmem:[%s23030_s5 + $0x288] sm:$0xff] }
 0x3ab   :  { %v5430_v0 = vpack.c.bf16 %v5380_v48, %v5379_v21  ;;  %v5272_v52 = vmax.f32 %v19032_v39, %v5084_v36  ;;  %v5087_v10 = vadd.f32 %v16316_v22, %v19360_v20  ;;  %v4871_v14 = vpop.f32.mrb[199].mxu1  ;;  %v5078_v32 = vpop.f32.mrb[231].mxu0  ;;  %v14678_v53 = vcombine.low %v5629_v37, %v5633_v33  ;;  %10612 = vmatprep.subr.bf16.mxu0 %v14717_v4  ;;  %v5637_v4 = vld [vmem:[%s23030_s5 + $0x2c8] sm:$0xff] }
 0x3ac   :  { %v5270_v23 = vmax.f32 %v19018_v62, %v5076_v12  ;;  %v5079_v44 = vadd.f32 %v5078_v32, %v19335_v55  ;;  %v5429_v2 = vpack.c.bf16 %v5378_v11, %v5377_v41  ;;  %v14679_v7 = vcombine.high %v5629_v37, %v5633_v33  ;;  %v19466_v62 = vld [vmem:[%s23030_s5 + $0x400] sm:$0xff] }
 0x3ad   :  { %v5331_v39 = vadd.f32 %v19414_v17, %v5272_v52  ;;  %v5273_v20 = vmax.f32 %v19037_v13, %v5087_v10  ;;  %5458 = vrot.lane.b32.xlu0 %v5430_v0, %s17096_s12  ;;  %v14716_v21 = vcombine.low %v5668_v59, %v5672_v47  ;;  %v19471_v13 = vld [vmem:[%s23030_s5 + $0x420] sm:$0xff]  ;;  %v23147_v0 = vld [vmem:[#allocation19_spill] sm:$0xff] }
 0x3ae   :  { %v5329_v48 = vadd.f32 %v19414_v17, %v5270_v23  ;;  %v5271_v36 = vmax.f32 %v19021_v63, %v5079_v44  ;;  %5456 = vst.msk [vmem:[#allocation4] sm:$0xff] %vm5455_vm6, %v5429_v2  ;;  %10903 = vmatprep.subr.bf16.mxu1 %v14679_v7  ;;  %v14725_v63 = vcombine.high %v19466_v62, %v19471_v13 }
 0x3af   :  { %v5332_v55 = vadd.f32 %v19414_v17, %v5273_v20  ;;  %10613 = vmatpush1.bf16.msra.mxu0 %v14716_v21  ;;  %10904 = vmatpush1.bf16.msra.mxu1 %v14678_v53  ;;  %v14724_v11 = vcombine.low %v19466_v62, %v19471_v13  ;;  %v5383_v12 = vmax.f32 %v5331_v39, 0.0 }
 0x3b0   :  { %v5330_v26 = vadd.f32 %v19414_v17, %v5271_v36  ;;  %v4874_v15 = vpop.f32.mrb[200].mxu1  ;;  %v16319_v41 = vpop.f32.mrb[232].mxu0  ;;  %10625 = vmatprep.subr.bf16.mxu0 %v14725_v63  ;;  %v5381_v10 = vmax.f32 %v5329_v48, 0.0  ;;  %v23148_v63 = vld [vmem:[#allocation10_spill] sm:$0xff] }
 0x3b1   :  { %v5384_v22 = vmax.f32 %v5332_v55, 0.0  ;;  %v5100_v59 = vadd.f32 %v16319_v41, %v19402_v25  ;;  %v5091_v47 = vpop.f32.mrb[233].mxu0  ;;  %3282 = vrot.lane.b32.xlu0 %v23147_v0, %s17096_s12  ;;  %v4876_v52 = vpop.f32.mrb[201].mxu1  ;;  %v5641_v25 = vld [vmem:[%s23030_s5 + $0x2e8] sm:$0xff] }
 0x3b2   :  { %v5382_v14 = vmax.f32 %v5330_v26, 0.0  ;;  %v5092_v32 = vadd.f32 %v5091_v47, %v19374_v29  ;;  %v4877_v37 = vpop.f32.mrb[202].mxu1  ;;  %v16320_v33 = vpop.f32.mrb[234].mxu0  ;;  %v14686_v20 = vcombine.low %v5637_v4, %v5641_v25  ;;  %v14687_v48 = vcombine.high %v5637_v4, %v5641_v25  ;;  %v23149_v47 = vld [vmem:[#allocation12_spill] sm:$0xff] }
 0x3b3   :  { %v5432_v23 = vpack.c.bf16 %v5384_v22, %v5383_v12  ;;  %v5276_v44 = vmax.f32 %v19066_v30, %v5100_v59  ;;  %v5103_v2 = vadd.f32 %v16320_v33, %v19417_v38  ;;  %v4879_v53 = vpop.f32.mrb[203].mxu1  ;;  %v5094_v39 = vpop.f32.mrb[235].mxu0 }
 0x3b4   :  { %v5274_v29 = vmax.f32 %v19050_v35, %v5092_v32  ;;  %v5095_v7 = vadd.f32 %v5094_v39, %v19385_v40  ;;  %v5431_v21 = vpack.c.bf16 %v5382_v14, %v5381_v10  ;;  %10905 = vmatprep.subr.bf16.mxu1 %v14687_v48 }
 0x3b5   :  { %v5335_v36 = vadd.f32 %v19414_v17, %v5276_v44  ;;  %v5277_v55 = vmax.f32 %v19069_v1, %v5103_v2  ;;  %3632 = vrot.lane.b32.xlu0 %v23148_v63, %s17098_s27  ;;  %5465 = vrot.lane.b32.xlu1 %v5432_v23, %s17096_s12 }
 0x3b6   :  { %v5333_v30 = vadd.f32 %v19414_v17, %v5274_v29  ;;  %v5275_v38 = vmax.f32 %v19053_v50, %v5095_v7  ;;  %5463 = vst.msk [vmem:[#allocation4 + $0x8] sm:$0xff] %vm5455_vm6, %v5431_v21  ;;  %10906 = vmatpush1.bf16.msra.mxu1 %v14686_v20 }
 0x3b7   :  { %v5336_v35 = vadd.f32 %v19414_v17, %v5277_v55  ;;  %v5387_v1 = vmax.f32 %v5335_v36, 0.0 }
 0x3b8   :  { %v5334_v40 = vadd.f32 %v19414_v17, %v5275_v38  ;;  %v4882_v26 = vpop.f32.mrb[204].mxu1  ;;  %v16323_v41 = vpop.f32.mrb[236].mxu0  ;;  %v5385_v0 = vmax.f32 %v5333_v30, 0.0 }
 0x3b9   :  { %v5388_v12 = vmax.f32 %v5336_v35, 0.0  ;;  %v5116_v22 = vadd.f32 %v16323_v41, %v4874_v15  ;;  %v5107_v59 = vpop.f32.mrb[237].mxu0  ;;  %3762 = vrot.lane.b32.xlu0 %v23149_v47, %s17097_s26  ;;  %3072 = vrot.lane.b32.xlu1 %v18009_v60, %s17098_s27  ;;  %v4884_v50 = vpop.f32.mrb[205].mxu1 }
 0x3ba   :  { %v5386_v52 = vmax.f32 %v5334_v40, 0.0  ;;  %v5108_v10 = vadd.f32 %v5107_v59, %v19435_v54  ;;  %v4885_v14 = vpop.f32.mrb[206].mxu1  ;;  %v16324_v32 = vpop.f32.mrb[238].mxu0  ;;  %v23150_v54 = vld [vmem:[#allocation20_spill] sm:$0xff] }
 0x3bb   :  { %v19508_v33 = vpack.c.bf16 %v5388_v12, %v5387_v1  ;;  %v5280_v4 = vmax.f32 %v19098_v27, %v5116_v22  ;;  %v5119_v25 = vadd.f32 %v16324_v32, %v4877_v37  ;;  %v4887_v15 = vpop.f32.mrb[207].mxu1  ;;  %v5110_v23 = vpop.f32.mrb[239].mxu0  ;;  %v5653_v22 = vld [vmem:[%s23030_s5 + $0x348] sm:$0xff] }
 0x3bc   :  { %v5278_v44 = vmax.f32 %v19080_v49, %v5108_v10  ;;  %v5111_v2 = vadd.f32 %v5110_v23, %v19439_v31  ;;  %v5433_v53 = vpack.c.bf16 %v5386_v52, %v5385_v0  ;;  %v5645_v49 = vld [vmem:[%s23030_s5 + $0x308] sm:$0xff] }
 0x3bd   :  { %v5339_v60 = vadd.f32 %v19414_v17, %v5280_v4  ;;  %v5281_v39 = vmax.f32 %v19101_v58, %v5119_v25  ;;  %3699 = vrot.lane.b32.xlu0 %v23150_v54, %s17096_s12  ;;  %3492 = vrot.lane.b32.xlu1 %v23148_v63, %s17097_s26  ;;  %v5649_v58 = vld [vmem:[%s23030_s5 + $0x328] sm:$0xff]  ;;  %v23151_v63 = vld [vmem:[#allocation18_spill] sm:$0xff] }
 0x3be   :  { %v5337_v27 = vadd.f32 %v19414_v17, %v5278_v44  ;;  %v5279_v37 = vmax.f32 %v19085_v9, %v5111_v2  ;;  %5469 = vst.msk [vmem:[#allocation4 + $0x10] sm:$0xff] %vm5455_vm6, %v5433_v53  ;;  %v14694_v21 = vcombine.low %v5645_v49, %v5649_v58  ;;  %v14695_v38 = vcombine.high %v5645_v49, %v5649_v58  ;;  %v5657_v32 = vld [vmem:[%s23030_s5 + $0x368] sm:$0xff]  ;;  %v23152_v49 = vld [vmem:[#allocation11_spill] sm:$0xff] }
 0x3bf   :  { %v5340_v31 = vadd.f32 %v19414_v17, %v5281_v39  ;;  %v5391_v48 = vmax.f32 %v5339_v60, 0.0 }
 0x3c0   :  { %v5338_v20 = vadd.f32 %v19414_v17, %v5279_v37  ;;  %v4890_v29 = vpop.f32.mrb[208].mxu1  ;;  %v16327_v7 = vpop.f32.mrb[240].mxu0  ;;  %v5389_v35 = vmax.f32 %v5337_v27, 0.0  ;;  %10907 = vmatprep.subr.bf16.mxu1 %v14695_v38 }
 0x3c1   :  { %v5392_v36 = vmax.f32 %v5340_v31, 0.0  ;;  %v5132_v9 = vadd.f32 %v16327_v7, %v4890_v29  ;;  %v5123_v55 = vpop.f32.mrb[241].mxu0  ;;  %3697 = vrot.lane.b32.xlu1 %v23151_v63, %s17096_s12  ;;  %v4892_v30 = vpop.f32.mrb[209].mxu1  ;;  %10908 = vmatpush1.bf16.msra.mxu1 %v14694_v21 }
 0x3c2   :  { %v5390_v40 = vmax.f32 %v5338_v20, 0.0  ;;  %v5124_v41 = vadd.f32 %v5123_v55, %v4882_v26  ;;  %v4893_v1 = vpop.f32.mrb[210].mxu1  ;;  %v16328_v12 = vpop.f32.mrb[242].mxu0  ;;  %v5673_v30 = vld [vmem:[%s23030_s5 + $0x3e8] sm:$0xff] }
 0x3c3   :  { %v5436_v59 = vpack.c.bf16 %v5392_v36, %v5391_v48  ;;  %v5284_v50 = vmax.f32 %v19128_v34, %v5132_v9  ;;  %v5135_v0 = vadd.f32 %v16328_v12, %v4893_v1  ;;  %v4895_v52 = vpop.f32.mrb[211].mxu1  ;;  %v5126_v10 = vpop.f32.mrb[243].mxu0  ;;  %v14702_v34 = vcombine.low %v5653_v22, %v5657_v32  ;;  %v5669_v36 = vld [vmem:[%s23030_s5 + $0x3c8] sm:$0xff] }
 0x3c4   :  { %v5282_v4 = vmax.f32 %v19114_v19, %v5124_v41  ;;  %v5127_v26 = vadd.f32 %v5126_v10, %v4885_v14  ;;  %v5435_v25 = vpack.c.bf16 %v5390_v40, %v5389_v35  ;;  %v14703_v19 = vcombine.high %v5653_v22, %v5657_v32  ;;  %v5661_v14 = vld [vmem:[%s23030_s5 + $0x388] sm:$0xff] }
 0x3c5   :  { %v5343_v15 = vadd.f32 %v19414_v17, %v5284_v50  ;;  %v5285_v23 = vmax.f32 %v19131_v5, %v5135_v0  ;;  %3634 = vrot.lane.b32.xlu1 %v23149_v47, %s17098_s27  ;;  %5477 = vrot.lane.b32.xlu0 %v5436_v59, %s17096_s12  ;;  %v5665_v5 = vld [vmem:[%s23030_s5 + $0x3a8] sm:$0xff]  ;;  %v14718_v41 = vcombine.low %v5669_v36, %v5673_v30 }
 0x3c6   :  { %v5341_v44 = vadd.f32 %v19414_v17, %v5282_v4  ;;  %v5283_v2 = vmax.f32 %v19117_v3, %v5127_v26  ;;  %5475 = vst.msk [vmem:[#allocation4 + $0x18] sm:$0xff] %vm5455_vm6, %v5435_v25  ;;  %10909 = vmatprep.subr.bf16.mxu1 %v14703_v19  ;;  %v14711_v54 = vcombine.high %v5661_v14, %v5665_v5  ;;  %v19573_v59 = vld [vmem:[%s23030_s5 + $0x408] sm:$0xff] }
 0x3c7   :  { %v5344_v53 = vadd.f32 %v19414_v17, %v5285_v23  ;;  %v5395_v3 = vmax.f32 %v5343_v15, 0.0  ;;  %10910 = vmatpush1.bf16.msra.mxu1 %v14702_v34  ;;  %v14710_v58 = vcombine.low %v5661_v14, %v5665_v5  ;;  %v14719_v1 = vcombine.high %v5669_v36, %v5673_v30 }
 0x3c8   :  { %v5342_v47 = vadd.f32 %v19414_v17, %v5283_v2  ;;  %v4898_v60 = vpop.f32.mrb[212].mxu1  ;;  %v16331_v39 = vpop.f32.mrb[244].mxu0  ;;  %v5393_v20 = vmax.f32 %v5341_v44, 0.0  ;;  %10911 = vmatprep.subr.bf16.mxu1 %v14711_v54 }
 0x3c9   :  { %v5396_v27 = vmax.f32 %v5344_v53, 0.0  ;;  %v5139_v37 = vpop.f32.mrb[245].mxu0  ;;  %3764 = vrot.lane.b32.xlu1 %v23152_v49, %s17097_s26  ;;  %v4900_v31 = vpop.f32.mrb[213].mxu1 }
 0x3ca   :  { %v5394_v29 = vmax.f32 %v5342_v47, 0.0  ;;  %v5140_v7 = vadd.f32 %v5139_v37, %v4898_v60  ;;  %v4901_v21 = vpop.f32.mrb[214].mxu1  ;;  %v16332_v48 = vpop.f32.mrb[246].mxu0 }
 0x3cb   :  { %v5438_v9 = vpack.c.bf16 %v5396_v27, %v5395_v3  ;;  %v4903_v55 = vpop.f32.mrb[215].mxu1  ;;  %v5142_v63 = vpop.f32.mrb[247].mxu0  ;;  %10912 = vmatpush1.bf16.msra.mxu1 %v14710_v58 }
 0x3cc   :  { %v5286_v38 = vmax.f32 %v19144_v51, %v5140_v7  ;;  %v5143_v35 = vadd.f32 %v5142_v63, %v4901_v21  ;;  %v5437_v40 = vpack.c.bf16 %v5394_v29, %v5393_v20  ;;  %10913 = vmatprep.subr.bf16.mxu1 %v14719_v1  ;;  %v19578_v51 = vld [vmem:[%s23030_s5 + $0x428] sm:$0xff] }
 0x3cd   :  { %5471 = vrot.lane.b32.xlu1 %v19508_v33, %s17096_s12  ;;  %v14727_v4 = vcombine.high %v19573_v59, %v19578_v51 }
 0x3ce   :  { %v5345_v12 = vadd.f32 %v19414_v17, %v5286_v38  ;;  %v5287_v22 = vmax.f32 %v19147_v43, %v5143_v35  ;;  %5481 = vst.msk [vmem:[#allocation4 + $0x20] sm:$0xff] %vm5455_vm6, %v5437_v40  ;;  %v14726_v43 = vcombine.low %v19573_v59, %v19578_v51  ;;  %v5701_v59 = vld [vmem:[%s23030_s5 + $0x4c8] sm:$0xff] }
 0x3cf   :  { %10914 = vmatpush1.bf16.msra.mxu1 %v14718_v41  ;;  %v5705_v51 = vld [vmem:[%s23030_s5 + $0x4e8] sm:$0xff] }
 0x3d0   :  { %v5346_v33 = vadd.f32 %v19414_v17, %v5287_v22  ;;  %v4906_v50 = vpop.f32.mrb[216].mxu1  ;;  %v16335_v0 = vpop.f32.mrb[248].mxu0  ;;  %v5397_v26 = vmax.f32 %v5345_v12, 0.0  ;;  %10926 = vmatprep.subr.bf16.mxu1 %v14727_v4 }
 0x3d1   :  { %v5148_v52 = vadd.f32 %v16331_v39, %v4906_v50  ;;  %v5155_v10 = vpop.f32.mrb[249].mxu0  ;;  %5483 = vrot.lane.b32.xlu1 %v5438_v9, %s17096_s12  ;;  %v4908_v32 = vpop.f32.mrb[217].mxu1 }
 0x3d2   :  { %v5398_v25 = vmax.f32 %v5346_v33, 0.0  ;;  %v4909_v15 = vpop.f32.mrb[218].mxu1  ;;  %v16336_v23 = vpop.f32.mrb[250].mxu0 }
 0x3d3   :  { %v5288_v34 = vmax.f32 %v19154_v16, %v5148_v52  ;;  %v5151_v44 = vadd.f32 %v16332_v48, %v4909_v15  ;;  %v4911_v2 = vpop.f32.mrb[219].mxu1  ;;  %v5158_v19 = vpop.f32.mrb[251].mxu0 }
 0x3d4   :  { %v5439_v14 = vpack.c.bf16 %v5398_v25, %v5397_v26 }
 0x3d5   :  { %v5347_v53 = vadd.f32 %v19414_v17, %v5288_v34  ;;  %v5289_v5 = vmax.f32 %v19157_v46, %v5151_v44 }
 0x3d6   :  { %5487 = vst.msk [vmem:[#allocation4 + $0x28] sm:$0xff] %vm5455_vm6, %v5439_v14 }
 0x3d7   :  { %v5348_v47 = vadd.f32 %v19414_v17, %v5289_v5  ;;  %v5399_v54 = vmax.f32 %v5347_v53, 0.0 }
 0x3d8   :  { %v4914_v60 = vpop.f32.mrb[220].mxu1  ;;  %v16339_v39 = vpop.f32.mrb[252].mxu0 }
 0x3d9   :  { %v5400_v3 = vmax.f32 %v5348_v47, 0.0  ;;  %v5156_v27 = vadd.f32 %v5155_v10, %v4914_v60  ;;  %v4916_v37 = vpop.f32.mrb[221].mxu1  ;;  %v5171_v16 = vpop.f32.mrb[253].mxu0 }
 0x3da   :  { %v4917_v49 = vpop.f32.mrb[222].mxu1  ;;  %v16340_v31 = vpop.f32.mrb[254].mxu0 }
 0x3db   :  { %v5440_v58 = vpack.c.bf16 %v5400_v3, %v5399_v54  ;;  %v5290_v20 = vmax.f32 %v19167_v61, %v5156_v27  ;;  %v5159_v29 = vadd.f32 %v5158_v19, %v4917_v49  ;;  %v4919_v7 = vpop.f32.mrb[223].mxu1  ;;  %v5174_v21 = vpop.f32.mrb[255].mxu0 }
 0x3dd   :  { %v5349_v46 = vadd.f32 %v19414_v17, %v5290_v20  ;;  %v5291_v48 = vmax.f32 %v19170_v8, %v5159_v29  ;;  %5489 = vrot.lane.b32.xlu0 %v5440_v58, %s17096_s12 }
 0x3df   :  { %v5350_v36 = vadd.f32 %v19414_v17, %v5291_v48  ;;  %v5401_v63 = vmax.f32 %v5349_v46, 0.0 }
 0x3e0   :  { %v4922_v9 = vpop.f32.mrb[224].mxu1  ;;  %v19596_v55 = vpop.f32.mrb[0].mxu0 }
 0x3e1   :  { %v5402_v30 = vmax.f32 %v5350_v36, 0.0  ;;  %v5164_v38 = vadd.f32 %v16335_v0, %v4922_v9  ;;  %v4924_v35 = vpop.f32.mrb[225].mxu1  ;;  %v5187_v40 = vpop.f32.mrb[1].mxu0 }
 0x3e2   :  { %v4925_v61 = vpop.f32.mrb[226].mxu1  ;;  %v19598_v41 = vpop.f32.mrb[2].mxu0 }
 0x3e3   :  { %v5292_v1 = vmax.f32 %v19179_v6, %v5164_v38  ;;  %v5167_v12 = vadd.f32 %v16336_v23, %v4925_v61  ;;  %v4927_v22 = vpop.f32.mrb[227].mxu1  ;;  %v5190_v8 = vpop.f32.mrb[3].mxu0  ;;  %v5441_v33 = vpack.c.bf16 %v5402_v30, %v5401_v63 }
 0x3e5   :  { %v5351_v50 = vadd.f32 %v19414_v17, %v5292_v1  ;;  %v5293_v52 = vmax.f32 %v19182_v57, %v5167_v12  ;;  %5493 = vst.msk [vmem:[#allocation4 + $0x30] sm:$0xff] %vm5455_vm6, %v5441_v33 }
 0x3e7   :  { %v5352_v10 = vadd.f32 %v19414_v17, %v5293_v52  ;;  %v5403_v4 = vmax.f32 %v5351_v50, 0.0 }
 0x3e8   :  { %v4930_v0 = vpop.f32.mrb[228].mxu1  ;;  %v19605_v32 = vpop.f32.mrb[4].mxu0 }
 0x3e9   :  { %v5404_v26 = vmax.f32 %v5352_v10, 0.0  ;;  %v5172_v25 = vadd.f32 %v5171_v16, %v4930_v0  ;;  %v4932_v15 = vpop.f32.mrb[229].mxu1  ;;  %v19607_v6 = vpop.f32.mrb[5].mxu0 }
 0x3ea   :  { %v4933_v23 = vpop.f32.mrb[230].mxu1  ;;  %v19609_v34 = vpop.f32.mrb[6].mxu0 }
 0x3eb   :  { %v5442_v44 = vpack.c.bf16 %v5404_v26, %v5403_v4  ;;  %v5294_v2 = vmax.f32 %v19185_v28, %v5172_v25  ;;  %v5175_v57 = vadd.f32 %v5174_v21, %v4933_v23  ;;  %v4935_v19 = vpop.f32.mrb[231].mxu1  ;;  %v19612_v14 = vpop.f32.mrb[7].mxu0 }
 0x3ed   :  { %v5353_v53 = vadd.f32 %v19414_v17, %v5294_v2  ;;  %v5295_v5 = vmax.f32 %v19188_v42, %v5175_v57  ;;  %5495 = vrot.lane.b32.xlu1 %v5442_v44, %s17096_s12  ;;  %v23153_v44 = vld [vmem:[#allocation13_spill] sm:$0xff] }
 0x3ef   :  { %v5354_v47 = vadd.f32 %v19414_v17, %v5295_v5  ;;  %v5405_v3 = vmax.f32 %v5353_v53, 0.0 }
 0x3f0   :  { %v4938_v60 = vpop.f32.mrb[232].mxu1  ;;  %v19618_v54 = vpop.f32.mrb[8].mxu0 }
 0x3f1   :  { %v5406_v27 = vmax.f32 %v5354_v47, 0.0  ;;  %v5180_v37 = vadd.f32 %v16339_v39, %v4938_v60  ;;  %v4940_v16 = vpop.f32.mrb[233].mxu1  ;;  %v19620_v28 = vpop.f32.mrb[9].mxu0  ;;  %v23154_v47 = vld [vmem:[#allocation5_spill] sm:$0xff] }
 0x3f2   :  { %v4941_v49 = vpop.f32.mrb[234].mxu1  ;;  %v19622_v58 = vpop.f32.mrb[10].mxu0 }
 0x3f3   :  { %v5296_v20 = vmax.f32 %v19197_v24, %v5180_v37  ;;  %v5183_v29 = vadd.f32 %v16340_v31, %v4941_v49  ;;  %v4943_v42 = vpop.f32.mrb[235].mxu1  ;;  %v19625_v7 = vpop.f32.mrb[11].mxu0  ;;  %v5443_v21 = vpack.c.bf16 %v5406_v27, %v5405_v3 }
 0x3f5   :  { %v5355_v46 = vadd.f32 %v19414_v17, %v5296_v20  ;;  %v5297_v48 = vmax.f32 %v19200_v45, %v5183_v29  ;;  %5499 = vst.msk [vmem:[#allocation4 + $0x38] sm:$0xff] %vm5455_vm6, %v5443_v21  ;;  %v23155_v29 = vld [vmem:[#allocation14_spill] sm:$0xff] }
 0x3f7   :  { %v5356_v39 = vadd.f32 %v19414_v17, %v5297_v48  ;;  %v5407_v63 = vmax.f32 %v5355_v46, 0.0 }
 0x3f8   :  { %v4946_v36 = vpop.f32.mrb[236].mxu1  ;;  %v19631_v9 = vpop.f32.mrb[12].mxu0 }
 0x3f9   :  { %v5408_v30 = vmax.f32 %v5356_v39, 0.0  ;;  %v5188_v38 = vadd.f32 %v5187_v40, %v4946_v36  ;;  %v4948_v24 = vpop.f32.mrb[237].mxu1  ;;  %v19633_v31 = vpop.f32.mrb[13].mxu0  ;;  %v23156_v39 = vld [vmem:[#allocation6_spill] sm:$0xff] }
 0x3fa   :  { %v4949_v35 = vpop.f32.mrb[238].mxu1  ;;  %v19635_v61 = vpop.f32.mrb[14].mxu0 }
 0x3fb   :  { %v5444_v1 = vpack.c.bf16 %v5408_v30, %v5407_v63  ;;  %v5298_v12 = vmax.f32 %v19203_v56, %v5188_v38  ;;  %v5191_v45 = vadd.f32 %v5190_v8, %v4949_v35  ;;  %v4951_v22 = vpop.f32.mrb[239].mxu1  ;;  %v19638_v33 = vpop.f32.mrb[15].mxu0 }
 0x3fd   :  { %v5357_v50 = vadd.f32 %v19414_v17, %v5298_v12  ;;  %v5299_v52 = vmax.f32 %v19212_v18, %v5191_v45  ;;  %5501 = vrot.lane.b32.xlu0 %v5444_v1, %s17096_s12  ;;  %v23157_v12 = vld [vmem:[#allocation15_spill] sm:$0xff] }
 0x3ff   :  { %v5358_v40 = vadd.f32 %v19414_v17, %v5299_v52  ;;  %v5409_v4 = vmax.f32 %v5357_v50, 0.0 }
 0x400   :  { %v4954_v10 = vpop.f32.mrb[240].mxu1  ;;  %v19644_v0 = vpop.f32.mrb[16].mxu0 }
 0x401   :  { %v5410_v26 = vmax.f32 %v5358_v40, 0.0  ;;  %v5196_v25 = vadd.f32 %v19596_v55, %v4954_v10  ;;  %v4956_v56 = vpop.f32.mrb[241].mxu1  ;;  %v19647_v8 = vpop.f32.mrb[17].mxu0  ;;  %v23158_v40 = vld [vmem:[#allocation8_spill] sm:$0xff] }
 0x402   :  { %v4957_v15 = vpop.f32.mrb[242].mxu1  ;;  %v19649_v23 = vpop.f32.mrb[18].mxu0 }
 0x403   :  { %v5300_v2 = vmax.f32 %v23153_v44, %v5196_v25  ;;  %v5199_v18 = vadd.f32 %v19598_v41, %v4957_v15  ;;  %v4959_v57 = vpop.f32.mrb[243].mxu1  ;;  %v19653_v19 = vpop.f32.mrb[19].mxu0  ;;  %v5445_v53 = vpack.c.bf16 %v5410_v26, %v5409_v4 }
 0x405   :  { %v5359_v5 = vadd.f32 %v19414_v17, %v5300_v2  ;;  %v5301_v60 = vmax.f32 %v23154_v47, %v5199_v18  ;;  %5505 = vst.msk [vmem:[#allocation4 + $0x40] sm:$0xff] %vm5455_vm6, %v5445_v53  ;;  %v23159_v18 = vld [vmem:[#allocation16_spill] sm:$0xff]  ;;  %v23160_v47 = vld [vmem:[#allocation7_spill] sm:$0xff] }
 0x407   :  { %v5360_v55 = vadd.f32 %v19414_v17, %v5301_v60  ;;  %v5411_v27 = vmax.f32 %v5359_v5, 0.0 }
 0x408   :  { %v4962_v3 = vpop.f32.mrb[244].mxu1 }
 0x409   :  { %v5412_v37 = vmax.f32 %v5360_v55, 0.0  ;;  %v5204_v16 = vadd.f32 %v19607_v6, %v4962_v3  ;;  %v4964_v49 = vpop.f32.mrb[245].mxu1 }
 0x40a   :  { %v4965_v20 = vpop.f32.mrb[246].mxu1 }
 0x40b   :  { %v5446_v41 = vpack.c.bf16 %v5412_v37, %v5411_v27  ;;  %v5302_v42 = vmax.f32 %v23155_v29, %v5204_v16  ;;  %v5207_v21 = vadd.f32 %v19612_v14, %v4965_v20  ;;  %v4967_v46 = vpop.f32.mrb[247].mxu1  ;;  %v23161_v20 = vld [vmem:[#allocation17_spill] sm:$0xff] }
 0x40d   :  { %v5361_v48 = vadd.f32 %v19414_v17, %v5302_v42  ;;  %v5303_v36 = vmax.f32 %v23156_v39, %v5207_v21  ;;  %5507 = vrot.lane.b32.xlu1 %v5446_v41, %s17096_s12  ;;  %v23162_v39 = vld [vmem:[#allocation9_spill] sm:$0xff] }
 0x40f   :  { %v5362_v63 = vadd.f32 %v19414_v17, %v5303_v36  ;;  %v5413_v38 = vmax.f32 %v5361_v48, 0.0 }
 0x410   :  { %v4970_v30 = vpop.f32.mrb[248].mxu1 }
 0x411   :  { %v5414_v24 = vmax.f32 %v5362_v63, 0.0  ;;  %v5212_v6 = vadd.f32 %v19605_v32, %v4970_v30  ;;  %v4972_v35 = vpop.f32.mrb[249].mxu1 }
 0x412   :  { %v4973_v1 = vpop.f32.mrb[250].mxu1 }
 0x413   :  { %v5304_v45 = vmax.f32 %v23157_v12, %v5212_v6  ;;  %v5215_v14 = vadd.f32 %v19609_v34, %v4973_v1  ;;  %v4975_v22 = vpop.f32.mrb[251].mxu1  ;;  %v5447_v50 = vpack.c.bf16 %v5414_v24, %v5413_v38 }
 0x415   :  { %v5363_v52 = vadd.f32 %v19414_v17, %v5304_v45  ;;  %v5305_v10 = vmax.f32 %v23158_v40, %v5215_v14  ;;  %5511 = vst.msk [vmem:[#allocation4 + $0x48] sm:$0xff] %vm5455_vm6, %v5447_v50  ;;  %v23163_v45 = vld [vmem:[#allocation23_spill] sm:$0xff]  ;;  %v5684_v40 = vld [vmem:[%s23030_s5 + $0x440] sm:$0xff] }
 0x417   :  { %v5364_v4 = vadd.f32 %v19414_v17, %v5305_v10  ;;  %v5415_v25 = vmax.f32 %v5363_v52, 0.0 }
 0x418   :  { %v4978_v26 = vpop.f32.mrb[252].mxu1 }
 0x419   :  { %v5416_v56 = vmax.f32 %v5364_v4, 0.0  ;;  %v5220_v32 = vadd.f32 %v19620_v28, %v4978_v26  ;;  %v4980_v15 = vpop.f32.mrb[253].mxu1  ;;  %v23164_v4 = vld [vmem:[#allocation21_spill] sm:$0xff] }
 0x41a   :  { %v4981_v44 = vpop.f32.mrb[254].mxu1 }
 0x41b   :  { %v5448_v2 = vpack.c.bf16 %v5416_v56, %v5415_v25  ;;  %v5306_v34 = vmax.f32 %v23159_v18, %v5220_v32  ;;  %v5223_v57 = vadd.f32 %v19625_v7, %v4981_v44  ;;  %v4983_v53 = vpop.f32.mrb[255].mxu1 }
 0x41d   :  { %v5365_v5 = vadd.f32 %v19414_v17, %v5306_v34  ;;  %v5307_v60 = vmax.f32 %v23160_v47, %v5223_v57  ;;  %5513 = vrot.lane.b32.xlu0 %v5448_v2, %s17096_s12  ;;  %v5692_v2 = vld [vmem:[%s23030_s5 + $0x480] sm:$0xff] }
 0x41f   :  { %v5366_v55 = vadd.f32 %v19414_v17, %v5307_v60  ;;  %v5459_v3 = vpop.permute.xlu0 %5458  ;;  %v5417_v27 = vmax.f32 %v5365_v5, 0.0 }
 0x420   :  { %5462 = vst.msk [vmem:[#allocation4] sm:$0xff] %vm5461_vm7, %v5459_v3  ;;  %v4986_v28 = vpop.f32.mrb[0].mxu1  ;;  %v5704_v3 = vld [vmem:[%s23030_s5 + $0x4e0] sm:$0xff] }
 0x421   :  { %v5418_v37 = vmax.f32 %v5366_v55, 0.0  ;;  %v5228_v16 = vadd.f32 %v19618_v54, %v4986_v28  ;;  %v4988_v49 = vpop.f32.mrb[1].mxu1  ;;  %v5700_v55 = vld [vmem:[%s23030_s5 + $0x4c0] sm:$0xff] }
 0x422   :  { %v4989_v7 = vpop.f32.mrb[2].mxu1  ;;  %v5712_v49 = vld [vmem:[%s23030_s5 + $0x520] sm:$0xff] }
 0x423   :  { %v5308_v41 = vmax.f32 %v23161_v20, %v5228_v16  ;;  %v5231_v29 = vadd.f32 %v19622_v58, %v4989_v7  ;;  %v3283_v42 = vpop.permute.xlu0 %3282  ;;  %v4991_v21 = vpop.f32.mrb[3].mxu1  ;;  %v5449_v46 = vpack.c.bf16 %v5418_v37, %v5417_v27  ;;  %v14749_v27 = vcombine.high %v5700_v55, %v5704_v3  ;;  %v4697_v37 = vld [vmem:[#allocation3 + $0x228] sm:$0xff]  ;;  %v5708_v16 = vld [vmem:[%s23030_s5 + $0x500] sm:$0xff] }
 0x424   :  { %v14748_v7 = vcombine.low %v5700_v55, %v5704_v3  ;;  %v5720_v21 = vld [vmem:[%s23030_s5 + $0x560] sm:$0xff]  ;;  %v14751_v3 = vcombine.high %v5701_v59, %v5705_v51 }
 0x425   :  { %v5367_v48 = vadd.f32 %v19414_v17, %v5308_v41  ;;  %v5309_v36 = vmax.f32 %v23162_v39, %v5231_v29  ;;  %5517 = vst.msk [vmem:[#allocation4 + $0x50] sm:$0xff] %vm5455_vm6, %v5449_v46  ;;  %v14757_v41 = vcombine.high %v5708_v16, %v5712_v49  ;;  %v14756_v46 = vcombine.low %v5708_v16, %v5712_v49 }
 0x427   :  { %v5368_v63 = vadd.f32 %v19414_v17, %v5309_v36  ;;  %v3633_v30 = vpop.permute.xlu0 %3632  ;;  %v5466_v38 = vpop.permute.xlu1 %5465  ;;  %v5419_v24 = vmax.f32 %v5367_v48, 0.0  ;;  %v19712_v44 = vld [vmem:[#allocation4] sm:$0xff] }
 0x428   :  { %3662 = vst.msk [vmem:[#allocation3 + $0x248] sm:$0xff] %vm2969_vm3, %v3633_v30  ;;  %v4994_v54 = vpop.f32.mrb[4].mxu1  ;;  %v5724_v30 = vld [vmem:[%s23030_s5 + $0x580] sm:$0xff] }
 0x429   :  { %5468 = vst.msk [vmem:[#allocation4 + $0x8] sm:$0xff] %vm5461_vm7, %v5466_v38  ;;  %v5420_v58 = vmax.f32 %v5368_v63, 0.0  ;;  %v5236_v6 = vadd.f32 %v19633_v31, %v4994_v54  ;;  %v4996_v35 = vpop.f32.mrb[5].mxu1  ;;  %v5688_v31 = vld [vmem:[%s23030_s5 + $0x460] sm:$0xff]  ;;  %v4700_v63 = vld [vmem:[#allocation3 + $0x240] sm:$0xff] }
 0x42a   :  { %v4997_v1 = vpop.f32.mrb[6].mxu1  ;;  %v14733_v15 = vcombine.high %v5684_v40, %v5688_v31  ;;  %v14732_v57 = vcombine.low %v5684_v40, %v5688_v31  ;;  %v5728_v38 = vld [vmem:[%s23030_s5 + $0x5a0] sm:$0xff] }
 0x42b   :  { %v5450_v12 = vpack.c.bf16 %v5420_v58, %v5419_v24  ;;  %v5310_v14 = vmax.f32 %v23163_v45, %v5236_v6  ;;  %v5239_v22 = vadd.f32 %v19638_v33, %v4997_v1  ;;  %v3073_v50 = vpop.permute.xlu1 %3072  ;;  %v4999_v52 = vpop.f32.mrb[7].mxu1  ;;  %v14773_v6 = vcombine.high %v5724_v30, %v5728_v38  ;;  %v5732_v35 = vld [vmem:[%s23030_s5 + $0x5c0] sm:$0xff] }
 0x42c   :  { %3125 = vst.msk [vmem:[#allocation3 + $0x258] sm:$0xff] %vm2969_vm3, %v3073_v50  ;;  %3661 = vst.msk [vmem:[#allocation3 + $0x230] sm:$0xff] %vm2969_vm3, %v3073_v50  ;;  %v3763_v25 = vpop.permute.xlu0 %3762  ;;  %v5736_v1 = vld [vmem:[%s23030_s5 + $0x5e0] sm:$0xff] }
 0x42d   :  { %v5369_v10 = vadd.f32 %v19414_v17, %v5310_v14  ;;  %v5311_v26 = vmax.f32 %v23164_v4, %v5239_v22  ;;  %3335 = vst.msk [vmem:[#allocation3 + $0x258] sm:$0xff] %vm3204_vm4, %v3283_v42  ;;  %3726 = vst.msk [vmem:[#allocation3 + $0x230] sm:$0xff] %vm3204_vm4, %v3283_v42  ;;  %5519 = vrot.lane.b32.xlu1 %v5450_v12, %s17096_s12  ;;  %v5716_v42 = vld [vmem:[%s23030_s5 + $0x540] sm:$0xff]  ;;  %v14772_v12 = vcombine.low %v5724_v30, %v5728_v38  ;;  %v5685_v4 = vld [vmem:[%s23030_s5 + $0x448] sm:$0xff] }
 0x42e   :  { %v14765_v36 = vcombine.high %v5716_v42, %v5720_v21  ;;  %v14764_v54 = vcombine.low %v5716_v42, %v5720_v21  ;;  %v14781_v45 = vcombine.high %v5732_v35, %v5736_v1  ;;  %v5740_v22 = vld [vmem:[%s23030_s5 + $0x600] sm:$0xff]  ;;  %v14780_v52 = vcombine.low %v5732_v35, %v5736_v1  ;;  %v5725_v30 = vld [vmem:[%s23030_s5 + $0x588] sm:$0xff] }
 0x42f   :  { %v5370_v33 = vadd.f32 %v19414_v17, %v5311_v26  ;;  %v3493_v56 = vpop.permute.xlu1 %3492  ;;  %v5696_v17 = vld [vmem:[%s23030_s5 + $0x4a0] sm:$0xff]  ;;  %v5421_v18 = vmax.f32 %v5369_v10, 0.0  ;;  %v5689_v26 = vld [vmem:[%s23030_s5 + $0x468] sm:$0xff] }
 0x430   :  { %v19707_v32 = vld [vmem:[#allocation4 + $0x8] sm:$0xff]  ;;  %3545 = vst.msk [vmem:[#allocation3 + $0x258] sm:$0xff] %vm3414_vm5, %v3493_v56  ;;  %3791 = vst.msk [vmem:[#allocation3 + $0x230] sm:$0xff] %vm3414_vm5, %v3493_v56  ;;  %v3700_v53 = vpop.permute.xlu0 %3699  ;;  %v14741_v47 = vcombine.high %v5692_v2, %v5696_v17  ;;  %v14740_v62 = vcombine.low %v5692_v2, %v5696_v17  ;;  %v5744_v50 = vld [vmem:[%s23030_s5 + $0x620] sm:$0xff] }
 0x431   :  { %10614 = vmatprep.mubr.bf16.mxu0 %v19707_v32  ;;  %v5422_v34 = vmax.f32 %v5370_v33, 0.0  ;;  %v14789_v40 = vcombine.high %v5740_v22, %v5744_v50  ;;  %v5748_v31 = vld [vmem:[%s23030_s5 + $0x640] sm:$0xff]  ;;  %v5693_v17 = vld [vmem:[%s23030_s5 + $0x488] sm:$0xff] }
 0x432   :  { %10615 = vmatmul.mubr.bf16.vlgmr.msra.gmra.mrb[20].mxu0 %v19712_v44  ;;  %v5752_v10 = vld [vmem:[%s23030_s5 + $0x660] sm:$0xff]  ;;  %v5729_v38 = vld [vmem:[%s23030_s5 + $0x5a8] sm:$0xff] }
 0x433   :  { %10626 = vmatpush1.bf16.msra.mxu0 %v14724_v11  ;;  %v3698_v5 = vpop.permute.xlu1 %3697  ;;  %v5451_v60 = vpack.c.bf16 %v5422_v34, %v5421_v18  ;;  %v14797_v56 = vcombine.high %v5748_v31, %v5752_v10  ;;  %v5760_v2 = vld [vmem:[%s23030_s5 + $0x6a0] sm:$0xff]  ;;  %v5697_v18 = vld [vmem:[%s23030_s5 + $0x4a8] sm:$0xff]  ;;  %v14796_v34 = vcombine.low %v5748_v31, %v5752_v10 }
 0x434   :  { %10627 = vmatprep.subr.bf16.mxu0 %v14733_v15  ;;  %3727 = vst.msk [vmem:[#allocation3 + $0x248] sm:$0xff] %vm3204_vm4, %v3698_v5  ;;  %v14735_v15 = vcombine.high %v5685_v4, %v5689_v26  ;;  %v14743_v5 = vcombine.high %v5693_v17, %v5697_v18  ;;  %v5796_v35 = vld [vmem:[%s23030_s5 + $0x7c0] sm:$0xff]  ;;  %v5741_v10 = vld [vmem:[%s23030_s5 + $0x608] sm:$0xff] }
 0x435   :  { %3792 = vst.msk [vmem:[#allocation3 + $0x248] sm:$0xff] %vm3414_vm5, %v3763_v25  ;;  %v14788_v25 = vcombine.low %v5740_v22, %v5744_v50  ;;  %v5800_v1 = vld [vmem:[%s23030_s5 + $0x7e0] sm:$0xff]  ;;  %v14774_v22 = vcombine.low %v5725_v30, %v5729_v38 }
 0x436   :  { %5523 = vst.msk [vmem:[#allocation4 + $0x58] sm:$0xff] %vm5455_vm6, %v5451_v60  ;;  %v14742_v60 = vcombine.low %v5693_v17, %v5697_v18  ;;  %v14845_v50 = vcombine.high %v5796_v35, %v5800_v1  ;;  %v5808_v31 = vld [vmem:[%s23030_s5 + $0x820] sm:$0xff]  ;;  %v5753_v17 = vld [vmem:[%s23030_s5 + $0x668] sm:$0xff] }
 0x437   :  { %10628 = vmatpush1.bf16.msra.mxu0 %v14732_v57  ;;  %v3635_v13 = vpop.permute.xlu1 %3634  ;;  %v5478_v11 = vpop.permute.xlu0 %5477  ;;  %v4698_v28 = vld [vmem:[#allocation3 + $0x230] sm:$0xff]  ;;  %v4703_v14 = vld [vmem:[#allocation3 + $0x258] sm:$0xff]  ;;  %v14734_v57 = vcombine.low %v5685_v4, %v5689_v26  ;;  %v14844_v26 = vcombine.low %v5796_v35, %v5800_v1 }
 0x438   :  { %10629 = vmatprep.subr.bf16.mxu0 %v14741_v47  ;;  %3663 = vst.msk [vmem:[#allocation3 + $0x260] sm:$0xff] %vm2969_vm3, %v3635_v13  ;;  %5000 = vmatprep.mubr.bf16.mxu1 %v4698_v28  ;;  %v5764_v47 = vld [vmem:[%s23030_s5 + $0x6c0] sm:$0xff]  ;;  %v5713_v28 = vld [vmem:[%s23030_s5 + $0x528] sm:$0xff] }
 0x439   :  { %5480 = vst.msk [vmem:[#allocation4 + $0x18] sm:$0xff] %vm5461_vm7, %v5478_v11  ;;  %5001 = vmatmul.mubr.bf16.gmra.mrb[8].mxu1 %v4697_v37  ;;  %v5776_v13 = vld [vmem:[%s23030_s5 + $0x720] sm:$0xff]  ;;  %v5709_v11 = vld [vmem:[%s23030_s5 + $0x508] sm:$0xff]  ;;  %v14750_v37 = vcombine.low %v5701_v59, %v5705_v51 }
 0x43a   :  { %3728 = vst.msk [vmem:[#allocation3 + $0x260] sm:$0xff] %vm3204_vm4, %v3700_v53  ;;  %v14759_v49 = vcombine.high %v5709_v11, %v5713_v28  ;;  %v14758_v21 = vcombine.low %v5709_v11, %v5713_v28  ;;  %v5745_v4 = vld [vmem:[%s23030_s5 + $0x628] sm:$0xff]  ;;  %v5824_v59 = vld [vmem:[%s23030_s5 + $0x8a0] sm:$0xff] }
 0x43b   :  { %10630 = vmatpush1.bf16.msra.mxu0 %v14740_v62  ;;  %v3765_v20 = vpop.permute.xlu1 %3764  ;;  %v5772_v62 = vld [vmem:[%s23030_s5 + $0x700] sm:$0xff] }
 0x43c   :  { %10631 = vmatprep.subr.bf16.mxu0 %v14749_v27  ;;  %3793 = vst.msk [vmem:[#allocation3 + $0x260] sm:$0xff] %vm3414_vm5, %v3765_v20  ;;  %v4701_v29 = vld [vmem:[#allocation3 + $0x248] sm:$0xff]  ;;  %v14821_v16 = vcombine.high %v5772_v62, %v5776_v13  ;;  %v5784_v20 = vld [vmem:[%s23030_s5 + $0x760] sm:$0xff]  ;;  %v14820_v42 = vcombine.low %v5772_v62, %v5776_v13 }
 0x43d   :  { %5008 = vmatprep.mubr.bf16.mxu1 %v4701_v29  ;;  %v5721_v29 = vld [vmem:[%s23030_s5 + $0x568] sm:$0xff]  ;;  %v5828_v11 = vld [vmem:[%s23030_s5 + $0x8c0] sm:$0xff] }
 0x43e   :  { %v5832_v28 = vld [vmem:[%s23030_s5 + $0x8e0] sm:$0xff] }
 0x43f   :  { %10632 = vmatpush1.bf16.msra.mxu0 %v14748_v7  ;;  %v5472_v48 = vpop.permute.xlu1 %5471  ;;  %v5780_v7 = vld [vmem:[%s23030_s5 + $0x740] sm:$0xff] }
 0x440   :  { %10633 = vmatprep.subr.bf16.mxu0 %v14757_v41  ;;  %v5538_v39 = vld [vmem:[#allocation4 + $0x18] sm:$0xff]  ;;  %5474 = vst.msk [vmem:[#allocation4 + $0x10] sm:$0xff] %vm5461_vm7, %v5472_v48  ;;  %v5717_v41 = vld [vmem:[%s23030_s5 + $0x548] sm:$0xff]  ;;  %v14829_v48 = vcombine.high %v5780_v7, %v5784_v20 }
 0x441   :  { %10657 = vmatprep.mubr.bf16.mxu0 %v5538_v39  ;;  %5009 = vmatmul.mubr.bf16.gmra.mrb[12].mxu1 %v4700_v63  ;;  %v5792_v63 = vld [vmem:[%s23030_s5 + $0x7a0] sm:$0xff] }
 0x443   :  { %10634 = vmatpush1.bf16.msra.mxu0 %v14756_v46  ;;  %v5484_v24 = vpop.permute.xlu1 %5483  ;;  %v4704_v58 = vld [vmem:[#allocation3 + $0x260] sm:$0xff] }
 0x444   :  { %10635 = vmatprep.subr.bf16.mxu0 %v14765_v36  ;;  %5486 = vst.msk [vmem:[#allocation4 + $0x20] sm:$0xff] %vm5461_vm7, %v5484_v24  ;;  %5016 = vmatprep.mubr.bf16.mxu1 %v4704_v58  ;;  %v5788_v36 = vld [vmem:[%s23030_s5 + $0x780] sm:$0xff]  ;;  %v14766_v24 = vcombine.low %v5717_v41, %v5721_v29 }
 0x445   :  { %v14837_v58 = vcombine.high %v5788_v36, %v5792_v63 }
 0x447   :  { %10636 = vmatpush1.bf16.msra.mxu0 %v14764_v54  ;;  %v14828_v54 = vcombine.low %v5780_v7, %v5784_v20  ;;  %v14877_v7 = vcombine.high %v5828_v11, %v5832_v28 }
 0x448   :  { %10637 = vmatprep.subr.bf16.mxu0 %v14773_v6  ;;  %v14775_v6 = vcombine.high %v5725_v30, %v5729_v38  ;;  %v5848_v30 = vld [vmem:[%s23030_s5 + $0x960] sm:$0xff]  ;;  %v5781_v38 = vld [vmem:[%s23030_s5 + $0x748] sm:$0xff] }
 0x449   :  { %5017 = vmatmul.mubr.bf16.gmra.mrb[16].mxu1 %v4703_v14  ;;  %v14836_v14 = vcombine.low %v5788_v36, %v5792_v63  ;;  %v5844_v63 = vld [vmem:[%s23030_s5 + $0x940] sm:$0xff] }
 0x44a   :  { %10915 = vmatprep.mubr.bf16.mxu1 %v19707_v32  ;;  %v5756_v32 = vld [vmem:[%s23030_s5 + $0x680] sm:$0xff]  ;;  %v14893_v35 = vcombine.high %v5844_v63, %v5848_v30 }
 0x44b   :  { %10638 = vmatpush1.bf16.msra.mxu0 %v14772_v12  ;;  %v14805_v53 = vcombine.high %v5756_v32, %v5760_v2  ;;  %v5733_v12 = vld [vmem:[%s23030_s5 + $0x5c8] sm:$0xff] }
 0x44c   :  { %10639 = vmatprep.subr.bf16.mxu0 %v14781_v45  ;;  %v5737_v45 = vld [vmem:[%s23030_s5 + $0x5e8] sm:$0xff] }
 0x44f   :  { %10640 = vmatpush1.bf16.msra.mxu0 %v14780_v52  ;;  %v5490_v33 = vpop.permute.xlu0 %5489  ;;  %v14783_v52 = vcombine.high %v5733_v12, %v5737_v45 }
 0x450   :  { %10641 = vmatprep.subr.bf16.mxu0 %v14789_v40  ;;  %5492 = vst.msk [vmem:[#allocation4 + $0x28] sm:$0xff] %vm5461_vm7, %v5490_v33  ;;  %v5804_v40 = vld [vmem:[%s23030_s5 + $0x800] sm:$0xff] }
 0x451   :  { %10916 = vmatmul.mubr.bf16.vlgmr.msra.gmra.mrb[20].mxu1 %v19712_v44  ;;  %v5768_v44 = vld [vmem:[%s23030_s5 + $0x6e0] sm:$0xff]  ;;  %v14853_v33 = vcombine.high %v5804_v40, %v5808_v31  ;;  %v14852_v18 = vcombine.low %v5804_v40, %v5808_v31 }
 0x452   :  { %10927 = vmatpush1.bf16.msra.mxu1 %v14726_v43  ;;  %10958 = vmatprep.mubr.bf16.mxu1 %v5538_v39  ;;  %v14804_v43 = vcombine.low %v5756_v32, %v5760_v2  ;;  %v14813_v55 = vcombine.high %v5764_v47, %v5768_v44  ;;  %v14812_v27 = vcombine.low %v5764_v47, %v5768_v44  ;;  %v5812_v32 = vld [vmem:[%s23030_s5 + $0x840] sm:$0xff]  ;;  %v5749_v2 = vld [vmem:[%s23030_s5 + $0x648] sm:$0xff] }
 0x453   :  { %10642 = vmatpush1.bf16.msra.mxu0 %v14788_v25  ;;  %10928 = vmatprep.subr.bf16.mxu1 %v14735_v15  ;;  %v14767_v39 = vcombine.high %v5717_v41, %v5721_v29  ;;  %v14782_v25 = vcombine.low %v5733_v12, %v5737_v45  ;;  %v5816_v15 = vld [vmem:[%s23030_s5 + $0x860] sm:$0xff]  ;;  %v14799_v47 = vcombine.high %v5749_v2, %v5753_v17 }
 0x454   :  { %10643 = vmatprep.subr.bf16.mxu0 %v14797_v56  ;;  %v14791_v56 = vcombine.high %v5741_v10, %v5745_v4  ;;  %v5820_v44 = vld [vmem:[%s23030_s5 + $0x880] sm:$0xff] }
 0x455   :  { %v14869_v62 = vcombine.high %v5820_v44, %v5824_v59  ;;  %v5836_v41 = vld [vmem:[%s23030_s5 + $0x900] sm:$0xff] }
 0x456   :  { %10929 = vmatpush1.bf16.msra.mxu1 %v14734_v57  ;;  %v14790_v57 = vcombine.low %v5741_v10, %v5745_v4  ;;  %v5840_v29 = vld [vmem:[%s23030_s5 + $0x920] sm:$0xff] }
 0x457   :  { %10644 = vmatpush1.bf16.msra.mxu0 %v14796_v34  ;;  %10930 = vmatprep.subr.bf16.mxu1 %v14743_v5  ;;  %v19885_v5 = vld [vmem:[#allocation4 + $0x10] sm:$0xff]  ;;  %v19894_v51 = vld [vmem:[#allocation4 + $0x28] sm:$0xff]  ;;  %v5852_v12 = vld [vmem:[%s23030_s5 + $0x980] sm:$0xff] }
 0x458   :  { %10645 = vmatprep.subr.bf16.mxu0 %v14805_v53  ;;  %v14861_v53 = vcombine.high %v5812_v32, %v5816_v15  ;;  %v5856_v45 = vld [vmem:[%s23030_s5 + $0x9a0] sm:$0xff] }
 0x459   :  { %v14901_v40 = vcombine.high %v5852_v12, %v5856_v45  ;;  %v5860_v10 = vld [vmem:[%s23030_s5 + $0x9c0] sm:$0xff] }
 0x45a   :  { %10931 = vmatpush1.bf16.msra.mxu1 %v14742_v60  ;;  %v5761_v60 = vld [vmem:[%s23030_s5 + $0x6a8] sm:$0xff]  ;;  %v5864_v4 = vld [vmem:[%s23030_s5 + $0x9e0] sm:$0xff] }
 0x45b   :  { %10646 = vmatpush1.bf16.msra.mxu0 %v14804_v43  ;;  %10932 = vmatprep.subr.bf16.mxu1 %v14751_v3  ;;  %v5757_v43 = vld [vmem:[%s23030_s5 + $0x688] sm:$0xff]  ;;  %v14798_v3 = vcombine.low %v5749_v2, %v5753_v17  ;;  %v5868_v2 = vld [vmem:[%s23030_s5 + $0xa00] sm:$0xff] }
 0x45c   :  { %10647 = vmatprep.subr.bf16.mxu0 %v14813_v55  ;;  %v14860_v55 = vcombine.low %v5812_v32, %v5816_v15  ;;  %v14807_v13 = vcombine.high %v5757_v43, %v5761_v60  ;;  %v14909_v32 = vcombine.high %v5860_v10, %v5864_v4  ;;  %v5872_v17 = vld [vmem:[%s23030_s5 + $0xa20] sm:$0xff] }
 0x45e   :  { %10933 = vmatpush1.bf16.msra.mxu1 %v14750_v37  ;;  %v5769_v37 = vld [vmem:[%s23030_s5 + $0x6e8] sm:$0xff] }
 0x45f   :  { %10648 = vmatpush1.bf16.msra.mxu0 %v14812_v27  ;;  %v5496_v46 = vpop.permute.xlu1 %5495  ;;  %10934 = vmatprep.subr.bf16.mxu1 %v14759_v49  ;;  %v5765_v27 = vld [vmem:[%s23030_s5 + $0x6c8] sm:$0xff]  ;;  %v14806_v49 = vcombine.low %v5757_v43, %v5761_v60  ;;  %v5880_v43 = vld [vmem:[%s23030_s5 + $0xa60] sm:$0xff] }
 0x460   :  { %10649 = vmatprep.subr.bf16.mxu0 %v14821_v16  ;;  %5498 = vst.msk [vmem:[#allocation4 + $0x30] sm:$0xff] %vm5461_vm7, %v5496_v46  ;;  %v14868_v16 = vcombine.low %v5820_v44, %v5824_v59  ;;  %v14815_v20 = vcombine.high %v5765_v27, %v5769_v37  ;;  %v14876_v46 = vcombine.low %v5828_v11, %v5832_v28  ;;  %v5876_v59 = vld [vmem:[%s23030_s5 + $0xa40] sm:$0xff]  ;;  %v5813_v60 = vld [vmem:[%s23030_s5 + $0x848] sm:$0xff] }
 0x461   :  { %v14925_v11 = vcombine.high %v5876_v59, %v5880_v43 }
 0x462   :  { %10935 = vmatpush1.bf16.msra.mxu1 %v14758_v21  ;;  %v5777_v21 = vld [vmem:[%s23030_s5 + $0x728] sm:$0xff] }
 0x463   :  { %10650 = vmatpush1.bf16.msra.mxu0 %v14820_v42  ;;  %10936 = vmatprep.subr.bf16.mxu1 %v14767_v39  ;;  %v5773_v42 = vld [vmem:[%s23030_s5 + $0x708] sm:$0xff]  ;;  %v14885_v39 = vcombine.high %v5836_v41, %v5840_v29 }
 0x464   :  { %10651 = vmatprep.subr.bf16.mxu0 %v14829_v48  ;;  %v14814_v48 = vcombine.low %v5765_v27, %v5769_v37  ;;  %v14823_v36 = vcombine.high %v5773_v42, %v5777_v21  ;;  %v5884_v27 = vld [vmem:[%s23030_s5 + $0xa80] sm:$0xff] }
 0x465   :  { %v5888_v37 = vld [vmem:[%s23030_s5 + $0xaa0] sm:$0xff] }
 0x466   :  { %10937 = vmatpush1.bf16.msra.mxu1 %v14766_v24  ;;  %v14884_v24 = vcombine.low %v5836_v41, %v5840_v29  ;;  %v14933_v41 = vcombine.high %v5884_v27, %v5888_v37 }
 0x467   :  { %10652 = vmatpush1.bf16.msra.mxu0 %v14828_v54  ;;  %10938 = vmatprep.subr.bf16.mxu1 %v14775_v6  ;;  %v5785_v54 = vld [vmem:[%s23030_s5 + $0x768] sm:$0xff]  ;;  %v14822_v6 = vcombine.low %v5773_v42, %v5777_v21  ;;  %v5892_v42 = vld [vmem:[%s23030_s5 + $0xac0] sm:$0xff] }
 0x468   :  { %10653 = vmatprep.subr.bf16.mxu0 %v14837_v58  ;;  %v14831_v1 = vcombine.high %v5781_v38, %v5785_v54  ;;  %v5896_v21 = vld [vmem:[%s23030_s5 + $0xae0] sm:$0xff] }
 0x46a   :  { %10939 = vmatpush1.bf16.msra.mxu1 %v14774_v22  ;;  %v5793_v22 = vld [vmem:[%s23030_s5 + $0x7a8] sm:$0xff] }
 0x46b   :  { %10654 = vmatpush1.bf16.msra.mxu0 %v14836_v14  ;;  %10940 = vmatprep.subr.bf16.mxu1 %v14783_v52  ;;  %v5789_v14 = vld [vmem:[%s23030_s5 + $0x788] sm:$0xff]  ;;  %v14830_v52 = vcombine.low %v5781_v38, %v5785_v54 }
 0x46c   :  { %10655 = vmatprep.subr.bf16.mxu0 %v14845_v50  ;;  %v14892_v50 = vcombine.low %v5844_v63, %v5848_v30  ;;  %v14839_v31 = vcombine.high %v5789_v14, %v5793_v22  ;;  %v5900_v63 = vld [vmem:[%s23030_s5 + $0xb00] sm:$0xff]  ;;  %v5837_v38 = vld [vmem:[%s23030_s5 + $0x908] sm:$0xff] }
 0x46d   :  { %v5904_v30 = vld [vmem:[%s23030_s5 + $0xb20] sm:$0xff]  ;;  %v5841_v54 = vld [vmem:[%s23030_s5 + $0x928] sm:$0xff] }
 0x46e   :  { %10941 = vmatpush1.bf16.msra.mxu1 %v14782_v25  ;;  %v5801_v25 = vld [vmem:[%s23030_s5 + $0x7e8] sm:$0xff] }
 0x46f   :  { %10656 = vmatpush1.bf16.msra.mxu0 %v14844_v26  ;;  %v5502_v34 = vpop.permute.xlu0 %5501  ;;  %10942 = vmatprep.subr.bf16.mxu1 %v14791_v56  ;;  %v5797_v26 = vld [vmem:[%s23030_s5 + $0x7c8] sm:$0xff]  ;;  %v14838_v56 = vcombine.low %v5789_v14, %v5793_v22  ;;  %v14948_v22 = vcombine.low %v5900_v63, %v5904_v30 }
 0x470   :  { %10668 = vmatprep.subr.bf16.mxu0 %v14853_v33  ;;  %5504 = vst.msk [vmem:[#allocation4 + $0x38] sm:$0xff] %vm5461_vm7, %v5502_v34  ;;  %v14900_v33 = vcombine.low %v5852_v12, %v5856_v45  ;;  %v14847_v15 = vcombine.high %v5797_v26, %v5801_v25  ;;  %v5809_v34 = vld [vmem:[%s23030_s5 + $0x828] sm:$0xff]  ;;  %v5912_v12 = vld [vmem:[%s23030_s5 + $0xb60] sm:$0xff] }
 0x471   :  { %v5845_v45 = vld [vmem:[%s23030_s5 + $0x948] sm:$0xff] }
 0x472   :  { %10658 = vmatmul.mubr.bf16.vlgmr.msra.gmra.mrb[20].mxu0 %v19885_v5  ;;  %10943 = vmatpush1.bf16.msra.mxu1 %v14790_v57  ;;  %v14908_v57 = vcombine.low %v5860_v10, %v5864_v4  ;;  %v5849_v14 = vld [vmem:[%s23030_s5 + $0x968] sm:$0xff]  ;;  %v5916_v10 = vld [vmem:[%s23030_s5 + $0xb80] sm:$0xff] }
 0x473   :  { %10669 = vmatpush1.bf16.msra.mxu0 %v14852_v18  ;;  %10700 = vmatprep.mubr.bf16.mxu0 %v19894_v51  ;;  %v5805_v18 = vld [vmem:[%s23030_s5 + $0x808] sm:$0xff]  ;;  %v5920_v4 = vld [vmem:[%s23030_s5 + $0xba0] sm:$0xff] }
 0x474   :  { %10670 = vmatprep.subr.bf16.mxu0 %v14861_v53  ;;  %10944 = vmatprep.subr.bf16.mxu1 %v14799_v47  ;;  %v14846_v53 = vcombine.low %v5797_v26, %v5801_v25  ;;  %v14917_v47 = vcombine.high %v5868_v2, %v5872_v17  ;;  %v14855_v44 = vcombine.high %v5805_v18, %v5809_v34  ;;  %v5853_v26 = vld [vmem:[%s23030_s5 + $0x988] sm:$0xff] }
 0x475   :  { %v5857_v25 = vld [vmem:[%s23030_s5 + $0x9a8] sm:$0xff] }
 0x476   :  { %10945 = vmatpush1.bf16.msra.mxu1 %v14798_v3  ;;  %v14916_v3 = vcombine.low %v5868_v2, %v5872_v17  ;;  %v5924_v2 = vld [vmem:[%s23030_s5 + $0xbc0] sm:$0xff] }
 0x477   :  { %10671 = vmatpush1.bf16.msra.mxu0 %v14860_v55  ;;  %10946 = vmatprep.subr.bf16.mxu1 %v14807_v13  ;;  %v5817_v55 = vld [vmem:[%s23030_s5 + $0x868] sm:$0xff]  ;;  %v14854_v13 = vcombine.low %v5805_v18, %v5809_v34  ;;  %v5928_v17 = vld [vmem:[%s23030_s5 + $0xbe0] sm:$0xff] }
 0x478   :  { %10672 = vmatprep.subr.bf16.mxu0 %v14869_v62  ;;  %v14863_v28 = vcombine.high %v5813_v60, %v5817_v55  ;;  %v5861_v18 = vld [vmem:[%s23030_s5 + $0x9c8] sm:$0xff] }
 0x479   :  { %v5865_v34 = vld [vmem:[%s23030_s5 + $0x9e8] sm:$0xff] }
 0x47a   :  { %10947 = vmatpush1.bf16.msra.mxu1 %v14806_v49  ;;  %v5825_v49 = vld [vmem:[%s23030_s5 + $0x8a8] sm:$0xff] }
 0x47b   :  { %10673 = vmatpush1.bf16.msra.mxu0 %v14868_v16  ;;  %10948 = vmatprep.subr.bf16.mxu1 %v14815_v20  ;;  %v5821_v16 = vld [vmem:[%s23030_s5 + $0x888] sm:$0xff]  ;;  %v14862_v20 = vcombine.low %v5813_v60, %v5817_v55 }
 0x47c   :  { %10674 = vmatprep.subr.bf16.mxu0 %v14877_v7  ;;  %v14924_v7 = vcombine.low %v5876_v59, %v5880_v43  ;;  %v14871_v29 = vcombine.high %v5821_v16, %v5825_v49  ;;  %v5932_v59 = vld [vmem:[%s23030_s5 + $0xc00] sm:$0xff]  ;;  %v5869_v60 = vld [vmem:[%s23030_s5 + $0xa08] sm:$0xff] }
 0x47d   :  { %v5936_v43 = vld [vmem:[%s23030_s5 + $0xc20] sm:$0xff]  ;;  %v5873_v55 = vld [vmem:[%s23030_s5 + $0xa28] sm:$0xff] }
 0x47e   :  { %10949 = vmatpush1.bf16.msra.mxu1 %v14814_v48  ;;  %v14870_v48 = vcombine.low %v5821_v16, %v5825_v49  ;;  %v5881_v16 = vld [vmem:[%s23030_s5 + $0xa68] sm:$0xff]  ;;  %v14980_v49 = vcombine.low %v5932_v59, %v5936_v43 }
 0x47f   :  { %10675 = vmatpush1.bf16.msra.mxu0 %v14876_v46  ;;  %v5508_v58 = vpop.permute.xlu1 %5507  ;;  %10950 = vmatprep.subr.bf16.mxu1 %v14823_v36  ;;  %v14932_v46 = vcombine.low %v5884_v27, %v5888_v37  ;;  %v5944_v27 = vld [vmem:[%s23030_s5 + $0xc60] sm:$0xff]  ;;  %v5877_v37 = vld [vmem:[%s23030_s5 + $0xa48] sm:$0xff] }
 0x480   :  { %10676 = vmatprep.subr.bf16.mxu0 %v14885_v39  ;;  %5510 = vst.msk [vmem:[#allocation4 + $0x40] sm:$0xff] %vm5461_vm7, %v5508_v58  ;;  %v14941_v39 = vcombine.high %v5892_v42, %v5896_v21 }
 0x482   :  { %10951 = vmatpush1.bf16.msra.mxu1 %v14822_v6  ;;  %v14949_v6 = vcombine.high %v5900_v63, %v5904_v30  ;;  %v5956_v30 = vld [vmem:[%s23030_s5 + $0xcc0] sm:$0xff] }
 0x483   :  { %10677 = vmatpush1.bf16.msra.mxu0 %v14884_v24  ;;  %10952 = vmatprep.subr.bf16.mxu1 %v14831_v1  ;;  %v14940_v24 = vcombine.low %v5892_v42, %v5896_v21  ;;  %v5908_v1 = vld [vmem:[%s23030_s5 + $0xb40] sm:$0xff] }
 0x484   :  { %10678 = vmatprep.subr.bf16.mxu0 %v14893_v35  ;;  %v14887_v35 = vcombine.high %v5837_v38, %v5841_v54  ;;  %v5948_v42 = vld [vmem:[%s23030_s5 + $0xc80] sm:$0xff] }
 0x485   :  { %v5952_v21 = vld [vmem:[%s23030_s5 + $0xca0] sm:$0xff] }
 0x486   :  { %10953 = vmatpush1.bf16.msra.mxu1 %v14830_v52  ;;  %v14886_v52 = vcombine.low %v5837_v38, %v5841_v54  ;;  %v5960_v38 = vld [vmem:[%s23030_s5 + $0xce0] sm:$0xff]  ;;  %v5893_v54 = vld [vmem:[%s23030_s5 + $0xac8] sm:$0xff] }
 0x487   :  { %10679 = vmatpush1.bf16.msra.mxu0 %v14892_v50  ;;  %10954 = vmatprep.subr.bf16.mxu1 %v14839_v31  ;;  %v14895_v31 = vcombine.high %v5845_v45, %v5849_v14 }
 0x488   :  { %10680 = vmatprep.subr.bf16.mxu0 %v14901_v40  ;;  %v14957_v40 = vcombine.high %v5908_v1, %v5912_v12 }
 0x48a   :  { %10955 = vmatpush1.bf16.msra.mxu1 %v14838_v56  ;;  %v14894_v56 = vcombine.low %v5845_v45, %v5849_v14  ;;  %v5968_v45 = vld [vmem:[%s23030_s5 + $0xd20] sm:$0xff]  ;;  %v5901_v14 = vld [vmem:[%s23030_s5 + $0xb08] sm:$0xff] }
 0x48b   :  { %10681 = vmatpush1.bf16.msra.mxu0 %v14900_v33  ;;  %10956 = vmatprep.subr.bf16.mxu1 %v14847_v15  ;;  %v14956_v33 = vcombine.low %v5908_v1, %v5912_v12  ;;  %v14903_v15 = vcombine.high %v5853_v26, %v5857_v25  ;;  %v5964_v12 = vld [vmem:[%s23030_s5 + $0xd00] sm:$0xff] }
 0x48c   :  { %10682 = vmatprep.subr.bf16.mxu0 %v14909_v32  ;;  %v14965_v32 = vcombine.high %v5916_v10, %v5920_v4 }
 0x48e   :  { %10957 = vmatpush1.bf16.msra.mxu1 %v14846_v53  ;;  %v14902_v53 = vcombine.low %v5853_v26, %v5857_v25  ;;  %v5909_v26 = vld [vmem:[%s23030_s5 + $0xb48] sm:$0xff] }
 0x48f   :  { %10683 = vmatpush1.bf16.msra.mxu0 %v14908_v57  ;;  %v5514_v62 = vpop.permute.xlu0 %5513  ;;  %10969 = vmatprep.subr.bf16.mxu1 %v14855_v44  ;;  %v14964_v57 = vcombine.low %v5916_v10, %v5920_v4  ;;  %v14911_v44 = vcombine.high %v5861_v18, %v5865_v34  ;;  %v5972_v10 = vld [vmem:[%s23030_s5 + $0xd40] sm:$0xff]  ;;  %v5913_v25 = vld [vmem:[%s23030_s5 + $0xb68] sm:$0xff] }
 0x490   :  { %10684 = vmatprep.subr.bf16.mxu0 %v14917_v47  ;;  %5516 = vst.msk [vmem:[#allocation4 + $0x48] sm:$0xff] %vm5461_vm7, %v5514_v62  ;;  %v14973_v47 = vcombine.high %v5924_v2, %v5928_v17  ;;  %v14910_v62 = vcombine.low %v5861_v18, %v5865_v34  ;;  %v5976_v4 = vld [vmem:[%s23030_s5 + $0xd60] sm:$0xff]  ;;  %v5917_v18 = vld [vmem:[%s23030_s5 + $0xb88] sm:$0xff] }
 0x491   :  { %10959 = vmatmul.mubr.bf16.vlgmr.msra.gmra.mrb[20].mxu1 %v19885_v5  ;;  %v5829_v5 = vld [vmem:[%s23030_s5 + $0x8c8] sm:$0xff] }
 0x492   :  { %10970 = vmatpush1.bf16.msra.mxu1 %v14854_v13  ;;  %11001 = vmatprep.mubr.bf16.mxu1 %v19894_v51  ;;  %v5833_v51 = vld [vmem:[%s23030_s5 + $0x8e8] sm:$0xff]  ;;  %v14981_v13 = vcombine.high %v5932_v59, %v5936_v43  ;;  %v5988_v59 = vld [vmem:[%s23030_s5 + $0xdc0] sm:$0xff] }
 0x493   :  { %10685 = vmatpush1.bf16.msra.mxu0 %v14916_v3  ;;  %10971 = vmatprep.subr.bf16.mxu1 %v14863_v28  ;;  %v14879_v36 = vcombine.high %v5829_v5, %v5833_v51  ;;  %v14878_v58 = vcombine.low %v5829_v5, %v5833_v51  ;;  %v14972_v3 = vcombine.low %v5924_v2, %v5928_v17  ;;  %v5940_v28 = vld [vmem:[%s23030_s5 + $0xc40] sm:$0xff]  ;;  %v20097_v5 = vld [vmem:[#allocation4 + $0x38] sm:$0xff]  ;;  %v5885_v51 = vld [vmem:[%s23030_s5 + $0xa88] sm:$0xff] }
 0x494   :  { %10686 = vmatprep.subr.bf16.mxu0 %v14925_v11  ;;  %v14919_v11 = vcombine.high %v5869_v60, %v5873_v55  ;;  %v5980_v2 = vld [vmem:[%s23030_s5 + $0xd80] sm:$0xff]  ;;  %v5921_v34 = vld [vmem:[%s23030_s5 + $0xba8] sm:$0xff] }
 0x495   :  { %v5984_v17 = vld [vmem:[%s23030_s5 + $0xda0] sm:$0xff] }
 0x496   :  { %10972 = vmatpush1.bf16.msra.mxu1 %v14862_v20  ;;  %v14989_v20 = vcombine.high %v5940_v28, %v5944_v27  ;;  %v5992_v43 = vld [vmem:[%s23030_s5 + $0xde0] sm:$0xff] }
 0x497   :  { %10687 = vmatpush1.bf16.msra.mxu0 %v14924_v7  ;;  %10973 = vmatprep.subr.bf16.mxu1 %v14871_v29  ;;  %v14918_v7 = vcombine.low %v5869_v60, %v5873_v55  ;;  %v14927_v29 = vcombine.high %v5877_v37, %v5881_v16  ;;  %v5925_v60 = vld [vmem:[%s23030_s5 + $0xbc8] sm:$0xff] }
 0x498   :  { %10688 = vmatprep.subr.bf16.mxu0 %v14933_v41  ;;  %v20088_v41 = vld [vmem:[#allocation4 + $0x20] sm:$0xff]  ;;  %v5929_v55 = vld [vmem:[%s23030_s5 + $0xbe8] sm:$0xff] }
 0x49a   :  { %10974 = vmatpush1.bf16.msra.mxu1 %v14870_v48  ;;  %v14988_v48 = vcombine.low %v5940_v28, %v5944_v27  ;;  %v5996_v28 = vld [vmem:[%s23030_s5 + $0xe00] sm:$0xff] }
 0x49b   :  { %10689 = vmatpush1.bf16.msra.mxu0 %v14932_v46  ;;  %10975 = vmatprep.subr.bf16.mxu1 %v14879_v36  ;;  %v5889_v46 = vld [vmem:[%s23030_s5 + $0xaa8] sm:$0xff]  ;;  %v14997_v36 = vcombine.high %v5948_v42, %v5952_v21  ;;  %v6000_v27 = vld [vmem:[%s23030_s5 + $0xe20] sm:$0xff] }
 0x49c   :  { %10690 = vmatprep.subr.bf16.mxu0 %v14941_v39  ;;  %v14926_v39 = vcombine.low %v5877_v37, %v5881_v16  ;;  %v14935_v63 = vcombine.high %v5885_v51, %v5889_v46  ;;  %v5933_v37 = vld [vmem:[%s23030_s5 + $0xc08] sm:$0xff] }
 0x49d   :  { %v5937_v16 = vld [vmem:[%s23030_s5 + $0xc28] sm:$0xff] }
 0x49e   :  { %10976 = vmatpush1.bf16.msra.mxu1 %v14878_v58  ;;  %v14996_v58 = vcombine.low %v5948_v42, %v5952_v21  ;;  %v6004_v42 = vld [vmem:[%s23030_s5 + $0xe40] sm:$0xff] }
 0x49f   :  { %10691 = vmatpush1.bf16.msra.mxu0 %v14940_v24  ;;  %v5520_v50 = vpop.permute.xlu1 %5519  ;;  %10977 = vmatprep.subr.bf16.mxu1 %v14887_v35  ;;  %v5897_v24 = vld [vmem:[%s23030_s5 + $0xae8] sm:$0xff]  ;;  %v15005_v35 = vcombine.high %v5956_v30, %v5960_v38  ;;  %v6008_v21 = vld [vmem:[%s23030_s5 + $0xe60] sm:$0xff] }
 0x4a0   :  { %10692 = vmatprep.subr.bf16.mxu0 %v14949_v6  ;;  %5522 = vst.msk [vmem:[#allocation4 + $0x50] sm:$0xff] %vm5461_vm7, %v5520_v50  ;;  %v14934_v6 = vcombine.low %v5885_v51, %v5889_v46  ;;  %v14943_v1 = vcombine.high %v5893_v54, %v5897_v24  ;;  %v15004_v50 = vcombine.low %v5956_v30, %v5960_v38  ;;  %v5941_v51 = vld [vmem:[%s23030_s5 + $0xc48] sm:$0xff]  ;;  %v6012_v30 = vld [vmem:[%s23030_s5 + $0xe80] sm:$0xff] }
 0x4a1   :  { %v5945_v46 = vld [vmem:[%s23030_s5 + $0xc68] sm:$0xff]  ;;  %v6016_v38 = vld [vmem:[%s23030_s5 + $0xea0] sm:$0xff] }
 0x4a2   :  { %10978 = vmatpush1.bf16.msra.mxu1 %v14886_v52  ;;  %v14942_v52 = vcombine.low %v5893_v54, %v5897_v24  ;;  %v5949_v54 = vld [vmem:[%s23030_s5 + $0xc88] sm:$0xff] }
 0x4a3   :  { %10693 = vmatpush1.bf16.msra.mxu0 %v14948_v22  ;;  %10979 = vmatprep.subr.bf16.mxu1 %v14895_v31  ;;  %v5905_v22 = vld [vmem:[%s23030_s5 + $0xb28] sm:$0xff] }
 0x4a4   :  { %10694 = vmatprep.subr.bf16.mxu0 %v14957_v40  ;;  %v15013_v40 = vcombine.high %v5964_v12, %v5968_v45  ;;  %v14951_v31 = vcombine.high %v5901_v14, %v5905_v22  ;;  %v5953_v24 = vld [vmem:[%s23030_s5 + $0xca8] sm:$0xff] }
 0x4a6   :  { %10980 = vmatpush1.bf16.msra.mxu1 %v14894_v56  ;;  %v14950_v56 = vcombine.low %v5901_v14, %v5905_v22  ;;  %v15060_v14 = vcombine.low %v6012_v30, %v6016_v38  ;;  %v14998_v22 = vcombine.low %v5949_v54, %v5953_v24 }
 0x4a7   :  { %10695 = vmatpush1.bf16.msra.mxu0 %v14956_v33  ;;  %10981 = vmatprep.subr.bf16.mxu1 %v14903_v15  ;;  %v15012_v33 = vcombine.low %v5964_v12, %v5968_v45  ;;  %v14959_v15 = vcombine.high %v5909_v26, %v5913_v25  ;;  %v6020_v12 = vld [vmem:[%s23030_s5 + $0xec0] sm:$0xff] }
 0x4a8   :  { %10696 = vmatprep.subr.bf16.mxu0 %v14965_v32  ;;  %v15021_v32 = vcombine.high %v5972_v10, %v5976_v4  ;;  %v6024_v45 = vld [vmem:[%s23030_s5 + $0xee0] sm:$0xff] }
 0x4aa   :  { %10982 = vmatpush1.bf16.msra.mxu1 %v14902_v53  ;;  %v14958_v53 = vcombine.low %v5909_v26, %v5913_v25  ;;  %v15068_v26 = vcombine.low %v6020_v12, %v6024_v45 }
 0x4ab   :  { %10697 = vmatpush1.bf16.msra.mxu0 %v14964_v57  ;;  %10983 = vmatprep.subr.bf16.mxu1 %v14911_v44  ;;  %v15020_v57 = vcombine.low %v5972_v10, %v5976_v4  ;;  %v14967_v44 = vcombine.high %v5917_v18, %v5921_v34  ;;  %v5965_v10 = vld [vmem:[%s23030_s5 + $0xd08] sm:$0xff] }
 0x4ac   :  { %10698 = vmatprep.subr.bf16.mxu0 %v14973_v47  ;;  %v15029_v47 = vcombine.high %v5980_v2, %v5984_v17  ;;  %v5969_v4 = vld [vmem:[%s23030_s5 + $0xd28] sm:$0xff] }
 0x4ae   :  { %10984 = vmatpush1.bf16.msra.mxu1 %v14910_v62  ;;  %v14966_v62 = vcombine.low %v5917_v18, %v5921_v34  ;;  %v15014_v34 = vcombine.low %v5965_v10, %v5969_v4 }
 0x4af   :  { %10699 = vmatpush1.bf16.msra.mxu0 %v14972_v3  ;;  %10985 = vmatprep.subr.bf16.mxu1 %v14919_v11  ;;  %v15028_v3 = vcombine.low %v5980_v2, %v5984_v17  ;;  %v14975_v11 = vcombine.high %v5925_v60, %v5929_v55  ;;  %v5973_v2 = vld [vmem:[%s23030_s5 + $0xd48] sm:$0xff] }
 0x4b0   :  { %10711 = vmatprep.subr.bf16.mxu0 %v14981_v13  ;;  %v15037_v13 = vcombine.high %v5988_v59, %v5992_v43  ;;  %v5977_v17 = vld [vmem:[%s23030_s5 + $0xd68] sm:$0xff] }
 0x4b2   :  { %10701 = vmatmul.mubr.bf16.vlgmr.msra.gmra.mrb[20].mxu0 %v20088_v41  ;;  %10986 = vmatpush1.bf16.msra.mxu1 %v14918_v7  ;;  %v14974_v7 = vcombine.low %v5925_v60, %v5929_v55  ;;  %v15022_v55 = vcombine.low %v5973_v2, %v5977_v17 }
 0x4b3   :  { %10712 = vmatpush1.bf16.msra.mxu0 %v14980_v49  ;;  %10743 = vmatprep.mubr.bf16.mxu0 %v20097_v5  ;;  %v15036_v49 = vcombine.low %v5988_v59, %v5992_v43  ;;  %v5981_v59 = vld [vmem:[%s23030_s5 + $0xd88] sm:$0xff] }
 0x4b4   :  { %10713 = vmatprep.subr.bf16.mxu0 %v14989_v20  ;;  %10987 = vmatprep.subr.bf16.mxu1 %v14927_v29  ;;  %v15045_v20 = vcombine.high %v5996_v28, %v6000_v27  ;;  %v14983_v29 = vcombine.high %v5933_v37, %v5937_v16  ;;  %v5985_v43 = vld [vmem:[%s23030_s5 + $0xda8] sm:$0xff] }
 0x4b6   :  { %10988 = vmatpush1.bf16.msra.mxu1 %v14926_v39  ;;  %v14982_v39 = vcombine.low %v5933_v37, %v5937_v16  ;;  %v15030_v16 = vcombine.low %v5981_v59, %v5985_v43 }
 0x4b7   :  { %10714 = vmatpush1.bf16.msra.mxu0 %v14988_v48  ;;  %10989 = vmatprep.subr.bf16.mxu1 %v14935_v63  ;;  %v15044_v48 = vcombine.low %v5996_v28, %v6000_v27  ;;  %v14991_v63 = vcombine.high %v5941_v51, %v5945_v46  ;;  %v5989_v28 = vld [vmem:[%s23030_s5 + $0xdc8] sm:$0xff] }
 0x4b8   :  { %10715 = vmatprep.subr.bf16.mxu0 %v14997_v36  ;;  %v15053_v36 = vcombine.high %v6004_v42, %v6008_v21  ;;  %v5993_v27 = vld [vmem:[%s23030_s5 + $0xde8] sm:$0xff] }
 0x4ba   :  { %10990 = vmatpush1.bf16.msra.mxu1 %v14934_v6  ;;  %v14990_v6 = vcombine.low %v5941_v51, %v5945_v46  ;;  %v15038_v46 = vcombine.low %v5989_v28, %v5993_v27 }
 0x4bb   :  { %10716 = vmatpush1.bf16.msra.mxu0 %v14996_v58  ;;  %10991 = vmatprep.subr.bf16.mxu1 %v14943_v1  ;;  %v15052_v58 = vcombine.low %v6004_v42, %v6008_v21  ;;  %v14999_v1 = vcombine.high %v5949_v54, %v5953_v24  ;;  %v5997_v42 = vld [vmem:[%s23030_s5 + $0xe08] sm:$0xff] }
 0x4bc   :  { %10717 = vmatprep.subr.bf16.mxu0 %v15005_v35  ;;  %v15061_v35 = vcombine.high %v6012_v30, %v6016_v38  ;;  %v6001_v21 = vld [vmem:[%s23030_s5 + $0xe28] sm:$0xff] }
 0x4bd   :  { %v6005_v30 = vld [vmem:[%s23030_s5 + $0xe48] sm:$0xff]  ;;  %v15046_v24 = vcombine.low %v5997_v42, %v6001_v21 }
 0x4be   :  { %10992 = vmatpush1.bf16.msra.mxu1 %v14942_v52  ;;  %v6009_v38 = vld [vmem:[%s23030_s5 + $0xe68] sm:$0xff] }
 0x4bf   :  { %10718 = vmatpush1.bf16.msra.mxu0 %v15004_v50  ;;  %10993 = vmatprep.subr.bf16.mxu1 %v14951_v31  ;;  %v15069_v50 = vcombine.high %v6020_v12, %v6024_v45  ;;  %v6032_v31 = vld [vmem:[%s23030_s5 + $0xf20] sm:$0xff]  ;;  %v20297_v45 = vld [vmem:[#allocation4 + $0x48] sm:$0xff] }
 0x4c0   :  { %10719 = vmatprep.subr.bf16.mxu0 %v15013_v40  ;;  %v6028_v40 = vld [vmem:[%s23030_s5 + $0xf00] sm:$0xff] }
 0x4c1   :  { %v15076_v18 = vcombine.low %v6028_v40, %v6032_v31  ;;  %v6080_v12 = vld [vmem:[%s23030_s5 + $0x10a0] sm:$0xff] }
 0x4c2   :  { %10994 = vmatpush1.bf16.msra.mxu1 %v14950_v56  ;;  %v15015_v56 = vcombine.high %v5965_v10, %v5969_v4  ;;  %v6021_v10 = vld [vmem:[%s23030_s5 + $0xec8] sm:$0xff] }
 0x4c3   :  { %10720 = vmatpush1.bf16.msra.mxu0 %v15012_v33  ;;  %10995 = vmatprep.subr.bf16.mxu1 %v14959_v15  ;;  %v15077_v33 = vcombine.high %v6028_v40, %v6032_v31  ;;  %v6040_v15 = vld [vmem:[%s23030_s5 + $0xf60] sm:$0xff]  ;;  %v6025_v4 = vld [vmem:[%s23030_s5 + $0xee8] sm:$0xff] }
 0x4c4   :  { %10721 = vmatprep.subr.bf16.mxu0 %v15021_v32  ;;  %v6036_v32 = vld [vmem:[%s23030_s5 + $0xf40] sm:$0xff] }
 0x4c5   :  { %v15084_v60 = vcombine.low %v6036_v32, %v6040_v15  ;;  %v6084_v40 = vld [vmem:[%s23030_s5 + $0x10c0] sm:$0xff] }
 0x4c6   :  { %10996 = vmatpush1.bf16.msra.mxu1 %v14958_v53  ;;  %v15023_v53 = vcombine.high %v5973_v2, %v5977_v17  ;;  %v6088_v31 = vld [vmem:[%s23030_s5 + $0x10e0] sm:$0xff]  ;;  %v6029_v2 = vld [vmem:[%s23030_s5 + $0xf08] sm:$0xff] }
 0x4c7   :  { %10722 = vmatpush1.bf16.msra.mxu0 %v15020_v57  ;;  %10997 = vmatprep.subr.bf16.mxu1 %v14967_v44  ;;  %v15085_v57 = vcombine.high %v6036_v32, %v6040_v15  ;;  %v6048_v44 = vld [vmem:[%s23030_s5 + $0xfa0] sm:$0xff]  ;;  %v6033_v17 = vld [vmem:[%s23030_s5 + $0xf28] sm:$0xff] }
 0x4c8   :  { %10723 = vmatprep.subr.bf16.mxu0 %v15029_v47  ;;  %v6044_v47 = vld [vmem:[%s23030_s5 + $0xf80] sm:$0xff] }
 0x4c9   :  { %v15092_v37 = vcombine.low %v6044_v47, %v6048_v44  ;;  %v6092_v32 = vld [vmem:[%s23030_s5 + $0x1100] sm:$0xff] }
 0x4ca   :  { %10998 = vmatpush1.bf16.msra.mxu1 %v14966_v62  ;;  %v15031_v62 = vcombine.high %v5981_v59, %v5985_v43  ;;  %v6096_v15 = vld [vmem:[%s23030_s5 + $0x1120] sm:$0xff]  ;;  %v6037_v59 = vld [vmem:[%s23030_s5 + $0xf48] sm:$0xff] }
 0x4cb   :  { %10724 = vmatpush1.bf16.msra.mxu0 %v15028_v3  ;;  %10999 = vmatprep.subr.bf16.mxu1 %v14975_v11  ;;  %v15093_v3 = vcombine.high %v6044_v47, %v6048_v44  ;;  %v6056_v11 = vld [vmem:[%s23030_s5 + $0xfe0] sm:$0xff]  ;;  %v6041_v43 = vld [vmem:[%s23030_s5 + $0xf68] sm:$0xff] }
 0x4cc   :  { %10725 = vmatprep.subr.bf16.mxu0 %v15037_v13  ;;  %v6052_v13 = vld [vmem:[%s23030_s5 + $0xfc0] sm:$0xff] }
 0x4cd   :  { %v15100_v51 = vcombine.low %v6052_v13, %v6056_v11  ;;  %v6100_v47 = vld [vmem:[%s23030_s5 + $0x1140] sm:$0xff] }
 0x4ce   :  { %11000 = vmatpush1.bf16.msra.mxu1 %v14974_v7  ;;  %v15039_v7 = vcombine.high %v5989_v28, %v5993_v27  ;;  %v6104_v44 = vld [vmem:[%s23030_s5 + $0x1160] sm:$0xff]  ;;  %v6045_v28 = vld [vmem:[%s23030_s5 + $0xf88] sm:$0xff] }
 0x4cf   :  { %10726 = vmatpush1.bf16.msra.mxu0 %v15036_v49  ;;  %11012 = vmatprep.subr.bf16.mxu1 %v14983_v29  ;;  %v15101_v49 = vcombine.high %v6052_v13, %v6056_v11  ;;  %v6064_v29 = vld [vmem:[%s23030_s5 + $0x1020] sm:$0xff]  ;;  %v6049_v27 = vld [vmem:[%s23030_s5 + $0xfa8] sm:$0xff] }
 0x4d0   :  { %10727 = vmatprep.subr.bf16.mxu0 %v15045_v20  ;;  %v6060_v20 = vld [vmem:[%s23030_s5 + $0x1000] sm:$0xff] }
 0x4d1   :  { %11002 = vmatmul.mubr.bf16.vlgmr.msra.gmra.mrb[20].mxu1 %v20088_v41  ;;  %v5957_v41 = vld [vmem:[%s23030_s5 + $0xcc8] sm:$0xff]  ;;  %v15108_v54 = vcombine.low %v6060_v20, %v6064_v29  ;;  %v6108_v13 = vld [vmem:[%s23030_s5 + $0x1180] sm:$0xff] }
 0x4d2   :  { %11013 = vmatpush1.bf16.msra.mxu1 %v14982_v39  ;;  %11044 = vmatprep.mubr.bf16.mxu1 %v20097_v5  ;;  %v5961_v5 = vld [vmem:[%s23030_s5 + $0xce8] sm:$0xff]  ;;  %v15047_v39 = vcombine.high %v5997_v42, %v6001_v21  ;;  %v6112_v11 = vld [vmem:[%s23030_s5 + $0x11a0] sm:$0xff] }
 0x4d3   :  { %10728 = vmatpush1.bf16.msra.mxu0 %v15044_v48  ;;  %11014 = vmatprep.subr.bf16.mxu1 %v14991_v63  ;;  %v15007_v52 = vcombine.high %v5957_v41, %v5961_v5  ;;  %v15006_v25 = vcombine.low %v5957_v41, %v5961_v5  ;;  %v15109_v48 = vcombine.high %v6060_v20, %v6064_v29  ;;  %v6072_v63 = vld [vmem:[%s23030_s5 + $0x1060] sm:$0xff]  ;;  %v6013_v41 = vld [vmem:[%s23030_s5 + $0xe88] sm:$0xff] }
 0x4d4   :  { %10729 = vmatprep.subr.bf16.mxu0 %v15053_v36  ;;  %v6068_v36 = vld [vmem:[%s23030_s5 + $0x1040] sm:$0xff]  ;;  %v6017_v5 = vld [vmem:[%s23030_s5 + $0xea8] sm:$0xff] }
 0x4d5   :  { %v6116_v20 = vld [vmem:[%s23030_s5 + $0x11c0] sm:$0xff]  ;;  %v6053_v42 = vld [vmem:[%s23030_s5 + $0xfc8] sm:$0xff] }
 0x4d6   :  { %11015 = vmatpush1.bf16.msra.mxu1 %v14990_v6  ;;  %v20288_v6 = vld [vmem:[#allocation4 + $0x30] sm:$0xff]  ;;  %v6120_v29 = vld [vmem:[%s23030_s5 + $0x11e0] sm:$0xff]  ;;  %v6057_v21 = vld [vmem:[%s23030_s5 + $0xfe8] sm:$0xff] }
 0x4d7   :  { %10730 = vmatpush1.bf16.msra.mxu0 %v15052_v58  ;;  %11016 = vmatprep.subr.bf16.mxu1 %v14999_v1  ;;  %v15117_v58 = vcombine.high %v6068_v36, %v6072_v63  ;;  %v6076_v1 = vld [vmem:[%s23030_s5 + $0x1080] sm:$0xff] }
 0x4d8   :  { %10731 = vmatprep.subr.bf16.mxu0 %v15061_v35  ;;  %v15055_v35 = vcombine.high %v6005_v30, %v6009_v38 }
 0x4da   :  { %11017 = vmatpush1.bf16.msra.mxu1 %v14998_v22  ;;  %v15054_v22 = vcombine.low %v6005_v30, %v6009_v38  ;;  %v6061_v30 = vld [vmem:[%s23030_s5 + $0x1008] sm:$0xff] }
 0x4db   :  { %10732 = vmatpush1.bf16.msra.mxu0 %v15060_v14  ;;  %11018 = vmatprep.subr.bf16.mxu1 %v15007_v52  ;;  %v15116_v14 = vcombine.low %v6068_v36, %v6072_v63  ;;  %v15063_v52 = vcombine.high %v6013_v41, %v6017_v5  ;;  %v6124_v36 = vld [vmem:[%s23030_s5 + $0x1200] sm:$0xff]  ;;  %v6065_v38 = vld [vmem:[%s23030_s5 + $0x1028] sm:$0xff] }
 0x4dc   :  { %10733 = vmatprep.subr.bf16.mxu0 %v15069_v50  ;;  %v15125_v50 = vcombine.high %v6076_v1, %v6080_v12  ;;  %v6128_v63 = vld [vmem:[%s23030_s5 + $0x1220] sm:$0xff] }
 0x4de   :  { %11019 = vmatpush1.bf16.msra.mxu1 %v15006_v25  ;;  %v15062_v25 = vcombine.low %v6013_v41, %v6017_v5 }
 0x4df   :  { %10734 = vmatpush1.bf16.msra.mxu0 %v15068_v26  ;;  %11020 = vmatprep.subr.bf16.mxu1 %v15015_v56  ;;  %v15124_v26 = vcombine.low %v6076_v1, %v6080_v12  ;;  %v15071_v56 = vcombine.high %v6021_v10, %v6025_v4  ;;  %v15111_v1 = vcombine.high %v6061_v30, %v6065_v38  ;;  %v6132_v12 = vld [vmem:[%s23030_s5 + $0x1240] sm:$0xff] }
 0x4e0   :  { %10735 = vmatprep.subr.bf16.mxu0 %v15077_v33  ;;  %v15133_v33 = vcombine.high %v6084_v40, %v6088_v31 }
 0x4e2   :  { %11021 = vmatpush1.bf16.msra.mxu1 %v15014_v34  ;;  %v15070_v34 = vcombine.low %v6021_v10, %v6025_v4 }
 0x4e3   :  { %10736 = vmatpush1.bf16.msra.mxu0 %v15076_v18  ;;  %11022 = vmatprep.subr.bf16.mxu1 %v15023_v53  ;;  %v15132_v18 = vcombine.low %v6084_v40, %v6088_v31  ;;  %v15079_v53 = vcombine.high %v6029_v2, %v6033_v17  ;;  %v15172_v40 = vcombine.low %v6124_v36, %v6128_v63  ;;  %v23165_v31 = vld [vmem:[#allocation22_spill] sm:$0xff] }
 0x4e4   :  { %10737 = vmatprep.subr.bf16.mxu0 %v15085_v57  ;;  %v15141_v57 = vcombine.high %v6092_v32, %v6096_v15 }
 0x4e6   :  { %11023 = vmatpush1.bf16.msra.mxu1 %v15022_v55  ;;  %v15078_v55 = vcombine.low %v6029_v2, %v6033_v17  ;;  %v23166_v2 = vld [vmem:[#allocation25_spill] sm:$0xff] }
 0x4e7   :  { %10738 = vmatpush1.bf16.msra.mxu0 %v15084_v60  ;;  %11024 = vmatprep.subr.bf16.mxu1 %v15031_v62  ;;  %v15140_v60 = vcombine.low %v6092_v32, %v6096_v15  ;;  %v15087_v62 = vcombine.high %v6037_v59, %v6041_v43  ;;  %v6144_v32 = vld [vmem:[%s23030_s5 + $0x12a0] sm:$0xff] }
 0x4e8   :  { %10739 = vmatprep.subr.bf16.mxu0 %v15093_v3  ;;  %v15149_v3 = vcombine.high %v6100_v47, %v6104_v44  ;;  %v20402_v15 = vld [vmem:[%s23031_s4] ss:$0 sm:$0xff] }
 0x4ea   :  { %11025 = vmatpush1.bf16.msra.mxu1 %v15030_v16  ;;  %v15086_v16 = vcombine.low %v6037_v59, %v6041_v43  ;;  %v6148_v59 = vld [vmem:[%s23030_s5 + $0x12c0] sm:$0xff] }
 0x4eb   :  { %10740 = vmatpush1.bf16.msra.mxu0 %v15092_v37  ;;  %11026 = vmatprep.subr.bf16.mxu1 %v15039_v7  ;;  %v15148_v37 = vcombine.low %v6100_v47, %v6104_v44  ;;  %v15095_v7 = vcombine.high %v6045_v28, %v6049_v27  ;;  %v6152_v43 = vld [vmem:[%s23030_s5 + $0x12e0] sm:$0xff] }
 0x4ec   :  { %10741 = vmatprep.subr.bf16.mxu0 %v15101_v49  ;;  %v15157_v49 = vcombine.high %v6108_v13, %v6112_v11 }
 0x4ee   :  { %11027 = vmatpush1.bf16.msra.mxu1 %v15038_v46  ;;  %v15094_v46 = vcombine.low %v6045_v28, %v6049_v27 }
 0x4ef   :  { %10742 = vmatpush1.bf16.msra.mxu0 %v15100_v51  ;;  %11028 = vmatprep.subr.bf16.mxu1 %v15047_v39  ;;  %v15156_v51 = vcombine.low %v6108_v13, %v6112_v11  ;;  %v15103_v39 = vcombine.high %v6053_v42, %v6057_v21  ;;  %v6089_v11 = vld [vmem:[%s23030_s5 + $0x10e8] sm:$0xff] }
 0x4f0   :  { %10754 = vmatprep.subr.bf16.mxu0 %v15109_v48  ;;  %v15165_v48 = vcombine.high %v6116_v20, %v6120_v29 }
 0x4f2   :  { %10744 = vmatmul.mubr.bf16.vlgmr.msra.gmra.mrb[20].mxu0 %v20288_v6  ;;  %11029 = vmatpush1.bf16.msra.mxu1 %v15046_v24  ;;  %v15102_v24 = vcombine.low %v6053_v42, %v6057_v21  ;;  %v6156_v21 = vld [vmem:[%s23030_s5 + $0x1300] sm:$0xff] }
 0x4f3   :  { %10755 = vmatpush1.bf16.msra.mxu0 %v15108_v54  ;;  %10786 = vmatprep.mubr.bf16.mxu0 %v20297_v45  ;;  %v15164_v54 = vcombine.low %v6116_v20, %v6120_v29 }
 0x4f4   :  { %10756 = vmatprep.subr.bf16.mxu0 %v15117_v58  ;;  %11030 = vmatprep.subr.bf16.mxu1 %v15055_v35  ;;  %v15173_v58 = vcombine.high %v6124_v36, %v6128_v63  ;;  %v6097_v36 = vld [vmem:[%s23030_s5 + $0x1128] sm:$0xff]  ;;  %v15196_v63 = vcombine.low %v6148_v59, %v6152_v43 }
 0x4f6   :  { %11031 = vmatpush1.bf16.msra.mxu1 %v15054_v22  ;;  %v6069_v22 = vld [vmem:[%s23030_s5 + $0x1048] sm:$0xff] }
 0x4f7   :  { %10757 = vmatpush1.bf16.msra.mxu0 %v15116_v14  ;;  %11032 = vmatprep.subr.bf16.mxu1 %v15063_v52  ;;  %v6136_v14 = vld [vmem:[%s23030_s5 + $0x1260] sm:$0xff] }
 0x4f8   :  { %10758 = vmatprep.subr.bf16.mxu0 %v15125_v50  ;;  %v6073_v50 = vld [vmem:[%s23030_s5 + $0x1068] sm:$0xff] }
 0x4f9   :  { %v15118_v47 = vcombine.low %v6069_v22, %v6073_v50 }
 0x4fa   :  { %11033 = vmatpush1.bf16.msra.mxu1 %v15062_v25  ;;  %v15181_v25 = vcombine.high %v6132_v12, %v6136_v14 }
 0x4fb   :  { %10759 = vmatpush1.bf16.msra.mxu0 %v15124_v26  ;;  %11034 = vmatprep.subr.bf16.mxu1 %v15071_v56  ;;  %v15110_v26 = vcombine.low %v6061_v30, %v6065_v38  ;;  %v6140_v56 = vld [vmem:[%s23030_s5 + $0x1280] sm:$0xff] }
 0x4fc   :  { %10760 = vmatprep.subr.bf16.mxu0 %v15133_v33  ;;  %v15119_v33 = vcombine.high %v6069_v22, %v6073_v50  ;;  %v15189_v44 = vcombine.high %v6140_v56, %v6144_v32  ;;  %v15188_v27 = vcombine.low %v6140_v56, %v6144_v32  ;;  %v6101_v22 = vld [vmem:[%s23030_s5 + $0x1148] sm:$0xff]  ;;  %v6172_v56 = vld [vmem:[%s23030_s5 + $0x1380] sm:$0xff] }
 0x4fd   :  { %v6105_v50 = vld [vmem:[%s23030_s5 + $0x1168] sm:$0xff]  ;;  %v6176_v32 = vld [vmem:[%s23030_s5 + $0x13a0] sm:$0xff] }
 0x4fe   :  { %11035 = vmatpush1.bf16.msra.mxu1 %v15070_v34  ;;  %v6081_v34 = vld [vmem:[%s23030_s5 + $0x10a8] sm:$0xff] }
 0x4ff   :  { %10761 = vmatpush1.bf16.msra.mxu0 %v15132_v18  ;;  %11036 = vmatprep.subr.bf16.mxu1 %v15079_v53  ;;  %v6077_v18 = vld [vmem:[%s23030_s5 + $0x1088] sm:$0xff] }
 0x500   :  { %10762 = vmatprep.subr.bf16.mxu0 %v15141_v57  ;;  %v15180_v57 = vcombine.low %v6132_v12, %v6136_v14 }
 0x502   :  { %11037 = vmatpush1.bf16.msra.mxu1 %v15078_v55 }
 0x503   :  { %10763 = vmatpush1.bf16.msra.mxu0 %v15140_v60  ;;  %11038 = vmatprep.subr.bf16.mxu1 %v15087_v62 }
 0x504   :  { %10764 = vmatprep.subr.bf16.mxu0 %v15149_v3 }
 0x506   :  { %11039 = vmatpush1.bf16.msra.mxu1 %v15086_v16  ;;  %v15197_v16 = vcombine.high %v6148_v59, %v6152_v43  ;;  %v6180_v59 = vld [vmem:[%s23030_s5 + $0x13c0] sm:$0xff] }
 0x507   :  { %10765 = vmatpush1.bf16.msra.mxu0 %v15148_v37  ;;  %11040 = vmatprep.subr.bf16.mxu1 %v15095_v7  ;;  %v15126_v37 = vcombine.low %v6077_v18, %v6081_v34  ;;  %v23167_v7 = vld [vmem:[#allocation27_spill] sm:$0xff]  ;;  %v6184_v43 = vld [vmem:[%s23030_s5 + $0x13e0] sm:$0xff] }
 0x508   :  { %10766 = vmatprep.subr.bf16.mxu0 %v15157_v49 }
 0x50a   :  { %11041 = vmatpush1.bf16.msra.mxu1 %v15094_v46 }
 0x50b   :  { %10767 = vmatpush1.bf16.msra.mxu0 %v15156_v51  ;;  %11042 = vmatprep.subr.bf16.mxu1 %v15103_v39  ;;  %v6160_v51 = vld [vmem:[%s23030_s5 + $0x1320] sm:$0xff] }
 0x50c   :  { %10768 = vmatprep.subr.bf16.mxu0 %v15165_v48  ;;  %v5002_v35 = vpop.f32.mrb[8].mxu1  ;;  %v23168_v48 = vld [vmem:[#allocation24_spill] sm:$0xff] }
 0x50d   :  { %v5244_v41 = vadd.f32 %v19631_v9, %v5002_v35  ;;  %v5004_v5 = vpop.f32.mrb[9].mxu1 }
 0x50e   :  { %v5005_v52 = vpop.f32.mrb[10].mxu1  ;;  %11043 = vmatpush1.bf16.msra.mxu1 %v15102_v24  ;;  %v6164_v24 = vld [vmem:[%s23030_s5 + $0x1340] sm:$0xff] }
 0x50f   :  { %10769 = vmatpush1.bf16.msra.mxu0 %v15164_v54  ;;  %v5312_v10 = vmax.f32 %v23165_v31, %v5244_v41  ;;  %v5247_v9 = vadd.f32 %v19635_v61, %v5005_v52  ;;  %v5007_v4 = vpop.f32.mrb[11].mxu1  ;;  %11055 = vmatprep.subr.bf16.mxu1 %v15111_v1  ;;  %v15205_v54 = vcombine.high %v6156_v21, %v6160_v51 }
 0x510   :  { %10770 = vmatprep.subr.bf16.mxu0 %v15173_v58  ;;  %v6168_v58 = vld [vmem:[%s23030_s5 + $0x1360] sm:$0xff] }
 0x511   :  { %v5371_v61 = vadd.f32 %v20402_v15, %v5312_v10  ;;  %v5313_v17 = vmax.f32 %v23166_v2, %v5247_v9  ;;  %11045 = vmatmul.mubr.bf16.vlgmr.msra.gmra.mrb[20].mxu1 %v20288_v6  ;;  %v15127_v6 = vcombine.high %v6077_v18, %v6081_v34  ;;  %v15213_v10 = vcombine.high %v6164_v24, %v6168_v58  ;;  %v23169_v9 = vld [vmem:[#allocation26_spill] sm:$0xff]  ;;  %v6113_v18 = vld [vmem:[%s23030_s5 + $0x11a8] sm:$0xff] }
 0x512   :  { %11056 = vmatpush1.bf16.msra.mxu1 %v15110_v26  ;;  %11087 = vmatprep.mubr.bf16.mxu1 %v20297_v45  ;;  %v6085_v45 = vld [vmem:[%s23030_s5 + $0x10c8] sm:$0xff]  ;;  %v23170_v2 = vld [vmem:[#allocation30_spill] sm:$0xff]  ;;  %v15212_v34 = vcombine.low %v6164_v24, %v6168_v58 }
 0x513   :  { %10771 = vmatpush1.bf16.msra.mxu0 %v15172_v40  ;;  %v5372_v53 = vadd.f32 %v20402_v15, %v5313_v17  ;;  %11057 = vmatprep.subr.bf16.mxu1 %v15119_v33  ;;  %v5423_v55 = vmax.f32 %v5371_v61, 0.0  ;;  %v15135_v42 = vcombine.high %v6085_v45, %v6089_v11  ;;  %v15134_v38 = vcombine.low %v6085_v45, %v6089_v11 }
 0x514   :  { %v5010_v60 = vpop.f32.mrb[12].mxu1  ;;  %10772 = vmatprep.subr.bf16.mxu0 %v15181_v25  ;;  %v15204_v40 = vcombine.low %v6156_v21, %v6160_v51  ;;  %v15151_v33 = vcombine.high %v6101_v22, %v6105_v50  ;;  %v15229_v45 = vcombine.high %v6180_v59, %v6184_v43  ;;  %v6133_v21 = vld [vmem:[%s23030_s5 + $0x1248] sm:$0xff] }
 0x515   :  { %v5424_v3 = vmax.f32 %v5372_v53, 0.0  ;;  %v5252_v62 = vadd.f32 %v19647_v8, %v5010_v60  ;;  %v5012_v13 = vpop.f32.mrb[13].mxu1  ;;  %v15150_v53 = vcombine.low %v6101_v22, %v6105_v50  ;;  %v6137_v51 = vld [vmem:[%s23030_s5 + $0x1268] sm:$0xff] }
 0x516   :  { %v5013_v28 = vpop.f32.mrb[14].mxu1  ;;  %11058 = vmatpush1.bf16.msra.mxu1 %v15118_v47  ;;  %v15221_v47 = vcombine.high %v6172_v56, %v6176_v32  ;;  %v15182_v58 = vcombine.low %v6133_v21, %v6137_v51 }
 0x517   :  { %10773 = vmatpush1.bf16.msra.mxu0 %v15180_v57  ;;  %v5452_v49 = vpack.c.bf16 %v5424_v3, %v5423_v55  ;;  %v5314_v20 = vmax.f32 %v23167_v7, %v5252_v62  ;;  %v5255_v8 = vadd.f32 %v19653_v19, %v5013_v28  ;;  %v5015_v29 = vpop.f32.mrb[15].mxu1  ;;  %11059 = vmatprep.subr.bf16.mxu1 %v15127_v6  ;;  %v6093_v19 = vld [vmem:[%s23030_s5 + $0x1108] sm:$0xff]  ;;  %v6188_v28 = vld [vmem:[%s23030_s5 + $0x1400] sm:$0xff] }
 0x518   :  { %10774 = vmatprep.subr.bf16.mxu0 %v15189_v44  ;;  %v15143_v1 = vcombine.high %v6093_v19, %v6097_v36  ;;  %v15142_v31 = vcombine.low %v6093_v19, %v6097_v36  ;;  %v6121_v55 = vld [vmem:[%s23030_s5 + $0x11e8] sm:$0xff]  ;;  %v15220_v3 = vcombine.low %v6172_v56, %v6176_v32  ;;  %v6196_v29 = vld [vmem:[%s23030_s5 + $0x1440] sm:$0xff]  ;;  %v15183_v36 = vcombine.high %v6133_v21, %v6137_v51 }
 0x519   :  { %v5373_v46 = vadd.f32 %v20402_v15, %v5314_v20  ;;  %v5315_v39 = vmax.f32 %v23168_v48, %v5255_v8  ;;  %5525 = vrot.lane.b32.xlu0 %v5452_v49, %s17096_s12  ;;  %v15228_v49 = vcombine.low %v6180_v59, %v6184_v43  ;;  %v20514_v19 = vld [vmem:[#allocation4 + $0x40] sm:$0xff]  ;;  %v6197_v51 = vld [vmem:[%s23030_s5 + $0x1448] sm:$0xff] }
 0x51a   :  { %11060 = vmatpush1.bf16.msra.mxu1 %v15126_v37  ;;  %v6125_v37 = vld [vmem:[%s23030_s5 + $0x1208] sm:$0xff]  ;;  %v6228_v56 = vld [vmem:[%s23030_s5 + $0x1540] sm:$0xff] }
 0x51b   :  { %10775 = vmatpush1.bf16.msra.mxu0 %v15188_v27  ;;  %v5374_v30 = vadd.f32 %v20402_v15, %v5315_v39  ;;  %11061 = vmatprep.subr.bf16.mxu1 %v15135_v42  ;;  %v5425_v12 = vmax.f32 %v5373_v46, 0.0  ;;  %v6192_v27 = vld [vmem:[%s23030_s5 + $0x1420] sm:$0xff] }
 0x51c   :  { %10776 = vmatprep.subr.bf16.mxu0 %v15197_v16  ;;  %v5018_v35 = vpop.f32.mrb[16].mxu1  ;;  %v6129_v16 = vld [vmem:[%s23030_s5 + $0x1228] sm:$0xff]  ;;  %v15237_v20 = vcombine.high %v6188_v28, %v6192_v27  ;;  %v6200_v42 = vld [vmem:[%s23030_s5 + $0x1460] sm:$0xff]  ;;  %v15236_v46 = vcombine.low %v6188_v28, %v6192_v27 }
 0x51d   :  { %v5426_v41 = vmax.f32 %v5374_v30, 0.0  ;;  %v5260_v5 = vadd.f32 %v19644_v0, %v5018_v35  ;;  %v5020_v14 = vpop.f32.mrb[17].mxu1  ;;  %v15175_v8 = vcombine.high %v6125_v37, %v6129_v16  ;;  %v15174_v48 = vcombine.low %v6125_v37, %v6129_v16  ;;  %v6208_v30 = vld [vmem:[%s23030_s5 + $0x14a0] sm:$0xff]  ;;  %v6189_v16 = vld [vmem:[%s23030_s5 + $0x1408] sm:$0xff] }
 0x51e   :  { %v5021_v52 = vpop.f32.mrb[18].mxu1  ;;  %11062 = vmatpush1.bf16.msra.mxu1 %v15134_v38  ;;  %v15245_v39 = vcombine.high %v6196_v29, %v6200_v42  ;;  %v6141_v38 = vld [vmem:[%s23030_s5 + $0x1288] sm:$0xff]  ;;  %v15244_v24 = vcombine.low %v6196_v29, %v6200_v42  ;;  %v6232_v32 = vld [vmem:[%s23030_s5 + $0x1560] sm:$0xff] }
 0x51f   :  { %10777 = vmatpush1.bf16.msra.mxu0 %v15196_v63  ;;  %v5316_v4 = vmax.f32 %v23169_v9, %v5260_v5  ;;  %v5263_v26 = vadd.f32 %v19649_v23, %v5021_v52  ;;  %v5023_v0 = vpop.f32.mrb[19].mxu1  ;;  %v5453_v25 = vpack.c.bf16 %v5426_v41, %v5425_v12  ;;  %11063 = vmatprep.subr.bf16.mxu1 %v15143_v1  ;;  %v6109_v23 = vld [vmem:[%s23030_s5 + $0x1188] sm:$0xff]  ;;  %v6204_v63 = vld [vmem:[%s23030_s5 + $0x1480] sm:$0xff] }
 0x520   :  { %10778 = vmatprep.subr.bf16.mxu0 %v15205_v54  ;;  %v15159_v44 = vcombine.high %v6109_v23, %v6113_v18  ;;  %v15158_v13 = vcombine.low %v6109_v23, %v6113_v18  ;;  %v6145_v54 = vld [vmem:[%s23030_s5 + $0x12a8] sm:$0xff]  ;;  %v15253_v35 = vcombine.high %v6204_v63, %v6208_v30  ;;  %v6212_v12 = vld [vmem:[%s23030_s5 + $0x14c0] sm:$0xff]  ;;  %v15252_v22 = vcombine.low %v6204_v63, %v6208_v30 }
 0x521   :  { %v5375_v61 = vadd.f32 %v20402_v15, %v5316_v4  ;;  %v5317_v17 = vmax.f32 %v23170_v2, %v5263_v26  ;;  %5529 = vst.msk [vmem:[#allocation4 + $0x60] sm:$0xff] %vm5455_vm6, %v5453_v25  ;;  %v15191_v1 = vcombine.high %v6141_v38, %v6145_v54  ;;  %v6216_v41 = vld [vmem:[%s23030_s5 + $0x14e0] sm:$0xff]  ;;  %v6149_v5 = vld [vmem:[%s23030_s5 + $0x12c8] sm:$0xff]  ;;  %v15190_v50 = vcombine.low %v6141_v38, %v6145_v54 }
 0x522   :  { %11064 = vmatpush1.bf16.msra.mxu1 %v15142_v31  ;;  %v6153_v14 = vld [vmem:[%s23030_s5 + $0x12e8] sm:$0xff]  ;;  %v15261_v52 = vcombine.high %v6212_v12, %v6216_v41  ;;  %v6220_v31 = vld [vmem:[%s23030_s5 + $0x1500] sm:$0xff]  ;;  %v15260_v26 = vcombine.low %v6212_v12, %v6216_v41  ;;  %v15277_v18 = vcombine.high %v6228_v56, %v6232_v32  ;;  %v15276_v59 = vcombine.low %v6228_v56, %v6232_v32 }
 0x523   :  { %10779 = vmatpush1.bf16.msra.mxu0 %v15204_v40  ;;  %v5376_v57 = vadd.f32 %v20402_v15, %v5317_v17  ;;  %11065 = vmatprep.subr.bf16.mxu1 %v15151_v33  ;;  %v5427_v60 = vmax.f32 %v5375_v61, 0.0  ;;  %v6117_v15 = vld [vmem:[%s23030_s5 + $0x11c8] sm:$0xff]  ;;  %v15199_v40 = vcombine.high %v6149_v5, %v6153_v14  ;;  %v15198_v0 = vcombine.low %v6149_v5, %v6153_v14  ;;  %v6252_v27 = vld [vmem:[%s23030_s5 + $0x1600] sm:$0xff] }
 0x524   :  { %10780 = vmatprep.subr.bf16.mxu0 %v15213_v10  ;;  %v15167_v11 = vcombine.high %v6117_v15, %v6121_v55  ;;  %v15166_v7 = vcombine.low %v6117_v15, %v6121_v55  ;;  %v6224_v10 = vld [vmem:[%s23030_s5 + $0x1520] sm:$0xff]  ;;  %v6157_v9 = vld [vmem:[%s23030_s5 + $0x1308] sm:$0xff] }
 0x525   :  { %v5428_v6 = vmax.f32 %v5376_v57, 0.0  ;;  %v6161_v4 = vld [vmem:[%s23030_s5 + $0x1328] sm:$0xff]  ;;  %v15269_v25 = vcombine.high %v6220_v31, %v6224_v10  ;;  %v15268_v17 = vcombine.low %v6220_v31, %v6224_v10  ;;  %v6236_v57 = vld [vmem:[%s23030_s5 + $0x1580] sm:$0xff] }
 0x526   :  { %11066 = vmatpush1.bf16.msra.mxu1 %v15150_v53  ;;  %v15207_v33 = vcombine.high %v6157_v9, %v6161_v4  ;;  %v6165_v61 = vld [vmem:[%s23030_s5 + $0x1348] sm:$0xff]  ;;  %v15206_v23 = vcombine.low %v6157_v9, %v6161_v4  ;;  %v6240_v53 = vld [vmem:[%s23030_s5 + $0x15a0] sm:$0xff] }
 0x527   :  { %10781 = vmatpush1.bf16.msra.mxu0 %v15212_v34  ;;  %v5454_v62 = vpack.c.bf16 %v5428_v6, %v5427_v60  ;;  %11067 = vmatprep.subr.bf16.mxu1 %v15159_v44  ;;  %v6169_v2 = vld [vmem:[%s23030_s5 + $0x1368] sm:$0xff]  ;;  %v15285_v60 = vcombine.high %v6236_v57, %v6240_v53  ;;  %v6244_v15 = vld [vmem:[%s23030_s5 + $0x15c0] sm:$0xff] }
 0x528   :  { %10782 = vmatprep.subr.bf16.mxu0 %v15221_v47  ;;  %v15215_v34 = vcombine.high %v6165_v61, %v6169_v2  ;;  %v6173_v47 = vld [vmem:[%s23030_s5 + $0x1388] sm:$0xff]  ;;  %v15214_v43 = vcombine.low %v6165_v61, %v6169_v2  ;;  %v6248_v55 = vld [vmem:[%s23030_s5 + $0x15e0] sm:$0xff] }
 0x529   :  { %5531 = vrot.lane.b32.xlu0 %v5454_v62, %s17096_s12  ;;  %v6177_v44 = vld [vmem:[%s23030_s5 + $0x13a8] sm:$0xff]  ;;  %v6256_v37 = vld [vmem:[%s23030_s5 + $0x1620] sm:$0xff] }
 0x52a   :  { %11068 = vmatpush1.bf16.msra.mxu1 %v15158_v13  ;;  %v15223_v6 = vcombine.high %v6173_v47, %v6177_v44  ;;  %v6185_v62 = vld [vmem:[%s23030_s5 + $0x13e8] sm:$0xff]  ;;  %v15284_v13 = vcombine.low %v6236_v57, %v6240_v53  ;;  %v6260_v42 = vld [vmem:[%s23030_s5 + $0x1640] sm:$0xff] }
 0x52b   :  { %10783 = vmatpush1.bf16.msra.mxu0 %v15220_v3  ;;  %11069 = vmatprep.subr.bf16.mxu1 %v15167_v11  ;;  %v6181_v3 = vld [vmem:[%s23030_s5 + $0x13c8] sm:$0xff]  ;;  %v15293_v11 = vcombine.high %v6244_v15, %v6248_v55  ;;  %v6264_v21 = vld [vmem:[%s23030_s5 + $0x1660] sm:$0xff] }
 0x52c   :  { %10784 = vmatprep.subr.bf16.mxu0 %v15229_v45  ;;  %v15222_v45 = vcombine.low %v6173_v47, %v6177_v44  ;;  %v15231_v28 = vcombine.high %v6181_v3, %v6185_v62  ;;  %v6268_v30 = vld [vmem:[%s23030_s5 + $0x1680] sm:$0xff]  ;;  %v6205_v54 = vld [vmem:[%s23030_s5 + $0x1488] sm:$0xff] }
 0x52d   :  { %v6272_v38 = vld [vmem:[%s23030_s5 + $0x16a0] sm:$0xff]  ;;  %v6217_v14 = vld [vmem:[%s23030_s5 + $0x14e8] sm:$0xff] }
 0x52e   :  { %11070 = vmatpush1.bf16.msra.mxu1 %v15166_v7  ;;  %v15292_v7 = vcombine.low %v6244_v15, %v6248_v55  ;;  %v6276_v41 = vld [vmem:[%s23030_s5 + $0x16c0] sm:$0xff]  ;;  %v6221_v9 = vld [vmem:[%s23030_s5 + $0x1508] sm:$0xff] }
 0x52f   :  { %10785 = vmatpush1.bf16.msra.mxu0 %v15228_v49  ;;  %11071 = vmatprep.subr.bf16.mxu1 %v15175_v8  ;;  %v6193_v49 = vld [vmem:[%s23030_s5 + $0x1428] sm:$0xff]  ;;  %v15301_v8 = vcombine.high %v6252_v27, %v6256_v37  ;;  %v6280_v5 = vld [vmem:[%s23030_s5 + $0x16e0] sm:$0xff] }
 0x530   :  { %10797 = vmatprep.subr.bf16.mxu0 %v15237_v20  ;;  %v15230_v20 = vcombine.low %v6181_v3, %v6185_v62  ;;  %v15239_v29 = vcombine.high %v6189_v16, %v6193_v49  ;;  %v6284_v31 = vld [vmem:[%s23030_s5 + $0x1700] sm:$0xff]  ;;  %v6225_v4 = vld [vmem:[%s23030_s5 + $0x1528] sm:$0xff] }
 0x531   :  { %v6288_v10 = vld [vmem:[%s23030_s5 + $0x1720] sm:$0xff]  ;;  %v6229_v61 = vld [vmem:[%s23030_s5 + $0x1548] sm:$0xff] }
 0x532   :  { %10787 = vmatmul.mubr.bf16.vlgmr.msra.gmra.mrb[20].mxu0 %v20514_v19  ;;  %11072 = vmatpush1.bf16.msra.mxu1 %v15174_v48  ;;  %v15300_v48 = vcombine.low %v6252_v27, %v6256_v37  ;;  %v6292_v56 = vld [vmem:[%s23030_s5 + $0x1740] sm:$0xff]  ;;  %v6233_v2 = vld [vmem:[%s23030_s5 + $0x1568] sm:$0xff] }
 0x533   :  { %10798 = vmatpush1.bf16.msra.mxu0 %v15236_v46  ;;  %11073 = vmatprep.subr.bf16.mxu1 %v15183_v36  ;;  %v6201_v46 = vld [vmem:[%s23030_s5 + $0x1468] sm:$0xff]  ;;  %v15309_v36 = vcombine.high %v6260_v42, %v6264_v21  ;;  %v6296_v32 = vld [vmem:[%s23030_s5 + $0x1760] sm:$0xff] }
 0x534   :  { %10799 = vmatprep.subr.bf16.mxu0 %v15245_v39  ;;  %v15238_v39 = vcombine.low %v6189_v16, %v6193_v49  ;;  %v15247_v63 = vcombine.high %v6197_v51, %v6201_v46  ;;  %v6300_v57 = vld [vmem:[%s23030_s5 + $0x1780] sm:$0xff]  ;;  %v6237_v47 = vld [vmem:[%s23030_s5 + $0x1588] sm:$0xff] }
 0x535   :  { %v6304_v53 = vld [vmem:[%s23030_s5 + $0x17a0] sm:$0xff]  ;;  %v6241_v44 = vld [vmem:[%s23030_s5 + $0x15a8] sm:$0xff] }
 0x536   :  { %11074 = vmatpush1.bf16.msra.mxu1 %v15182_v58  ;;  %v15308_v58 = vcombine.low %v6260_v42, %v6264_v21  ;;  %v6308_v15 = vld [vmem:[%s23030_s5 + $0x17c0] sm:$0xff]  ;;  %v6245_v3 = vld [vmem:[%s23030_s5 + $0x15c8] sm:$0xff] }
 0x537   :  { %10800 = vmatpush1.bf16.msra.mxu0 %v15244_v24  ;;  %11075 = vmatprep.subr.bf16.mxu1 %v15191_v1  ;;  %v6209_v24 = vld [vmem:[%s23030_s5 + $0x14a8] sm:$0xff]  ;;  %v15317_v1 = vcombine.high %v6268_v30, %v6272_v38  ;;  %v6312_v55 = vld [vmem:[%s23030_s5 + $0x17e0] sm:$0xff] }
 0x538   :  { %10801 = vmatprep.subr.bf16.mxu0 %v15253_v35  ;;  %v15246_v35 = vcombine.low %v6197_v51, %v6201_v46  ;;  %v15255_v12 = vcombine.high %v6205_v54, %v6209_v24  ;;  %v6249_v62 = vld [vmem:[%s23030_s5 + $0x15e8] sm:$0xff]  ;;  %v20689_v27 = vld [vmem:[%s23030_s5 + $0x1800] sm:$0xff] }
 0x539   :  { %v20694_v37 = vld [vmem:[%s23030_s5 + $0x1820] sm:$0xff]  ;;  %v6253_v16 = vld [vmem:[%s23030_s5 + $0x1608] sm:$0xff] }
 0x53a   :  { %11076 = vmatpush1.bf16.msra.mxu1 %v15190_v50  ;;  %v15254_v50 = vcombine.low %v6205_v54, %v6209_v24  ;;  %v6257_v49 = vld [vmem:[%s23030_s5 + $0x1628] sm:$0xff] }
 0x53b   :  { %10802 = vmatpush1.bf16.msra.mxu0 %v15252_v22  ;;  %11077 = vmatprep.subr.bf16.mxu1 %v15199_v40  ;;  %v15316_v22 = vcombine.low %v6268_v30, %v6272_v38  ;;  %v6261_v42 = vld [vmem:[%s23030_s5 + $0x1648] sm:$0xff]  ;;  %v15302_v51 = vcombine.low %v6253_v16, %v6257_v49 }
 0x53c   :  { %10803 = vmatprep.subr.bf16.mxu0 %v15261_v52  ;;  %v15325_v52 = vcombine.high %v6276_v41, %v6280_v5  ;;  %v6265_v21 = vld [vmem:[%s23030_s5 + $0x1668] sm:$0xff] }
 0x53d   :  { %v15311_v46 = vcombine.high %v6261_v42, %v6265_v21  ;;  %v6277_v30 = vld [vmem:[%s23030_s5 + $0x16c8] sm:$0xff] }
 0x53e   :  { %11078 = vmatpush1.bf16.msra.mxu1 %v15198_v0  ;;  %v6281_v38 = vld [vmem:[%s23030_s5 + $0x16e8] sm:$0xff] }
 0x53f   :  { %10804 = vmatpush1.bf16.msra.mxu0 %v15260_v26  ;;  %11079 = vmatprep.subr.bf16.mxu1 %v15207_v33  ;;  %v15324_v26 = vcombine.low %v6276_v41, %v6280_v5  ;;  %v15271_v33 = vcombine.high %v6221_v9, %v6225_v4  ;;  %v15327_v24 = vcombine.high %v6277_v30, %v6281_v38  ;;  %v6293_v41 = vld [vmem:[%s23030_s5 + $0x1748] sm:$0xff] }
 0x540   :  { %10805 = vmatprep.subr.bf16.mxu0 %v15269_v25  ;;  %v15333_v25 = vcombine.high %v6284_v31, %v6288_v10  ;;  %v6297_v5 = vld [vmem:[%s23030_s5 + $0x1768] sm:$0xff] }
 0x542   :  { %11080 = vmatpush1.bf16.msra.mxu1 %v15206_v23  ;;  %v15270_v23 = vcombine.low %v6221_v9, %v6225_v4 }
 0x543   :  { %10806 = vmatpush1.bf16.msra.mxu0 %v15268_v17  ;;  %11081 = vmatprep.subr.bf16.mxu1 %v15215_v34  ;;  %v15332_v17 = vcombine.low %v6284_v31, %v6288_v10  ;;  %v15279_v34 = vcombine.high %v6229_v61, %v6233_v2  ;;  %v6309_v31 = vld [vmem:[%s23030_s5 + $0x17c8] sm:$0xff] }
 0x544   :  { %10807 = vmatprep.subr.bf16.mxu0 %v15277_v18  ;;  %v15341_v18 = vcombine.high %v6292_v56, %v6296_v32  ;;  %v6313_v10 = vld [vmem:[%s23030_s5 + $0x17e8] sm:$0xff] }
 0x545   :  { %v15359_v4 = vcombine.high %v6309_v31, %v6313_v10 }
 0x546   :  { %11082 = vmatpush1.bf16.msra.mxu1 %v15214_v43  ;;  %v15278_v43 = vcombine.low %v6229_v61, %v6233_v2  ;;  %v6328_v61 = vld [vmem:[%s23030_s5 + $0x1860] sm:$0xff]  ;;  %v6325_v2 = vld [vmem:[%s23030_s5 + $0x1848] sm:$0xff] }
 0x547   :  { %10808 = vmatpush1.bf16.msra.mxu0 %v15276_v59  ;;  %11083 = vmatprep.subr.bf16.mxu1 %v15223_v6  ;;  %v15340_v59 = vcombine.low %v6292_v56, %v6296_v32  ;;  %v15287_v6 = vcombine.high %v6237_v47, %v6241_v44  ;;  %v6324_v32 = vld [vmem:[%s23030_s5 + $0x1840] sm:$0xff] }
 0x548   :  { %10809 = vmatprep.subr.bf16.mxu0 %v15285_v60  ;;  %v15349_v60 = vcombine.high %v6300_v57, %v6304_v53 }
 0x54a   :  { %11084 = vmatpush1.bf16.msra.mxu1 %v15222_v45  ;;  %v15286_v45 = vcombine.low %v6237_v47, %v6241_v44  ;;  %v6332_v44 = vld [vmem:[%s23030_s5 + $0x1880] sm:$0xff] }
 0x54b   :  { %10810 = vmatpush1.bf16.msra.mxu0 %v15284_v13  ;;  %11085 = vmatprep.subr.bf16.mxu1 %v15231_v28  ;;  %v15348_v13 = vcombine.low %v6300_v57, %v6304_v53  ;;  %v15295_v28 = vcombine.high %v6245_v3, %v6249_v62  ;;  %v5545_v57 = vld [vmem:[#allocation4 + $0x50] sm:$0xff]  ;;  %v15373_v53 = vcombine.high %v6324_v32, %v6328_v61 }
 0x54c   :  { %10811 = vmatprep.subr.bf16.mxu0 %v15293_v11  ;;  %v15357_v11 = vcombine.high %v6308_v15, %v6312_v55 }
 0x54e   :  { %11086 = vmatpush1.bf16.msra.mxu1 %v15230_v20  ;;  %v15294_v20 = vcombine.low %v6245_v3, %v6249_v62  ;;  %v6340_v62 = vld [vmem:[%s23030_s5 + $0x18c0] sm:$0xff] }
 0x54f   :  { %10812 = vmatpush1.bf16.msra.mxu0 %v15292_v7  ;;  %11098 = vmatprep.subr.bf16.mxu1 %v15239_v29  ;;  %v15356_v7 = vcombine.low %v6308_v15, %v6312_v55  ;;  %v15303_v29 = vcombine.high %v6253_v16, %v6257_v49 }
 0x550   :  { %10813 = vmatprep.subr.bf16.mxu0 %v15301_v8  ;;  %v15365_v8 = vcombine.high %v20689_v27, %v20694_v37 }
 0x551   :  { %11088 = vmatmul.mubr.bf16.vlgmr.msra.gmra.mrb[20].mxu1 %v20514_v19  ;;  %v6213_v19 = vld [vmem:[%s23030_s5 + $0x14c8] sm:$0xff] }
 0x552   :  { %11099 = vmatpush1.bf16.msra.mxu1 %v15238_v39  ;;  %v15263_v40 = vcombine.high %v6213_v19, %v6217_v14  ;;  %v15262_v0 = vcombine.low %v6213_v19, %v6217_v14  ;;  %v6273_v39 = vld [vmem:[%s23030_s5 + $0x16a8] sm:$0xff]  ;;  %v15343_v14 = vcombine.high %v6293_v41, %v6297_v5 }
 0x553   :  { %10814 = vmatpush1.bf16.msra.mxu0 %v15300_v48  ;;  %11100 = vmatprep.subr.bf16.mxu1 %v15247_v63  ;;  %v6269_v48 = vld [vmem:[%s23030_s5 + $0x1688] sm:$0xff] }
 0x554   :  { %10815 = vmatprep.subr.bf16.mxu0 %v15309_v36  ;;  %v15310_v36 = vcombine.low %v6261_v42, %v6265_v21  ;;  %v15319_v63 = vcombine.high %v6269_v48, %v6273_v39  ;;  %v15318_v54 = vcombine.low %v6269_v48, %v6273_v39  ;;  %v6353_v42 = vld [vmem:[%s23030_s5 + $0x1928] sm:$0xff]  ;;  %v6356_v39 = vld [vmem:[%s23030_s5 + $0x1940] sm:$0xff] }
 0x556   :  { %11101 = vmatpush1.bf16.msra.mxu1 %v15246_v35  ;;  %v6289_v35 = vld [vmem:[%s23030_s5 + $0x1728] sm:$0xff] }
 0x557   :  { %10816 = vmatpush1.bf16.msra.mxu0 %v15308_v58  ;;  %11102 = vmatprep.subr.bf16.mxu1 %v15255_v12  ;;  %v6285_v58 = vld [vmem:[%s23030_s5 + $0x1708] sm:$0xff] }
 0x558   :  { %10817 = vmatprep.subr.bf16.mxu0 %v15317_v1  ;;  %v15326_v1 = vcombine.low %v6277_v30, %v6281_v38  ;;  %v15335_v12 = vcombine.high %v6285_v58, %v6289_v35  ;;  %v15334_v19 = vcombine.low %v6285_v58, %v6289_v35  ;;  %v6361_v30 = vld [vmem:[%s23030_s5 + $0x1968] sm:$0xff]  ;;  %v6364_v35 = vld [vmem:[%s23030_s5 + $0x1980] sm:$0xff] }
 0x55a   :  { %11103 = vmatpush1.bf16.msra.mxu1 %v15254_v50  ;;  %v6305_v50 = vld [vmem:[%s23030_s5 + $0x17a8] sm:$0xff] }
 0x55b   :  { %10818 = vmatpush1.bf16.msra.mxu0 %v15316_v22  ;;  %11104 = vmatprep.subr.bf16.mxu1 %v15263_v40  ;;  %v6301_v22 = vld [vmem:[%s23030_s5 + $0x1788] sm:$0xff] }
 0x55c   :  { %10819 = vmatprep.subr.bf16.mxu0 %v15325_v52  ;;  %v15342_v52 = vcombine.low %v6293_v41, %v6297_v5  ;;  %v15351_v40 = vcombine.high %v6301_v22, %v6305_v50  ;;  %v15350_v9 = vcombine.low %v6301_v22, %v6305_v50  ;;  %v6369_v41 = vld [vmem:[%s23030_s5 + $0x19a8] sm:$0xff]  ;;  %v6372_v50 = vld [vmem:[%s23030_s5 + $0x19c0] sm:$0xff] }
 0x55e   :  { %11105 = vmatpush1.bf16.msra.mxu1 %v15262_v0  ;;  %v6321_v0 = vld [vmem:[%s23030_s5 + $0x1828] sm:$0xff] }
 0x55f   :  { %10820 = vmatpush1.bf16.msra.mxu0 %v15324_v26  ;;  %11106 = vmatprep.subr.bf16.mxu1 %v15271_v33  ;;  %v6317_v26 = vld [vmem:[%s23030_s5 + $0x1808] sm:$0xff]  ;;  %v15358_v33 = vcombine.low %v6309_v31, %v6313_v10 }
 0x560   :  { %10821 = vmatprep.subr.bf16.mxu0 %v15333_v25  ;;  %v15367_v56 = vcombine.high %v6317_v26, %v6321_v0  ;;  %v6377_v31 = vld [vmem:[%s23030_s5 + $0x19e8] sm:$0xff] }
 0x562   :  { %11107 = vmatpush1.bf16.msra.mxu1 %v15270_v23  ;;  %v15364_v23 = vcombine.low %v20689_v27, %v20694_v37 }
 0x563   :  { %10822 = vmatpush1.bf16.msra.mxu0 %v15332_v17  ;;  %11108 = vmatprep.subr.bf16.mxu1 %v15279_v34  ;;  %v6329_v17 = vld [vmem:[%s23030_s5 + $0x1868] sm:$0xff] }
 0x564   :  { %10823 = vmatprep.subr.bf16.mxu0 %v15341_v18  ;;  %v15366_v18 = vcombine.low %v6317_v26, %v6321_v0  ;;  %v15375_v47 = vcombine.high %v6325_v2, %v6329_v17  ;;  %v15374_v15 = vcombine.low %v6325_v2, %v6329_v17  ;;  %v5550_v0 = vld [vmem:[%s23030_s5 + $0x10] sm:$0xff] }
 0x566   :  { %11109 = vmatpush1.bf16.msra.mxu1 %v15278_v43  ;;  %v6333_v43 = vld [vmem:[%s23030_s5 + $0x1888] sm:$0xff] }
 0x567   :  { %10824 = vmatpush1.bf16.msra.mxu0 %v15340_v59  ;;  %11110 = vmatprep.subr.bf16.mxu1 %v15287_v6  ;;  %v6336_v59 = vld [vmem:[%s23030_s5 + $0x18a0] sm:$0xff]  ;;  %v15372_v6 = vcombine.low %v6324_v32, %v6328_v61 }
 0x568   :  { %10825 = vmatprep.subr.bf16.mxu0 %v15349_v60  ;;  %v6337_v60 = vld [vmem:[%s23030_s5 + $0x18a8] sm:$0xff]  ;;  %v15381_v55 = vcombine.high %v6332_v44, %v6336_v59  ;;  %v15380_v27 = vcombine.low %v6332_v44, %v6336_v59 }
 0x569   :  { %v15383_v3 = vcombine.high %v6333_v43, %v6337_v60  ;;  %v15382_v37 = vcombine.low %v6333_v43, %v6337_v60  ;;  %v5566_v60 = vld [vmem:[%s23030_s5 + $0x90] sm:$0xff] }
 0x56a   :  { %11111 = vmatpush1.bf16.msra.mxu1 %v15286_v45  ;;  %v6341_v45 = vld [vmem:[%s23030_s5 + $0x18c8] sm:$0xff] }
 0x56b   :  { %10826 = vmatpush1.bf16.msra.mxu0 %v15348_v13  ;;  %11112 = vmatprep.subr.bf16.mxu1 %v15295_v28  ;;  %v6344_v13 = vld [vmem:[%s23030_s5 + $0x18e0] sm:$0xff]  ;;  %v23171_v28 = vmov 0  }
 0x56c   :  { %10827 = vmatprep.subr.bf16.mxu0 %v15357_v11  ;;  %v6345_v11 = vld [vmem:[%s23030_s5 + $0x18e8] sm:$0xff]  ;;  %v15389_v49 = vcombine.high %v6340_v62, %v6344_v13  ;;  %v15388_v21 = vcombine.low %v6340_v62, %v6344_v13 }
 0x56e   :  { %11113 = vmatpush1.bf16.msra.mxu1 %v15294_v20  ;;  %v6348_v20 = vld [vmem:[%s23030_s5 + $0x1900] sm:$0xff] }
 0x56f   :  { %10828 = vmatpush1.bf16.msra.mxu0 %v15356_v7  ;;  %11114 = vmatprep.subr.bf16.mxu1 %v15303_v29  ;;  %v15391_v7 = vcombine.high %v6341_v45, %v6345_v11  ;;  %v6349_v29 = vld [vmem:[%s23030_s5 + $0x1908] sm:$0xff] }
 0x570   :  { %10840 = vmatprep.subr.bf16.mxu0 %v15365_v8  ;;  %v6352_v8 = vld [vmem:[%s23030_s5 + $0x1920] sm:$0xff]  ;;  %v15399_v48 = vcombine.high %v6349_v29, %v6353_v42 }
 0x571   :  { %v15396_v38 = vcombine.low %v6348_v20, %v6352_v8 }
 0x572   :  { %11115 = vmatpush1.bf16.msra.mxu1 %v15302_v51  ;;  %v15390_v51 = vcombine.low %v6341_v45, %v6345_v11 }
 0x573   :  { %11116 = vmatprep.subr.bf16.mxu1 %v15311_v46  ;;  %v15397_v46 = vcombine.high %v6348_v20, %v6352_v8 }
 0x576   :  { %11117 = vmatpush1.bf16.msra.mxu1 %v15310_v36  ;;  %v6360_v36 = vld [vmem:[%s23030_s5 + $0x1960] sm:$0xff] }
 0x577   :  { %11118 = vmatprep.subr.bf16.mxu1 %v15319_v63  ;;  %v6357_v63 = vld [vmem:[%s23030_s5 + $0x1948] sm:$0xff]  ;;  %v15404_v5 = vcombine.low %v6356_v39, %v6360_v36 }
 0x578   :  { %v15407_v58 = vcombine.high %v6357_v63, %v6361_v30 }
 0x57a   :  { %11119 = vmatpush1.bf16.msra.mxu1 %v15318_v54  ;;  %v15398_v54 = vcombine.low %v6349_v29, %v6353_v42  ;;  %v5582_v42 = vld [vmem:[%s23030_s5 + $0x110] sm:$0xff] }
 0x57b   :  { %11120 = vmatprep.subr.bf16.mxu1 %v15327_v24  ;;  %v15405_v24 = vcombine.high %v6356_v39, %v6360_v36 }
 0x57e   :  { %11121 = vmatpush1.bf16.msra.mxu1 %v15326_v1  ;;  %v6368_v1 = vld [vmem:[%s23030_s5 + $0x19a0] sm:$0xff] }
 0x57f   :  { %11122 = vmatprep.subr.bf16.mxu1 %v15335_v12  ;;  %v6365_v12 = vld [vmem:[%s23030_s5 + $0x1988] sm:$0xff]  ;;  %v15412_v10 = vcombine.low %v6364_v35, %v6368_v1 }
 0x580   :  { %v15415_v22 = vcombine.high %v6365_v12, %v6369_v41 }
 0x582   :  { %11123 = vmatpush1.bf16.msra.mxu1 %v15334_v19  ;;  %v15406_v19 = vcombine.low %v6357_v63, %v6361_v30  ;;  %v5590_v30 = vld [vmem:[%s23030_s5 + $0x150] sm:$0xff] }
 0x583   :  { %11124 = vmatprep.subr.bf16.mxu1 %v15343_v14  ;;  %v15413_v14 = vcombine.high %v6364_v35, %v6368_v1 }
 0x586   :  { %11125 = vmatpush1.bf16.msra.mxu1 %v15342_v52  ;;  %v6376_v52 = vld [vmem:[%s23030_s5 + $0x19e0] sm:$0xff] }
 0x587   :  { %11126 = vmatprep.subr.bf16.mxu1 %v15351_v40  ;;  %v6373_v40 = vld [vmem:[%s23030_s5 + $0x19c8] sm:$0xff]  ;;  %v15420_v32 = vcombine.low %v6372_v50, %v6376_v52 }
 0x588   :  { %v15423_v26 = vcombine.high %v6373_v40, %v6377_v31  ;;  %v15422_v61 = vcombine.low %v6373_v40, %v6377_v31  ;;  %v5606_v31 = vld [vmem:[%s23030_s5 + $0x1d0] sm:$0xff] }
 0x58a   :  { %11127 = vmatpush1.bf16.msra.mxu1 %v15350_v9  ;;  %v15414_v9 = vcombine.low %v6365_v12, %v6369_v41  ;;  %v5598_v41 = vld [vmem:[%s23030_s5 + $0x190] sm:$0xff] }
 0x58b   :  { %v5526_v25 = vpop.permute.xlu0 %5525  ;;  %11128 = vmatprep.subr.bf16.mxu1 %v15359_v4  ;;  %v15421_v4 = vcombine.high %v6372_v50, %v6376_v52 }
 0x58c   :  { %5528 = vst.msk [vmem:[#allocation4 + $0x58] sm:$0xff] %vm5461_vm7, %v5526_v25  ;;  %v5554_v25 = vld [vmem:[%s23030_s5 + $0x30] sm:$0xff] }
 0x58d   :  { %v14601_v2 = vcombine.high %v5550_v0, %v5554_v25 }
 0x58e   :  { %11129 = vmatpush1.bf16.msra.mxu1 %v15358_v33  ;;  %v5551_v33 = vld [vmem:[%s23030_s5 + $0x18] sm:$0xff] }
 0x58f   :  { %11141 = vmatprep.subr.bf16.mxu1 %v15367_v56  ;;  %v5555_v56 = vld [vmem:[%s23030_s5 + $0x38] sm:$0xff] }
 0x590   :  { %v14603_v17 = vcombine.high %v5551_v33, %v5555_v56 }
 0x593   :  { %v5546_v34 = vld [vmem:[#allocation4 + $0x58] sm:$0xff] }
 0x594   :  { %10829 = vmatprep.mubr.bf16.mxu0 %v5546_v34  ;;  %11130 = vmatprep.mubr.bf16.mxu1 %v5546_v34  ;;  %v5559_v34 = vld [vmem:[%s23030_s5 + $0x58] sm:$0xff] }
 0x595   :  { %10830 = vmatmul.mubr.bf16.vlgmr.msra.gmra.mrb[20].mxu0 %v5545_v57  ;;  %11131 = vmatmul.mubr.bf16.vlgmr.msra.gmra.mrb[20].mxu1 %v5545_v57  ;;  %v5563_v57 = vld [vmem:[%s23030_s5 + $0x78] sm:$0xff] }
 0x596   :  { %10841 = vmatpush1.bf16.msra.mxu0 %v15364_v23  ;;  %11142 = vmatpush1.bf16.msra.mxu1 %v15366_v18  ;;  %v5558_v23 = vld [vmem:[%s23030_s5 + $0x50] sm:$0xff]  ;;  %v14611_v43 = vcombine.high %v5559_v34, %v5563_v57  ;;  %v14610_v13 = vcombine.low %v5559_v34, %v5563_v57 }
 0x597   :  { %10842 = vmatprep.subr.bf16.mxu0 %v15373_v53  ;;  %11143 = vmatprep.subr.bf16.mxu1 %v15375_v47  ;;  %v5562_v18 = vld [vmem:[%s23030_s5 + $0x70] sm:$0xff]  ;;  %v14600_v53 = vcombine.low %v5550_v0, %v5554_v25  ;;  %v14602_v47 = vcombine.low %v5551_v33, %v5555_v56 }
 0x598   :  { %10872 = vmatprep.mubr.bf16.mxu0 %v23171_v28  ;;  %11173 = vmatprep.mubr.bf16.mxu1 %v23171_v28  ;;  %v14609_v59 = vcombine.high %v5558_v23, %v5562_v18  ;;  %v14608_v62 = vcombine.low %v5558_v23, %v5562_v18  ;;  %v5614_v56 = vld [vmem:[%s23030_s5 + $0x210] sm:$0xff] }
 0x599   :  { %v5622_v57 = vld [vmem:[%s23030_s5 + $0x250] sm:$0xff] }
 0x59a   :  { %10843 = vmatpush1.bf16.msra.mxu0 %v15372_v6  ;;  %11144 = vmatpush1.bf16.msra.mxu1 %v15374_v15  ;;  %v5570_v6 = vld [vmem:[%s23030_s5 + $0xb0] sm:$0xff]  ;;  %v5567_v15 = vld [vmem:[%s23030_s5 + $0x98] sm:$0xff] }
 0x59b   :  { %v5532_v16 = vpop.permute.xlu0 %5531  ;;  %10844 = vmatprep.subr.bf16.mxu0 %v15381_v55  ;;  %11145 = vmatprep.subr.bf16.mxu1 %v15383_v3  ;;  %v5571_v55 = vld [vmem:[%s23030_s5 + $0xb8] sm:$0xff]  ;;  %v17081_v3 = vld [vmem:[#allocation4 + $0x8] sm:$0xff]  ;;  %v14617_v45 = vcombine.high %v5566_v60, %v5570_v6 }
 0x59c   :  { %5534 = vst.msk [vmem:[#allocation4 + $0x60] sm:$0xff] %vm5461_vm7, %v5532_v16  ;;  %v14619_v11 = vcombine.high %v5567_v15, %v5571_v55  ;;  %v5575_v16 = vld [vmem:[%s23030_s5 + $0xd8] sm:$0xff]  ;;  %v14618_v20 = vcombine.low %v5567_v15, %v5571_v55  ;;  %v5630_v15 = vld [vmem:[%s23030_s5 + $0x290] sm:$0xff] }
 0x59d   :  { %v5634_v55 = vld [vmem:[%s23030_s5 + $0x2b0] sm:$0xff] }
 0x59e   :  { %10845 = vmatpush1.bf16.msra.mxu0 %v15380_v27  ;;  %11146 = vmatpush1.bf16.msra.mxu1 %v15382_v37  ;;  %v5574_v27 = vld [vmem:[%s23030_s5 + $0xd0] sm:$0xff] }
 0x59f   :  { %10846 = vmatprep.subr.bf16.mxu0 %v15389_v49  ;;  %11147 = vmatprep.subr.bf16.mxu1 %v15391_v7  ;;  %v5578_v37 = vld [vmem:[%s23030_s5 + $0xf0] sm:$0xff]  ;;  %v5579_v49 = vld [vmem:[%s23030_s5 + $0xf8] sm:$0xff]  ;;  %v14616_v7 = vcombine.low %v5566_v60, %v5570_v6 }
 0x5a0   :  { %v14625_v8 = vcombine.high %v5574_v27, %v5578_v37  ;;  %v14627_v29 = vcombine.high %v5575_v16, %v5579_v49  ;;  %v14626_v39 = vcombine.low %v5575_v16, %v5579_v49  ;;  %v5642_v16 = vld [vmem:[%s23030_s5 + $0x2f0] sm:$0xff]  ;;  %v5639_v49 = vld [vmem:[%s23030_s5 + $0x2d8] sm:$0xff] }
 0x5a2   :  { %10847 = vmatpush1.bf16.msra.mxu0 %v15388_v21  ;;  %11148 = vmatpush1.bf16.msra.mxu1 %v15390_v51  ;;  %v5586_v21 = vld [vmem:[%s23030_s5 + $0x130] sm:$0xff]  ;;  %v5583_v51 = vld [vmem:[%s23030_s5 + $0x118] sm:$0xff] }
 0x5a3   :  { %10848 = vmatprep.subr.bf16.mxu0 %v15397_v46  ;;  %11149 = vmatprep.subr.bf16.mxu1 %v15399_v48  ;;  %v5547_v44 = vld [vmem:[#allocation4 + $0x60] sm:$0xff]  ;;  %v5587_v46 = vld [vmem:[%s23030_s5 + $0x138] sm:$0xff]  ;;  %v14624_v48 = vcombine.low %v5574_v27, %v5578_v37  ;;  %v14633_v36 = vcombine.high %v5582_v42, %v5586_v21  ;;  %v5638_v37 = vld [vmem:[%s23030_s5 + $0x2d0] sm:$0xff] }
 0x5a4   :  { %v14635_v63 = vcombine.high %v5583_v51, %v5587_v46  ;;  %v14634_v35 = vcombine.low %v5583_v51, %v5587_v46  ;;  %v5650_v51 = vld [vmem:[%s23030_s5 + $0x330] sm:$0xff]  ;;  %v5647_v46 = vld [vmem:[%s23030_s5 + $0x318] sm:$0xff] }
 0x5a6   :  { %10849 = vmatpush1.bf16.msra.mxu0 %v15396_v38  ;;  %11150 = vmatpush1.bf16.msra.mxu1 %v15398_v54  ;;  %v5594_v38 = vld [vmem:[%s23030_s5 + $0x170] sm:$0xff]  ;;  %v5591_v54 = vld [vmem:[%s23030_s5 + $0x158] sm:$0xff] }
 0x5a7   :  { %10850 = vmatprep.subr.bf16.mxu0 %v15405_v24  ;;  %11151 = vmatprep.subr.bf16.mxu1 %v15407_v58  ;;  %v5595_v24 = vld [vmem:[%s23030_s5 + $0x178] sm:$0xff]  ;;  %v14632_v58 = vcombine.low %v5582_v42, %v5586_v21  ;;  %v14641_v1 = vcombine.high %v5590_v30, %v5594_v38  ;;  %v5646_v21 = vld [vmem:[%s23030_s5 + $0x310] sm:$0xff] }
 0x5a8   :  { %v14643_v12 = vcombine.high %v5591_v54, %v5595_v24  ;;  %v14642_v50 = vcombine.low %v5591_v54, %v5595_v24  ;;  %v5658_v54 = vld [vmem:[%s23030_s5 + $0x370] sm:$0xff]  ;;  %v5655_v24 = vld [vmem:[%s23030_s5 + $0x358] sm:$0xff] }
 0x5aa   :  { %10851 = vmatpush1.bf16.msra.mxu0 %v15404_v5  ;;  %11152 = vmatpush1.bf16.msra.mxu1 %v15406_v19  ;;  %v5602_v5 = vld [vmem:[%s23030_s5 + $0x1b0] sm:$0xff]  ;;  %v5599_v19 = vld [vmem:[%s23030_s5 + $0x198] sm:$0xff] }
 0x5ab   :  { %10852 = vmatprep.subr.bf16.mxu0 %v15413_v14  ;;  %11153 = vmatprep.subr.bf16.mxu1 %v15415_v22  ;;  %v5603_v14 = vld [vmem:[%s23030_s5 + $0x1b8] sm:$0xff]  ;;  %v14640_v22 = vcombine.low %v5590_v30, %v5594_v38  ;;  %v14649_v52 = vcombine.high %v5598_v41, %v5602_v5  ;;  %v5654_v38 = vld [vmem:[%s23030_s5 + $0x350] sm:$0xff] }
 0x5ac   :  { %v14651_v40 = vcombine.high %v5599_v19, %v5603_v14  ;;  %v14650_v0 = vcombine.low %v5599_v19, %v5603_v14  ;;  %v5666_v19 = vld [vmem:[%s23030_s5 + $0x3b0] sm:$0xff]  ;;  %v5663_v14 = vld [vmem:[%s23030_s5 + $0x398] sm:$0xff] }
 0x5ae   :  { %10853 = vmatpush1.bf16.msra.mxu0 %v15412_v10  ;;  %11154 = vmatpush1.bf16.msra.mxu1 %v15414_v9  ;;  %v5610_v10 = vld [vmem:[%s23030_s5 + $0x1f0] sm:$0xff]  ;;  %v5607_v9 = vld [vmem:[%s23030_s5 + $0x1d8] sm:$0xff] }
 0x5af   :  { %10854 = vmatprep.subr.bf16.mxu0 %v15421_v4  ;;  %11155 = vmatprep.subr.bf16.mxu1 %v15423_v26  ;;  %v5611_v4 = vld [vmem:[%s23030_s5 + $0x1f8] sm:$0xff]  ;;  %v14648_v26 = vcombine.low %v5598_v41, %v5602_v5  ;;  %v14657_v25 = vcombine.high %v5606_v31, %v5610_v10  ;;  %v5662_v5 = vld [vmem:[%s23030_s5 + $0x390] sm:$0xff] }
 0x5b0   :  { %v14659_v33 = vcombine.high %v5607_v9, %v5611_v4  ;;  %v14658_v23 = vcombine.low %v5607_v9, %v5611_v4  ;;  %v5674_v9 = vld [vmem:[%s23030_s5 + $0x3f0] sm:$0xff]  ;;  %v5671_v4 = vld [vmem:[%s23030_s5 + $0x3d8] sm:$0xff] }
 0x5b2   :  { %10855 = vmatpush1.bf16.msra.mxu0 %v15420_v32  ;;  %11156 = vmatpush1.bf16.msra.mxu1 %v15422_v61  ;;  %v5618_v32 = vld [vmem:[%s23030_s5 + $0x230] sm:$0xff]  ;;  %v5615_v61 = vld [vmem:[%s23030_s5 + $0x218] sm:$0xff] }
 0x5b3   :  { %11184 = vmatprep.subr.bf16.mxu0 %v14601_v2  ;;  %11485 = vmatprep.subr.bf16.mxu1 %v14603_v17  ;;  %v5619_v2 = vld [vmem:[%s23030_s5 + $0x238] sm:$0xff]  ;;  %v14656_v17 = vcombine.low %v5606_v31, %v5610_v10  ;;  %v14665_v18 = vcombine.high %v5614_v56, %v5618_v32  ;;  %v5670_v10 = vld [vmem:[%s23030_s5 + $0x3d0] sm:$0xff] }
 0x5b4   :  { %v14667_v34 = vcombine.high %v5615_v61, %v5619_v2 }
 0x5b5   :  { %10873 = vmatmul.mubr.bf16.vlgmr.msra.gmra.mrb[20].mxu0 %v5547_v44  ;;  %11174 = vmatmul.mubr.bf16.vlgmr.msra.gmra.mrb[20].mxu1 %v5547_v44  ;;  %v5627_v44 = vld [vmem:[%s23030_s5 + $0x278] sm:$0xff] }
 0x5b6   :  { %11185 = vmatpush1.bf16.msra.mxu0 %v14600_v53  ;;  %11216 = vmatprep.mubr.bf16.mxu0 %v17081_v3  ;;  %v5626_v53 = vld [vmem:[%s23030_s5 + $0x270] sm:$0xff] }
 0x5b7   :  { %11486 = vmatpush1.bf16.msra.mxu1 %v14602_v47  ;;  %11517 = vmatprep.mubr.bf16.mxu1 %v17081_v3  ;;  %v5623_v47 = vld [vmem:[%s23030_s5 + $0x258] sm:$0xff]  ;;  %v14673_v60 = vcombine.high %v5622_v57, %v5626_v53 }
 0x5b8   :  { %11186 = vmatprep.subr.bf16.mxu0 %v14609_v59  ;;  %11487 = vmatprep.subr.bf16.mxu1 %v14611_v43  ;;  %v14664_v59 = vcombine.low %v5614_v56, %v5618_v32  ;;  %v14666_v43 = vcombine.low %v5615_v61, %v5619_v2  ;;  %v14675_v6 = vcombine.high %v5623_v47, %v5627_v44  ;;  %v5631_v3 = vld [vmem:[%s23030_s5 + $0x298] sm:$0xff]  ;;  %v5678_v32 = vld [vmem:[%s23030_s5 + $0x410] sm:$0xff] }
 0x5b9   :  { %v5682_v61 = vld [vmem:[%s23030_s5 + $0x430] sm:$0xff]  ;;  %v5679_v2 = vld [vmem:[%s23030_s5 + $0x418] sm:$0xff] }
 0x5ba   :  { %11187 = vmatpush1.bf16.msra.mxu0 %v14608_v62  ;;  %v5635_v62 = vld [vmem:[%s23030_s5 + $0x2b8] sm:$0xff] }
 0x5bb   :  { %11488 = vmatpush1.bf16.msra.mxu1 %v14610_v13  ;;  %11188 = vmatprep.subr.bf16.mxu0 %v14617_v45  ;;  %v14672_v13 = vcombine.low %v5622_v57, %v5626_v53  ;;  %v14674_v45 = vcombine.low %v5623_v47, %v5627_v44  ;;  %v14683_v27 = vcombine.high %v5631_v3, %v5635_v62  ;;  %v5686_v53 = vld [vmem:[%s23030_s5 + $0x450] sm:$0xff] }
 0x5bc   :  { %11489 = vmatprep.subr.bf16.mxu1 %v14619_v11  ;;  %v14681_v11 = vcombine.high %v5630_v15, %v5634_v55  ;;  %v5690_v47 = vld [vmem:[%s23030_s5 + $0x470] sm:$0xff]  ;;  %v14728_v44 = vcombine.low %v5678_v32, %v5682_v61 }
 0x5be   :  { %11189 = vmatpush1.bf16.msra.mxu0 %v14616_v7  ;;  %v5643_v7 = vld [vmem:[%s23030_s5 + $0x2f8] sm:$0xff] }
 0x5bf   :  { %11490 = vmatpush1.bf16.msra.mxu1 %v14618_v20  ;;  %11190 = vmatprep.subr.bf16.mxu0 %v14625_v8  ;;  %v14680_v20 = vcombine.low %v5630_v15, %v5634_v55  ;;  %v14682_v8 = vcombine.low %v5631_v3, %v5635_v62  ;;  %v14691_v42 = vcombine.high %v5639_v49, %v5643_v7  ;;  %v5694_v15 = vld [vmem:[%s23030_s5 + $0x490] sm:$0xff]  ;;  %v17082_v3 = vld [vmem:[#allocation4] sm:$0xff] }
 0x5c0   :  { %11491 = vmatprep.subr.bf16.mxu1 %v14627_v29  ;;  %v14689_v29 = vcombine.high %v5638_v37, %v5642_v16  ;;  %v5698_v55 = vld [vmem:[%s23030_s5 + $0x4b0] sm:$0xff] }
 0x5c2   :  { %11191 = vmatpush1.bf16.msra.mxu0 %v14624_v48  ;;  %v5651_v48 = vld [vmem:[%s23030_s5 + $0x338] sm:$0xff] }
 0x5c3   :  { %11492 = vmatpush1.bf16.msra.mxu1 %v14626_v39  ;;  %11192 = vmatprep.subr.bf16.mxu0 %v14633_v36  ;;  %v14688_v39 = vcombine.low %v5638_v37, %v5642_v16  ;;  %v14690_v36 = vcombine.low %v5639_v49, %v5643_v7  ;;  %v14699_v30 = vcombine.high %v5647_v46, %v5651_v48  ;;  %v5702_v7 = vld [vmem:[%s23030_s5 + $0x4d0] sm:$0xff] }
 0x5c4   :  { %11493 = vmatprep.subr.bf16.mxu1 %v14635_v63  ;;  %v14697_v63 = vcombine.high %v5646_v21, %v5650_v51  ;;  %v14745_v16 = vcombine.high %v5694_v15, %v5698_v55 }
 0x5c6   :  { %11193 = vmatpush1.bf16.msra.mxu0 %v14632_v58  ;;  %v5659_v58 = vld [vmem:[%s23030_s5 + $0x378] sm:$0xff] }
 0x5c7   :  { %11494 = vmatpush1.bf16.msra.mxu1 %v14634_v35  ;;  %11194 = vmatprep.subr.bf16.mxu0 %v14641_v1  ;;  %v14696_v35 = vcombine.low %v5646_v21, %v5650_v51  ;;  %v14698_v1 = vcombine.low %v5647_v46, %v5651_v48  ;;  %v14707_v41 = vcombine.high %v5655_v24, %v5659_v58  ;;  %v5710_v48 = vld [vmem:[%s23030_s5 + $0x510] sm:$0xff] }
 0x5c8   :  { %11495 = vmatprep.subr.bf16.mxu1 %v14643_v12  ;;  %v14705_v12 = vcombine.high %v5654_v38, %v5658_v54 }
 0x5ca   :  { %11195 = vmatpush1.bf16.msra.mxu0 %v14640_v22  ;;  %v5667_v22 = vld [vmem:[%s23030_s5 + $0x3b8] sm:$0xff] }
 0x5cb   :  { %11496 = vmatpush1.bf16.msra.mxu1 %v14642_v50  ;;  %11196 = vmatprep.subr.bf16.mxu0 %v14649_v52  ;;  %v14704_v50 = vcombine.low %v5654_v38, %v5658_v54  ;;  %v14706_v52 = vcombine.low %v5655_v24, %v5659_v58  ;;  %v14715_v31 = vcombine.high %v5663_v14, %v5667_v22  ;;  %v5718_v58 = vld [vmem:[%s23030_s5 + $0x550] sm:$0xff] }
 0x5cc   :  { %11497 = vmatprep.subr.bf16.mxu1 %v14651_v40  ;;  %v14713_v40 = vcombine.high %v5662_v5, %v5666_v19 }
 0x5ce   :  { %11197 = vmatpush1.bf16.msra.mxu0 %v14648_v26  ;;  %v5675_v26 = vld [vmem:[%s23030_s5 + $0x3f8] sm:$0xff] }
 0x5cf   :  { %11498 = vmatpush1.bf16.msra.mxu1 %v14650_v0  ;;  %11198 = vmatprep.subr.bf16.mxu0 %v14657_v25  ;;  %v14712_v0 = vcombine.low %v5662_v5, %v5666_v19  ;;  %v14714_v25 = vcombine.low %v5663_v14, %v5667_v22  ;;  %v14723_v56 = vcombine.high %v5671_v4, %v5675_v26  ;;  %v5726_v22 = vld [vmem:[%s23030_s5 + $0x590] sm:$0xff] }
 0x5d0   :  { %11499 = vmatprep.subr.bf16.mxu1 %v14659_v33  ;;  %v14721_v33 = vcombine.high %v5670_v10, %v5674_v9 }
 0x5d2   :  { %11199 = vmatpush1.bf16.msra.mxu0 %v14656_v17  ;;  %v5683_v17 = vld [vmem:[%s23030_s5 + $0x438] sm:$0xff] }
 0x5d3   :  { %11500 = vmatpush1.bf16.msra.mxu1 %v14658_v23  ;;  %11200 = vmatprep.subr.bf16.mxu0 %v14665_v18  ;;  %v14720_v23 = vcombine.low %v5670_v10, %v5674_v9  ;;  %v14722_v18 = vcombine.low %v5671_v4, %v5675_v26  ;;  %v14731_v57 = vcombine.high %v5679_v2, %v5683_v17  ;;  %v5734_v26 = vld [vmem:[%s23030_s5 + $0x5d0] sm:$0xff] }
 0x5d4   :  { %11501 = vmatprep.subr.bf16.mxu1 %v14667_v34  ;;  %v14729_v34 = vcombine.high %v5678_v32, %v5682_v61 }
 0x5d6   :  { %11201 = vmatpush1.bf16.msra.mxu0 %v14664_v59  ;;  %v5687_v59 = vld [vmem:[%s23030_s5 + $0x458] sm:$0xff] }
 0x5d7   :  { %11502 = vmatpush1.bf16.msra.mxu1 %v14666_v43  ;;  %11202 = vmatprep.subr.bf16.mxu0 %v14673_v60  ;;  %v5691_v43 = vld [vmem:[%s23030_s5 + $0x478] sm:$0xff]  ;;  %v14730_v60 = vcombine.low %v5679_v2, %v5683_v17  ;;  %v5742_v17 = vld [vmem:[%s23030_s5 + $0x610] sm:$0xff] }
 0x5d8   :  { %11503 = vmatprep.subr.bf16.mxu1 %v14675_v6  ;;  %v14737_v6 = vcombine.high %v5686_v53, %v5690_v47  ;;  %v14739_v62 = vcombine.high %v5687_v59, %v5691_v43  ;;  %v14738_v37 = vcombine.low %v5687_v59, %v5691_v43  ;;  %v5750_v59 = vld [vmem:[%s23030_s5 + $0x650] sm:$0xff] }
 0x5d9   :  { %v5754_v43 = vld [vmem:[%s23030_s5 + $0x670] sm:$0xff] }
 0x5da   :  { %11203 = vmatpush1.bf16.msra.mxu0 %v14672_v13  ;;  %v5695_v13 = vld [vmem:[%s23030_s5 + $0x498] sm:$0xff] }
 0x5db   :  { %11504 = vmatpush1.bf16.msra.mxu1 %v14674_v45  ;;  %11204 = vmatprep.subr.bf16.mxu0 %v14681_v11  ;;  %v5699_v45 = vld [vmem:[%s23030_s5 + $0x4b8] sm:$0xff]  ;;  %v14736_v11 = vcombine.low %v5686_v53, %v5690_v47 }
 0x5dc   :  { %11505 = vmatprep.subr.bf16.mxu1 %v14683_v27  ;;  %v17083_v27 = vld [vmem:[#allocation4 + $0x18] sm:$0xff]  ;;  %v14747_v49 = vcombine.high %v5695_v13, %v5699_v45  ;;  %v14746_v21 = vcombine.low %v5695_v13, %v5699_v45  ;;  %v5758_v13 = vld [vmem:[%s23030_s5 + $0x690] sm:$0xff] }
 0x5dd   :  { %v5762_v45 = vld [vmem:[%s23030_s5 + $0x6b0] sm:$0xff] }
 0x5de   :  { %11205 = vmatpush1.bf16.msra.mxu0 %v14680_v20  ;;  %v5706_v20 = vld [vmem:[%s23030_s5 + $0x4f0] sm:$0xff] }
 0x5df   :  { %11506 = vmatpush1.bf16.msra.mxu1 %v14682_v8  ;;  %11206 = vmatprep.subr.bf16.mxu0 %v14689_v29  ;;  %v5703_v8 = vld [vmem:[%s23030_s5 + $0x4d8] sm:$0xff]  ;;  %v14753_v51 = vcombine.high %v5702_v7, %v5706_v20 }
 0x5e0   :  { %11507 = vmatprep.subr.bf16.mxu1 %v14691_v42  ;;  %v5707_v29 = vld [vmem:[%s23030_s5 + $0x4f8] sm:$0xff]  ;;  %v14744_v42 = vcombine.low %v5694_v15, %v5698_v55 }
 0x5e1   :  { %v14755_v46 = vcombine.high %v5703_v8, %v5707_v29  ;;  %v14754_v38 = vcombine.low %v5703_v8, %v5707_v29  ;;  %v5770_v8 = vld [vmem:[%s23030_s5 + $0x6f0] sm:$0xff]  ;;  %v5767_v29 = vld [vmem:[%s23030_s5 + $0x6d8] sm:$0xff] }
 0x5e2   :  { %11207 = vmatpush1.bf16.msra.mxu0 %v14688_v39  ;;  %v5714_v39 = vld [vmem:[%s23030_s5 + $0x530] sm:$0xff] }
 0x5e3   :  { %11508 = vmatpush1.bf16.msra.mxu1 %v14690_v36  ;;  %11208 = vmatprep.subr.bf16.mxu0 %v14697_v63  ;;  %v5711_v36 = vld [vmem:[%s23030_s5 + $0x518] sm:$0xff]  ;;  %v14761_v54 = vcombine.high %v5710_v48, %v5714_v39 }
 0x5e4   :  { %11509 = vmatprep.subr.bf16.mxu1 %v14699_v30  ;;  %v5715_v63 = vld [vmem:[%s23030_s5 + $0x538] sm:$0xff]  ;;  %v14752_v30 = vcombine.low %v5702_v7, %v5706_v20  ;;  %v5766_v20 = vld [vmem:[%s23030_s5 + $0x6d0] sm:$0xff] }
 0x5e5   :  { %v14763_v24 = vcombine.high %v5711_v36, %v5715_v63  ;;  %v14762_v5 = vcombine.low %v5711_v36, %v5715_v63  ;;  %v5778_v36 = vld [vmem:[%s23030_s5 + $0x730] sm:$0xff]  ;;  %v5775_v63 = vld [vmem:[%s23030_s5 + $0x718] sm:$0xff] }
 0x5e6   :  { %11209 = vmatpush1.bf16.msra.mxu0 %v14696_v35  ;;  %v5722_v35 = vld [vmem:[%s23030_s5 + $0x570] sm:$0xff] }
 0x5e7   :  { %11510 = vmatpush1.bf16.msra.mxu1 %v14698_v1  ;;  %11210 = vmatprep.subr.bf16.mxu0 %v14705_v12  ;;  %v5719_v1 = vld [vmem:[%s23030_s5 + $0x558] sm:$0xff]  ;;  %v14769_v19 = vcombine.high %v5718_v58, %v5722_v35 }
 0x5e8   :  { %11511 = vmatprep.subr.bf16.mxu1 %v14707_v41  ;;  %v5723_v12 = vld [vmem:[%s23030_s5 + $0x578] sm:$0xff]  ;;  %v14760_v41 = vcombine.low %v5710_v48, %v5714_v39  ;;  %v5774_v39 = vld [vmem:[%s23030_s5 + $0x710] sm:$0xff] }
 0x5e9   :  { %v14771_v14 = vcombine.high %v5719_v1, %v5723_v12  ;;  %v14770_v10 = vcombine.low %v5719_v1, %v5723_v12  ;;  %v5786_v1 = vld [vmem:[%s23030_s5 + $0x770] sm:$0xff]  ;;  %v5783_v12 = vld [vmem:[%s23030_s5 + $0x758] sm:$0xff] }
 0x5ea   :  { %11211 = vmatpush1.bf16.msra.mxu0 %v14704_v50  ;;  %v5730_v50 = vld [vmem:[%s23030_s5 + $0x5b0] sm:$0xff] }
 0x5eb   :  { %11512 = vmatpush1.bf16.msra.mxu1 %v14706_v52  ;;  %11212 = vmatprep.subr.bf16.mxu0 %v14713_v40  ;;  %v5727_v52 = vld [vmem:[%s23030_s5 + $0x598] sm:$0xff]  ;;  %v14777_v9 = vcombine.high %v5726_v22, %v5730_v50 }
 0x5ec   :  { %11513 = vmatprep.subr.bf16.mxu1 %v14715_v31  ;;  %v5731_v40 = vld [vmem:[%s23030_s5 + $0x5b8] sm:$0xff]  ;;  %v14768_v31 = vcombine.low %v5718_v58, %v5722_v35  ;;  %v5782_v35 = vld [vmem:[%s23030_s5 + $0x750] sm:$0xff] }
 0x5ed   :  { %v14779_v4 = vcombine.high %v5727_v52, %v5731_v40  ;;  %v14778_v32 = vcombine.low %v5727_v52, %v5731_v40  ;;  %v5794_v52 = vld [vmem:[%s23030_s5 + $0x7b0] sm:$0xff]  ;;  %v5791_v40 = vld [vmem:[%s23030_s5 + $0x798] sm:$0xff] }
 0x5ee   :  { %11213 = vmatpush1.bf16.msra.mxu0 %v14712_v0  ;;  %v5738_v0 = vld [vmem:[%s23030_s5 + $0x5f0] sm:$0xff] }
 0x5ef   :  { %11514 = vmatpush1.bf16.msra.mxu1 %v14714_v25  ;;  %11214 = vmatprep.subr.bf16.mxu0 %v14721_v33  ;;  %v5735_v25 = vld [vmem:[%s23030_s5 + $0x5d8] sm:$0xff]  ;;  %v14785_v61 = vcombine.high %v5734_v26, %v5738_v0 }
 0x5f0   :  { %11515 = vmatprep.subr.bf16.mxu1 %v14723_v56  ;;  %v5739_v33 = vld [vmem:[%s23030_s5 + $0x5f8] sm:$0xff]  ;;  %v14776_v56 = vcombine.low %v5726_v22, %v5730_v50  ;;  %v5790_v50 = vld [vmem:[%s23030_s5 + $0x790] sm:$0xff] }
 0x5f1   :  { %v14787_v2 = vcombine.high %v5735_v25, %v5739_v33  ;;  %v14786_v53 = vcombine.low %v5735_v25, %v5739_v33  ;;  %v5802_v25 = vld [vmem:[%s23030_s5 + $0x7f0] sm:$0xff]  ;;  %v5799_v33 = vld [vmem:[%s23030_s5 + $0x7d8] sm:$0xff] }
 0x5f2   :  { %11215 = vmatpush1.bf16.msra.mxu0 %v14720_v23  ;;  %v5746_v23 = vld [vmem:[%s23030_s5 + $0x630] sm:$0xff] }
 0x5f3   :  { %11516 = vmatpush1.bf16.msra.mxu1 %v14722_v18  ;;  %11227 = vmatprep.subr.bf16.mxu0 %v14729_v34  ;;  %v5743_v18 = vld [vmem:[%s23030_s5 + $0x618] sm:$0xff]  ;;  %v14793_v47 = vcombine.high %v5742_v17, %v5746_v23  ;;  %v14792_v15 = vcombine.low %v5742_v17, %v5746_v23  ;;  %v5806_v23 = vld [vmem:[%s23030_s5 + $0x810] sm:$0xff] }
 0x5f4   :  { %11528 = vmatprep.subr.bf16.mxu1 %v14731_v57  ;;  %v5747_v34 = vld [vmem:[%s23030_s5 + $0x638] sm:$0xff]  ;;  %v14784_v57 = vcombine.low %v5734_v26, %v5738_v0  ;;  %v5798_v0 = vld [vmem:[%s23030_s5 + $0x7d0] sm:$0xff] }
 0x5f5   :  { %11217 = vmatmul.mubr.bf16.vlgmr.msra.gmra.mrb[24].mxu0 %v17082_v3  ;;  %v14794_v55 = vcombine.low %v5743_v18, %v5747_v34 }
 0x5f6   :  { %11518 = vmatmul.mubr.bf16.vlgmr.msra.gmra.mrb[24].mxu1 %v17082_v3  ;;  %11228 = vmatpush1.bf16.msra.mxu0 %v14728_v44  ;;  %v14795_v44 = vcombine.high %v5743_v18, %v5747_v34  ;;  %v14801_v3 = vcombine.high %v5750_v59, %v5754_v43  ;;  %v5810_v18 = vld [vmem:[%s23030_s5 + $0x830] sm:$0xff]  ;;  %v5807_v34 = vld [vmem:[%s23030_s5 + $0x818] sm:$0xff] }
 0x5f7   :  { %11259 = vmatprep.mubr.bf16.mxu0 %v17083_v27  ;;  %11529 = vmatpush1.bf16.msra.mxu1 %v14730_v60  ;;  %v5751_v60 = vld [vmem:[%s23030_s5 + $0x658] sm:$0xff] }
 0x5f8   :  { %11560 = vmatprep.mubr.bf16.mxu1 %v17083_v27  ;;  %11229 = vmatprep.subr.bf16.mxu0 %v14737_v6  ;;  %v5755_v6 = vld [vmem:[%s23030_s5 + $0x678] sm:$0xff] }
 0x5f9   :  { %11530 = vmatprep.subr.bf16.mxu1 %v14739_v62  ;;  %v14803_v62 = vcombine.high %v5751_v60, %v5755_v6  ;;  %v5763_v27 = vld [vmem:[%s23030_s5 + $0x6b8] sm:$0xff] }
 0x5fa   :  { %11230 = vmatpush1.bf16.msra.mxu0 %v14736_v11  ;;  %v5759_v11 = vld [vmem:[%s23030_s5 + $0x698] sm:$0xff] }
 0x5fb   :  { %11531 = vmatpush1.bf16.msra.mxu1 %v14738_v37  ;;  %11231 = vmatprep.subr.bf16.mxu0 %v14745_v16  ;;  %v14800_v37 = vcombine.low %v5750_v59, %v5754_v43  ;;  %v14802_v16 = vcombine.low %v5751_v60, %v5755_v6  ;;  %v14811_v7 = vcombine.high %v5759_v11, %v5763_v27  ;;  %v5814_v43 = vld [vmem:[%s23030_s5 + $0x850] sm:$0xff] }
 0x5fc   :  { %11532 = vmatprep.subr.bf16.mxu1 %v14747_v49  ;;  %v14809_v49 = vcombine.high %v5758_v13, %v5762_v45  ;;  %v5818_v60 = vld [vmem:[%s23030_s5 + $0x870] sm:$0xff]  ;;  %v14856_v6 = vcombine.low %v5806_v23, %v5810_v18 }
 0x5fe   :  { %11232 = vmatpush1.bf16.msra.mxu0 %v14744_v42  ;;  %v5771_v42 = vld [vmem:[%s23030_s5 + $0x6f8] sm:$0xff] }
 0x5ff   :  { %11533 = vmatpush1.bf16.msra.mxu1 %v14746_v21  ;;  %11233 = vmatprep.subr.bf16.mxu0 %v14753_v51  ;;  %v14808_v21 = vcombine.low %v5758_v13, %v5762_v45  ;;  %v14810_v51 = vcombine.low %v5759_v11, %v5763_v27  ;;  %v14819_v48 = vcombine.high %v5767_v29, %v5771_v42  ;;  %v5822_v13 = vld [vmem:[%s23030_s5 + $0x890] sm:$0xff] }
 0x600   :  { %11534 = vmatprep.subr.bf16.mxu1 %v14755_v46  ;;  %v14817_v46 = vcombine.high %v5766_v20, %v5770_v8  ;;  %v5826_v45 = vld [vmem:[%s23030_s5 + $0x8b0] sm:$0xff] }
 0x601   :  { %v17084_v11 = vld [vmem:[#allocation4 + $0x10] sm:$0xff] }
 0x602   :  { %11234 = vmatpush1.bf16.msra.mxu0 %v14752_v30  ;;  %v5779_v30 = vld [vmem:[%s23030_s5 + $0x738] sm:$0xff] }
 0x603   :  { %11535 = vmatpush1.bf16.msra.mxu1 %v14754_v38  ;;  %11235 = vmatprep.subr.bf16.mxu0 %v14761_v54  ;;  %v14816_v38 = vcombine.low %v5766_v20, %v5770_v8  ;;  %v14818_v54 = vcombine.low %v5767_v29, %v5771_v42  ;;  %v14827_v58 = vcombine.high %v5775_v63, %v5779_v30  ;;  %v5830_v42 = vld [vmem:[%s23030_s5 + $0x8d0] sm:$0xff] }
 0x604   :  { %11536 = vmatprep.subr.bf16.mxu1 %v14763_v24  ;;  %v14825_v24 = vcombine.high %v5774_v39, %v5778_v36  ;;  %v14873_v8 = vcombine.high %v5822_v13, %v5826_v45 }
 0x606   :  { %11236 = vmatpush1.bf16.msra.mxu0 %v14760_v41  ;;  %v5787_v41 = vld [vmem:[%s23030_s5 + $0x778] sm:$0xff] }
 0x607   :  { %11537 = vmatpush1.bf16.msra.mxu1 %v14762_v5  ;;  %11237 = vmatprep.subr.bf16.mxu0 %v14769_v19  ;;  %v14824_v5 = vcombine.low %v5774_v39, %v5778_v36  ;;  %v14826_v19 = vcombine.low %v5775_v63, %v5779_v30  ;;  %v14835_v22 = vcombine.high %v5783_v12, %v5787_v41  ;;  %v5838_v30 = vld [vmem:[%s23030_s5 + $0x910] sm:$0xff] }
 0x608   :  { %11538 = vmatprep.subr.bf16.mxu1 %v14771_v14  ;;  %v14833_v14 = vcombine.high %v5782_v35, %v5786_v1 }
 0x60a   :  { %11238 = vmatpush1.bf16.msra.mxu0 %v14768_v31  ;;  %v5795_v31 = vld [vmem:[%s23030_s5 + $0x7b8] sm:$0xff] }
 0x60b   :  { %11539 = vmatpush1.bf16.msra.mxu1 %v14770_v10  ;;  %11239 = vmatprep.subr.bf16.mxu0 %v14777_v9  ;;  %v14832_v10 = vcombine.low %v5782_v35, %v5786_v1  ;;  %v14834_v9 = vcombine.low %v5783_v12, %v5787_v41  ;;  %v14843_v26 = vcombine.high %v5791_v40, %v5795_v31  ;;  %v5846_v41 = vld [vmem:[%s23030_s5 + $0x950] sm:$0xff] }
 0x60c   :  { %11540 = vmatprep.subr.bf16.mxu1 %v14779_v4  ;;  %v14841_v4 = vcombine.high %v5790_v50, %v5794_v52 }
 0x60e   :  { %11240 = vmatpush1.bf16.msra.mxu0 %v14776_v56  ;;  %v5803_v56 = vld [vmem:[%s23030_s5 + $0x7f8] sm:$0xff] }
 0x60f   :  { %11541 = vmatpush1.bf16.msra.mxu1 %v14778_v32  ;;  %11241 = vmatprep.subr.bf16.mxu0 %v14785_v61  ;;  %v14840_v32 = vcombine.low %v5790_v50, %v5794_v52  ;;  %v14842_v61 = vcombine.low %v5791_v40, %v5795_v31  ;;  %v14851_v17 = vcombine.high %v5799_v33, %v5803_v56  ;;  %v5854_v31 = vld [vmem:[%s23030_s5 + $0x990] sm:$0xff] }
 0x610   :  { %11542 = vmatprep.subr.bf16.mxu1 %v14787_v2  ;;  %v14849_v2 = vcombine.high %v5798_v0, %v5802_v25 }
 0x612   :  { %11242 = vmatpush1.bf16.msra.mxu0 %v14784_v57  ;;  %v5811_v57 = vld [vmem:[%s23030_s5 + $0x838] sm:$0xff] }
 0x613   :  { %11543 = vmatpush1.bf16.msra.mxu1 %v14786_v53  ;;  %11243 = vmatprep.subr.bf16.mxu0 %v14793_v47  ;;  %v14848_v53 = vcombine.low %v5798_v0, %v5802_v25  ;;  %v14850_v47 = vcombine.low %v5799_v33, %v5803_v56  ;;  %v14859_v59 = vcombine.high %v5807_v34, %v5811_v57  ;;  %v5862_v56 = vld [vmem:[%s23030_s5 + $0x9d0] sm:$0xff] }
 0x614   :  { %11544 = vmatprep.subr.bf16.mxu1 %v14795_v44  ;;  %v14857_v44 = vcombine.high %v5806_v23, %v5810_v18 }
 0x616   :  { %11244 = vmatpush1.bf16.msra.mxu0 %v14792_v15  ;;  %v5815_v15 = vld [vmem:[%s23030_s5 + $0x858] sm:$0xff] }
 0x617   :  { %11545 = vmatpush1.bf16.msra.mxu1 %v14794_v55  ;;  %11245 = vmatprep.subr.bf16.mxu0 %v14801_v3  ;;  %v5819_v55 = vld [vmem:[%s23030_s5 + $0x878] sm:$0xff]  ;;  %v14858_v3 = vcombine.low %v5807_v34, %v5811_v57  ;;  %v5870_v57 = vld [vmem:[%s23030_s5 + $0xa10] sm:$0xff] }
 0x618   :  { %11546 = vmatprep.subr.bf16.mxu1 %v14803_v62  ;;  %v14865_v62 = vcombine.high %v5814_v43, %v5818_v60  ;;  %v14867_v27 = vcombine.high %v5815_v15, %v5819_v55  ;;  %v14866_v20 = vcombine.low %v5815_v15, %v5819_v55  ;;  %v5878_v15 = vld [vmem:[%s23030_s5 + $0xa50] sm:$0xff] }
 0x619   :  { %v5882_v55 = vld [vmem:[%s23030_s5 + $0xa70] sm:$0xff] }
 0x61a   :  { %11246 = vmatpush1.bf16.msra.mxu0 %v14800_v37  ;;  %v5823_v37 = vld [vmem:[%s23030_s5 + $0x898] sm:$0xff] }
 0x61b   :  { %11547 = vmatpush1.bf16.msra.mxu1 %v14802_v16  ;;  %11247 = vmatprep.subr.bf16.mxu0 %v14809_v49  ;;  %v5827_v16 = vld [vmem:[%s23030_s5 + $0x8b8] sm:$0xff]  ;;  %v14864_v49 = vcombine.low %v5814_v43, %v5818_v60 }
 0x61c   :  { %11548 = vmatprep.subr.bf16.mxu1 %v14811_v7  ;;  %v17085_v7 = vld [vmem:[#allocation4 + $0x28] sm:$0xff]  ;;  %v14875_v29 = vcombine.high %v5823_v37, %v5827_v16  ;;  %v14874_v39 = vcombine.low %v5823_v37, %v5827_v16  ;;  %v5886_v37 = vld [vmem:[%s23030_s5 + $0xa90] sm:$0xff] }
 0x61d   :  { %v5890_v16 = vld [vmem:[%s23030_s5 + $0xab0] sm:$0xff] }
 0x61e   :  { %11248 = vmatpush1.bf16.msra.mxu0 %v14808_v21  ;;  %v5834_v21 = vld [vmem:[%s23030_s5 + $0x8f0] sm:$0xff] }
 0x61f   :  { %11549 = vmatpush1.bf16.msra.mxu1 %v14810_v51  ;;  %11249 = vmatprep.subr.bf16.mxu0 %v14817_v46  ;;  %v5831_v51 = vld [vmem:[%s23030_s5 + $0x8d8] sm:$0xff]  ;;  %v14881_v36 = vcombine.high %v5830_v42, %v5834_v21 }
 0x620   :  { %11550 = vmatprep.subr.bf16.mxu1 %v14819_v48  ;;  %v5835_v46 = vld [vmem:[%s23030_s5 + $0x8f8] sm:$0xff]  ;;  %v14872_v48 = vcombine.low %v5822_v13, %v5826_v45 }
 0x621   :  { %v14883_v63 = vcombine.high %v5831_v51, %v5835_v46  ;;  %v14882_v35 = vcombine.low %v5831_v51, %v5835_v46  ;;  %v5898_v51 = vld [vmem:[%s23030_s5 + $0xaf0] sm:$0xff]  ;;  %v5895_v46 = vld [vmem:[%s23030_s5 + $0xad8] sm:$0xff] }
 0x622   :  { %11250 = vmatpush1.bf16.msra.mxu0 %v14816_v38  ;;  %v5842_v38 = vld [vmem:[%s23030_s5 + $0x930] sm:$0xff] }
 0x623   :  { %11551 = vmatpush1.bf16.msra.mxu1 %v14818_v54  ;;  %11251 = vmatprep.subr.bf16.mxu0 %v14825_v24  ;;  %v5839_v54 = vld [vmem:[%s23030_s5 + $0x918] sm:$0xff]  ;;  %v14889_v1 = vcombine.high %v5838_v30, %v5842_v38 }
 0x624   :  { %11552 = vmatprep.subr.bf16.mxu1 %v14827_v58  ;;  %v5843_v24 = vld [vmem:[%s23030_s5 + $0x938] sm:$0xff]  ;;  %v14880_v58 = vcombine.low %v5830_v42, %v5834_v21  ;;  %v5894_v21 = vld [vmem:[%s23030_s5 + $0xad0] sm:$0xff] }
 0x625   :  { %v14891_v12 = vcombine.high %v5839_v54, %v5843_v24  ;;  %v14890_v50 = vcombine.low %v5839_v54, %v5843_v24  ;;  %v5906_v54 = vld [vmem:[%s23030_s5 + $0xb30] sm:$0xff]  ;;  %v5903_v24 = vld [vmem:[%s23030_s5 + $0xb18] sm:$0xff] }
 0x626   :  { %11252 = vmatpush1.bf16.msra.mxu0 %v14824_v5  ;;  %v5850_v5 = vld [vmem:[%s23030_s5 + $0x970] sm:$0xff] }
 0x627   :  { %11553 = vmatpush1.bf16.msra.mxu1 %v14826_v19  ;;  %11253 = vmatprep.subr.bf16.mxu0 %v14833_v14  ;;  %v5847_v19 = vld [vmem:[%s23030_s5 + $0x958] sm:$0xff]  ;;  %v14897_v52 = vcombine.high %v5846_v41, %v5850_v5 }
 0x628   :  { %11554 = vmatprep.subr.bf16.mxu1 %v14835_v22  ;;  %v5851_v14 = vld [vmem:[%s23030_s5 + $0x978] sm:$0xff]  ;;  %v14888_v22 = vcombine.low %v5838_v30, %v5842_v38  ;;  %v5902_v38 = vld [vmem:[%s23030_s5 + $0xb10] sm:$0xff] }
 0x629   :  { %v14899_v40 = vcombine.high %v5847_v19, %v5851_v14  ;;  %v14898_v0 = vcombine.low %v5847_v19, %v5851_v14  ;;  %v5914_v19 = vld [vmem:[%s23030_s5 + $0xb70] sm:$0xff]  ;;  %v5911_v14 = vld [vmem:[%s23030_s5 + $0xb58] sm:$0xff] }
 0x62a   :  { %11254 = vmatpush1.bf16.msra.mxu0 %v14832_v10  ;;  %v5858_v10 = vld [vmem:[%s23030_s5 + $0x9b0] sm:$0xff] }
 0x62b   :  { %11555 = vmatpush1.bf16.msra.mxu1 %v14834_v9  ;;  %11255 = vmatprep.subr.bf16.mxu0 %v14841_v4  ;;  %v5855_v9 = vld [vmem:[%s23030_s5 + $0x998] sm:$0xff]  ;;  %v14905_v25 = vcombine.high %v5854_v31, %v5858_v10 }
 0x62c   :  { %11556 = vmatprep.subr.bf16.mxu1 %v14843_v26  ;;  %v5859_v4 = vld [vmem:[%s23030_s5 + $0x9b8] sm:$0xff]  ;;  %v14896_v26 = vcombine.low %v5846_v41, %v5850_v5  ;;  %v5910_v5 = vld [vmem:[%s23030_s5 + $0xb50] sm:$0xff] }
 0x62d   :  { %v14907_v33 = vcombine.high %v5855_v9, %v5859_v4  ;;  %v14906_v23 = vcombine.low %v5855_v9, %v5859_v4  ;;  %v5922_v9 = vld [vmem:[%s23030_s5 + $0xbb0] sm:$0xff]  ;;  %v5919_v4 = vld [vmem:[%s23030_s5 + $0xb98] sm:$0xff] }
 0x62e   :  { %11256 = vmatpush1.bf16.msra.mxu0 %v14840_v32  ;;  %v5866_v32 = vld [vmem:[%s23030_s5 + $0x9f0] sm:$0xff] }
 0x62f   :  { %11557 = vmatpush1.bf16.msra.mxu1 %v14842_v61  ;;  %11257 = vmatprep.subr.bf16.mxu0 %v14849_v2  ;;  %v5863_v61 = vld [vmem:[%s23030_s5 + $0x9d8] sm:$0xff]  ;;  %v14913_v18 = vcombine.high %v5862_v56, %v5866_v32 }
 0x630   :  { %11558 = vmatprep.subr.bf16.mxu1 %v14851_v17  ;;  %v5867_v2 = vld [vmem:[%s23030_s5 + $0x9f8] sm:$0xff]  ;;  %v14904_v17 = vcombine.low %v5854_v31, %v5858_v10  ;;  %v5918_v10 = vld [vmem:[%s23030_s5 + $0xb90] sm:$0xff] }
 0x631   :  { %v14915_v34 = vcombine.high %v5863_v61, %v5867_v2  ;;  %v14914_v43 = vcombine.low %v5863_v61, %v5867_v2  ;;  %v5930_v61 = vld [vmem:[%s23030_s5 + $0xbf0] sm:$0xff]  ;;  %v5927_v2 = vld [vmem:[%s23030_s5 + $0xbd8] sm:$0xff] }
 0x632   :  { %11258 = vmatpush1.bf16.msra.mxu0 %v14848_v53  ;;  %v5874_v53 = vld [vmem:[%s23030_s5 + $0xa30] sm:$0xff] }
 0x633   :  { %11559 = vmatpush1.bf16.msra.mxu1 %v14850_v47  ;;  %11270 = vmatprep.subr.bf16.mxu0 %v14857_v44  ;;  %v5871_v47 = vld [vmem:[%s23030_s5 + $0xa18] sm:$0xff]  ;;  %v14921_v60 = vcombine.high %v5870_v57, %v5874_v53  ;;  %v14920_v13 = vcombine.low %v5870_v57, %v5874_v53  ;;  %v5934_v53 = vld [vmem:[%s23030_s5 + $0xc10] sm:$0xff] }
 0x634   :  { %11571 = vmatprep.subr.bf16.mxu1 %v14859_v59  ;;  %v5875_v44 = vld [vmem:[%s23030_s5 + $0xa38] sm:$0xff]  ;;  %v14912_v59 = vcombine.low %v5862_v56, %v5866_v32  ;;  %v5926_v32 = vld [vmem:[%s23030_s5 + $0xbd0] sm:$0xff] }
 0x635   :  { %11260 = vmatmul.mubr.bf16.vlgmr.msra.gmra.mrb[24].mxu0 %v17084_v11  ;;  %v14922_v45 = vcombine.low %v5871_v47, %v5875_v44 }
 0x636   :  { %11561 = vmatmul.mubr.bf16.vlgmr.msra.gmra.mrb[24].mxu1 %v17084_v11  ;;  %11271 = vmatpush1.bf16.msra.mxu0 %v14856_v6  ;;  %v14923_v6 = vcombine.high %v5871_v47, %v5875_v44  ;;  %v14929_v11 = vcombine.high %v5878_v15, %v5882_v55  ;;  %v5938_v47 = vld [vmem:[%s23030_s5 + $0xc30] sm:$0xff]  ;;  %v5935_v44 = vld [vmem:[%s23030_s5 + $0xc18] sm:$0xff] }
 0x637   :  { %11302 = vmatprep.mubr.bf16.mxu0 %v17085_v7  ;;  %11572 = vmatpush1.bf16.msra.mxu1 %v14858_v3  ;;  %v5879_v3 = vld [vmem:[%s23030_s5 + $0xa58] sm:$0xff] }
 0x638   :  { %11603 = vmatprep.mubr.bf16.mxu1 %v17085_v7  ;;  %11272 = vmatprep.subr.bf16.mxu0 %v14865_v62  ;;  %v5883_v62 = vld [vmem:[%s23030_s5 + $0xa78] sm:$0xff] }
 0x639   :  { %11573 = vmatprep.subr.bf16.mxu1 %v14867_v27  ;;  %v14931_v27 = vcombine.high %v5879_v3, %v5883_v62  ;;  %v5891_v7 = vld [vmem:[%s23030_s5 + $0xab8] sm:$0xff] }
 0x63a   :  { %11273 = vmatpush1.bf16.msra.mxu0 %v14864_v49  ;;  %v5887_v49 = vld [vmem:[%s23030_s5 + $0xa98] sm:$0xff] }
 0x63b   :  { %11574 = vmatpush1.bf16.msra.mxu1 %v14866_v20  ;;  %11274 = vmatprep.subr.bf16.mxu0 %v14873_v8  ;;  %v14928_v20 = vcombine.low %v5878_v15, %v5882_v55  ;;  %v14930_v8 = vcombine.low %v5879_v3, %v5883_v62  ;;  %v14939_v42 = vcombine.high %v5887_v49, %v5891_v7  ;;  %v5942_v55 = vld [vmem:[%s23030_s5 + $0xc50] sm:$0xff] }
 0x63c   :  { %11575 = vmatprep.subr.bf16.mxu1 %v14875_v29  ;;  %v14937_v29 = vcombine.high %v5886_v37, %v5890_v16  ;;  %v5946_v3 = vld [vmem:[%s23030_s5 + $0xc70] sm:$0xff]  ;;  %v14984_v62 = vcombine.low %v5934_v53, %v5938_v47 }
 0x63e   :  { %11275 = vmatpush1.bf16.msra.mxu0 %v14872_v48  ;;  %v5899_v48 = vld [vmem:[%s23030_s5 + $0xaf8] sm:$0xff] }
 0x63f   :  { %11576 = vmatpush1.bf16.msra.mxu1 %v14874_v39  ;;  %11276 = vmatprep.subr.bf16.mxu0 %v14881_v36  ;;  %v14936_v39 = vcombine.low %v5886_v37, %v5890_v16  ;;  %v14938_v36 = vcombine.low %v5887_v49, %v5891_v7  ;;  %v14947_v30 = vcombine.high %v5895_v46, %v5899_v48  ;;  %v5950_v37 = vld [vmem:[%s23030_s5 + $0xc90] sm:$0xff]  ;;  %v17086_v49 = vld [vmem:[#allocation4 + $0x20] sm:$0xff] }
 0x640   :  { %11577 = vmatprep.subr.bf16.mxu1 %v14883_v63  ;;  %v14945_v63 = vcombine.high %v5894_v21, %v5898_v51  ;;  %v5954_v16 = vld [vmem:[%s23030_s5 + $0xcb0] sm:$0xff] }
 0x642   :  { %11277 = vmatpush1.bf16.msra.mxu0 %v14880_v58  ;;  %v5907_v58 = vld [vmem:[%s23030_s5 + $0xb38] sm:$0xff] }
 0x643   :  { %11578 = vmatpush1.bf16.msra.mxu1 %v14882_v35  ;;  %11278 = vmatprep.subr.bf16.mxu0 %v14889_v1  ;;  %v14944_v35 = vcombine.low %v5894_v21, %v5898_v51  ;;  %v14946_v1 = vcombine.low %v5895_v46, %v5899_v48  ;;  %v14955_v41 = vcombine.high %v5903_v24, %v5907_v58  ;;  %v5958_v48 = vld [vmem:[%s23030_s5 + $0xcd0] sm:$0xff] }
 0x644   :  { %11579 = vmatprep.subr.bf16.mxu1 %v14891_v12  ;;  %v14953_v12 = vcombine.high %v5902_v38, %v5906_v54  ;;  %v15001_v51 = vcombine.high %v5950_v37, %v5954_v16 }
 0x646   :  { %11279 = vmatpush1.bf16.msra.mxu0 %v14888_v22  ;;  %v5915_v22 = vld [vmem:[%s23030_s5 + $0xb78] sm:$0xff] }
 0x647   :  { %11580 = vmatpush1.bf16.msra.mxu1 %v14890_v50  ;;  %11280 = vmatprep.subr.bf16.mxu0 %v14897_v52  ;;  %v14952_v50 = vcombine.low %v5902_v38, %v5906_v54  ;;  %v14954_v52 = vcombine.low %v5903_v24, %v5907_v58  ;;  %v14963_v31 = vcombine.high %v5911_v14, %v5915_v22 }
 0x648   :  { %11581 = vmatprep.subr.bf16.mxu1 %v14899_v40  ;;  %v14961_v40 = vcombine.high %v5910_v5, %v5914_v19  ;;  %v15000_v38 = vcombine.low %v5950_v37, %v5954_v16  ;;  %v5991_v37 = vld [vmem:[%s23030_s5 + $0xdd8] sm:$0xff] }
 0x649   :  { %v5995_v16 = vld [vmem:[%s23030_s5 + $0xdf8] sm:$0xff] }
 0x64a   :  { %11281 = vmatpush1.bf16.msra.mxu0 %v14896_v26  ;;  %v5923_v26 = vld [vmem:[%s23030_s5 + $0xbb8] sm:$0xff] }
 0x64b   :  { %11582 = vmatpush1.bf16.msra.mxu1 %v14898_v0  ;;  %11282 = vmatprep.subr.bf16.mxu0 %v14905_v25  ;;  %v14960_v0 = vcombine.low %v5910_v5, %v5914_v19  ;;  %v14962_v25 = vcombine.low %v5911_v14, %v5915_v22  ;;  %v14971_v56 = vcombine.high %v5919_v4, %v5923_v26 }
 0x64c   :  { %11583 = vmatprep.subr.bf16.mxu1 %v14907_v33  ;;  %v14969_v33 = vcombine.high %v5918_v10, %v5922_v9 }
 0x64e   :  { %11283 = vmatpush1.bf16.msra.mxu0 %v14904_v17  ;;  %v5931_v17 = vld [vmem:[%s23030_s5 + $0xbf8] sm:$0xff] }
 0x64f   :  { %11584 = vmatpush1.bf16.msra.mxu1 %v14906_v23  ;;  %11284 = vmatprep.subr.bf16.mxu0 %v14913_v18  ;;  %v14968_v23 = vcombine.low %v5918_v10, %v5922_v9  ;;  %v14970_v18 = vcombine.low %v5919_v4, %v5923_v26  ;;  %v14979_v57 = vcombine.high %v5927_v2, %v5931_v17  ;;  %v5975_v9 = vld [vmem:[%s23030_s5 + $0xd58] sm:$0xff] }
 0x650   :  { %11585 = vmatprep.subr.bf16.mxu1 %v14915_v34  ;;  %v14977_v34 = vcombine.high %v5926_v32, %v5930_v61  ;;  %v5979_v4 = vld [vmem:[%s23030_s5 + $0xd78] sm:$0xff] }
 0x652   :  { %11285 = vmatpush1.bf16.msra.mxu0 %v14912_v59  ;;  %v5939_v59 = vld [vmem:[%s23030_s5 + $0xc38] sm:$0xff] }
 0x653   :  { %11586 = vmatpush1.bf16.msra.mxu1 %v14914_v43  ;;  %11286 = vmatprep.subr.bf16.mxu0 %v14921_v60  ;;  %v14976_v43 = vcombine.low %v5926_v32, %v5930_v61  ;;  %v14978_v60 = vcombine.low %v5927_v2, %v5931_v17  ;;  %v14987_v15 = vcombine.high %v5935_v44, %v5939_v59  ;;  %v5982_v2 = vld [vmem:[%s23030_s5 + $0xd90] sm:$0xff] }
 0x654   :  { %11587 = vmatprep.subr.bf16.mxu1 %v14923_v6  ;;  %v14985_v6 = vcombine.high %v5934_v53, %v5938_v47  ;;  %v15027_v61 = vcombine.high %v5975_v9, %v5979_v4  ;;  %v5986_v17 = vld [vmem:[%s23030_s5 + $0xdb0] sm:$0xff] }
 0x656   :  { %11287 = vmatpush1.bf16.msra.mxu0 %v14920_v13  ;;  %v5943_v13 = vld [vmem:[%s23030_s5 + $0xc58] sm:$0xff] }
 0x657   :  { %11588 = vmatpush1.bf16.msra.mxu1 %v14922_v45  ;;  %11288 = vmatprep.subr.bf16.mxu0 %v14929_v11  ;;  %v5947_v45 = vld [vmem:[%s23030_s5 + $0xc78] sm:$0xff]  ;;  %v14986_v11 = vcombine.low %v5935_v44, %v5939_v59  ;;  %v15026_v59 = vcombine.low %v5975_v9, %v5979_v4 }
 0x658   :  { %11589 = vmatprep.subr.bf16.mxu1 %v14931_v27  ;;  %v14993_v27 = vcombine.high %v5942_v55, %v5946_v3  ;;  %v14995_v7 = vcombine.high %v5943_v13, %v5947_v45  ;;  %v14994_v21 = vcombine.low %v5943_v13, %v5947_v45 }
 0x65a   :  { %11289 = vmatpush1.bf16.msra.mxu0 %v14928_v20  ;;  %v5951_v20 = vld [vmem:[%s23030_s5 + $0xc98] sm:$0xff] }
 0x65b   :  { %11590 = vmatpush1.bf16.msra.mxu1 %v14930_v8  ;;  %11290 = vmatprep.subr.bf16.mxu0 %v14937_v29  ;;  %v5955_v8 = vld [vmem:[%s23030_s5 + $0xcb8] sm:$0xff]  ;;  %v14992_v29 = vcombine.low %v5942_v55, %v5946_v3 }
 0x65c   :  { %11591 = vmatprep.subr.bf16.mxu1 %v14939_v42  ;;  %v17087_v42 = vld [vmem:[#allocation4 + $0x38] sm:$0xff]  ;;  %v15003_v46 = vcombine.high %v5951_v20, %v5955_v8  ;;  %v15002_v54 = vcombine.low %v5951_v20, %v5955_v8 }
 0x65e   :  { %11291 = vmatpush1.bf16.msra.mxu0 %v14936_v39  ;;  %v5962_v39 = vld [vmem:[%s23030_s5 + $0xcf0] sm:$0xff] }
 0x65f   :  { %11592 = vmatpush1.bf16.msra.mxu1 %v14938_v36  ;;  %11292 = vmatprep.subr.bf16.mxu0 %v14945_v63  ;;  %v5959_v36 = vld [vmem:[%s23030_s5 + $0xcd8] sm:$0xff]  ;;  %v15009_v24 = vcombine.high %v5958_v48, %v5962_v39  ;;  %v15008_v19 = vcombine.low %v5958_v48, %v5962_v39 }
 0x660   :  { %11593 = vmatprep.subr.bf16.mxu1 %v14947_v30  ;;  %v5963_v63 = vld [vmem:[%s23030_s5 + $0xcf8] sm:$0xff]  ;;  %v6382_v30 = vlaneseq }
 0x661   :  { %v15011_v58 = vcombine.high %v5959_v36, %v5963_v63  ;;  %v15010_v14 = vcombine.low %v5959_v36, %v5963_v63 }
 0x662   :  { %11293 = vmatpush1.bf16.msra.mxu0 %v14944_v35  ;;  %v5966_v35 = vld [vmem:[%s23030_s5 + $0xd10] sm:$0xff]  ;;  %v21478_v5 = vshrl.u32 %v6382_v30, 7  ;;  %v15042_v30 = vcombine.low %v5991_v37, %v5995_v16 }
 0x663   :  { %11594 = vmatpush1.bf16.msra.mxu1 %v14946_v1  ;;  %11294 = vmatprep.subr.bf16.mxu0 %v14953_v12  ;;  %v5970_v1 = vld [vmem:[%s23030_s5 + $0xd30] sm:$0xff]  ;;  %v5967_v12 = vld [vmem:[%s23030_s5 + $0xd18] sm:$0xff] }
 0x664   :  { %11595 = vmatprep.subr.bf16.mxu1 %v14955_v41  ;;  %v5971_v41 = vld [vmem:[%s23030_s5 + $0xd38] sm:$0xff]  ;;  %v15017_v22 = vcombine.high %v5966_v35, %v5970_v1  ;;  %v6392_v10 = vsub.s32 2, %v21478_v5  ;;  %v15016_v26 = vcombine.low %v5966_v35, %v5970_v1 }
 0x666   :  { %11295 = vmatpush1.bf16.msra.mxu0 %v14952_v50  ;;  %v15019_v50 = vcombine.high %v5967_v12, %v5971_v41 }
 0x667   :  { %11596 = vmatpush1.bf16.msra.mxu1 %v14954_v52  ;;  %11296 = vmatprep.subr.bf16.mxu0 %v14961_v40  ;;  %v5974_v52 = vld [vmem:[%s23030_s5 + $0xd50] sm:$0xff] }
 0x668   :  { %11597 = vmatprep.subr.bf16.mxu1 %v14963_v31  ;;  %v5978_v40 = vld [vmem:[%s23030_s5 + $0xd70] sm:$0xff]  ;;  %v6384_v31 = vsub.s32 0, %v21478_v5 }
 0x669   :  { %v15025_v32 = vcombine.high %v5974_v52, %v5978_v40  ;;  %v15024_v44 = vcombine.low %v5974_v52, %v5978_v40 }
 0x66a   :  { %11297 = vmatpush1.bf16.msra.mxu0 %v14960_v0  ;;  %v6380_v0 = vld [vmem:[%s23032_s6] sm:$0xff] }
 0x66b   :  { %11598 = vmatpush1.bf16.msra.mxu1 %v14962_v25  ;;  %11298 = vmatprep.subr.bf16.mxu0 %v14969_v33  ;;  %v6388_v25 = vsub.s32 1, %v21478_v5  ;;  %v6396_v33 = vsub.s32 3, %v21478_v5 }
 0x66c   :  { %11599 = vmatprep.subr.bf16.mxu1 %v14971_v56  ;;  %v15018_v56 = vcombine.low %v5967_v12, %v5971_v41  ;;  %v5999_v41 = vld [vmem:[%s23030_s5 + $0xe18] sm:$0xff] }
 0x66d   :  { %v6389_v53 = vrot.slane %v6380_v0, %v6388_v25  ;;  %v6397_v47 = vrot.slane %v6380_v0, %v6396_v33 }
 0x66e   :  { %11299 = vmatpush1.bf16.msra.mxu0 %v14968_v23  ;;  %v6385_v23 = vrot.slane %v6380_v0, %v6384_v31 }
 0x66f   :  { %11600 = vmatpush1.bf16.msra.mxu1 %v14970_v18  ;;  %11300 = vmatprep.subr.bf16.mxu0 %v14977_v34  ;;  %v6393_v18 = vrot.slane %v6380_v0, %v6392_v10  ;;  %v5983_v34 = vld [vmem:[%s23030_s5 + $0xd98] sm:$0xff] }
 0x670   :  { %11601 = vmatprep.subr.bf16.mxu1 %v14979_v57  ;;  %v5987_v57 = vld [vmem:[%s23030_s5 + $0xdb8] sm:$0xff] }
 0x671   :  { %v15035_v3 = vcombine.high %v5983_v34, %v5987_v57 }
 0x672   :  { %11301 = vmatpush1.bf16.msra.mxu0 %v14976_v43  ;;  %v15033_v43 = vcombine.high %v5982_v2, %v5986_v17 }
 0x673   :  { %11602 = vmatpush1.bf16.msra.mxu1 %v14978_v60  ;;  %11313 = vmatprep.subr.bf16.mxu0 %v14985_v6  ;;  %v5990_v60 = vld [vmem:[%s23030_s5 + $0xdd0] sm:$0xff] }
 0x674   :  { %11614 = vmatprep.subr.bf16.mxu1 %v14987_v15  ;;  %v5994_v6 = vld [vmem:[%s23030_s5 + $0xdf0] sm:$0xff] }
 0x675   :  { %11303 = vmatmul.mubr.bf16.vlgmr.msra.gmra.mrb[24].mxu0 %v17086_v49  ;;  %v15041_v39 = vcombine.high %v5990_v60, %v5994_v6 }
 0x676   :  { %11604 = vmatmul.mubr.bf16.vlgmr.msra.gmra.mrb[24].mxu1 %v17086_v49  ;;  %11314 = vmatpush1.bf16.msra.mxu0 %v14984_v62 }
 0x677   :  { %11345 = vmatprep.mubr.bf16.mxu0 %v17087_v42  ;;  %11615 = vmatpush1.bf16.msra.mxu1 %v14986_v11 }
 0x678   :  { %11646 = vmatprep.mubr.bf16.mxu1 %v17087_v42  ;;  %11315 = vmatprep.subr.bf16.mxu0 %v14993_v27  ;;  %v15032_v27 = vcombine.low %v5982_v2, %v5986_v17  ;;  %v15040_v42 = vcombine.low %v5990_v60, %v5994_v6  ;;  %v6007_v2 = vld [vmem:[%s23030_s5 + $0xe58] sm:$0xff] }
 0x679   :  { %11616 = vmatprep.subr.bf16.mxu1 %v14995_v7  ;;  %v6011_v17 = vld [vmem:[%s23030_s5 + $0xe78] sm:$0xff] }
 0x67a   :  { %11316 = vmatpush1.bf16.msra.mxu0 %v14992_v29  ;;  %v15034_v29 = vcombine.low %v5983_v34, %v5987_v57  ;;  %v15059_v57 = vcombine.high %v6007_v2, %v6011_v17  ;;  %v15058_v60 = vcombine.low %v6007_v2, %v6011_v17  ;;  %v6062_v2 = vld [vmem:[%s23030_s5 + $0x1010] sm:$0xff] }
 0x67b   :  { %11617 = vmatpush1.bf16.msra.mxu1 %v14994_v21  ;;  %11317 = vmatprep.subr.bf16.mxu0 %v15001_v51  ;;  %v6066_v17 = vld [vmem:[%s23030_s5 + $0x1030] sm:$0xff] }
 0x67c   :  { %11618 = vmatprep.subr.bf16.mxu1 %v15003_v46 }
 0x67e   :  { %11318 = vmatpush1.bf16.msra.mxu0 %v15000_v38  ;;  %v15043_v38 = vcombine.high %v5991_v37, %v5995_v16  ;;  %v6030_v16 = vld [vmem:[%s23030_s5 + $0xf10] sm:$0xff] }
 0x67f   :  { %11619 = vmatpush1.bf16.msra.mxu1 %v15002_v54  ;;  %11319 = vmatprep.subr.bf16.mxu0 %v15009_v24  ;;  %v5998_v54 = vld [vmem:[%s23030_s5 + $0xe10] sm:$0xff] }
 0x680   :  { %11620 = vmatprep.subr.bf16.mxu1 %v15011_v58  ;;  %v6002_v24 = vld [vmem:[%s23030_s5 + $0xe30] sm:$0xff] }
 0x681   :  { %v15049_v4 = vcombine.high %v5998_v54, %v6002_v24 }
 0x682   :  { %11320 = vmatpush1.bf16.msra.mxu0 %v15008_v19  ;;  %v6003_v19 = vld [vmem:[%s23030_s5 + $0xe38] sm:$0xff] }
 0x683   :  { %11621 = vmatpush1.bf16.msra.mxu1 %v15010_v14  ;;  %11321 = vmatprep.subr.bf16.mxu0 %v15017_v22 }
 0x684   :  { %11622 = vmatprep.subr.bf16.mxu1 %v15019_v50 }
 0x686   :  { %11322 = vmatpush1.bf16.msra.mxu0 %v15016_v26 }
 0x687   :  { %11623 = vmatpush1.bf16.msra.mxu1 %v15018_v56  ;;  %11323 = vmatprep.subr.bf16.mxu0 %v15025_v32  ;;  %v15051_v56 = vcombine.high %v5999_v41, %v6003_v19  ;;  %v6006_v32 = vld [vmem:[%s23030_s5 + $0xe50] sm:$0xff] }
 0x688   :  { %v10874_v15 = vpop.f32.mrb[20].mxu0  ;;  %v11175_v55 = vpop.f32.mrb[20].mxu1  ;;  %11624 = vmatprep.subr.bf16.mxu1 %v15027_v61  ;;  %v6010_v61 = vld [vmem:[%s23030_s5 + $0xe70] sm:$0xff] }
 0x689   :  { %v16361_v62 = vadd.f32 %v10874_v15, %v6385_v23  ;;  %v16365_v13 = vadd.f32 %v11175_v55, %v6393_v18  ;;  %v10876_v45 = vpop.f32.mrb[21].mxu0  ;;  %v11177_v11 = vpop.f32.mrb[21].mxu1  ;;  %v15057_v34 = vcombine.high %v6006_v32, %v6010_v61  ;;  %v6022_v55 = vld [vmem:[%s23030_s5 + $0xed0] sm:$0xff] }
 0x68a   :  { %v16362_v49 = vadd.f32 %v10876_v45, %v6389_v53  ;;  %v16366_v7 = vadd.f32 %v11177_v11, %v6397_v47  ;;  %v10878_v20 = vpop.f32.mrb[22].mxu0  ;;  %v11179_v8 = vpop.f32.mrb[22].mxu1  ;;  %11324 = vmatpush1.bf16.msra.mxu0 %v15024_v44  ;;  %v6015_v44 = vld [vmem:[%s23030_s5 + $0xe98] sm:$0xff] }
 0x68b   :  { %v16363_v21 = vadd.f32 %v10878_v20, %v6385_v23  ;;  %v16367_v51 = vadd.f32 %v11179_v8, %v6393_v18  ;;  %11625 = vmatpush1.bf16.msra.mxu1 %v15026_v59  ;;  %v10880_v46 = vpop.f32.mrb[23].mxu0  ;;  %v11181_v48 = vpop.f32.mrb[23].mxu1  ;;  %11325 = vmatprep.subr.bf16.mxu0 %v15033_v43  ;;  %v11786_v58 = vmax.f32 %v16361_v62, 0.0  ;;  %v11788_v35 = vmax.f32 %v16365_v13, 0.0  ;;  %v6019_v59 = vld [vmem:[%s23030_s5 + $0xeb8] sm:$0xff] }
 0x68c   :  { %v16364_v36 = vadd.f32 %v10880_v46, %v6389_v53  ;;  %v16368_v63 = vadd.f32 %v11181_v48, %v6397_v47  ;;  %11626 = vmatprep.subr.bf16.mxu1 %v15035_v3  ;;  %v11787_v14 = vmax.f32 %v16362_v49, 0.0  ;;  %v11789_v22 = vmax.f32 %v16366_v7, 0.0  ;;  %v6014_v53 = vld [vmem:[%s23030_s5 + $0xe90] sm:$0xff]  ;;  %v6023_v62 = vld [vmem:[%s23030_s5 + $0xed8] sm:$0xff] }
 0x68d   :  { %v11794_v1 = vmax.f32 %v16363_v21, 0.0  ;;  %v11796_v12 = vmax.f32 %v16367_v51, 0.0  ;;  %v15048_v23 = vcombine.low %v5998_v54, %v6002_v24  ;;  %v15050_v18 = vcombine.low %v5999_v41, %v6003_v19  ;;  %v6018_v47 = vld [vmem:[%s23030_s5 + $0xeb0] sm:$0xff]  ;;  %v6027_v13 = vld [vmem:[%s23030_s5 + $0xef8] sm:$0xff] }
 0x68e   :  { %v11795_v50 = vmax.f32 %v16364_v36, 0.0  ;;  %v11797_v52 = vmax.f32 %v16368_v63, 0.0  ;;  %11326 = vmatpush1.bf16.msra.mxu0 %v15032_v27  ;;  %v15056_v43 = vcombine.low %v6006_v32, %v6010_v61  ;;  %v15065_v6 = vcombine.high %v6014_v53, %v6018_v47  ;;  %v6026_v3 = vld [vmem:[%s23030_s5 + $0xef0] sm:$0xff]  ;;  %v6031_v7 = vld [vmem:[%s23030_s5 + $0xf18] sm:$0xff] }
 0x68f   :  { %v21543_v40 = vpack.c.bf16 %v11794_v1, %v11786_v58  ;;  %v21545_v9 = vpack.c.bf16 %v11796_v12, %v11788_v35  ;;  %11627 = vmatpush1.bf16.msra.mxu1 %v15034_v29  ;;  %11327 = vmatprep.subr.bf16.mxu0 %v15041_v39  ;;  %v15067_v15 = vcombine.high %v6015_v44, %v6019_v59  ;;  %v6034_v49 = vld [vmem:[%s23030_s5 + $0xf30] sm:$0xff]  ;;  %v6035_v20 = vld [vmem:[%s23030_s5 + $0xf38] sm:$0xff] }
 0x690   :  { %v21547_v26 = vpack.c.bf16 %v11795_v50, %v11787_v14  ;;  %v21549_v0 = vpack.c.bf16 %v11797_v52, %v11789_v22  ;;  %11628 = vmatprep.subr.bf16.mxu1 %v15043_v38  ;;  %v15064_v45 = vcombine.low %v6014_v53, %v6018_v47  ;;  %v15066_v11 = vcombine.low %v6015_v44, %v6019_v59  ;;  %v6038_v51 = vld [vmem:[%s23030_s5 + $0xf50] sm:$0xff]  ;;  %v6039_v48 = vld [vmem:[%s23030_s5 + $0xf58] sm:$0xff] }
 0x691   :  { %v15073_v27 = vcombine.high %v6022_v55, %v6026_v3  ;;  %v15075_v37 = vcombine.high %v6023_v62, %v6027_v13  ;;  %v15072_v8 = vcombine.low %v6022_v55, %v6026_v3  ;;  %v15074_v29 = vcombine.low %v6023_v62, %v6027_v13  ;;  %v6042_v46 = vld [vmem:[%s23030_s5 + $0xf70] sm:$0xff]  ;;  %v6043_v39 = vld [vmem:[%s23030_s5 + $0xf78] sm:$0xff] }
 0x692   :  { %11328 = vmatpush1.bf16.msra.mxu0 %v15040_v42  ;;  %v15081_v42 = vcombine.high %v6030_v16, %v6034_v49  ;;  %v15083_v21 = vcombine.high %v6031_v7, %v6035_v20  ;;  %v15080_v36 = vcombine.low %v6030_v16, %v6034_v49  ;;  %v15082_v63 = vcombine.low %v6031_v7, %v6035_v20  ;;  %v6046_v54 = vld [vmem:[%s23030_s5 + $0xf90] sm:$0xff]  ;;  %v6047_v58 = vld [vmem:[%s23030_s5 + $0xf98] sm:$0xff]  ;;  %v17089_v16 = vld [vmem:[#allocation4 + $0x48] sm:$0xff] }
 0x693   :  { %11629 = vmatpush1.bf16.msra.mxu1 %v15042_v30  ;;  %11329 = vmatprep.subr.bf16.mxu0 %v15049_v4  ;;  %v15089_v30 = vcombine.high %v6038_v51, %v6042_v46  ;;  %v15091_v38 = vcombine.high %v6039_v48, %v6043_v39  ;;  %v6050_v24 = vld [vmem:[%s23030_s5 + $0xfb0] sm:$0xff]  ;;  %v6051_v35 = vld [vmem:[%s23030_s5 + $0xfb8] sm:$0xff]  ;;  %v15088_v1 = vcombine.low %v6038_v51, %v6042_v46 }
 0x694   :  { %11630 = vmatprep.subr.bf16.mxu1 %v15051_v56  ;;  %v15090_v12 = vcombine.low %v6039_v48, %v6043_v39  ;;  %v15097_v41 = vcombine.high %v6046_v54, %v6050_v24  ;;  %v15099_v19 = vcombine.high %v6047_v58, %v6051_v35  ;;  %v6054_v14 = vld [vmem:[%s23030_s5 + $0xfd0] sm:$0xff]  ;;  %v6055_v50 = vld [vmem:[%s23030_s5 + $0xfd8] sm:$0xff]  ;;  %v15096_v4 = vcombine.low %v6046_v54, %v6050_v24 }
 0x695   :  { %v6058_v22 = vld [vmem:[%s23030_s5 + $0xff0] sm:$0xff]  ;;  %v6059_v52 = vld [vmem:[%s23030_s5 + $0xff8] sm:$0xff]  ;;  %v15098_v56 = vcombine.low %v6047_v58, %v6051_v35  ;;  %v15113_v53 = vcombine.high %v6062_v2, %v6066_v17 }
 0x696   :  { %11330 = vmatpush1.bf16.msra.mxu0 %v15048_v23  ;;  %v15105_v32 = vcombine.high %v6054_v14, %v6058_v22  ;;  %v15107_v61 = vcombine.high %v6055_v50, %v6059_v52  ;;  %v6063_v23 = vld [vmem:[%s23030_s5 + $0x1018] sm:$0xff]  ;;  %v6070_v44 = vld [vmem:[%s23030_s5 + $0x1050] sm:$0xff] }
 0x697   :  { %11631 = vmatpush1.bf16.msra.mxu1 %v15050_v18  ;;  %11331 = vmatprep.subr.bf16.mxu0 %v15057_v34  ;;  %v6067_v18 = vld [vmem:[%s23030_s5 + $0x1038] sm:$0xff]  ;;  %v15104_v34 = vcombine.low %v6054_v14, %v6058_v22  ;;  %v6074_v59 = vld [vmem:[%s23030_s5 + $0x1070] sm:$0xff] }
 0x698   :  { %11632 = vmatprep.subr.bf16.mxu1 %v15059_v57  ;;  %v15106_v57 = vcombine.low %v6055_v50, %v6059_v52  ;;  %v15115_v47 = vcombine.high %v6063_v23, %v6067_v18  ;;  %v15121_v55 = vcombine.high %v6070_v44, %v6074_v59  ;;  %v6078_v3 = vld [vmem:[%s23030_s5 + $0x1090] sm:$0xff] }
 0x699   :  { %v6082_v62 = vld [vmem:[%s23030_s5 + $0x10b0] sm:$0xff] }
 0x69a   :  { %11332 = vmatpush1.bf16.msra.mxu0 %v15056_v43  ;;  %v15112_v43 = vcombine.low %v6062_v2, %v6066_v17  ;;  %v17088_v13 = vld [vmem:[#allocation4 + $0x30] sm:$0xff]  ;;  %v15129_v7 = vcombine.high %v6078_v3, %v6082_v62  ;;  %v15128_v51 = vcombine.low %v6078_v3, %v6082_v62  ;;  %v6131_v3 = vld [vmem:[%s23030_s5 + $0x1238] sm:$0xff] }
 0x69b   :  { %11633 = vmatpush1.bf16.msra.mxu1 %v15058_v60  ;;  %11333 = vmatprep.subr.bf16.mxu0 %v15065_v6  ;;  %v6071_v60 = vld [vmem:[%s23030_s5 + $0x1058] sm:$0xff] }
 0x69c   :  { %11634 = vmatprep.subr.bf16.mxu1 %v15067_v15  ;;  %v6075_v6 = vld [vmem:[%s23030_s5 + $0x1078] sm:$0xff]  ;;  %v15114_v15 = vcombine.low %v6063_v23, %v6067_v18 }
 0x69d   :  { %v15122_v49 = vcombine.low %v6071_v60, %v6075_v6 }
 0x69e   :  { %11334 = vmatpush1.bf16.msra.mxu0 %v15064_v45  ;;  %v15123_v45 = vcombine.high %v6071_v60, %v6075_v6  ;;  %v6126_v6 = vld [vmem:[%s23030_s5 + $0x1210] sm:$0xff] }
 0x69f   :  { %11635 = vmatpush1.bf16.msra.mxu1 %v15066_v11  ;;  %11335 = vmatprep.subr.bf16.mxu0 %v15073_v27  ;;  %v6079_v11 = vld [vmem:[%s23030_s5 + $0x1098] sm:$0xff] }
 0x6a0   :  { %11636 = vmatprep.subr.bf16.mxu1 %v15075_v37  ;;  %v6083_v27 = vld [vmem:[%s23030_s5 + $0x10b8] sm:$0xff]  ;;  %v15120_v37 = vcombine.low %v6070_v44, %v6074_v59 }
 0x6a1   :  { %v15131_v20 = vcombine.high %v6079_v11, %v6083_v27  ;;  %v15130_v46 = vcombine.low %v6079_v11, %v6083_v27  ;;  %v6134_v27 = vld [vmem:[%s23030_s5 + $0x1250] sm:$0xff] }
 0x6a2   :  { %11336 = vmatpush1.bf16.msra.mxu0 %v15072_v8  ;;  %v6086_v8 = vld [vmem:[%s23030_s5 + $0x10d0] sm:$0xff] }
 0x6a3   :  { %11637 = vmatpush1.bf16.msra.mxu1 %v15074_v29  ;;  %11337 = vmatprep.subr.bf16.mxu0 %v15081_v42  ;;  %v6090_v29 = vld [vmem:[%s23030_s5 + $0x10f0] sm:$0xff]  ;;  %v6087_v42 = vld [vmem:[%s23030_s5 + $0x10d8] sm:$0xff] }
 0x6a4   :  { %11638 = vmatprep.subr.bf16.mxu1 %v15083_v21  ;;  %v6091_v21 = vld [vmem:[%s23030_s5 + $0x10f8] sm:$0xff]  ;;  %v15137_v48 = vcombine.high %v6086_v8, %v6090_v29  ;;  %v15136_v54 = vcombine.low %v6086_v8, %v6090_v29 }
 0x6a5   :  { %v15139_v39 = vcombine.high %v6087_v42, %v6091_v21  ;;  %v15138_v24 = vcombine.low %v6087_v42, %v6091_v21  ;;  %v6142_v42 = vld [vmem:[%s23030_s5 + $0x1290] sm:$0xff] }
 0x6a6   :  { %11338 = vmatpush1.bf16.msra.mxu0 %v15080_v36  ;;  %v6094_v36 = vld [vmem:[%s23030_s5 + $0x1110] sm:$0xff] }
 0x6a7   :  { %11639 = vmatpush1.bf16.msra.mxu1 %v15082_v63  ;;  %11339 = vmatprep.subr.bf16.mxu0 %v15089_v30  ;;  %v6098_v63 = vld [vmem:[%s23030_s5 + $0x1130] sm:$0xff]  ;;  %v6095_v30 = vld [vmem:[%s23030_s5 + $0x1118] sm:$0xff] }
 0x6a8   :  { %11640 = vmatprep.subr.bf16.mxu1 %v15091_v38  ;;  %v6099_v38 = vld [vmem:[%s23030_s5 + $0x1138] sm:$0xff]  ;;  %v15145_v58 = vcombine.high %v6094_v36, %v6098_v63  ;;  %v15144_v14 = vcombine.low %v6094_v36, %v6098_v63  ;;  %v6146_v21 = vld [vmem:[%s23030_s5 + $0x12b0] sm:$0xff] }
 0x6a9   :  { %v15147_v35 = vcombine.high %v6095_v30, %v6099_v38  ;;  %v15146_v22 = vcombine.low %v6095_v30, %v6099_v38  ;;  %v15193_v36 = vcombine.high %v6142_v42, %v6146_v21  ;;  %v6150_v63 = vld [vmem:[%s23030_s5 + $0x12d0] sm:$0xff] }
 0x6aa   :  { %11340 = vmatpush1.bf16.msra.mxu0 %v15088_v1  ;;  %v6102_v1 = vld [vmem:[%s23030_s5 + $0x1150] sm:$0xff] }
 0x6ab   :  { %11641 = vmatpush1.bf16.msra.mxu1 %v15090_v12  ;;  %11341 = vmatprep.subr.bf16.mxu0 %v15097_v41  ;;  %v6106_v12 = vld [vmem:[%s23030_s5 + $0x1170] sm:$0xff]  ;;  %v6103_v41 = vld [vmem:[%s23030_s5 + $0x1158] sm:$0xff] }
 0x6ac   :  { %11642 = vmatprep.subr.bf16.mxu1 %v15099_v19  ;;  %v6107_v19 = vld [vmem:[%s23030_s5 + $0x1178] sm:$0xff]  ;;  %v15153_v50 = vcombine.high %v6102_v1, %v6106_v12  ;;  %v15152_v2 = vcombine.low %v6102_v1, %v6106_v12  ;;  %v6154_v38 = vld [vmem:[%s23030_s5 + $0x12f0] sm:$0xff] }
 0x6ad   :  { %v15155_v52 = vcombine.high %v6103_v41, %v6107_v19  ;;  %v15154_v17 = vcombine.low %v6103_v41, %v6107_v19  ;;  %v15201_v1 = vcombine.high %v6150_v63, %v6154_v38  ;;  %v6158_v12 = vld [vmem:[%s23030_s5 + $0x1310] sm:$0xff] }
 0x6ae   :  { %11342 = vmatpush1.bf16.msra.mxu0 %v15096_v4  ;;  %v6110_v4 = vld [vmem:[%s23030_s5 + $0x1190] sm:$0xff] }
 0x6af   :  { %11643 = vmatpush1.bf16.msra.mxu1 %v15098_v56  ;;  %11343 = vmatprep.subr.bf16.mxu0 %v15105_v32  ;;  %v6114_v56 = vld [vmem:[%s23030_s5 + $0x11b0] sm:$0xff]  ;;  %v6111_v32 = vld [vmem:[%s23030_s5 + $0x1198] sm:$0xff] }
 0x6b0   :  { %11644 = vmatprep.subr.bf16.mxu1 %v15107_v61  ;;  %v6115_v61 = vld [vmem:[%s23030_s5 + $0x11b8] sm:$0xff]  ;;  %v15161_v23 = vcombine.high %v6110_v4, %v6114_v56  ;;  %v15160_v44 = vcombine.low %v6110_v4, %v6114_v56  ;;  %v6162_v41 = vld [vmem:[%s23030_s5 + $0x1330] sm:$0xff] }
 0x6b1   :  { %v15163_v18 = vcombine.high %v6111_v32, %v6115_v61  ;;  %v15162_v59 = vcombine.low %v6111_v32, %v6115_v61  ;;  %v15209_v4 = vcombine.high %v6158_v12, %v6162_v41  ;;  %v6166_v56 = vld [vmem:[%s23030_s5 + $0x1350] sm:$0xff]  ;;  %v6167_v61 = vld [vmem:[%s23030_s5 + $0x1358] sm:$0xff] }
 0x6b2   :  { %11344 = vmatpush1.bf16.msra.mxu0 %v15104_v34  ;;  %v6118_v34 = vld [vmem:[%s23030_s5 + $0x11d0] sm:$0xff] }
 0x6b3   :  { %11645 = vmatpush1.bf16.msra.mxu1 %v15106_v57  ;;  %11356 = vmatprep.subr.bf16.mxu0 %v15113_v53  ;;  %v6122_v57 = vld [vmem:[%s23030_s5 + $0x11f0] sm:$0xff]  ;;  %v6119_v53 = vld [vmem:[%s23030_s5 + $0x11d8] sm:$0xff] }
 0x6b4   :  { %11657 = vmatprep.subr.bf16.mxu1 %v15115_v47  ;;  %v6123_v47 = vld [vmem:[%s23030_s5 + $0x11f8] sm:$0xff]  ;;  %v15168_v62 = vcombine.low %v6118_v34, %v6122_v57  ;;  %v6170_v32 = vld [vmem:[%s23030_s5 + $0x1370] sm:$0xff] }
 0x6b5   :  { %11346 = vmatmul.mubr.bf16.vlgmr.msra.gmra.mrb[24].mxu0 %v17088_v13  ;;  %v15171_v60 = vcombine.high %v6119_v53, %v6123_v47 }
 0x6b6   :  { %11647 = vmatmul.mubr.bf16.vlgmr.msra.gmra.mrb[24].mxu1 %v17088_v13  ;;  %11357 = vmatpush1.bf16.msra.mxu0 %v15112_v43  ;;  %v15169_v43 = vcombine.high %v6118_v34, %v6122_v57  ;;  %v15170_v13 = vcombine.low %v6119_v53, %v6123_v47  ;;  %v15217_v34 = vcombine.high %v6166_v56, %v6170_v32  ;;  %v6174_v57 = vld [vmem:[%s23030_s5 + $0x1390] sm:$0xff]  ;;  %v6175_v47 = vld [vmem:[%s23030_s5 + $0x1398] sm:$0xff] }
 0x6b7   :  { %11388 = vmatprep.mubr.bf16.mxu0 %v17089_v16  ;;  %11658 = vmatpush1.bf16.msra.mxu1 %v15114_v15  ;;  %v6130_v15 = vld [vmem:[%s23030_s5 + $0x1230] sm:$0xff] }
 0x6b8   :  { %11689 = vmatprep.mubr.bf16.mxu1 %v17089_v16  ;;  %11358 = vmatprep.subr.bf16.mxu0 %v15121_v55  ;;  %v6127_v55 = vld [vmem:[%s23030_s5 + $0x1218] sm:$0xff]  ;;  %v6178_v53 = vld [vmem:[%s23030_s5 + $0x13b0] sm:$0xff] }
 0x6b9   :  { %11659 = vmatprep.subr.bf16.mxu1 %v15123_v45  ;;  %v15177_v45 = vcombine.high %v6126_v6, %v6130_v15  ;;  %v15179_v11 = vcombine.high %v6127_v55, %v6131_v3  ;;  %v6135_v16 = vld [vmem:[%s23030_s5 + $0x1258] sm:$0xff] }
 0x6ba   :  { %11359 = vmatpush1.bf16.msra.mxu0 %v15120_v37  ;;  %v6138_v37 = vld [vmem:[%s23030_s5 + $0x1270] sm:$0xff] }
 0x6bb   :  { %11660 = vmatpush1.bf16.msra.mxu1 %v15122_v49  ;;  %11360 = vmatprep.subr.bf16.mxu0 %v15129_v7  ;;  %v6139_v49 = vld [vmem:[%s23030_s5 + $0x1278] sm:$0xff]  ;;  %v15176_v7 = vcombine.low %v6126_v6, %v6130_v15  ;;  %v15185_v8 = vcombine.high %v6134_v27, %v6138_v37  ;;  %v15225_v6 = vcombine.high %v6174_v57, %v6178_v53  ;;  %v6182_v15 = vld [vmem:[%s23030_s5 + $0x13d0] sm:$0xff] }
 0x6bc   :  { %11661 = vmatprep.subr.bf16.mxu1 %v15131_v20  ;;  %v15178_v20 = vcombine.low %v6127_v55, %v6131_v3  ;;  %v15187_v29 = vcombine.high %v6135_v16, %v6139_v49  ;;  %v6186_v55 = vld [vmem:[%s23030_s5 + $0x13f0] sm:$0xff]  ;;  %v6183_v3 = vld [vmem:[%s23030_s5 + $0x13d8] sm:$0xff] }
 0x6be   :  { %11361 = vmatpush1.bf16.msra.mxu0 %v15128_v51  ;;  %v6143_v51 = vld [vmem:[%s23030_s5 + $0x1298] sm:$0xff] }
 0x6bf   :  { %11662 = vmatpush1.bf16.msra.mxu1 %v15130_v46  ;;  %11362 = vmatprep.subr.bf16.mxu0 %v15137_v48  ;;  %v6147_v46 = vld [vmem:[%s23030_s5 + $0x12b8] sm:$0xff]  ;;  %v15184_v48 = vcombine.low %v6134_v27, %v6138_v37  ;;  %v15233_v27 = vcombine.high %v6182_v15, %v6186_v55  ;;  %v6190_v37 = vld [vmem:[%s23030_s5 + $0x1410] sm:$0xff] }
 0x6c0   :  { %11663 = vmatprep.subr.bf16.mxu1 %v15139_v39  ;;  %v15186_v39 = vcombine.low %v6135_v16, %v6139_v49  ;;  %v15195_v30 = vcombine.high %v6143_v51, %v6147_v46  ;;  %v6194_v16 = vld [vmem:[%s23030_s5 + $0x1430] sm:$0xff]  ;;  %v6191_v49 = vld [vmem:[%s23030_s5 + $0x1418] sm:$0xff] }
 0x6c2   :  { %11363 = vmatpush1.bf16.msra.mxu0 %v15136_v54  ;;  %v6151_v54 = vld [vmem:[%s23030_s5 + $0x12d8] sm:$0xff] }
 0x6c3   :  { %11664 = vmatpush1.bf16.msra.mxu1 %v15138_v24  ;;  %11364 = vmatprep.subr.bf16.mxu0 %v15145_v58  ;;  %v6155_v24 = vld [vmem:[%s23030_s5 + $0x12f8] sm:$0xff]  ;;  %v15192_v58 = vcombine.low %v6142_v42, %v6146_v21  ;;  %v15241_v42 = vcombine.high %v6190_v37, %v6194_v16  ;;  %v6198_v21 = vld [vmem:[%s23030_s5 + $0x1450] sm:$0xff] }
 0x6c4   :  { %11665 = vmatprep.subr.bf16.mxu1 %v15147_v35  ;;  %v15194_v35 = vcombine.low %v6143_v51, %v6147_v46  ;;  %v15203_v19 = vcombine.high %v6151_v54, %v6155_v24  ;;  %v6202_v51 = vld [vmem:[%s23030_s5 + $0x1470] sm:$0xff] }
 0x6c6   :  { %11365 = vmatpush1.bf16.msra.mxu0 %v15144_v14  ;;  %v6159_v14 = vld [vmem:[%s23030_s5 + $0x1318] sm:$0xff] }
 0x6c7   :  { %11666 = vmatpush1.bf16.msra.mxu1 %v15146_v22  ;;  %11366 = vmatprep.subr.bf16.mxu0 %v15153_v50  ;;  %v6163_v22 = vld [vmem:[%s23030_s5 + $0x1338] sm:$0xff]  ;;  %v15200_v50 = vcombine.low %v6150_v63, %v6154_v38  ;;  %v6210_v38 = vld [vmem:[%s23030_s5 + $0x14b0] sm:$0xff] }
 0x6c8   :  { %11667 = vmatprep.subr.bf16.mxu1 %v15155_v52  ;;  %v15202_v52 = vcombine.low %v6151_v54, %v6155_v24  ;;  %v6207_v54 = vld [vmem:[%s23030_s5 + $0x1498] sm:$0xff]  ;;  %v15249_v24 = vcombine.high %v6198_v21, %v6202_v51 }
 0x6ca   :  { %11367 = vmatpush1.bf16.msra.mxu0 %v15152_v2  ;;  %v15211_v2 = vcombine.high %v6159_v14, %v6163_v22 }
 0x6cb   :  { %11668 = vmatpush1.bf16.msra.mxu1 %v15154_v17  ;;  %11368 = vmatprep.subr.bf16.mxu0 %v15161_v23  ;;  %v6171_v17 = vld [vmem:[%s23030_s5 + $0x1378] sm:$0xff]  ;;  %v15208_v23 = vcombine.low %v6158_v12, %v6162_v41  ;;  %v15248_v12 = vcombine.low %v6198_v21, %v6202_v51 }
 0x6cc   :  { %11669 = vmatprep.subr.bf16.mxu1 %v15163_v18  ;;  %v15210_v18 = vcombine.low %v6159_v14, %v6163_v22  ;;  %v17091_v41 = vld [vmem:[#allocation4 + $0x58] sm:$0xff]  ;;  %v6214_v22 = vld [vmem:[%s23030_s5 + $0x14d0] sm:$0xff] }
 0x6cd   :  { %v6251_v21 = vld [vmem:[%s23030_s5 + $0x15f8] sm:$0xff] }
 0x6ce   :  { %11369 = vmatpush1.bf16.msra.mxu0 %v15160_v44  ;;  %v15219_v44 = vcombine.high %v6167_v61, %v6171_v17 }
 0x6cf   :  { %11670 = vmatpush1.bf16.msra.mxu1 %v15162_v59  ;;  %11370 = vmatprep.subr.bf16.mxu0 %v15169_v43  ;;  %v6179_v59 = vld [vmem:[%s23030_s5 + $0x13b8] sm:$0xff]  ;;  %v15216_v43 = vcombine.low %v6166_v56, %v6170_v32 }
 0x6d0   :  { %11671 = vmatprep.subr.bf16.mxu1 %v15171_v60  ;;  %v15218_v60 = vcombine.low %v6167_v61, %v6171_v17  ;;  %v6219_v56 = vld [vmem:[%s23030_s5 + $0x14f8] sm:$0xff]  ;;  %v6222_v17 = vld [vmem:[%s23030_s5 + $0x1510] sm:$0xff] }
 0x6d2   :  { %11371 = vmatpush1.bf16.msra.mxu0 %v15168_v62  ;;  %v15227_v62 = vcombine.high %v6175_v47, %v6179_v59 }
 0x6d3   :  { %11672 = vmatpush1.bf16.msra.mxu1 %v15170_v13  ;;  %11372 = vmatprep.subr.bf16.mxu0 %v15177_v45  ;;  %v6187_v13 = vld [vmem:[%s23030_s5 + $0x13f8] sm:$0xff]  ;;  %v15224_v45 = vcombine.low %v6174_v57, %v6178_v53 }
 0x6d4   :  { %11673 = vmatprep.subr.bf16.mxu1 %v15179_v11  ;;  %v15226_v11 = vcombine.low %v6175_v47, %v6179_v59  ;;  %v6227_v57 = vld [vmem:[%s23030_s5 + $0x1538] sm:$0xff]  ;;  %v6230_v59 = vld [vmem:[%s23030_s5 + $0x1550] sm:$0xff] }
 0x6d6   :  { %11373 = vmatpush1.bf16.msra.mxu0 %v15176_v7  ;;  %v15235_v7 = vcombine.high %v6183_v3, %v6187_v13 }
 0x6d7   :  { %11674 = vmatpush1.bf16.msra.mxu1 %v15178_v20  ;;  %11374 = vmatprep.subr.bf16.mxu0 %v15185_v8  ;;  %v6195_v20 = vld [vmem:[%s23030_s5 + $0x1438] sm:$0xff]  ;;  %v15232_v8 = vcombine.low %v6182_v15, %v6186_v55 }
 0x6d8   :  { %11675 = vmatprep.subr.bf16.mxu1 %v15187_v29  ;;  %v15234_v29 = vcombine.low %v6183_v3, %v6187_v13  ;;  %v15243_v46 = vcombine.high %v6191_v49, %v6195_v20  ;;  %v15242_v63 = vcombine.low %v6191_v49, %v6195_v20  ;;  %v6235_v15 = vld [vmem:[%s23030_s5 + $0x1578] sm:$0xff]  ;;  %v6238_v13 = vld [vmem:[%s23030_s5 + $0x1590] sm:$0xff] }
 0x6d9   :  { %v6246_v20 = vld [vmem:[%s23030_s5 + $0x15d0] sm:$0xff] }
 0x6da   :  { %11375 = vmatpush1.bf16.msra.mxu0 %v15184_v48  ;;  %v6199_v48 = vld [vmem:[%s23030_s5 + $0x1458] sm:$0xff] }
 0x6db   :  { %11676 = vmatpush1.bf16.msra.mxu1 %v15186_v39  ;;  %11376 = vmatprep.subr.bf16.mxu0 %v15193_v36  ;;  %v6203_v39 = vld [vmem:[%s23030_s5 + $0x1478] sm:$0xff]  ;;  %v15240_v36 = vcombine.low %v6190_v37, %v6194_v16 }
 0x6dc   :  { %11677 = vmatprep.subr.bf16.mxu1 %v15195_v30  ;;  %v6206_v30 = vld [vmem:[%s23030_s5 + $0x1490] sm:$0xff]  ;;  %v6243_v37 = vld [vmem:[%s23030_s5 + $0x15b8] sm:$0xff] }
 0x6dd   :  { %v15257_v14 = vcombine.high %v6206_v30, %v6210_v38  ;;  %v15256_v32 = vcombine.low %v6206_v30, %v6210_v38  ;;  %v6259_v38 = vld [vmem:[%s23030_s5 + $0x1638] sm:$0xff] }
 0x6de   :  { %11377 = vmatpush1.bf16.msra.mxu0 %v15192_v58  ;;  %v6211_v58 = vld [vmem:[%s23030_s5 + $0x14b8] sm:$0xff] }
 0x6df   :  { %11678 = vmatpush1.bf16.msra.mxu1 %v15194_v35  ;;  %11378 = vmatprep.subr.bf16.mxu0 %v15201_v1  ;;  %v17090_v35 = vld [vmem:[#allocation4 + $0x40] sm:$0xff]  ;;  %v15251_v1 = vcombine.high %v6199_v48, %v6203_v39  ;;  %v15258_v61 = vcombine.low %v6207_v54, %v6211_v58 }
 0x6e0   :  { %11679 = vmatprep.subr.bf16.mxu1 %v15203_v19  ;;  %v15250_v19 = vcombine.low %v6199_v48, %v6203_v39  ;;  %v6254_v39 = vld [vmem:[%s23030_s5 + $0x1610] sm:$0xff] }
 0x6e2   :  { %11379 = vmatpush1.bf16.msra.mxu0 %v15200_v50  ;;  %v6218_v50 = vld [vmem:[%s23030_s5 + $0x14f0] sm:$0xff] }
 0x6e3   :  { %11680 = vmatpush1.bf16.msra.mxu1 %v15202_v52  ;;  %11380 = vmatprep.subr.bf16.mxu0 %v15209_v4  ;;  %v6215_v52 = vld [vmem:[%s23030_s5 + $0x14d8] sm:$0xff]  ;;  %v15259_v4 = vcombine.high %v6207_v54, %v6211_v58  ;;  %v15264_v53 = vcombine.low %v6214_v22, %v6218_v50 }
 0x6e4   :  { %11681 = vmatprep.subr.bf16.mxu1 %v15211_v2  ;;  %v15265_v2 = vcombine.high %v6214_v22, %v6218_v50  ;;  %v15266_v47 = vcombine.low %v6215_v52, %v6219_v56  ;;  %v6270_v22 = vld [vmem:[%s23030_s5 + $0x1690] sm:$0xff] }
 0x6e5   :  { %v6274_v50 = vld [vmem:[%s23030_s5 + $0x16b0] sm:$0xff] }
 0x6e6   :  { %11381 = vmatpush1.bf16.msra.mxu0 %v15208_v23  ;;  %v6226_v23 = vld [vmem:[%s23030_s5 + $0x1530] sm:$0xff] }
 0x6e7   :  { %11682 = vmatpush1.bf16.msra.mxu1 %v15210_v18  ;;  %11382 = vmatprep.subr.bf16.mxu0 %v15217_v34  ;;  %v6223_v18 = vld [vmem:[%s23030_s5 + $0x1518] sm:$0xff]  ;;  %v15267_v34 = vcombine.high %v6215_v52, %v6219_v56  ;;  %v15272_v55 = vcombine.low %v6222_v17, %v6226_v23 }
 0x6e8   :  { %11683 = vmatprep.subr.bf16.mxu1 %v15219_v44  ;;  %v15273_v44 = vcombine.high %v6222_v17, %v6226_v23  ;;  %v15274_v3 = vcombine.low %v6223_v18, %v6227_v57  ;;  %v15321_v23 = vcombine.high %v6270_v22, %v6274_v50 }
 0x6ea   :  { %11383 = vmatpush1.bf16.msra.mxu0 %v15216_v43  ;;  %v6234_v43 = vld [vmem:[%s23030_s5 + $0x1570] sm:$0xff] }
 0x6eb   :  { %11684 = vmatpush1.bf16.msra.mxu1 %v15218_v60  ;;  %11384 = vmatprep.subr.bf16.mxu0 %v15225_v6  ;;  %v6231_v60 = vld [vmem:[%s23030_s5 + $0x1558] sm:$0xff]  ;;  %v15275_v6 = vcombine.high %v6223_v18, %v6227_v57  ;;  %v15280_v16 = vcombine.low %v6230_v59, %v6234_v43  ;;  %v6282_v57 = vld [vmem:[%s23030_s5 + $0x16f0] sm:$0xff] }
 0x6ec   :  { %11685 = vmatprep.subr.bf16.mxu1 %v15227_v62  ;;  %v15281_v62 = vcombine.high %v6230_v59, %v6234_v43  ;;  %v15282_v49 = vcombine.low %v6231_v60, %v6235_v15 }
 0x6ee   :  { %11385 = vmatpush1.bf16.msra.mxu0 %v15224_v45  ;;  %v6242_v45 = vld [vmem:[%s23030_s5 + $0x15b0] sm:$0xff] }
 0x6ef   :  { %11686 = vmatpush1.bf16.msra.mxu1 %v15226_v11  ;;  %11386 = vmatprep.subr.bf16.mxu0 %v15233_v27  ;;  %v6239_v11 = vld [vmem:[%s23030_s5 + $0x1598] sm:$0xff]  ;;  %v15283_v27 = vcombine.high %v6231_v60, %v6235_v15  ;;  %v15288_v51 = vcombine.low %v6238_v13, %v6242_v45  ;;  %v6286_v60 = vld [vmem:[%s23030_s5 + $0x1710] sm:$0xff] }
 0x6f0   :  { %11687 = vmatprep.subr.bf16.mxu1 %v15235_v7  ;;  %v15289_v7 = vcombine.high %v6238_v13, %v6242_v45  ;;  %v6287_v15 = vld [vmem:[%s23030_s5 + $0x1718] sm:$0xff] }
 0x6f2   :  { %11387 = vmatpush1.bf16.msra.mxu0 %v15232_v8  ;;  %v6250_v8 = vld [vmem:[%s23030_s5 + $0x15f0] sm:$0xff] }
 0x6f3   :  { %11688 = vmatpush1.bf16.msra.mxu1 %v15234_v29  ;;  %11399 = vmatprep.subr.bf16.mxu0 %v15241_v42  ;;  %v6247_v29 = vld [vmem:[%s23030_s5 + $0x15d8] sm:$0xff]  ;;  %v15291_v42 = vcombine.high %v6239_v11, %v6243_v37  ;;  %v15297_v48 = vcombine.high %v6246_v20, %v6250_v8  ;;  %v15296_v54 = vcombine.low %v6246_v20, %v6250_v8 }
 0x6f4   :  { %11700 = vmatprep.subr.bf16.mxu1 %v15243_v46  ;;  %v15290_v46 = vcombine.low %v6239_v11, %v6243_v37  ;;  %v15299_v30 = vcombine.high %v6247_v29, %v6251_v21  ;;  %v6294_v11 = vld [vmem:[%s23030_s5 + $0x1750] sm:$0xff]  ;;  %v6295_v37 = vld [vmem:[%s23030_s5 + $0x1758] sm:$0xff] }
 0x6f5   :  { %11389 = vmatmul.mubr.bf16.vlgmr.msra.gmra.mrb[24].mxu0 %v17090_v35 }
 0x6f6   :  { %11690 = vmatmul.mubr.bf16.vlgmr.msra.gmra.mrb[24].mxu1 %v17090_v35  ;;  %11400 = vmatpush1.bf16.msra.mxu0 %v15240_v36  ;;  %v6258_v36 = vld [vmem:[%s23030_s5 + $0x1630] sm:$0xff] }
 0x6f7   :  { %11431 = vmatprep.mubr.bf16.mxu0 %v17091_v41  ;;  %11701 = vmatpush1.bf16.msra.mxu1 %v15242_v63  ;;  %v6255_v63 = vld [vmem:[%s23030_s5 + $0x1618] sm:$0xff]  ;;  %v15305_v58 = vcombine.high %v6254_v39, %v6258_v36  ;;  %v6262_v35 = vld [vmem:[%s23030_s5 + $0x1650] sm:$0xff] }
 0x6f8   :  { %11732 = vmatprep.mubr.bf16.mxu1 %v17091_v41  ;;  %11401 = vmatprep.subr.bf16.mxu0 %v15249_v24  ;;  %v15298_v24 = vcombine.low %v6247_v29, %v6251_v21  ;;  %v15307_v41 = vcombine.high %v6255_v63, %v6259_v38  ;;  %v15306_v52 = vcombine.low %v6255_v63, %v6259_v38  ;;  %v6302_v29 = vld [vmem:[%s23030_s5 + $0x1790] sm:$0xff]  ;;  %v6303_v21 = vld [vmem:[%s23030_s5 + $0x1798] sm:$0xff] }
 0x6f9   :  { %11702 = vmatprep.subr.bf16.mxu1 %v15251_v1  ;;  %v6266_v1 = vld [vmem:[%s23030_s5 + $0x1670] sm:$0xff]  ;;  %v6311_v38 = vld [vmem:[%s23030_s5 + $0x17d8] sm:$0xff] }
 0x6fa   :  { %11402 = vmatpush1.bf16.msra.mxu0 %v15248_v12  ;;  %v6263_v12 = vld [vmem:[%s23030_s5 + $0x1658] sm:$0xff]  ;;  %v6310_v63 = vld [vmem:[%s23030_s5 + $0x17d0] sm:$0xff] }
 0x6fb   :  { %11703 = vmatpush1.bf16.msra.mxu1 %v15250_v19  ;;  %11403 = vmatprep.subr.bf16.mxu0 %v15257_v14  ;;  %v6267_v19 = vld [vmem:[%s23030_s5 + $0x1678] sm:$0xff]  ;;  %v15304_v14 = vcombine.low %v6254_v39, %v6258_v36 }
 0x6fc   :  { %11704 = vmatprep.subr.bf16.mxu1 %v15259_v4  ;;  %v15313_v4 = vcombine.high %v6262_v35, %v6266_v1  ;;  %v15315_v56 = vcombine.high %v6263_v12, %v6267_v19  ;;  %v15314_v17 = vcombine.low %v6263_v12, %v6267_v19  ;;  %v6318_v12 = vld [vmem:[%s23030_s5 + $0x1810] sm:$0xff]  ;;  %v6319_v19 = vld [vmem:[%s23030_s5 + $0x1818] sm:$0xff] }
 0x6fe   :  { %11404 = vmatpush1.bf16.msra.mxu0 %v15256_v32  ;;  %v6271_v32 = vld [vmem:[%s23030_s5 + $0x1698] sm:$0xff] }
 0x6ff   :  { %11705 = vmatpush1.bf16.msra.mxu1 %v15258_v61  ;;  %11405 = vmatprep.subr.bf16.mxu0 %v15265_v2  ;;  %v6275_v61 = vld [vmem:[%s23030_s5 + $0x16b8] sm:$0xff]  ;;  %v15312_v2 = vcombine.low %v6262_v35, %v6266_v1 }
 0x700   :  { %11706 = vmatprep.subr.bf16.mxu1 %v15267_v34  ;;  %v15323_v18 = vcombine.high %v6271_v32, %v6275_v61  ;;  %v6278_v34 = vld [vmem:[%s23030_s5 + $0x16d0] sm:$0xff]  ;;  %v15322_v59 = vcombine.low %v6271_v32, %v6275_v61  ;;  %v6327_v61 = vld [vmem:[%s23030_s5 + $0x1858] sm:$0xff] }
 0x701   :  { %v15329_v43 = vcombine.high %v6278_v34, %v6282_v57  ;;  %v6330_v32 = vld [vmem:[%s23030_s5 + $0x1870] sm:$0xff] }
 0x702   :  { %11406 = vmatpush1.bf16.msra.mxu0 %v15264_v53  ;;  %v6279_v53 = vld [vmem:[%s23030_s5 + $0x16d8] sm:$0xff] }
 0x703   :  { %11707 = vmatpush1.bf16.msra.mxu1 %v15266_v47  ;;  %11407 = vmatprep.subr.bf16.mxu0 %v15273_v44  ;;  %v6283_v47 = vld [vmem:[%s23030_s5 + $0x16f8] sm:$0xff]  ;;  %v15320_v44 = vcombine.low %v6270_v22, %v6274_v50 }
 0x704   :  { %11708 = vmatprep.subr.bf16.mxu1 %v15275_v6  ;;  %v6290_v6 = vld [vmem:[%s23030_s5 + $0x1730] sm:$0xff]  ;;  %v15330_v13 = vcombine.low %v6279_v53, %v6283_v47  ;;  %v6323_v22 = vld [vmem:[%s23030_s5 + $0x1838] sm:$0xff] }
 0x705   :  { %v15337_v45 = vcombine.high %v6286_v60, %v6290_v6 }
 0x706   :  { %11408 = vmatpush1.bf16.msra.mxu0 %v15272_v55  ;;  %v15331_v55 = vcombine.high %v6279_v53, %v6283_v47  ;;  %v6338_v53 = vld [vmem:[%s23030_s5 + $0x18b0] sm:$0xff]  ;;  %v6335_v47 = vld [vmem:[%s23030_s5 + $0x1898] sm:$0xff] }
 0x707   :  { %11709 = vmatpush1.bf16.msra.mxu1 %v15274_v3  ;;  %11409 = vmatprep.subr.bf16.mxu0 %v15281_v62  ;;  %v6291_v3 = vld [vmem:[%s23030_s5 + $0x1738] sm:$0xff]  ;;  %v15328_v62 = vcombine.low %v6278_v34, %v6282_v57  ;;  %v6334_v57 = vld [vmem:[%s23030_s5 + $0x1890] sm:$0xff] }
 0x708   :  { %11710 = vmatprep.subr.bf16.mxu1 %v15283_v27  ;;  %v6298_v27 = vld [vmem:[%s23030_s5 + $0x1770] sm:$0xff]  ;;  %v15338_v20 = vcombine.low %v6287_v15, %v6291_v3 }
 0x709   :  { %v15345_v8 = vcombine.high %v6294_v11, %v6298_v27 }
 0x70a   :  { %11410 = vmatpush1.bf16.msra.mxu0 %v15280_v16  ;;  %v15339_v16 = vcombine.high %v6287_v15, %v6291_v3  ;;  %v15385_v15 = vcombine.high %v6334_v57, %v6338_v53  ;;  %v6346_v3 = vld [vmem:[%s23030_s5 + $0x18f0] sm:$0xff] }
 0x70b   :  { %11711 = vmatpush1.bf16.msra.mxu1 %v15282_v49  ;;  %11411 = vmatprep.subr.bf16.mxu0 %v15289_v7  ;;  %v6299_v49 = vld [vmem:[%s23030_s5 + $0x1778] sm:$0xff]  ;;  %v15336_v7 = vcombine.low %v6286_v60, %v6290_v6 }
 0x70c   :  { %11712 = vmatprep.subr.bf16.mxu1 %v15291_v42  ;;  %v6306_v42 = vld [vmem:[%s23030_s5 + $0x17b0] sm:$0xff]  ;;  %v15346_v39 = vcombine.low %v6295_v37, %v6299_v49 }
 0x70d   :  { %v15353_v36 = vcombine.high %v6302_v29, %v6306_v42 }
 0x70e   :  { %11412 = vmatpush1.bf16.msra.mxu0 %v15288_v51  ;;  %v15347_v51 = vcombine.high %v6295_v37, %v6299_v49  ;;  %v6354_v49 = vld [vmem:[%s23030_s5 + $0x1930] sm:$0xff] }
 0x70f   :  { %11713 = vmatpush1.bf16.msra.mxu1 %v15290_v46  ;;  %11413 = vmatprep.subr.bf16.mxu0 %v15297_v48  ;;  %v6307_v46 = vld [vmem:[%s23030_s5 + $0x17b8] sm:$0xff]  ;;  %v15344_v48 = vcombine.low %v6294_v11, %v6298_v27  ;;  %v15384_v11 = vcombine.low %v6334_v57, %v6338_v53  ;;  %v16661_v53 = vld [vmem:[%s23033_s7 + $0x24] ss:$16 sps:$4 sm:$0xff]  }
 0x710   :  { %11714 = vmatprep.subr.bf16.mxu1 %v15299_v30  ;;  %v6314_v30 = vld [vmem:[%s23030_s5 + $0x17f0] sm:$0xff]  ;;  %v15354_v35 = vcombine.low %v6303_v21, %v6307_v46  ;;  %v16656_v57 = vld [vmem:[%s23033_s7 + $0x8] ss:$16 sps:$4 sm:$0xff]  }
 0x711   :  { %v15361_v1 = vcombine.high %v6310_v63, %v6314_v30  ;;  %v15360_v50 = vcombine.low %v6310_v63, %v6314_v30 }
 0x712   :  { %11414 = vmatpush1.bf16.msra.mxu0 %v15296_v54  ;;  %v15355_v54 = vcombine.high %v6303_v21, %v6307_v46  ;;  %v6358_v21 = vld [vmem:[%s23030_s5 + $0x1950] sm:$0xff]  ;;  %v6359_v46 = vld [vmem:[%s23030_s5 + $0x1958] sm:$0xff] }
 0x713   :  { %11715 = vmatpush1.bf16.msra.mxu1 %v15298_v24  ;;  %11415 = vmatprep.subr.bf16.mxu0 %v15305_v58  ;;  %v6315_v24 = vld [vmem:[%s23030_s5 + $0x17f8] sm:$0xff]  ;;  %v15352_v58 = vcombine.low %v6302_v29, %v6306_v42 }
 0x714   :  { %11716 = vmatprep.subr.bf16.mxu1 %v15307_v41  ;;  %v6322_v41 = vld [vmem:[%s23030_s5 + $0x1830] sm:$0xff] }
 0x716   :  { %11416 = vmatpush1.bf16.msra.mxu0 %v15304_v14  ;;  %v15363_v14 = vcombine.high %v6311_v38, %v6315_v24 }
 0x717   :  { %11717 = vmatpush1.bf16.msra.mxu1 %v15306_v52  ;;  %11417 = vmatprep.subr.bf16.mxu0 %v15313_v4  ;;  %v15362_v52 = vcombine.low %v6311_v38, %v6315_v24  ;;  %v15369_v4 = vcombine.high %v6318_v12, %v6322_v41  ;;  %v6366_v38 = vld [vmem:[%s23030_s5 + $0x1990] sm:$0xff]  ;;  %v6367_v24 = vld [vmem:[%s23030_s5 + $0x1998] sm:$0xff] }
 0x718   :  { %11718 = vmatprep.subr.bf16.mxu1 %v15315_v56  ;;  %v6326_v56 = vld [vmem:[%s23030_s5 + $0x1850] sm:$0xff] }
 0x719   :  { %v15377_v34 = vcombine.high %v6326_v56, %v6330_v32  ;;  %v15376_v60 = vcombine.low %v6326_v56, %v6330_v32 }
 0x71a   :  { %11418 = vmatpush1.bf16.msra.mxu0 %v15312_v2  ;;  %v15371_v2 = vcombine.high %v6319_v19, %v6323_v22 }
 0x71b   :  { %11719 = vmatpush1.bf16.msra.mxu1 %v15314_v17  ;;  %11419 = vmatprep.subr.bf16.mxu0 %v15321_v23  ;;  %v6331_v17 = vld [vmem:[%s23030_s5 + $0x1878] sm:$0xff]  ;;  %v15368_v23 = vcombine.low %v6318_v12, %v6322_v41 }
 0x71c   :  { %11720 = vmatprep.subr.bf16.mxu1 %v15323_v18  ;;  %v15370_v18 = vcombine.low %v6319_v19, %v6323_v22  ;;  %v15378_v6 = vcombine.low %v6327_v61, %v6331_v17  ;;  %v6374_v19 = vld [vmem:[%s23030_s5 + $0x19d0] sm:$0xff]  ;;  %v6375_v22 = vld [vmem:[%s23030_s5 + $0x19d8] sm:$0xff] }
 0x71e   :  { %11420 = vmatpush1.bf16.msra.mxu0 %v15320_v44  ;;  %v15379_v44 = vcombine.high %v6327_v61, %v6331_v17 }
 0x71f   :  { %11721 = vmatpush1.bf16.msra.mxu1 %v15322_v59  ;;  %11421 = vmatprep.subr.bf16.mxu0 %v15329_v43  ;;  %v6339_v59 = vld [vmem:[%s23030_s5 + $0x18b8] sm:$0xff]  ;;  %v17092_v43 = vld [vmem:[#allocation4 + $0x50] sm:$0xff] }
 0x720   :  { %11722 = vmatprep.subr.bf16.mxu1 %v15331_v55  ;;  %v6342_v55 = vld [vmem:[%s23030_s5 + $0x18d0] sm:$0xff]  ;;  %v15386_v27 = vcombine.low %v6335_v47, %v6339_v59 }
 0x721   :  { %v15393_v37 = vcombine.high %v6342_v55, %v6346_v3 }
 0x722   :  { %11422 = vmatpush1.bf16.msra.mxu0 %v15328_v62  ;;  %v6343_v62 = vld [vmem:[%s23030_s5 + $0x18d8] sm:$0xff] }
 0x723   :  { %11723 = vmatpush1.bf16.msra.mxu1 %v15330_v13  ;;  %11423 = vmatprep.subr.bf16.mxu0 %v15337_v45  ;;  %v15387_v13 = vcombine.high %v6335_v47, %v6339_v59  ;;  %v6347_v45 = vld [vmem:[%s23030_s5 + $0x18f8] sm:$0xff]  ;;  %v17093_v47 = vld [vmem:[#allocation4 + $0x60] sm:$0xff] }
 0x724   :  { %11724 = vmatprep.subr.bf16.mxu1 %v15339_v16  ;;  %v6350_v16 = vld [vmem:[%s23030_s5 + $0x1910] sm:$0xff]  ;;  %v15394_v29 = vcombine.low %v6343_v62, %v6347_v45 }
 0x725   :  { %v15401_v42 = vcombine.high %v6350_v16, %v6354_v49  ;;  %v16659_v59 = vld [vmem:[%s23033_s7 + $0x20] ss:$16 sps:$4 sm:$0xff]  }
 0x726   :  { %11424 = vmatpush1.bf16.msra.mxu0 %v15336_v7  ;;  %v6351_v7 = vld [vmem:[%s23030_s5 + $0x1918] sm:$0xff] }
 0x727   :  { %11725 = vmatpush1.bf16.msra.mxu1 %v15338_v20  ;;  %11425 = vmatprep.subr.bf16.mxu0 %v15345_v8  ;;  %v6355_v20 = vld [vmem:[%s23030_s5 + $0x1938] sm:$0xff]  ;;  %v15392_v8 = vcombine.low %v6342_v55, %v6346_v3 }
 0x728   :  { %11726 = vmatprep.subr.bf16.mxu1 %v15347_v51  ;;  %v6362_v51 = vld [vmem:[%s23030_s5 + $0x1970] sm:$0xff]  ;;  %v15402_v63 = vcombine.low %v6351_v7, %v6355_v20  ;;  %v16668_v55 = vld [vmem:[%s23033_s7 + $0x48] ss:$16 sps:$4 sm:$0xff]   ;;  %v16676_v3 = vld [vmem:[%s23033_s7 + $0x6c] ss:$16 sps:$4 sm:$0xff]  }
 0x729   :  { %v15409_v30 = vcombine.high %v6358_v21, %v6362_v51 }
 0x72a   :  { %11426 = vmatpush1.bf16.msra.mxu0 %v15344_v48  ;;  %v15403_v48 = vcombine.high %v6351_v7, %v6355_v20  ;;  %v16683_v7 = vld [vmem:[%s23033_s7 + $0xa0] ss:$16 sps:$4 sm:$0xff]   ;;  %v16691_v20 = vld [vmem:[%s23033_s7 + $0xc4] ss:$16 sps:$4 sm:$0xff]  }
 0x72b   :  { %11727 = vmatpush1.bf16.msra.mxu1 %v15346_v39  ;;  %11427 = vmatprep.subr.bf16.mxu0 %v15353_v36  ;;  %v6363_v39 = vld [vmem:[%s23030_s5 + $0x1978] sm:$0xff]  ;;  %v15400_v36 = vcombine.low %v6350_v16, %v6354_v49  ;;  %v16685_v16 = vld [vmem:[%s23033_s7 + $0xa4] ss:$16 sps:$4 sm:$0xff]  }
 0x72c   :  { %11728 = vmatprep.subr.bf16.mxu1 %v15355_v54  ;;  %v6370_v54 = vld [vmem:[%s23030_s5 + $0x19b0] sm:$0xff]  ;;  %v15410_v12 = vcombine.low %v6359_v46, %v6363_v39  ;;  %v16688_v49 = vld [vmem:[%s23033_s7 + $0xac] ss:$16 sps:$4 sm:$0xff]  }
 0x72d   :  { %v15417_v41 = vcombine.high %v6366_v38, %v6370_v54 }
 0x72e   :  { %11428 = vmatpush1.bf16.msra.mxu0 %v15352_v58  ;;  %v15411_v58 = vcombine.high %v6359_v46, %v6363_v39  ;;  %v16695_v46 = vld [vmem:[%s23033_s7 + $0xe0] ss:$16 sps:$4 sm:$0xff]   ;;  %v16703_v39 = vld [vmem:[%s23033_s7 + $0x104] ss:$16 sps:$4 sm:$0xff]  }
 0x72f   :  { %11729 = vmatpush1.bf16.msra.mxu1 %v15354_v35  ;;  %11429 = vmatprep.subr.bf16.mxu0 %v15361_v1  ;;  %v6371_v35 = vld [vmem:[%s23030_s5 + $0x19b8] sm:$0xff]  ;;  %v15408_v1 = vcombine.low %v6358_v21, %v6362_v51  ;;  %v16697_v21 = vld [vmem:[%s23033_s7 + $0xe4] ss:$16 sps:$4 sm:$0xff]  }
 0x730   :  { %11730 = vmatprep.subr.bf16.mxu1 %v15363_v14  ;;  %v6378_v14 = vld [vmem:[%s23030_s5 + $0x19f0] sm:$0xff]  ;;  %v15418_v56 = vcombine.low %v6367_v24, %v6371_v35  ;;  %v16700_v51 = vld [vmem:[%s23033_s7 + $0xec] ss:$16 sps:$4 sm:$0xff]  }
 0x731   :  { %v15425_v32 = vcombine.high %v6374_v19, %v6378_v14 }
 0x732   :  { %11430 = vmatpush1.bf16.msra.mxu0 %v15360_v50  ;;  %v15419_v50 = vcombine.high %v6367_v24, %v6371_v35  ;;  %v16707_v24 = vld [vmem:[%s23033_s7 + $0x120] ss:$16 sps:$4 sm:$0xff]   ;;  %v16715_v35 = vld [vmem:[%s23033_s7 + $0x144] ss:$16 sps:$4 sm:$0xff]  }
 0x733   :  { %11731 = vmatpush1.bf16.msra.mxu1 %v15362_v52  ;;  %11442 = vmatprep.subr.bf16.mxu0 %v15369_v4  ;;  %v6379_v52 = vld [vmem:[%s23030_s5 + $0x19f8] sm:$0xff]  ;;  %v15416_v4 = vcombine.low %v6366_v38, %v6370_v54  ;;  %v16709_v38 = vld [vmem:[%s23033_s7 + $0x124] ss:$16 sps:$4 sm:$0xff]  }
 0x734   :  { %11743 = vmatprep.subr.bf16.mxu1 %v15371_v2  ;;  %v15427_v61 = vcombine.high %v6375_v22, %v6379_v52  ;;  %v15424_v2 = vcombine.low %v6374_v19, %v6378_v14  ;;  %v15426_v17 = vcombine.low %v6375_v22, %v6379_v52  ;;  %v16712_v54 = vld [vmem:[%s23033_s7 + $0x12c] ss:$16 sps:$4 sm:$0xff]   ;;  %v16721_v19 = vld [vmem:[%s23033_s7 + $0x164] ss:$16 sps:$4 sm:$0xff]   ;;  %v16719_v22 = vld [vmem:[%s23033_s7 + $0x160] ss:$16 sps:$4 sm:$0xff]  }
 0x735   :  { %11432 = vmatmul.mubr.bf16.vlgmr.msra.gmra.mrb[24].mxu0 %v17092_v43  ;;  %v16724_v14 = vld [vmem:[%s23033_s7 + $0x16c] ss:$16 sps:$4 sm:$0xff]   ;;  %v16727_v52 = vld [vmem:[%s23033_s7 + $0x184] ss:$16 sps:$4 sm:$0xff]  }
 0x736   :  { %11733 = vmatmul.mubr.bf16.vlgmr.msra.gmra.mrb[24].mxu1 %v17092_v43  ;;  %11443 = vmatpush1.bf16.msra.mxu0 %v15368_v23  ;;  %v16655_v23 = vld [vmem:[%s23033_s7 + $0x4] ss:$16 sps:$4 sm:$0xff]   ;;  %v16662_v43 = vld [vmem:[%s23033_s7 + $0x28] ss:$16 sps:$4 sm:$0xff]  }
 0x737   :  { %11744 = vmatpush1.bf16.msra.mxu1 %v15370_v18  ;;  %11444 = vmatprep.subr.bf16.mxu0 %v15377_v34  ;;  %v16653_v18 = vld [vmem:[%s23033_s7] ss:$16 sps:$4 sm:$0xff]   ;;  %v16658_v34 = vld [vmem:[%s23033_s7 + $0xc] ss:$16 sps:$4 sm:$0xff]  }
 0x738   :  { %11745 = vmatprep.subr.bf16.mxu1 %v15379_v44  ;;  %11474 = vmatprep.mubr.bf16.mxu0 %v23171_v28  ;;  %v16664_v44 = vld [vmem:[%s23033_s7 + $0x2c] ss:$16 sps:$4 sm:$0xff]  }
 0x739   :  { %11775 = vmatprep.mubr.bf16.mxu1 %v23171_v28  ;;  %v15395_v28 = vcombine.high %v6343_v62, %v6347_v45  ;;  %v16671_v62 = vld [vmem:[%s23033_s7 + $0x60] ss:$16 sps:$4 sm:$0xff]   ;;  %v16679_v45 = vld [vmem:[%s23033_s7 + $0x84] ss:$16 sps:$4 sm:$0xff]  }
 0x73a   :  { %11445 = vmatpush1.bf16.msra.mxu0 %v15376_v60  ;;  %v16667_v60 = vld [vmem:[%s23033_s7 + $0x44] ss:$16 sps:$4 sm:$0xff]  }
 0x73b   :  { %11746 = vmatpush1.bf16.msra.mxu1 %v15378_v6  ;;  %11446 = vmatprep.subr.bf16.mxu0 %v15385_v15  ;;  %v16670_v6 = vld [vmem:[%s23033_s7 + $0x4c] ss:$16 sps:$4 sm:$0xff]   ;;  %v16665_v15 = vld [vmem:[%s23033_s7 + $0x40] ss:$16 sps:$4 sm:$0xff]  }
 0x73c   :  { %11747 = vmatprep.subr.bf16.mxu1 %v15387_v13  ;;  %v16674_v13 = vld [vmem:[%s23033_s7 + $0x68] ss:$16 sps:$4 sm:$0xff]  }
 0x73e   :  { %11447 = vmatpush1.bf16.msra.mxu0 %v15384_v11  ;;  %v16682_v11 = vld [vmem:[%s23033_s7 + $0x8c] ss:$16 sps:$4 sm:$0xff]  }
 0x73f   :  { %11748 = vmatpush1.bf16.msra.mxu1 %v15386_v27  ;;  %11448 = vmatprep.subr.bf16.mxu0 %v15393_v37  ;;  %v16677_v27 = vld [vmem:[%s23033_s7 + $0x80] ss:$16 sps:$4 sm:$0xff]   ;;  %v16680_v37 = vld [vmem:[%s23033_s7 + $0x88] ss:$16 sps:$4 sm:$0xff]  }
 0x740   :  { %11749 = vmatprep.subr.bf16.mxu1 %v15395_v28  ;;  %v16686_v28 = vld [vmem:[%s23033_s7 + $0xa8] ss:$16 sps:$4 sm:$0xff]  }
 0x742   :  { %11449 = vmatpush1.bf16.msra.mxu0 %v15392_v8  ;;  %v16694_v8 = vld [vmem:[%s23033_s7 + $0xcc] ss:$16 sps:$4 sm:$0xff]  }
 0x743   :  { %11750 = vmatpush1.bf16.msra.mxu1 %v15394_v29  ;;  %11450 = vmatprep.subr.bf16.mxu0 %v15401_v42  ;;  %v16689_v29 = vld [vmem:[%s23033_s7 + $0xc0] ss:$16 sps:$4 sm:$0xff]   ;;  %v16692_v42 = vld [vmem:[%s23033_s7 + $0xc8] ss:$16 sps:$4 sm:$0xff]  }
 0x744   :  { %11751 = vmatprep.subr.bf16.mxu1 %v15403_v48  ;;  %v16698_v48 = vld [vmem:[%s23033_s7 + $0xe8] ss:$16 sps:$4 sm:$0xff]  }
 0x746   :  { %11451 = vmatpush1.bf16.msra.mxu0 %v15400_v36  ;;  %v16706_v36 = vld [vmem:[%s23033_s7 + $0x10c] ss:$16 sps:$4 sm:$0xff]  }
 0x747   :  { %11752 = vmatpush1.bf16.msra.mxu1 %v15402_v63  ;;  %11452 = vmatprep.subr.bf16.mxu0 %v15409_v30  ;;  %v16701_v63 = vld [vmem:[%s23033_s7 + $0x100] ss:$16 sps:$4 sm:$0xff]   ;;  %v16704_v30 = vld [vmem:[%s23033_s7 + $0x108] ss:$16 sps:$4 sm:$0xff]  }
 0x748   :  { %11753 = vmatprep.subr.bf16.mxu1 %v15411_v58  ;;  %v16710_v58 = vld [vmem:[%s23033_s7 + $0x128] ss:$16 sps:$4 sm:$0xff]  }
 0x74a   :  { %11453 = vmatpush1.bf16.msra.mxu0 %v15408_v1  ;;  %v16718_v1 = vld [vmem:[%s23033_s7 + $0x14c] ss:$16 sps:$4 sm:$0xff]  }
 0x74b   :  { %11754 = vmatpush1.bf16.msra.mxu1 %v15410_v12  ;;  %11454 = vmatprep.subr.bf16.mxu0 %v15417_v41  ;;  %v16713_v12 = vld [vmem:[%s23033_s7 + $0x140] ss:$16 sps:$4 sm:$0xff]   ;;  %v16716_v41 = vld [vmem:[%s23033_s7 + $0x148] ss:$16 sps:$4 sm:$0xff]  }
 0x74c   :  { %11755 = vmatprep.subr.bf16.mxu1 %v15419_v50  ;;  %v16722_v50 = vld [vmem:[%s23033_s7 + $0x168] ss:$16 sps:$4 sm:$0xff]  }
 0x74e   :  { %11455 = vmatpush1.bf16.msra.mxu0 %v15416_v4  ;;  %v16730_v4 = vld [vmem:[%s23033_s7 + $0x18c] ss:$16 sps:$4 sm:$0xff]  }
 0x74f   :  { %11756 = vmatpush1.bf16.msra.mxu1 %v15418_v56  ;;  %11456 = vmatprep.subr.bf16.mxu0 %v15425_v32  ;;  %v16725_v56 = vld [vmem:[%s23033_s7 + $0x180] ss:$16 sps:$4 sm:$0xff]   ;;  %v16728_v32 = vld [vmem:[%s23033_s7 + $0x188] ss:$16 sps:$4 sm:$0xff]  }
 0x750   :  { %11757 = vmatprep.subr.bf16.mxu1 %v15427_v61  ;;  %v16733_v61 = vld [vmem:[%s23033_s7 + $0x1a4] ss:$16 sps:$4 sm:$0xff]  }
 0x752   :  { %11457 = vmatpush1.bf16.msra.mxu0 %v15424_v2  ;;  %v16736_v2 = vld [vmem:[%s23033_s7 + $0x1ac] ss:$16 sps:$4 sm:$0xff]  }
 0x753   :  { %11758 = vmatpush1.bf16.msra.mxu1 %v15426_v17  ;;  %13368 = vmatprep.subr.bf16.mxu0 %v16655_v23  ;;  %v16731_v17 = vld [vmem:[%s23033_s7 + $0x1a0] ss:$16 sps:$4 sm:$0xff]   ;;  %v16734_v23 = vld [vmem:[%s23033_s7 + $0x1a8] ss:$16 sps:$4 sm:$0xff]  }
 0x754   :  { %13540 = vmatprep.subr.bf16.mxu1 %v16658_v34  ;;  %v16742_v34 = vld [vmem:[%s23033_s7 + $0x1cc] ss:$16 sps:$4 sm:$0xff]  }
 0x755   :  { %11475 = vmatmul.mubr.bf16.vlgmr.msra.gmra.mrb[24].mxu0 %v17093_v47 }
 0x756   :  { %11776 = vmatmul.mubr.bf16.vlgmr.msra.gmra.mrb[24].mxu1 %v17093_v47  ;;  %13369 = vmatpush1.bf16.msra.mxu0 %v16653_v18  ;;  %v16739_v18 = vld [vmem:[%s23033_s7 + $0x1c4] ss:$16 sps:$4 sm:$0xff]  }
 0x757   :  { %13400 = vmatprep.mubr.bf16.mxu0 %v21547_v26  ;;  %13541 = vmatpush1.bf16.msra.mxu1 %v16656_v57  ;;  %v16737_v57 = vld [vmem:[%s23033_s7 + $0x1c0] ss:$16 sps:$4 sm:$0xff]   ;;  %v16745_v47 = vld [vmem:[%s23033_s7 + $0x1e4] ss:$16 sps:$4 sm:$0xff]  }
 0x758   :  { %13572 = vmatprep.mubr.bf16.mxu1 %v21547_v26  ;;  %13370 = vmatprep.subr.bf16.mxu0 %v16661_v53  ;;  %v16673_v26 = vld [vmem:[%s23033_s7 + $0x64] ss:$16 sps:$4 sm:$0xff]   ;;  %v16740_v53 = vld [vmem:[%s23033_s7 + $0x1c8] ss:$16 sps:$4 sm:$0xff]  }
 0x759   :  { %13542 = vmatprep.subr.bf16.mxu1 %v16664_v44  ;;  %v16748_v44 = vld [vmem:[%s23033_s7 + $0x1ec] ss:$16 sps:$4 sm:$0xff]  }
 0x75a   :  { %13371 = vmatpush1.bf16.msra.mxu0 %v16659_v59  ;;  %v16743_v59 = vld [vmem:[%s23033_s7 + $0x1e0] ss:$16 sps:$4 sm:$0xff]  }
 0x75b   :  { %13543 = vmatpush1.bf16.msra.mxu1 %v16662_v43  ;;  %13372 = vmatprep.subr.bf16.mxu0 %v16667_v60  ;;  %v16746_v43 = vld [vmem:[%s23033_s7 + $0x1e8] ss:$16 sps:$4 sm:$0xff]   ;;  %v16751_v60 = vld [vmem:[%s23033_s7 + $0x204] ss:$16 sps:$4 sm:$0xff]  }
 0x75c   :  { %13544 = vmatprep.subr.bf16.mxu1 %v16670_v6  ;;  %v16754_v6 = vld [vmem:[%s23033_s7 + $0x20c] ss:$16 sps:$4 sm:$0xff]  }
 0x75e   :  { %13373 = vmatpush1.bf16.msra.mxu0 %v16665_v15  ;;  %v16749_v15 = vld [vmem:[%s23033_s7 + $0x200] ss:$16 sps:$4 sm:$0xff]  }
 0x75f   :  { %13545 = vmatpush1.bf16.msra.mxu1 %v16668_v55  ;;  %13374 = vmatprep.subr.bf16.mxu0 %v16673_v26  ;;  %v16752_v55 = vld [vmem:[%s23033_s7 + $0x208] ss:$16 sps:$4 sm:$0xff]   ;;  %v16757_v26 = vld [vmem:[%s23033_s7 + $0x224] ss:$16 sps:$4 sm:$0xff]  }
 0x760   :  { %13546 = vmatprep.subr.bf16.mxu1 %v16676_v3  ;;  %v16760_v3 = vld [vmem:[%s23033_s7 + $0x22c] ss:$16 sps:$4 sm:$0xff]  }
 0x762   :  { %13375 = vmatpush1.bf16.msra.mxu0 %v16671_v62  ;;  %v16755_v62 = vld [vmem:[%s23033_s7 + $0x220] ss:$16 sps:$4 sm:$0xff]  }
 0x763   :  { %13547 = vmatpush1.bf16.msra.mxu1 %v16674_v13  ;;  %13376 = vmatprep.subr.bf16.mxu0 %v16679_v45  ;;  %v16758_v13 = vld [vmem:[%s23033_s7 + $0x228] ss:$16 sps:$4 sm:$0xff]   ;;  %v16763_v45 = vld [vmem:[%s23033_s7 + $0x244] ss:$16 sps:$4 sm:$0xff]  }
 0x764   :  { %13548 = vmatprep.subr.bf16.mxu1 %v16682_v11  ;;  %v16761_v11 = vld [vmem:[%s23033_s7 + $0x240] ss:$16 sps:$4 sm:$0xff]  }
 0x766   :  { %13377 = vmatpush1.bf16.msra.mxu0 %v16677_v27  ;;  %v16764_v27 = vld [vmem:[%s23033_s7 + $0x248] ss:$16 sps:$4 sm:$0xff]  }
 0x767   :  { %13549 = vmatpush1.bf16.msra.mxu1 %v16680_v37  ;;  %13378 = vmatprep.subr.bf16.mxu0 %v16685_v16  ;;  %v16772_v37 = vld [vmem:[%s23033_s7 + $0x26c] ss:$16 sps:$4 sm:$0xff]   ;;  %v16767_v16 = vld [vmem:[%s23033_s7 + $0x260] ss:$16 sps:$4 sm:$0xff]  }
 0x768   :  { %13550 = vmatprep.subr.bf16.mxu1 %v16688_v49  ;;  %v16770_v49 = vld [vmem:[%s23033_s7 + $0x268] ss:$16 sps:$4 sm:$0xff]  }
 0x76a   :  { %13379 = vmatpush1.bf16.msra.mxu0 %v16683_v7  ;;  %v16775_v7 = vld [vmem:[%s23033_s7 + $0x284] ss:$16 sps:$4 sm:$0xff]  }
 0x76b   :  { %13551 = vmatpush1.bf16.msra.mxu1 %v16686_v28  ;;  %13380 = vmatprep.subr.bf16.mxu0 %v16691_v20  ;;  %v16778_v28 = vld [vmem:[%s23033_s7 + $0x28c] ss:$16 sps:$4 sm:$0xff]   ;;  %v16773_v20 = vld [vmem:[%s23033_s7 + $0x280] ss:$16 sps:$4 sm:$0xff]  }
 0x76c   :  { %13552 = vmatprep.subr.bf16.mxu1 %v16694_v8  ;;  %v16776_v8 = vld [vmem:[%s23033_s7 + $0x288] ss:$16 sps:$4 sm:$0xff]  }
 0x76e   :  { %13381 = vmatpush1.bf16.msra.mxu0 %v16689_v29  ;;  %v16781_v29 = vld [vmem:[%s23033_s7 + $0x2a4] ss:$16 sps:$4 sm:$0xff]  }
 0x76f   :  { %13553 = vmatpush1.bf16.msra.mxu1 %v16692_v42  ;;  %13382 = vmatprep.subr.bf16.mxu0 %v16697_v21  ;;  %v16784_v42 = vld [vmem:[%s23033_s7 + $0x2ac] ss:$16 sps:$4 sm:$0xff]   ;;  %v16779_v21 = vld [vmem:[%s23033_s7 + $0x2a0] ss:$16 sps:$4 sm:$0xff]  }
 0x770   :  { %13554 = vmatprep.subr.bf16.mxu1 %v16700_v51  ;;  %v16782_v51 = vld [vmem:[%s23033_s7 + $0x2a8] ss:$16 sps:$4 sm:$0xff]  }
 0x772   :  { %13383 = vmatpush1.bf16.msra.mxu0 %v16695_v46  ;;  %v16787_v46 = vld [vmem:[%s23033_s7 + $0x2c4] ss:$16 sps:$4 sm:$0xff]  }
 0x773   :  { %13555 = vmatpush1.bf16.msra.mxu1 %v16698_v48  ;;  %13384 = vmatprep.subr.bf16.mxu0 %v16703_v39  ;;  %v16790_v48 = vld [vmem:[%s23033_s7 + $0x2cc] ss:$16 sps:$4 sm:$0xff]   ;;  %v16785_v39 = vld [vmem:[%s23033_s7 + $0x2c0] ss:$16 sps:$4 sm:$0xff]  }
 0x774   :  { %13556 = vmatprep.subr.bf16.mxu1 %v16706_v36  ;;  %v16788_v36 = vld [vmem:[%s23033_s7 + $0x2c8] ss:$16 sps:$4 sm:$0xff]  }
 0x776   :  { %13385 = vmatpush1.bf16.msra.mxu0 %v16701_v63  ;;  %v16793_v63 = vld [vmem:[%s23033_s7 + $0x2e4] ss:$16 sps:$4 sm:$0xff]  }
 0x777   :  { %13557 = vmatpush1.bf16.msra.mxu1 %v16704_v30  ;;  %13386 = vmatprep.subr.bf16.mxu0 %v16709_v38  ;;  %v16796_v30 = vld [vmem:[%s23033_s7 + $0x2ec] ss:$16 sps:$4 sm:$0xff]   ;;  %v16791_v38 = vld [vmem:[%s23033_s7 + $0x2e0] ss:$16 sps:$4 sm:$0xff]  }
 0x778   :  { %13558 = vmatprep.subr.bf16.mxu1 %v16712_v54  ;;  %v16794_v54 = vld [vmem:[%s23033_s7 + $0x2e8] ss:$16 sps:$4 sm:$0xff]  }
 0x77a   :  { %13387 = vmatpush1.bf16.msra.mxu0 %v16707_v24  ;;  %v16799_v24 = vld [vmem:[%s23033_s7 + $0x304] ss:$16 sps:$4 sm:$0xff]  }
 0x77b   :  { %13559 = vmatpush1.bf16.msra.mxu1 %v16710_v58  ;;  %13388 = vmatprep.subr.bf16.mxu0 %v16715_v35  ;;  %v16802_v58 = vld [vmem:[%s23033_s7 + $0x30c] ss:$16 sps:$4 sm:$0xff]   ;;  %v16797_v35 = vld [vmem:[%s23033_s7 + $0x300] ss:$16 sps:$4 sm:$0xff]  }
 0x77c   :  { %13560 = vmatprep.subr.bf16.mxu1 %v16718_v1  ;;  %v16800_v1 = vld [vmem:[%s23033_s7 + $0x308] ss:$16 sps:$4 sm:$0xff]  }
 0x77e   :  { %13389 = vmatpush1.bf16.msra.mxu0 %v16713_v12  ;;  %v16805_v12 = vld [vmem:[%s23033_s7 + $0x324] ss:$16 sps:$4 sm:$0xff]  }
 0x77f   :  { %13561 = vmatpush1.bf16.msra.mxu1 %v16716_v41  ;;  %13390 = vmatprep.subr.bf16.mxu0 %v16721_v19  ;;  %v16808_v41 = vld [vmem:[%s23033_s7 + $0x32c] ss:$16 sps:$4 sm:$0xff]   ;;  %v16803_v19 = vld [vmem:[%s23033_s7 + $0x320] ss:$16 sps:$4 sm:$0xff]  }
 0x780   :  { %13562 = vmatprep.subr.bf16.mxu1 %v16724_v14  ;;  %v16806_v14 = vld [vmem:[%s23033_s7 + $0x328] ss:$16 sps:$4 sm:$0xff]  }
 0x782   :  { %13391 = vmatpush1.bf16.msra.mxu0 %v16719_v22  ;;  %v16811_v22 = vld [vmem:[%s23033_s7 + $0x344] ss:$16 sps:$4 sm:$0xff]  }
 0x783   :  { %13563 = vmatpush1.bf16.msra.mxu1 %v16722_v50  ;;  %13392 = vmatprep.subr.bf16.mxu0 %v16727_v52  ;;  %v16814_v50 = vld [vmem:[%s23033_s7 + $0x34c] ss:$16 sps:$4 sm:$0xff]   ;;  %v16809_v52 = vld [vmem:[%s23033_s7 + $0x340] ss:$16 sps:$4 sm:$0xff]  }
 0x784   :  { %13564 = vmatprep.subr.bf16.mxu1 %v16730_v4  ;;  %v16812_v4 = vld [vmem:[%s23033_s7 + $0x348] ss:$16 sps:$4 sm:$0xff]  }
 0x786   :  { %13393 = vmatpush1.bf16.msra.mxu0 %v16725_v56  ;;  %v16817_v56 = vld [vmem:[%s23033_s7 + $0x364] ss:$16 sps:$4 sm:$0xff]  }
 0x787   :  { %13565 = vmatpush1.bf16.msra.mxu1 %v16728_v32  ;;  %13394 = vmatprep.subr.bf16.mxu0 %v16733_v61  ;;  %v16820_v32 = vld [vmem:[%s23033_s7 + $0x36c] ss:$16 sps:$4 sm:$0xff]   ;;  %v16815_v61 = vld [vmem:[%s23033_s7 + $0x360] ss:$16 sps:$4 sm:$0xff]  }
 0x788   :  { %13566 = vmatprep.subr.bf16.mxu1 %v16736_v2  ;;  %v16818_v2 = vld [vmem:[%s23033_s7 + $0x368] ss:$16 sps:$4 sm:$0xff]  }
 0x78a   :  { %13395 = vmatpush1.bf16.msra.mxu0 %v16731_v17  ;;  %v16823_v17 = vld [vmem:[%s23033_s7 + $0x384] ss:$16 sps:$4 sm:$0xff]  }
 0x78b   :  { %13567 = vmatpush1.bf16.msra.mxu1 %v16734_v23  ;;  %13396 = vmatprep.subr.bf16.mxu0 %v16739_v18  ;;  %v16826_v23 = vld [vmem:[%s23033_s7 + $0x38c] ss:$16 sps:$4 sm:$0xff]   ;;  %v16821_v18 = vld [vmem:[%s23033_s7 + $0x380] ss:$16 sps:$4 sm:$0xff]  }
 0x78c   :  { %13568 = vmatprep.subr.bf16.mxu1 %v16742_v34  ;;  %v16824_v34 = vld [vmem:[%s23033_s7 + $0x388] ss:$16 sps:$4 sm:$0xff]  }
 0x78e   :  { %13397 = vmatpush1.bf16.msra.mxu0 %v16737_v57  ;;  %v16829_v57 = vld [vmem:[%s23033_s7 + $0x3a4] ss:$16 sps:$4 sm:$0xff]  }
 0x78f   :  { %13569 = vmatpush1.bf16.msra.mxu1 %v16740_v53  ;;  %13398 = vmatprep.subr.bf16.mxu0 %v16745_v47  ;;  %v16832_v53 = vld [vmem:[%s23033_s7 + $0x3ac] ss:$16 sps:$4 sm:$0xff]   ;;  %v16827_v47 = vld [vmem:[%s23033_s7 + $0x3a0] ss:$16 sps:$4 sm:$0xff]  }
 0x790   :  { %13570 = vmatprep.subr.bf16.mxu1 %v16748_v44  ;;  %v16830_v44 = vld [vmem:[%s23033_s7 + $0x3a8] ss:$16 sps:$4 sm:$0xff]  }
 0x792   :  { %13399 = vmatpush1.bf16.msra.mxu0 %v16743_v59  ;;  %v16835_v59 = vld [vmem:[%s23033_s7 + $0x3c4] ss:$16 sps:$4 sm:$0xff]  }
 0x793   :  { %13571 = vmatpush1.bf16.msra.mxu1 %v16746_v43  ;;  %13411 = vmatprep.subr.bf16.mxu0 %v16751_v60  ;;  %v16838_v43 = vld [vmem:[%s23033_s7 + $0x3cc] ss:$16 sps:$4 sm:$0xff]   ;;  %v16833_v60 = vld [vmem:[%s23033_s7 + $0x3c0] ss:$16 sps:$4 sm:$0xff]  }
 0x794   :  { %13583 = vmatprep.subr.bf16.mxu1 %v16754_v6  ;;  %v16836_v6 = vld [vmem:[%s23033_s7 + $0x3c8] ss:$16 sps:$4 sm:$0xff]  }
 0x795   :  { %13401 = vmatmul.mubr.bf16.vlgmr.msra.gmra.mrb[28].mxu0 %v21543_v40 }
 0x796   :  { %13573 = vmatmul.mubr.bf16.vlgmr.msra.gmra.mrb[28].mxu1 %v21543_v40  ;;  %13412 = vmatpush1.bf16.msra.mxu0 %v16749_v15  ;;  %v16766_v40 = vld [vmem:[%s23033_s7 + $0x24c] ss:$16 sps:$4 sm:$0xff]   ;;  %v16841_v15 = vld [vmem:[%s23033_s7 + $0x3e4] ss:$16 sps:$4 sm:$0xff]  }
 0x797   :  { %13443 = vmatprep.mubr.bf16.mxu0 %v21549_v0  ;;  %13584 = vmatpush1.bf16.msra.mxu1 %v16752_v55  ;;  %v16844_v55 = vld [vmem:[%s23033_s7 + $0x3ec] ss:$16 sps:$4 sm:$0xff]  }
 0x798   :  { %13615 = vmatprep.mubr.bf16.mxu1 %v21549_v0  ;;  %13413 = vmatprep.subr.bf16.mxu0 %v16757_v26  ;;  %v16769_v0 = vld [vmem:[%s23033_s7 + $0x264] ss:$16 sps:$4 sm:$0xff]   ;;  %v16839_v26 = vld [vmem:[%s23033_s7 + $0x3e0] ss:$16 sps:$4 sm:$0xff]  }
 0x799   :  { %13585 = vmatprep.subr.bf16.mxu1 %v16760_v3  ;;  %v16842_v3 = vld [vmem:[%s23033_s7 + $0x3e8] ss:$16 sps:$4 sm:$0xff]  }
 0x79a   :  { %13414 = vmatpush1.bf16.msra.mxu0 %v16755_v62  ;;  %v16847_v62 = vld [vmem:[%s23033_s7 + $0x404] ss:$16 sps:$4 sm:$0xff]  }
 0x79b   :  { %13586 = vmatpush1.bf16.msra.mxu1 %v16758_v13  ;;  %13415 = vmatprep.subr.bf16.mxu0 %v16763_v45  ;;  %v16850_v13 = vld [vmem:[%s23033_s7 + $0x40c] ss:$16 sps:$4 sm:$0xff]   ;;  %v16845_v45 = vld [vmem:[%s23033_s7 + $0x400] ss:$16 sps:$4 sm:$0xff]  }
 0x79c   :  { %13587 = vmatprep.subr.bf16.mxu1 %v16766_v40  ;;  %v16848_v40 = vld [vmem:[%s23033_s7 + $0x408] ss:$16 sps:$4 sm:$0xff]  }
 0x79e   :  { %13416 = vmatpush1.bf16.msra.mxu0 %v16761_v11  ;;  %v16853_v11 = vld [vmem:[%s23033_s7 + $0x424] ss:$16 sps:$4 sm:$0xff]  }
 0x79f   :  { %13588 = vmatpush1.bf16.msra.mxu1 %v16764_v27  ;;  %13417 = vmatprep.subr.bf16.mxu0 %v16769_v0  ;;  %v16856_v27 = vld [vmem:[%s23033_s7 + $0x42c] ss:$16 sps:$4 sm:$0xff]   ;;  %v16851_v0 = vld [vmem:[%s23033_s7 + $0x420] ss:$16 sps:$4 sm:$0xff]  }
 0x7a0   :  { %13589 = vmatprep.subr.bf16.mxu1 %v16772_v37  ;;  %v16854_v37 = vld [vmem:[%s23033_s7 + $0x428] ss:$16 sps:$4 sm:$0xff]  }
 0x7a2   :  { %13418 = vmatpush1.bf16.msra.mxu0 %v16767_v16  ;;  %v16859_v16 = vld [vmem:[%s23033_s7 + $0x444] ss:$16 sps:$4 sm:$0xff]  }
 0x7a3   :  { %13590 = vmatpush1.bf16.msra.mxu1 %v16770_v49  ;;  %13419 = vmatprep.subr.bf16.mxu0 %v16775_v7  ;;  %v16857_v49 = vld [vmem:[%s23033_s7 + $0x440] ss:$16 sps:$4 sm:$0xff]   ;;  %v16860_v7 = vld [vmem:[%s23033_s7 + $0x448] ss:$16 sps:$4 sm:$0xff]  }
 0x7a4   :  { %13591 = vmatprep.subr.bf16.mxu1 %v16778_v28  ;;  %v16865_v28 = vld [vmem:[%s23033_s7 + $0x464] ss:$16 sps:$4 sm:$0xff]  }
 0x7a6   :  { %13420 = vmatpush1.bf16.msra.mxu0 %v16773_v20  ;;  %v16868_v20 = vld [vmem:[%s23033_s7 + $0x46c] ss:$16 sps:$4 sm:$0xff]  }
 0x7a7   :  { %13592 = vmatpush1.bf16.msra.mxu1 %v16776_v8  ;;  %13421 = vmatprep.subr.bf16.mxu0 %v16781_v29  ;;  %v16863_v8 = vld [vmem:[%s23033_s7 + $0x460] ss:$16 sps:$4 sm:$0xff]   ;;  %v16866_v29 = vld [vmem:[%s23033_s7 + $0x468] ss:$16 sps:$4 sm:$0xff]  }
 0x7a8   :  { %13593 = vmatprep.subr.bf16.mxu1 %v16784_v42  ;;  %v16871_v42 = vld [vmem:[%s23033_s7 + $0x484] ss:$16 sps:$4 sm:$0xff]  }
 0x7aa   :  { %13422 = vmatpush1.bf16.msra.mxu0 %v16779_v21  ;;  %v16874_v21 = vld [vmem:[%s23033_s7 + $0x48c] ss:$16 sps:$4 sm:$0xff]  }
 0x7ab   :  { %13594 = vmatpush1.bf16.msra.mxu1 %v16782_v51  ;;  %13423 = vmatprep.subr.bf16.mxu0 %v16787_v46  ;;  %v16869_v51 = vld [vmem:[%s23033_s7 + $0x480] ss:$16 sps:$4 sm:$0xff]   ;;  %v16872_v46 = vld [vmem:[%s23033_s7 + $0x488] ss:$16 sps:$4 sm:$0xff]  }
 0x7ac   :  { %13595 = vmatprep.subr.bf16.mxu1 %v16790_v48  ;;  %v16877_v48 = vld [vmem:[%s23033_s7 + $0x4a4] ss:$16 sps:$4 sm:$0xff]  }
 0x7ae   :  { %13424 = vmatpush1.bf16.msra.mxu0 %v16785_v39  ;;  %v16880_v39 = vld [vmem:[%s23033_s7 + $0x4ac] ss:$16 sps:$4 sm:$0xff]  }
 0x7af   :  { %13596 = vmatpush1.bf16.msra.mxu1 %v16788_v36  ;;  %13425 = vmatprep.subr.bf16.mxu0 %v16793_v63  ;;  %v16875_v36 = vld [vmem:[%s23033_s7 + $0x4a0] ss:$16 sps:$4 sm:$0xff]   ;;  %v16878_v63 = vld [vmem:[%s23033_s7 + $0x4a8] ss:$16 sps:$4 sm:$0xff]  }
 0x7b0   :  { %13597 = vmatprep.subr.bf16.mxu1 %v16796_v30  ;;  %v16883_v30 = vld [vmem:[%s23033_s7 + $0x4c4] ss:$16 sps:$4 sm:$0xff]  }
 0x7b2   :  { %13426 = vmatpush1.bf16.msra.mxu0 %v16791_v38  ;;  %v16886_v38 = vld [vmem:[%s23033_s7 + $0x4cc] ss:$16 sps:$4 sm:$0xff]  }
 0x7b3   :  { %13598 = vmatpush1.bf16.msra.mxu1 %v16794_v54  ;;  %13427 = vmatprep.subr.bf16.mxu0 %v16799_v24  ;;  %v16881_v54 = vld [vmem:[%s23033_s7 + $0x4c0] ss:$16 sps:$4 sm:$0xff]   ;;  %v16884_v24 = vld [vmem:[%s23033_s7 + $0x4c8] ss:$16 sps:$4 sm:$0xff]  }
 0x7b4   :  { %13599 = vmatprep.subr.bf16.mxu1 %v16802_v58  ;;  %v16889_v58 = vld [vmem:[%s23033_s7 + $0x4e4] ss:$16 sps:$4 sm:$0xff]  }
 0x7b6   :  { %13428 = vmatpush1.bf16.msra.mxu0 %v16797_v35  ;;  %v16892_v35 = vld [vmem:[%s23033_s7 + $0x4ec] ss:$16 sps:$4 sm:$0xff]  }
 0x7b7   :  { %13600 = vmatpush1.bf16.msra.mxu1 %v16800_v1  ;;  %13429 = vmatprep.subr.bf16.mxu0 %v16805_v12  ;;  %v16887_v1 = vld [vmem:[%s23033_s7 + $0x4e0] ss:$16 sps:$4 sm:$0xff]   ;;  %v16890_v12 = vld [vmem:[%s23033_s7 + $0x4e8] ss:$16 sps:$4 sm:$0xff]  }
 0x7b8   :  { %13601 = vmatprep.subr.bf16.mxu1 %v16808_v41  ;;  %v16895_v41 = vld [vmem:[%s23033_s7 + $0x504] ss:$16 sps:$4 sm:$0xff]  }
 0x7ba   :  { %13430 = vmatpush1.bf16.msra.mxu0 %v16803_v19  ;;  %v16898_v19 = vld [vmem:[%s23033_s7 + $0x50c] ss:$16 sps:$4 sm:$0xff]  }
 0x7bb   :  { %13602 = vmatpush1.bf16.msra.mxu1 %v16806_v14  ;;  %13431 = vmatprep.subr.bf16.mxu0 %v16811_v22  ;;  %v16893_v14 = vld [vmem:[%s23033_s7 + $0x500] ss:$16 sps:$4 sm:$0xff]   ;;  %v16896_v22 = vld [vmem:[%s23033_s7 + $0x508] ss:$16 sps:$4 sm:$0xff]  }
 0x7bc   :  { %13603 = vmatprep.subr.bf16.mxu1 %v16814_v50  ;;  %v16901_v50 = vld [vmem:[%s23033_s7 + $0x524] ss:$16 sps:$4 sm:$0xff]  }
 0x7be   :  { %13432 = vmatpush1.bf16.msra.mxu0 %v16809_v52  ;;  %v16904_v52 = vld [vmem:[%s23033_s7 + $0x52c] ss:$16 sps:$4 sm:$0xff]  }
 0x7bf   :  { %13604 = vmatpush1.bf16.msra.mxu1 %v16812_v4  ;;  %13433 = vmatprep.subr.bf16.mxu0 %v16817_v56  ;;  %v16899_v4 = vld [vmem:[%s23033_s7 + $0x520] ss:$16 sps:$4 sm:$0xff]   ;;  %v16902_v56 = vld [vmem:[%s23033_s7 + $0x528] ss:$16 sps:$4 sm:$0xff]  }
 0x7c0   :  { %13605 = vmatprep.subr.bf16.mxu1 %v16820_v32  ;;  %v16907_v32 = vld [vmem:[%s23033_s7 + $0x544] ss:$16 sps:$4 sm:$0xff]  }
 0x7c2   :  { %13434 = vmatpush1.bf16.msra.mxu0 %v16815_v61  ;;  %v16910_v61 = vld [vmem:[%s23033_s7 + $0x54c] ss:$16 sps:$4 sm:$0xff]  }
 0x7c3   :  { %13606 = vmatpush1.bf16.msra.mxu1 %v16818_v2  ;;  %13435 = vmatprep.subr.bf16.mxu0 %v16823_v17  ;;  %v16905_v2 = vld [vmem:[%s23033_s7 + $0x540] ss:$16 sps:$4 sm:$0xff]   ;;  %v16908_v17 = vld [vmem:[%s23033_s7 + $0x548] ss:$16 sps:$4 sm:$0xff]  }
 0x7c4   :  { %13607 = vmatprep.subr.bf16.mxu1 %v16826_v23  ;;  %v16913_v23 = vld [vmem:[%s23033_s7 + $0x564] ss:$16 sps:$4 sm:$0xff]  }
 0x7c6   :  { %13436 = vmatpush1.bf16.msra.mxu0 %v16821_v18  ;;  %v16916_v18 = vld [vmem:[%s23033_s7 + $0x56c] ss:$16 sps:$4 sm:$0xff]  }
 0x7c7   :  { %13608 = vmatpush1.bf16.msra.mxu1 %v16824_v34  ;;  %13437 = vmatprep.subr.bf16.mxu0 %v16829_v57  ;;  %v16911_v34 = vld [vmem:[%s23033_s7 + $0x560] ss:$16 sps:$4 sm:$0xff]   ;;  %v16914_v57 = vld [vmem:[%s23033_s7 + $0x568] ss:$16 sps:$4 sm:$0xff]  }
 0x7c8   :  { %13609 = vmatprep.subr.bf16.mxu1 %v16832_v53  ;;  %v16919_v53 = vld [vmem:[%s23033_s7 + $0x584] ss:$16 sps:$4 sm:$0xff]  }
 0x7ca   :  { %13438 = vmatpush1.bf16.msra.mxu0 %v16827_v47  ;;  %v16922_v47 = vld [vmem:[%s23033_s7 + $0x58c] ss:$16 sps:$4 sm:$0xff]  }
 0x7cb   :  { %13610 = vmatpush1.bf16.msra.mxu1 %v16830_v44  ;;  %13439 = vmatprep.subr.bf16.mxu0 %v16835_v59  ;;  %v16917_v44 = vld [vmem:[%s23033_s7 + $0x580] ss:$16 sps:$4 sm:$0xff]   ;;  %v16920_v59 = vld [vmem:[%s23033_s7 + $0x588] ss:$16 sps:$4 sm:$0xff]  }
 0x7cc   :  { %13611 = vmatprep.subr.bf16.mxu1 %v16838_v43  ;;  %v16925_v43 = vld [vmem:[%s23033_s7 + $0x5a4] ss:$16 sps:$4 sm:$0xff]  }
 0x7ce   :  { %13440 = vmatpush1.bf16.msra.mxu0 %v16833_v60  ;;  %v16923_v60 = vld [vmem:[%s23033_s7 + $0x5a0] ss:$16 sps:$4 sm:$0xff]  }
 0x7cf   :  { %13612 = vmatpush1.bf16.msra.mxu1 %v16836_v6  ;;  %13441 = vmatprep.subr.bf16.mxu0 %v16841_v15  ;;  %v16928_v6 = vld [vmem:[%s23033_s7 + $0x5ac] ss:$16 sps:$4 sm:$0xff]   ;;  %v16926_v15 = vld [vmem:[%s23033_s7 + $0x5a8] ss:$16 sps:$4 sm:$0xff]  }
 0x7d0   :  { %13613 = vmatprep.subr.bf16.mxu1 %v16844_v55  ;;  %v16931_v55 = vld [vmem:[%s23033_s7 + $0x5c4] ss:$16 sps:$4 sm:$0xff]  }
 0x7d2   :  { %13442 = vmatpush1.bf16.msra.mxu0 %v16839_v26  ;;  %v16934_v26 = vld [vmem:[%s23033_s7 + $0x5cc] ss:$16 sps:$4 sm:$0xff]  }
 0x7d3   :  { %13614 = vmatpush1.bf16.msra.mxu1 %v16842_v3  ;;  %13454 = vmatprep.subr.bf16.mxu0 %v16847_v62  ;;  %v16929_v3 = vld [vmem:[%s23033_s7 + $0x5c0] ss:$16 sps:$4 sm:$0xff]   ;;  %v16932_v62 = vld [vmem:[%s23033_s7 + $0x5c8] ss:$16 sps:$4 sm:$0xff]  }
 0x7d4   :  { %13626 = vmatprep.subr.bf16.mxu1 %v16850_v13  ;;  %v16937_v13 = vld [vmem:[%s23033_s7 + $0x5e4] ss:$16 sps:$4 sm:$0xff]  }
 0x7d5   :  { %13444 = vmatmul.mubr.bf16.vlgmr.msra.gmra.mrb[28].mxu0 %v21545_v9 }
 0x7d6   :  { %13616 = vmatmul.mubr.bf16.vlgmr.msra.gmra.mrb[28].mxu1 %v21545_v9  ;;  %13455 = vmatpush1.bf16.msra.mxu0 %v16845_v45  ;;  %v16862_v9 = vld [vmem:[%s23033_s7 + $0x44c] ss:$16 sps:$4 sm:$0xff]  }
 0x7d7   :  { %13627 = vmatpush1.bf16.msra.mxu1 %v16848_v40  ;;  %13456 = vmatprep.subr.bf16.mxu0 %v16853_v11  ;;  %v16940_v45 = vld [vmem:[%s23033_s7 + $0x5ec] ss:$16 sps:$4 sm:$0xff]   ;;  %v16935_v40 = vld [vmem:[%s23033_s7 + $0x5e0] ss:$16 sps:$4 sm:$0xff]   ;;  %v16938_v11 = vld [vmem:[%s23033_s7 + $0x5e8] ss:$16 sps:$4 sm:$0xff]  }
 0x7d8   :  { %13628 = vmatprep.subr.bf16.mxu1 %v16856_v27  ;;  %v16943_v27 = vld [vmem:[%s23033_s7 + $0x604] ss:$16 sps:$4 sm:$0xff]  }
 0x7da   :  { %13457 = vmatpush1.bf16.msra.mxu0 %v16851_v0  ;;  %v16946_v0 = vld [vmem:[%s23033_s7 + $0x60c] ss:$16 sps:$4 sm:$0xff]  }
 0x7db   :  { %13629 = vmatpush1.bf16.msra.mxu1 %v16854_v37  ;;  %13458 = vmatprep.subr.bf16.mxu0 %v16859_v16  ;;  %v6400_v37 = vsub.s32 4, %v21478_v5  ;;  %v6408_v16 = vsub.s32 6, %v21478_v5 }
 0x7dc   :  { %13630 = vmatprep.subr.bf16.mxu1 %v16862_v9  ;;  %v6404_v9 = vsub.s32 5, %v21478_v5 }
 0x7de   :  { %13459 = vmatpush1.bf16.msra.mxu0 %v16857_v49  ;;  %v6412_v49 = vsub.s32 7, %v21478_v5 }
 0x7df   :  { %13631 = vmatpush1.bf16.msra.mxu1 %v16860_v7  ;;  %13460 = vmatprep.subr.bf16.mxu0 %v16865_v28  ;;  %v17094_v7 = vld [vmem:[%s23032_s6] sm:$0xff] }
 0x7e0   :  { %13632 = vmatprep.subr.bf16.mxu1 %v16868_v20  ;;  %v6401_v28 = vrot.slane %v17094_v7, %v6400_v37  ;;  %v6409_v20 = vrot.slane %v17094_v7, %v6408_v16  ;;  %v16979_v37 = vld [vmem:[%s23033_s7 + $0x6c4] ss:$16 sps:$4 sm:$0xff]   ;;  %v16982_v16 = vld [vmem:[%s23033_s7 + $0x6cc] ss:$16 sps:$4 sm:$0xff]  }
 0x7e2   :  { %13461 = vmatpush1.bf16.msra.mxu0 %v16863_v8  ;;  %v6405_v8 = vrot.slane %v17094_v7, %v6404_v9  ;;  %v16977_v9 = vld [vmem:[%s23033_s7 + $0x6c0] ss:$16 sps:$4 sm:$0xff]  }
 0x7e3   :  { %13633 = vmatpush1.bf16.msra.mxu1 %v16866_v29  ;;  %13462 = vmatprep.subr.bf16.mxu0 %v16871_v42  ;;  %v6413_v29 = vrot.slane %v17094_v7, %v6412_v49  ;;  %v16980_v49 = vld [vmem:[%s23033_s7 + $0x6c8] ss:$16 sps:$4 sm:$0xff]   ;;  %v16985_v7 = vld [vmem:[%s23033_s7 + $0x6e4] ss:$16 sps:$4 sm:$0xff]  }
 0x7e4   :  { %13634 = vmatprep.subr.bf16.mxu1 %v16874_v21 }
 0x7e6   :  { %13463 = vmatpush1.bf16.msra.mxu0 %v16869_v51 }
 0x7e7   :  { %13635 = vmatpush1.bf16.msra.mxu1 %v16872_v46  ;;  %13464 = vmatprep.subr.bf16.mxu0 %v16877_v48 }
 0x7e8   :  { %13636 = vmatprep.subr.bf16.mxu1 %v16880_v39 }
 0x7ea   :  { %13465 = vmatpush1.bf16.msra.mxu0 %v16875_v36 }
 0x7eb   :  { %13637 = vmatpush1.bf16.msra.mxu1 %v16878_v63  ;;  %13466 = vmatprep.subr.bf16.mxu0 %v16883_v30 }
 0x7ec   :  { %13638 = vmatprep.subr.bf16.mxu1 %v16886_v38 }
 0x7ee   :  { %13467 = vmatpush1.bf16.msra.mxu0 %v16881_v54 }
 0x7ef   :  { %13639 = vmatpush1.bf16.msra.mxu1 %v16884_v24  ;;  %13468 = vmatprep.subr.bf16.mxu0 %v16889_v58 }
 0x7f0   :  { %13640 = vmatprep.subr.bf16.mxu1 %v16892_v35 }
 0x7f2   :  { %13469 = vmatpush1.bf16.msra.mxu0 %v16887_v1 }
 0x7f3   :  { %13641 = vmatpush1.bf16.msra.mxu1 %v16890_v12  ;;  %13470 = vmatprep.subr.bf16.mxu0 %v16895_v41 }
 0x7f4   :  { %13642 = vmatprep.subr.bf16.mxu1 %v16898_v19 }
 0x7f6   :  { %13471 = vmatpush1.bf16.msra.mxu0 %v16893_v14 }
 0x7f7   :  { %13643 = vmatpush1.bf16.msra.mxu1 %v16896_v22  ;;  %13472 = vmatprep.subr.bf16.mxu0 %v16901_v50 }
 0x7f8   :  { %13644 = vmatprep.subr.bf16.mxu1 %v16904_v52 }
 0x7fa   :  { %13473 = vmatpush1.bf16.msra.mxu0 %v16899_v4 }
 0x7fb   :  { %13645 = vmatpush1.bf16.msra.mxu1 %v16902_v56  ;;  %13474 = vmatprep.subr.bf16.mxu0 %v16907_v32 }
 0x7fc   :  { %13646 = vmatprep.subr.bf16.mxu1 %v16910_v61 }
 0x7fe   :  { %13475 = vmatpush1.bf16.msra.mxu0 %v16905_v2 }
 0x7ff   :  { %13647 = vmatpush1.bf16.msra.mxu1 %v16908_v17  ;;  %13476 = vmatprep.subr.bf16.mxu0 %v16913_v23  ;;  %v16941_v17 = vld [vmem:[%s23033_s7 + $0x600] ss:$16 sps:$4 sm:$0xff]   ;;  %v16944_v23 = vld [vmem:[%s23033_s7 + $0x608] ss:$16 sps:$4 sm:$0xff]  }
 0x800   :  { %13648 = vmatprep.subr.bf16.mxu1 %v16916_v18 }
 0x802   :  { %13477 = vmatpush1.bf16.msra.mxu0 %v16911_v34  ;;  %v16949_v34 = vld [vmem:[%s23033_s7 + $0x624] ss:$16 sps:$4 sm:$0xff]  }
 0x803   :  { %13649 = vmatpush1.bf16.msra.mxu1 %v16914_v57  ;;  %13478 = vmatprep.subr.bf16.mxu0 %v16919_v53  ;;  %v16952_v57 = vld [vmem:[%s23033_s7 + $0x62c] ss:$16 sps:$4 sm:$0xff]   ;;  %v16947_v53 = vld [vmem:[%s23033_s7 + $0x620] ss:$16 sps:$4 sm:$0xff]  }
 0x804   :  { %13650 = vmatprep.subr.bf16.mxu1 %v16922_v47  ;;  %v16950_v47 = vld [vmem:[%s23033_s7 + $0x628] ss:$16 sps:$4 sm:$0xff]  }
 0x806   :  { %13479 = vmatpush1.bf16.msra.mxu0 %v16917_v44  ;;  %v16955_v44 = vld [vmem:[%s23033_s7 + $0x644] ss:$16 sps:$4 sm:$0xff]  }
 0x807   :  { %13651 = vmatpush1.bf16.msra.mxu1 %v16920_v59  ;;  %13480 = vmatprep.subr.bf16.mxu0 %v16925_v43  ;;  %v16958_v59 = vld [vmem:[%s23033_s7 + $0x64c] ss:$16 sps:$4 sm:$0xff]   ;;  %v16953_v43 = vld [vmem:[%s23033_s7 + $0x640] ss:$16 sps:$4 sm:$0xff]  }
 0x808   :  { %13652 = vmatprep.subr.bf16.mxu1 %v16928_v6  ;;  %v16961_v6 = vld [vmem:[%s23033_s7 + $0x664] ss:$16 sps:$4 sm:$0xff]  }
 0x80a   :  { %13481 = vmatpush1.bf16.msra.mxu0 %v16923_v60  ;;  %v16956_v60 = vld [vmem:[%s23033_s7 + $0x648] ss:$16 sps:$4 sm:$0xff]  }
 0x80b   :  { %13653 = vmatpush1.bf16.msra.mxu1 %v16926_v15  ;;  %13482 = vmatprep.subr.bf16.mxu0 %v16931_v55  ;;  %v16964_v15 = vld [vmem:[%s23033_s7 + $0x66c] ss:$16 sps:$4 sm:$0xff]   ;;  %v16959_v55 = vld [vmem:[%s23033_s7 + $0x660] ss:$16 sps:$4 sm:$0xff]  }
 0x80c   :  { %13654 = vmatprep.subr.bf16.mxu1 %v16934_v26  ;;  %v16962_v26 = vld [vmem:[%s23033_s7 + $0x668] ss:$16 sps:$4 sm:$0xff]  }
 0x80e   :  { %13483 = vmatpush1.bf16.msra.mxu0 %v16929_v3  ;;  %v16967_v3 = vld [vmem:[%s23033_s7 + $0x684] ss:$16 sps:$4 sm:$0xff]  }
 0x80f   :  { %13655 = vmatpush1.bf16.msra.mxu1 %v16932_v62  ;;  %13484 = vmatprep.subr.bf16.mxu0 %v16937_v13  ;;  %v16970_v62 = vld [vmem:[%s23033_s7 + $0x68c] ss:$16 sps:$4 sm:$0xff]   ;;  %v16965_v13 = vld [vmem:[%s23033_s7 + $0x680] ss:$16 sps:$4 sm:$0xff]  }
 0x810   :  { %13656 = vmatprep.subr.bf16.mxu1 %v16940_v45  ;;  %v16968_v45 = vld [vmem:[%s23033_s7 + $0x688] ss:$16 sps:$4 sm:$0xff]  }
 0x812   :  { %13485 = vmatpush1.bf16.msra.mxu0 %v16935_v40  ;;  %v16973_v40 = vld [vmem:[%s23033_s7 + $0x6a4] ss:$16 sps:$4 sm:$0xff]  }
 0x813   :  { %13657 = vmatpush1.bf16.msra.mxu1 %v16938_v11  ;;  %13497 = vmatprep.subr.bf16.mxu0 %v16943_v27  ;;  %v16976_v11 = vld [vmem:[%s23033_s7 + $0x6ac] ss:$16 sps:$4 sm:$0xff]   ;;  %v16971_v27 = vld [vmem:[%s23033_s7 + $0x6a0] ss:$16 sps:$4 sm:$0xff]  }
 0x814   :  { %13669 = vmatprep.subr.bf16.mxu1 %v16946_v0  ;;  %v16974_v0 = vld [vmem:[%s23033_s7 + $0x6a8] ss:$16 sps:$4 sm:$0xff]  }
 0x828   :  { %v11476_v42 = vpop.f32.mrb[24].mxu0 }
 0x829   :  { %v16369_v21 = vadd.f32 %v11476_v42, %v6401_v28  ;;  %v11777_v51 = vpop.f32.mrb[24].mxu1  ;;  %v11478_v46 = vpop.f32.mrb[25].mxu0  ;;  %v16994_v42 = vld [vmem:[%s23033_s7 + $0x70c] ss:$16 sps:$4 sm:$0xff]  }
 0x82a   :  { %v16373_v48 = vadd.f32 %v11777_v51, %v6409_v20  ;;  %v16370_v39 = vadd.f32 %v11478_v46, %v6405_v8  ;;  %v11779_v36 = vpop.f32.mrb[25].mxu1  ;;  %v11480_v63 = vpop.f32.mrb[26].mxu0  ;;  %v16992_v51 = vld [vmem:[%s23033_s7 + $0x708] ss:$16 sps:$4 sm:$0xff]   ;;  %v16997_v46 = vld [vmem:[%s23033_s7 + $0x724] ss:$16 sps:$4 sm:$0xff]  }
 0x82b   :  { %v16374_v30 = vadd.f32 %v11779_v36, %v6413_v29  ;;  %v16371_v38 = vadd.f32 %v11480_v63, %v6401_v28  ;;  %v11781_v54 = vpop.f32.mrb[26].mxu1  ;;  %v11482_v24 = vpop.f32.mrb[27].mxu0  ;;  %v11790_v12 = vmax.f32 %v16369_v21, 0.0  ;;  %v16988_v28 = vld [vmem:[%s23033_s7 + $0x6ec] ss:$16 sps:$4 sm:$0xff]  }
 0x82c   :  { %v16375_v58 = vadd.f32 %v11781_v54, %v6409_v20  ;;  %v16372_v35 = vadd.f32 %v11482_v24, %v6405_v8  ;;  %v11783_v1 = vpop.f32.mrb[27].mxu1  ;;  %v11792_v14 = vmax.f32 %v16373_v48, 0.0  ;;  %v11791_v22 = vmax.f32 %v16370_v39, 0.0  ;;  %v16983_v20 = vld [vmem:[%s23033_s7 + $0x6e0] ss:$16 sps:$4 sm:$0xff]  }
 0x82d   :  { %v11798_v41 = vmax.f32 %v16371_v38, 0.0  ;;  %v16376_v19 = vadd.f32 %v11783_v1, %v6413_v29  ;;  %v11793_v4 = vmax.f32 %v16374_v30, 0.0  ;;  %v16986_v8 = vld [vmem:[%s23033_s7 + $0x6e8] ss:$16 sps:$4 sm:$0xff]   ;;  %v16991_v29 = vld [vmem:[%s23033_s7 + $0x704] ss:$16 sps:$4 sm:$0xff]  }
 0x82e   :  { %v11800_v50 = vmax.f32 %v16375_v58, 0.0  ;;  %v11799_v52 = vmax.f32 %v16372_v35, 0.0  ;;  %v16989_v21 = vld [vmem:[%s23033_s7 + $0x700] ss:$16 sps:$4 sm:$0xff]   ;;  %v17000_v48 = vld [vmem:[%s23033_s7 + $0x72c] ss:$16 sps:$4 sm:$0xff]  }
 0x82f   :  { %v11806_v56 = vpack.c.bf16 %v11798_v41, %v11790_v12  ;;  %v11801_v32 = vmax.f32 %v16376_v19, 0.0  ;;  %v16995_v39 = vld [vmem:[%s23033_s7 + $0x720] ss:$16 sps:$4 sm:$0xff]   ;;  %v16998_v36 = vld [vmem:[%s23033_s7 + $0x728] ss:$16 sps:$4 sm:$0xff]  }
 0x830   :  { %v22714_v61 = vpack.c.bf16 %v11800_v50, %v11792_v14  ;;  %v11807_v2 = vpack.c.bf16 %v11799_v52, %v11791_v22  ;;  %v17003_v63 = vld [vmem:[%s23033_s7 + $0x744] ss:$16 sps:$4 sm:$0xff]   ;;  %v17006_v30 = vld [vmem:[%s23033_s7 + $0x74c] ss:$16 sps:$4 sm:$0xff]   ;;  %v17001_v38 = vld [vmem:[%s23033_s7 + $0x740] ss:$16 sps:$4 sm:$0xff]  }
 0x831   :  { %v11809_v18 = vpack.c.bf16 %v11801_v32, %v11793_v4  ;;  %v17004_v54 = vld [vmem:[%s23033_s7 + $0x748] ss:$16 sps:$4 sm:$0xff]   ;;  %v17009_v24 = vld [vmem:[%s23033_s7 + $0x764] ss:$16 sps:$4 sm:$0xff]   ;;  %v17012_v58 = vld [vmem:[%s23033_s7 + $0x76c] ss:$16 sps:$4 sm:$0xff]  }
 0x832   :  { %13486 = vmatprep.mubr.bf16.mxu0 %v11807_v2  ;;  %13658 = vmatprep.mubr.bf16.mxu1 %v11807_v2  ;;  %v17007_v35 = vld [vmem:[%s23033_s7 + $0x760] ss:$16 sps:$4 sm:$0xff]   ;;  %v17010_v1 = vld [vmem:[%s23033_s7 + $0x768] ss:$16 sps:$4 sm:$0xff]   ;;  %v17015_v12 = vld [vmem:[%s23033_s7 + $0x784] ss:$16 sps:$4 sm:$0xff]  }
 0x833   :  { %13487 = vmatmul.mubr.bf16.vlgmr.msra.gmra.mrb[28].mxu0 %v11806_v56  ;;  %13659 = vmatmul.mubr.bf16.vlgmr.msra.gmra.mrb[28].mxu1 %v11806_v56  ;;  %v17018_v41 = vld [vmem:[%s23033_s7 + $0x78c] ss:$16 sps:$4 sm:$0xff]   ;;  %v17013_v19 = vld [vmem:[%s23033_s7 + $0x780] ss:$16 sps:$4 sm:$0xff]   ;;  %v17016_v14 = vld [vmem:[%s23033_s7 + $0x788] ss:$16 sps:$4 sm:$0xff]  }
 0x834   :  { %13498 = vmatpush1.bf16.msra.mxu0 %v16941_v17  ;;  %13670 = vmatpush1.bf16.msra.mxu1 %v16944_v23  ;;  %v17021_v22 = vld [vmem:[%s23033_s7 + $0x7a4] ss:$16 sps:$4 sm:$0xff]   ;;  %v17024_v50 = vld [vmem:[%s23033_s7 + $0x7ac] ss:$16 sps:$4 sm:$0xff]   ;;  %v17019_v52 = vld [vmem:[%s23033_s7 + $0x7a0] ss:$16 sps:$4 sm:$0xff]  }
 0x835   :  { %13529 = vmatprep.mubr.bf16.mxu0 %v11809_v18  ;;  %13701 = vmatprep.mubr.bf16.mxu1 %v11809_v18  ;;  %v17022_v4 = vld [vmem:[%s23033_s7 + $0x7a8] ss:$16 sps:$4 sm:$0xff]   ;;  %v17027_v56 = vld [vmem:[%s23033_s7 + $0x7c4] ss:$16 sps:$4 sm:$0xff]   ;;  %v17030_v32 = vld [vmem:[%s23033_s7 + $0x7cc] ss:$16 sps:$4 sm:$0xff]  }
 0x836   :  { %13499 = vmatprep.subr.bf16.mxu0 %v16949_v34  ;;  %13671 = vmatprep.subr.bf16.mxu1 %v16952_v57  ;;  %v17025_v2 = vld [vmem:[%s23033_s7 + $0x7c0] ss:$16 sps:$4 sm:$0xff]   ;;  %v17028_v17 = vld [vmem:[%s23033_s7 + $0x7c8] ss:$16 sps:$4 sm:$0xff]   ;;  %v17033_v23 = vld [vmem:[%s23033_s7 + $0x7e4] ss:$16 sps:$4 sm:$0xff]  }
 0x837   :  { %v17036_v18 = vld [vmem:[%s23033_s7 + $0x7ec] ss:$16 sps:$4 sm:$0xff]   ;;  %v17031_v34 = vld [vmem:[%s23033_s7 + $0x7e0] ss:$16 sps:$4 sm:$0xff]   ;;  %v17034_v57 = vld [vmem:[%s23033_s7 + $0x7e8] ss:$16 sps:$4 sm:$0xff]  }
 0x838   :  { %13500 = vmatpush1.bf16.msra.mxu0 %v16947_v53  ;;  %13672 = vmatpush1.bf16.msra.mxu1 %v16950_v47  ;;  %v17037_v53 = vld [vmem:[%s23034_s9 + $0x40] sm:$0xff]  }
 0x839   :  { %13501 = vmatprep.subr.bf16.mxu0 %v16955_v44  ;;  %13673 = vmatprep.subr.bf16.mxu1 %v16958_v59  ;;  %v17038_v47 = vld [vmem:[%s23034_s9 + $0xc0] sm:$0xff]  }
 0x83a   :  { %v17039_v44 = vld [vmem:[%s23034_s9] sm:$0xff]  }
 0x83b   :  { %v17040_v59 = vld [vmem:[%s23034_s9 + $0x80] sm:$0xff]  }
 0x83c   :  { %13502 = vmatpush1.bf16.msra.mxu0 %v16953_v43  ;;  %13674 = vmatpush1.bf16.msra.mxu1 %v16956_v60  ;;  %v17041_v43 = vld [vmem:[%s23034_s9 + $0x48] sm:$0xff]  }
 0x83d   :  { %13503 = vmatprep.subr.bf16.mxu0 %v16961_v6  ;;  %13675 = vmatprep.subr.bf16.mxu1 %v16964_v15  ;;  %v17042_v60 = vld [vmem:[%s23034_s9 + $0xc8] sm:$0xff]  }
 0x83e   :  { %v17043_v6 = vld [vmem:[%s23034_s9 + $0x8] sm:$0xff]  }
 0x83f   :  { %v17044_v15 = vld [vmem:[%s23034_s9 + $0x88] sm:$0xff]  }
 0x840   :  { %13504 = vmatpush1.bf16.msra.mxu0 %v16959_v55  ;;  %13676 = vmatpush1.bf16.msra.mxu1 %v16962_v26  ;;  %v17045_v55 = vld [vmem:[%s23034_s9 + $0x50] sm:$0xff]  }
 0x841   :  { %13505 = vmatprep.subr.bf16.mxu0 %v16967_v3  ;;  %13677 = vmatprep.subr.bf16.mxu1 %v16970_v62  ;;  %v17047_v26 = vld [vmem:[%s23034_s9 + $0x10] sm:$0xff]   ;;  %v17049_v62 = vld [vmem:[%s23034_s9 + $0x58] sm:$0xff]  }
 0x842   :  { %v17048_v3 = vld [vmem:[%s23034_s9 + $0x90] sm:$0xff]  }
 0x844   :  { %13506 = vmatpush1.bf16.msra.mxu0 %v16965_v13  ;;  %13678 = vmatpush1.bf16.msra.mxu1 %v16968_v45  ;;  %v17050_v13 = vld [vmem:[%s23034_s9 + $0xd8] sm:$0xff]  }
 0x845   :  { %13507 = vmatprep.subr.bf16.mxu0 %v16973_v40  ;;  %13679 = vmatprep.subr.bf16.mxu1 %v16976_v11  ;;  %v17051_v45 = vld [vmem:[%s23034_s9 + $0x18] sm:$0xff]   ;;  %v17053_v11 = vld [vmem:[%s23034_s9 + $0x60] sm:$0xff]  }
 0x846   :  { %v17052_v40 = vld [vmem:[%s23034_s9 + $0x98] sm:$0xff]  }
 0x848   :  { %13508 = vmatpush1.bf16.msra.mxu0 %v16971_v27  ;;  %13680 = vmatpush1.bf16.msra.mxu1 %v16974_v0  ;;  %v17054_v27 = vld [vmem:[%s23034_s9 + $0xe0] sm:$0xff]  }
 0x849   :  { %13509 = vmatprep.subr.bf16.mxu0 %v16979_v37  ;;  %13681 = vmatprep.subr.bf16.mxu1 %v16982_v16  ;;  %v17055_v0 = vld [vmem:[%s23034_s9 + $0x20] sm:$0xff]   ;;  %v17057_v16 = vld [vmem:[%s23034_s9 + $0x68] sm:$0xff]  }
 0x84a   :  { %v17056_v37 = vld [vmem:[%s23034_s9 + $0xa0] sm:$0xff]  }
 0x84c   :  { %13510 = vmatpush1.bf16.msra.mxu0 %v16977_v9  ;;  %13682 = vmatpush1.bf16.msra.mxu1 %v16980_v49  ;;  %v17058_v9 = vld [vmem:[%s23034_s9 + $0xe8] sm:$0xff]  }
 0x84d   :  { %13511 = vmatprep.subr.bf16.mxu0 %v16985_v7  ;;  %13683 = vmatprep.subr.bf16.mxu1 %v16988_v28  ;;  %v17059_v49 = vld [vmem:[%s23034_s9 + $0x28] sm:$0xff]   ;;  %v17061_v28 = vld [vmem:[%s23034_s9 + $0x70] sm:$0xff]  }
 0x84e   :  { %v17060_v7 = vld [vmem:[%s23034_s9 + $0xa8] sm:$0xff]  }
 0x850   :  { %13512 = vmatpush1.bf16.msra.mxu0 %v16983_v20  ;;  %13684 = vmatpush1.bf16.msra.mxu1 %v16986_v8  ;;  %v17062_v20 = vld [vmem:[%s23034_s9 + $0xf0] sm:$0xff]  }
 0x851   :  { %13513 = vmatprep.subr.bf16.mxu0 %v16991_v29  ;;  %13685 = vmatprep.subr.bf16.mxu1 %v16994_v42  ;;  %v17063_v8 = vld [vmem:[%s23034_s9 + $0x30] sm:$0xff]   ;;  %v17065_v42 = vld [vmem:[%s23034_s9 + $0x78] sm:$0xff]  }
 0x852   :  { %v17064_v29 = vld [vmem:[%s23034_s9 + $0xb0] sm:$0xff]  }
 0x854   :  { %13514 = vmatpush1.bf16.msra.mxu0 %v16989_v21  ;;  %13686 = vmatpush1.bf16.msra.mxu1 %v16992_v51  ;;  %v17066_v21 = vld [vmem:[%s23034_s9 + $0xf8] sm:$0xff]  }
 0x855   :  { %13515 = vmatprep.subr.bf16.mxu0 %v16997_v46  ;;  %13687 = vmatprep.subr.bf16.mxu1 %v17000_v48  ;;  %v17067_v51 = vld [vmem:[%s23034_s9 + $0x38] sm:$0xff]   ;;  %v12066_v48 = vld [vmem:[%s23035_s8] sm:$0xf] }
 0x856   :  { %v17068_v46 = vld [vmem:[%s23034_s9 + $0xb8] sm:$0xff]  }
 0x858   :  { %13516 = vmatpush1.bf16.msra.mxu0 %v16995_v39  ;;  %13688 = vmatpush1.bf16.msra.mxu1 %v16998_v36  ;;  %v12071_v39 = vrot.slane %v12066_v48, %v6384_v31  ;;  %v12079_v36 = vrot.slane %v12066_v48, %v6392_v10 }
 0x859   :  { %13517 = vmatprep.subr.bf16.mxu0 %v17003_v63  ;;  %13689 = vmatprep.subr.bf16.mxu1 %v17006_v30  ;;  %v12075_v63 = vrot.slane %v12066_v48, %v6388_v25  ;;  %v12083_v30 = vrot.slane %v12066_v48, %v6396_v33 }
 0x85c   :  { %13518 = vmatpush1.bf16.msra.mxu0 %v17001_v38  ;;  %13690 = vmatpush1.bf16.msra.mxu1 %v17004_v54 }
 0x85d   :  { %13519 = vmatprep.subr.bf16.mxu0 %v17009_v24  ;;  %13691 = vmatprep.subr.bf16.mxu1 %v17012_v58 }
 0x860   :  { %13520 = vmatpush1.bf16.msra.mxu0 %v17007_v35  ;;  %13692 = vmatpush1.bf16.msra.mxu1 %v17010_v1 }
 0x861   :  { %13521 = vmatprep.subr.bf16.mxu0 %v17015_v12  ;;  %13693 = vmatprep.subr.bf16.mxu1 %v17018_v41 }
 0x864   :  { %13522 = vmatpush1.bf16.msra.mxu0 %v17013_v19  ;;  %13694 = vmatpush1.bf16.msra.mxu1 %v17016_v14 }
 0x865   :  { %13523 = vmatprep.subr.bf16.mxu0 %v17021_v22  ;;  %13695 = vmatprep.subr.bf16.mxu1 %v17024_v50 }
 0x868   :  { %13524 = vmatpush1.bf16.msra.mxu0 %v17019_v52  ;;  %13696 = vmatpush1.bf16.msra.mxu1 %v17022_v4 }
 0x869   :  { %13525 = vmatprep.subr.bf16.mxu0 %v17027_v56  ;;  %13697 = vmatprep.subr.bf16.mxu1 %v17030_v32 }
 0x86c   :  { %13526 = vmatpush1.bf16.msra.mxu0 %v17025_v2  ;;  %13698 = vmatpush1.bf16.msra.mxu1 %v17028_v17 }
 0x86d   :  { %13527 = vmatprep.subr.bf16.mxu0 %v17033_v23  ;;  %13699 = vmatprep.subr.bf16.mxu1 %v17036_v18 }
 0x870   :  { %13528 = vmatpush1.bf16.msra.mxu0 %v17031_v34  ;;  %13700 = vmatpush1.bf16.msra.mxu1 %v17034_v57 }
 0x871   :  { %15917 = vmatprep.subr.bf16.mxu0 %v17037_v53  ;;  %15939 = vmatprep.subr.bf16.mxu1 %v17038_v47 }
 0x873   :  { %13530 = vmatmul.mubr.bf16.vlgmr.msra.gmra.mrb[28].mxu0 %v22714_v61  ;;  %13702 = vmatmul.mubr.bf16.vlgmr.msra.gmra.mrb[28].mxu1 %v22714_v61  ;;  %v17046_v61 = vld [vmem:[%s23034_s9 + $0xd0] sm:$0xff]  }
 0x874   :  { %15918 = vmatpush3.bf16.msra.mxu0 %v17039_v44  ;;  %15940 = vmatpush3.bf16.msra.mxu1 %v17040_v59  ;;  %v15684_v59 = vld [vmem:[%s23036_s10] ss:$0 sm:$0xff] }
 0x875   :  { %15919 = vmatprep.subr.bf16.mxu0 %v17041_v43  ;;  %15941 = vmatprep.subr.bf16.mxu1 %v17042_v60 }
 0x878   :  { %15920 = vmatpush3.bf16.msra.mxu0 %v17043_v6  ;;  %15942 = vmatpush3.bf16.msra.mxu1 %v17044_v15 }
 0x879   :  { %15921 = vmatprep.subr.bf16.mxu0 %v17045_v55  ;;  %15943 = vmatprep.subr.bf16.mxu1 %v17046_v61 }
 0x87c   :  { %15922 = vmatpush3.bf16.msra.mxu0 %v17047_v26  ;;  %15944 = vmatpush3.bf16.msra.mxu1 %v17048_v3 }
 0x87d   :  { %15923 = vmatprep.subr.bf16.mxu0 %v17049_v62  ;;  %15945 = vmatprep.subr.bf16.mxu1 %v17050_v13 }
 0x880   :  { %15924 = vmatpush3.bf16.msra.mxu0 %v17051_v45  ;;  %15946 = vmatpush3.bf16.msra.mxu1 %v17052_v40 }
 0x881   :  { %15925 = vmatprep.subr.bf16.mxu0 %v17053_v11  ;;  %15947 = vmatprep.subr.bf16.mxu1 %v17054_v27 }
 0x884   :  { %15926 = vmatpush3.bf16.msra.mxu0 %v17055_v0  ;;  %15948 = vmatpush3.bf16.msra.mxu1 %v17056_v37 }
 0x885   :  { %15927 = vmatprep.subr.bf16.mxu0 %v17057_v16  ;;  %15949 = vmatprep.subr.bf16.mxu1 %v17058_v9 }
 0x888   :  { %15928 = vmatpush3.bf16.msra.mxu0 %v17059_v49  ;;  %15950 = vmatpush3.bf16.msra.mxu1 %v17060_v7 }
 0x889   :  { %15929 = vmatprep.subr.bf16.mxu0 %v17061_v28  ;;  %15951 = vmatprep.subr.bf16.mxu1 %v17062_v20 }
 0x88c   :  { %15930 = vmatpush3.bf16.msra.mxu0 %v17063_v8  ;;  %15952 = vmatpush3.bf16.msra.mxu1 %v17064_v29 }
 0x88d   :  { %15931 = vmatprep.subr.bf16.mxu0 %v17065_v42  ;;  %15953 = vmatprep.subr.bf16.mxu1 %v17066_v21 }
 0x890   :  { %15932 = vmatpush3.bf16.msra.mxu0 %v17067_v51  ;;  %15954 = vmatpush3.bf16.msra.mxu1 %v17068_v46 }
 0x946   :  { %v13531_v38 = vpop.f32.mrb[28].mxu0  ;;  %v13703_v54 = vpop.f32.mrb[28].mxu1 }
 0x947   :  { %v16377_v24 = vadd.f32 %v13531_v38, %v12071_v39  ;;  %v16381_v58 = vadd.f32 %v13703_v54, %v12079_v36  ;;  %v13533_v35 = vpop.f32.mrb[29].mxu0  ;;  %v13705_v1 = vpop.f32.mrb[29].mxu1 }
 0x948   :  { %v16378_v12 = vadd.f32 %v13533_v35, %v12075_v63  ;;  %v16382_v41 = vadd.f32 %v13705_v1, %v12083_v30  ;;  %v13535_v19 = vpop.f32.mrb[30].mxu0  ;;  %v13707_v14 = vpop.f32.mrb[30].mxu1 }
 0x949   :  { %v16379_v31 = vadd.f32 %v13535_v19, %v12071_v39  ;;  %v16383_v22 = vadd.f32 %v13707_v14, %v12079_v36  ;;  %v13537_v50 = vpop.f32.mrb[31].mxu0  ;;  %v13709_v10 = vpop.f32.mrb[31].mxu1  ;;  %v13712_v25 = vmax.f32 %v16377_v24, 0.0  ;;  %v13714_v56 = vmax.f32 %v16381_v58, 0.0 }
 0x94a   :  { %v16380_v52 = vadd.f32 %v13537_v50, %v12075_v63  ;;  %v16384_v4 = vadd.f32 %v13709_v10, %v12083_v30  ;;  %v13713_v32 = vmax.f32 %v16378_v12, 0.0  ;;  %v13715_v2 = vmax.f32 %v16382_v41, 0.0 }
 0x94b   :  { %v13716_v5 = vmax.f32 %v16379_v31, 0.0  ;;  %v13718_v33 = vmax.f32 %v16383_v22, 0.0 }
 0x94c   :  { %v13717_v17 = vmax.f32 %v16380_v52, 0.0  ;;  %v13719_v23 = vmax.f32 %v16384_v4, 0.0 }
 0x94d   :  { %v13720_v18 = vpack.c.bf16 %v13716_v5, %v13712_v25  ;;  %v13722_v34 = vpack.c.bf16 %v13718_v33, %v13714_v56 }
 0x94e   :  { %v13721_v57 = vpack.c.bf16 %v13717_v17, %v13713_v32  ;;  %v13723_v53 = vpack.c.bf16 %v13719_v23, %v13715_v2 }
 0x950   :  { %14019 = vmatprep.mubr.bf16.mxu0 %v13721_v57  ;;  %14060 = vmatprep.mubr.bf16.mxu1 %v13723_v53 }
 0x951   :  { %14020 = vmatmul.mubr.bf16.vlgmr.msra.gmra.mrb[32].mxu0 %v13720_v18  ;;  %14061 = vmatmul.mubr.bf16.vlgmr.msra.gmra.mrb[32].mxu1 %v13722_v34 }
 0xa24   :  { %v15933_v47 = vpop.f32.mrb[32].mxu0  ;;  %v15955_v44 = vpop.f32.mrb[32].mxu1 }
 0xa25   :  { %v15934_v43 = vpop.f32.mrb[33].mxu0  ;;  %v15956_v60 = vpop.f32.mrb[33].mxu1 }
 0xa26   :  { %v15935_v6 = vadd.f32 %v15934_v43, %v15933_v47  ;;  %v15957_v15 = vadd.f32 %v15956_v60, %v15955_v44  ;;  %v15936_v55 = vpop.f32.mrb[34].mxu0  ;;  %v15958_v61 = vpop.f32.mrb[34].mxu1 }
 0xa27   :  { %v15937_v26 = vpop.f32.mrb[35].mxu0  ;;  %v15959_v3 = vpop.f32.mrb[35].mxu1 }
 0xa28   :  { %v14022_v62 = vadd.f32 %v15935_v6, %v15684_v59  ;;  %v15938_v13 = vadd.f32 %v15937_v26, %v15936_v55  ;;  %v15960_v45 = vadd.f32 %v15959_v3, %v15958_v61 }
 0xa2a   :  { %v14063_v40 = vadd.f32 %v15957_v15, %v14022_v62  ;;  %v14025_v11 = vadd.f32 %v15938_v13, %v15684_v59 }
 0xa2c   :  { %v14066_v27 = vadd.f32 %v15960_v45, %v14025_v11  ;;  %v14070_v0 = vsel %vm14069_vm8, %v14063_v40, -inf }
 0xa2d   :  { %14071 = vmax.xlane.f32.xlu1 %v14070_v0 }
 0xa2e   :  { %v14073_v37 = vsel %vm14069_vm8, %v14066_v27, -inf }
 0xa2f   :  { %14074 = vmax.xlane.f32.xlu0 %v14073_v37 }
 0xaba   :  { %v14072_v16 = vpop.xlane.xlu1 %14071 }
 0xabb   :  { %v14076_v9 = vsub.f32 %v14063_v40, %v14072_v16 }
 0xabc   :  { %v14075_v49 = vpop.xlane.xlu0 %14074 }
 0xabd   :  { %v14078_v7 = vmul.f32 1.442695, %v14076_v9  ;;  %v14077_v28 = vsub.f32 %v14066_v27, %v14075_v49 }
 0xabf   :  { %17069 = vpow2.f32 %v14078_v7  ;;  %v14080_v20 = vmul.f32 1.442695, %v14077_v28 }
 0xac1   :  { %17071 = vpow2.f32 %v14080_v20 }
 0xac9   :  { %v17070_v8 = vpop.eup %17069 }
 0xaca   :  { %v14082_v29 = vsel %vm14069_vm8, %v17070_v8, 0.0 }
 0xacb   :  { %v17072_v42 = vpop.eup %17071  ;;  %14083 = vadd.xlane.f32.xlu0 %v14082_v29 }
 0xacc   :  { %v14085_v21 = vsel %vm14069_vm8, %v17072_v42, 0.0 }
 0xacd   :  { %14086 = vadd.xlane.f32.xlu1 %v14085_v21 }
 0xb58   :  { %v14084_v51 = vpop.xlane.xlu0 %14083 }
 0xb59   :  { %17073 = vrcp.f32 %v14084_v51 }
 0xb5a   :  { %v14087_v46 = vpop.xlane.xlu1 %14086 }
 0xb5b   :  { %17075 = vrcp.f32 %v14087_v46 }
 0xb63   :  { %v17074_v48 = vpop.eup %17073 }
 0xb64   :  { %v14090_v39 = vmul.f32 %v17074_v48, %v17070_v8 }
 0xb65   :  { %v17076_v36 = vpop.eup %17075 }
 0xb66   :  { %14092 = vst.msk [vmem:[%s23037_s11] sm:$0xff] %vm14069_vm8, %v14090_v39  ;;  %v14091_v63 = vmul.f32 %v17076_v36, %v17072_v42 }
 0xb68   :  { %14093 = vst.msk [vmem:[%s23037_s11 + $0x8] sm:$0xff] %vm14069_vm8, %v14091_v63 }

</bundles_post_ra>
